<compile_context>
chip_gen: v7x
topology: tpu7x:2x2x1
jax: 0.10.0
libtpu: 0.0.40
codegen_flags: <defaults>
</compile_context>

<pallas_src>
import jax
import jax.numpy as jnp
from jax import lax
from jax.experimental import pallas as pl
from jax.experimental.pallas import tpu as pltpu

# ---- module hyper-parameters (from model.py) --------------------------------
NUM_EMBEDS = 512
CONTEXT_WINDOW = 16
N_LAYERS = 6
NUM_HEADS = 8
VOCAB_SIZE = 500
HEAD_SIZE = NUM_EMBEDS // NUM_HEADS          # 64 (Block computes n_embeds // n_heads)
FFN_DIM = 4 * NUM_EMBEDS                     # 2048
VOCAB_PAD = 512                              # pad 500 -> 512 for lane-dense output
LN_EPS = 1e-5

# 32 MiB scoped VMEM: valid on v5e/v6e (128 MiB) and v7x (64 MiB physical),
# comfortably above the ~14 MiB of double-buffered bf16 weights + activations.
_VMEM_LIMIT_BYTES = 32 * 1024 * 1024
_COMPILER_PARAMS = pltpu.CompilerParams(
    dimension_semantics=("arbitrary",),          # layers are sequential
    vmem_limit_bytes=_VMEM_LIMIT_BYTES)

# Row layout of the packed per-layer small-vector tensor (L, 8, FFN_DIM).
_ROW_BP, _ROW_G1, _ROW_BE1, _ROW_BF2, _ROW_G2, _ROW_BE2, _ROW_BF1 = 0, 1, 2, 3, 4, 5, 6


def _layernorm(x, gamma, beta):
    # x: (N, C), gamma/beta: (1, C)  -- PyTorch LayerNorm (biased variance, eps=1e-5)
    mu = jnp.mean(x, axis=-1, keepdims=True)
    var = jnp.mean((x - mu) ** 2, axis=-1, keepdims=True)
    return (x - mu) * lax.rsqrt(var + LN_EPS) * gamma + beta


# ---- fused kernel: all 6 blocks + final LN + LM head, grid over layers -------
# Per layer (matches model.py Block.forward exactly):
#   x = x + ln1(MHSA(x));  x = x + ln2(FFWD(x))
# At the last grid step additionally: logits = ln_f(x) @ W_head + b_head
def _fused_kernel(x_ref, wqkv_ref, wp_ref, w1_ref, w2_ref, vec_ref,
                  gf_ref, bef_ref, wh_ref, bh_ref,
                  logits_ref, res_ref):
    B, T, C = res_ref.shape
    hs = HEAD_SIZE
    # Reference HeadAttention scales by x.shape[-1]**-0.5 == num_embeds**-0.5 (NOT
    # head_size**-0.5); this intentionally matches model.py.
    scale = NUM_EMBEDS ** (-0.5)
    neg = jnp.float32(-1e30)       # finite mask constant (no inf-arithmetic hazards)

    l = pl.program_id(0)

    # residual stream lives in VMEM scratch across all grid steps; seed at layer 0.
    @pl.when(l == 0)
    def _seed():
        res_ref[...] = x_ref[...]

    # unpack the packed per-layer small vectors (single DMA per layer)
    bp  = vec_ref[_ROW_BP:_ROW_BP + 1, :C]      # attention proj bias      (1, C)
    g1  = vec_ref[_ROW_G1:_ROW_G1 + 1, :C]      # ln1 gamma                (1, C)
    be1 = vec_ref[_ROW_BE1:_ROW_BE1 + 1, :C]    # ln1 beta                 (1, C)
    bf2 = vec_ref[_ROW_BF2:_ROW_BF2 + 1, :C]    # FFN second bias          (1, C)
    g2  = vec_ref[_ROW_G2:_ROW_G2 + 1, :C]      # ln2 gamma                (1, C)
    be2 = vec_ref[_ROW_BE2:_ROW_BE2 + 1, :C]    # ln2 beta                 (1, C)
    bf1 = vec_ref[_ROW_BF1:_ROW_BF1 + 1, :]     # FFN first bias           (1, 4C)

    x3 = res_ref[...]                              # (B, T, C) f32
    xf = x3.reshape(B * T, C)                      # fold batch for lane-dense matmuls
    xb = xf.astype(jnp.bfloat16)

    # ---- multi-head self attention: one fused QKV matmul ----
    qkv = jnp.dot(xb, wqkv_ref[...], preferred_element_type=jnp.float32)   # (BT, 3C)
    qkv = qkv.astype(jnp.bfloat16)                 # cut live vreg footprint
    q = qkv[:, 0 * C:1 * C].reshape(B, T, C)       # 512-aligned lane slices
    k = qkv[:, 1 * C:2 * C].reshape(B, T, C)
    v = qkv[:, 2 * C:3 * C].reshape(B, T, C)

    rows = lax.broadcasted_iota(jnp.int32, (T, T), 0)
    cols = lax.broadcasted_iota(jnp.int32, (T, T), 1)
    causal = (rows >= cols)[None, :, :]            # (1, T, T), broadcast over batch

    heads = []
    for h in range(NUM_HEADS):
        sl = slice(h * hs, (h + 1) * hs)
        qh, kh, vh = q[:, :, sl], k[:, :, sl], v[:, :, sl]          # (B, T, hs) bf16
        s = jnp.einsum('bqd,bkd->bqk', qh, kh,
                       preferred_element_type=jnp.float32) * scale  # (B, T, T) f32
        s = jnp.where(causal, s, neg)
        s = s - jnp.max(s, axis=-1, keepdims=True)
        p = jnp.exp(s)
        p = p * pl.reciprocal(jnp.sum(p, axis=-1, keepdims=True), approx=True)
        oh = jnp.einsum('bqk,bkd->bqd', p.astype(jnp.bfloat16), vh,
                        preferred_element_type=jnp.float32)         # (B, T, hs)
        heads.append(oh.astype(jnp.bfloat16))
    att = jnp.concatenate(heads, axis=-1).reshape(B * T, C)         # (BT, C) bf16

    # single K=512 output projection (replaces 8 serially-accumulated K=64 dots)
    sa = jnp.dot(att, wp_ref[...], preferred_element_type=jnp.float32) + bp
    # dropout -> identity (eval)
    x1 = xf + _layernorm(sa, g1, be1)              # x + ln1(sa(x))

    # ---- feed-forward ----
    h1 = jnp.maximum(
        jnp.dot(x1.astype(jnp.bfloat16), w1_ref[...],
                preferred_element_type=jnp.float32) + bf1, 0.0)
    ff = jnp.dot(h1.astype(jnp.bfloat16), w2_ref[...],
                 preferred_element_type=jnp.float32) + bf2
    # dropout -> identity (eval)
    x2 = x1 + _layernorm(ff, g2, be2)              # x + ln2(ffwd(x))

    res_ref[...] = x2.reshape(B, T, C)

    # ---- final LayerNorm + LM head, fused into the last layer step ----
    @pl.when(l == N_LAYERS - 1)
    def _head():
        xn = _layernorm(x2, gf_ref[...], bef_ref[...])
        logits = jnp.dot(xn.astype(jnp.bfloat16), wh_ref[...],
                         preferred_element_type=jnp.float32) + bh_ref[...]
        logits_ref[...] = logits.reshape(B, T, VOCAB_PAD)


def _stacked_spec(r, c):
    # (L, r, c) array -> kernel sees an (r, c) tile for layer l (leading dim squeezed).
    return pl.BlockSpec((None, r, c), lambda l: (l, 0, 0))


def _const_spec(r, c):
    # small array resident across the whole grid (fetched once at step 0)
    return pl.BlockSpec((r, c), lambda l: (0, 0))


def _body_forward(x, p):
    B, T, C = x.shape
    grid_spec = pltpu.PrefetchScalarGridSpec(
        num_scalar_prefetch=0,
        grid=(N_LAYERS,),
        in_specs=[
            pl.BlockSpec((B, T, C), lambda l: (0, 0, 0)),   # x (seeds residual scratch)
            _stacked_spec(C, 3 * C),      # WQKV  (fused q/k/v weights)
            _stacked_spec(C, C),          # WP
            _stacked_spec(C, FFN_DIM),    # W1
            _stacked_spec(FFN_DIM, C),    # W2
            _stacked_spec(8, FFN_DIM),    # packed per-layer vectors
            _const_spec(1, C),            # ln_f gamma
            _const_spec(1, C),            # ln_f beta
            _const_spec(C, VOCAB_PAD),    # W_head (vocab padded to 512)
            _const_spec(1, VOCAB_PAD),    # b_head
        ],
        out_specs=pl.BlockSpec((B, T, VOCAB_PAD), lambda l: (0, 0, 0)),
        scratch_shapes=[pltpu.VMEM((B, T, C), jnp.float32)],   # residual stream
    )
    logits_pad = pl.pallas_call(
        _fused_kernel,
        out_shape=jax.ShapeDtypeStruct((B, T, VOCAB_PAD), jnp.float32),
        grid_spec=grid_spec,
        compiler_params=_COMPILER_PARAMS,
    )(x, p["WQKV"], p["WP"], p["W1"], p["W2"], p["VECS"],
      p["ln_f_g"], p["ln_f_b"], p["w_head"], p["b_head"])
    return logits_pad[:, :, :VOCAB_SIZE]


# ---- full model forward ------------------------------------------------------
@jax.jit
def transformer_forward(params, ids):
    B, T = ids.shape
    tok_emb = jnp.take(params["tok_table"], ids, axis=0)      # (B, T, C) gather (glue)
    pos_emb = params["pos_table"][:T]                         # (T, C)
    x = tok_emb + pos_emb[None, :, :]
    logits = _body_forward(x, params)                         # blocks + ln_f + lm_head
    # targets=None path of the reference -> loss is None; return logits only.
    return logits


# ---- deterministic parameter init -------------------------------------------
def init_params(key):
    C = NUM_EMBEDS
    std = 0.02

    def nrm(k, shape):
        return std * jax.random.normal(k, shape, dtype=jnp.float32)

    keys = iter(jax.random.split(key, 3 + N_LAYERS * 6))
    bf16 = jnp.bfloat16

    tok_table = nrm(next(keys), (VOCAB_SIZE, C))
    pos_table = nrm(next(keys), (CONTEXT_WINDOW, C))
    w_head = nrm(next(keys), (C, VOCAB_SIZE))

    WQKV, WP, W1, W2 = [], [], [], []
    for _ in range(N_LAYERS):
        wq = nrm(next(keys), (C, C))        # per-head (C, 64) columns concatenated
        wk = nrm(next(keys), (C, C))
        wv = nrm(next(keys), (C, C))
        WQKV.append(jnp.concatenate([wq, wk, wv], axis=1))   # (C, 3C)
        WP.append(nrm(next(keys), (C, C)))
        W1.append(nrm(next(keys), (C, FFN_DIM)))
        W2.append(nrm(next(keys), (FFN_DIM, C)))

    # packed per-layer small vectors: biases zero, LayerNorm gammas one
    vecs = jnp.zeros((N_LAYERS, 8, FFN_DIM), jnp.float32)
    vecs = vecs.at[:, _ROW_G1, :C].set(1.0)
    vecs = vecs.at[:, _ROW_G2, :C].set(1.0)

    params = {
        "tok_table": tok_table,
        "pos_table": pos_table,
        # stacked per-layer weights, streamed as bf16 (accumulation stays f32)
        "WQKV": jnp.stack(WQKV).astype(bf16),
        "WP": jnp.stack(WP).astype(bf16),
        "W1": jnp.stack(W1).astype(bf16),
        "W2": jnp.stack(W2).astype(bf16),
        "VECS": vecs,
        # final LN + LM head (vocab padded 500 -> 512 for lane-dense output)
        "ln_f_g": jnp.ones((1, C), jnp.float32),
        "ln_f_b": jnp.zeros((1, C), jnp.float32),
        "w_head": jnp.pad(w_head, ((0, 0), (0, VOCAB_PAD - VOCAB_SIZE))).astype(bf16),
        "b_head": jnp.zeros((1, VOCAB_PAD), jnp.float32),
    }
    return params


if __name__ == "__main__":
    root = jax.random.PRNGKey(0)
    k_params, k_ids = jax.random.split(root)
    params = init_params(k_params)

    B, T = 2, CONTEXT_WINDOW                  # small shapes consistent with the module
    ids = jax.random.randint(k_ids, (B, T), 0, VOCAB_SIZE, dtype=jnp.int32)

    logits = transformer_forward(params, ids)
    logits = jax.block_until_ready(logits)

    assert logits.shape == (B, T, VOCAB_SIZE), logits.shape
    assert bool(jnp.all(jnp.isfinite(logits)))
    print("KERNEL_OK")
</pallas_src>

<mosaic_0001>
module attributes {stable_mosaic.version = 11 : i64} {
  func.func @_fused_kernel(%arg0: i32, %arg1: memref<2x16x512xf32, #tpu.memory_space<vmem>>, %arg2: memref<1x512x1536xbf16, #tpu.memory_space<vmem>>, %arg3: memref<1x512x512xbf16, #tpu.memory_space<vmem>>, %arg4: memref<1x512x2048xbf16, #tpu.memory_space<vmem>>, %arg5: memref<1x2048x512xbf16, #tpu.memory_space<vmem>>, %arg6: memref<1x8x2048xf32, #tpu.memory_space<vmem>>, %arg7: memref<1x512xf32, #tpu.memory_space<vmem>>, %arg8: memref<1x512xf32, #tpu.memory_space<vmem>>, %arg9: memref<512x512xbf16, #tpu.memory_space<vmem>>, %arg10: memref<1x512xf32, #tpu.memory_space<vmem>>, %arg11: memref<2x16x512xf32, #tpu.memory_space<vmem>>, %arg12: memref<2x16x512xf32, #tpu.memory_space<vmem>>) attributes {dimension_semantics = [#tpu.dimension_semantics<arbitrary>], iteration_bounds = array<i64: 6>, scalar_prefetch = 0 : i64, scratch_operands = 1 : i64, tpu.core_type = #tpu.core_type<tc>, window_params = [{pipeline_mode = #tpu.pipeline_mode<synchronous>, transform_indices = @transform_0, window_bounds = array<i64: 2, 16, 512>}, {transform_indices = @transform_1, window_bounds = array<i64: 1, 512, 1536>}, {transform_indices = @transform_2, window_bounds = array<i64: 1, 512, 512>}, {transform_indices = @transform_3, window_bounds = array<i64: 1, 512, 2048>}, {transform_indices = @transform_4, window_bounds = array<i64: 1, 2048, 512>}, {transform_indices = @transform_5, window_bounds = array<i64: 1, 8, 2048>}, {pipeline_mode = #tpu.pipeline_mode<synchronous>, transform_indices = @transform_6, window_bounds = array<i64: 1, 512>}, {pipeline_mode = #tpu.pipeline_mode<synchronous>, transform_indices = @transform_7, window_bounds = array<i64: 1, 512>}, {pipeline_mode = #tpu.pipeline_mode<synchronous>, transform_indices = @transform_8, window_bounds = array<i64: 512, 512>}, {pipeline_mode = #tpu.pipeline_mode<synchronous>, transform_indices = @transform_9, window_bounds = array<i64: 1, 512>}, {pipeline_mode = #tpu.pipeline_mode<synchronous>, transform_indices = @transform_10, window_bounds = array<i64: 2, 16, 512>}]} {
    %c0_i32 = arith.constant 0 : i32
    %0 = arith.cmpi eq, %arg0, %c0_i32 : i32
    %1 = arith.extui %0 : i1 to i32
    %c0_i32_0 = arith.constant 0 : i32
    %2 = arith.cmpi ne, %1, %c0_i32_0 : i32
    scf.if %2 {
      %c0_96 = arith.constant 0 : index
      %c0_97 = arith.constant 0 : index
      %c0_98 = arith.constant 0 : index
      %290 = vector.load %arg1[%c0_96, %c0_97, %c0_98] : memref<2x16x512xf32, #tpu.memory_space<vmem>>, vector<2x16x512xf32>
      %c0_99 = arith.constant 0 : index
      %c0_100 = arith.constant 0 : index
      %c0_101 = arith.constant 0 : index
      %291 = vector.load %arg12[%c0_99, %c0_100, %c0_101] : memref<2x16x512xf32, #tpu.memory_space<vmem>>, vector<2x16x512xf32>
      tpu.vector_store %arg12[%c0_99, %c0_100, %c0_101], %290 {strides = array<i32>} : memref<2x16x512xf32, #tpu.memory_space<vmem>>, vector<2x16x512xf32>,
    } else {
    }
    %c0 = arith.constant 0 : index
    %c0_1 = arith.constant 0 : index
    %c0_2 = arith.constant 0 : index
    %3 = vector.load %arg6[%c0, %c0_1, %c0_2] : memref<1x8x2048xf32, #tpu.memory_space<vmem>>, vector<1x1x512xf32>
    %4 = vector.shape_cast %3 : vector<1x1x512xf32> to vector<1x512xf32>
    %c0_3 = arith.constant 0 : index
    %c1 = arith.constant 1 : index
    %c0_4 = arith.constant 0 : index
    %5 = vector.load %arg6[%c0_3, %c1, %c0_4] : memref<1x8x2048xf32, #tpu.memory_space<vmem>>, vector<1x1x512xf32>
    %6 = vector.shape_cast %5 : vector<1x1x512xf32> to vector<1x512xf32>
    %c0_5 = arith.constant 0 : index
    %c2 = arith.constant 2 : index
    %c0_6 = arith.constant 0 : index
    %7 = vector.load %arg6[%c0_5, %c2, %c0_6] : memref<1x8x2048xf32, #tpu.memory_space<vmem>>, vector<1x1x512xf32>
    %8 = vector.shape_cast %7 : vector<1x1x512xf32> to vector<1x512xf32>
    %c0_7 = arith.constant 0 : index
    %c3 = arith.constant 3 : index
    %c0_8 = arith.constant 0 : index
    %9 = vector.load %arg6[%c0_7, %c3, %c0_8] : memref<1x8x2048xf32, #tpu.memory_space<vmem>>, vector<1x1x512xf32>
    %10 = vector.shape_cast %9 : vector<1x1x512xf32> to vector<1x512xf32>
    %c0_9 = arith.constant 0 : index
    %c4 = arith.constant 4 : index
    %c0_10 = arith.constant 0 : index
    %11 = vector.load %arg6[%c0_9, %c4, %c0_10] : memref<1x8x2048xf32, #tpu.memory_space<vmem>>, vector<1x1x512xf32>
    %12 = vector.shape_cast %11 : vector<1x1x512xf32> to vector<1x512xf32>
    %c0_11 = arith.constant 0 : index
    %c5 = arith.constant 5 : index
    %c0_12 = arith.constant 0 : index
    %13 = vector.load %arg6[%c0_11, %c5, %c0_12] : memref<1x8x2048xf32, #tpu.memory_space<vmem>>, vector<1x1x512xf32>
    %14 = vector.shape_cast %13 : vector<1x1x512xf32> to vector<1x512xf32>
    %c0_13 = arith.constant 0 : index
    %c6 = arith.constant 6 : index
    %c0_14 = arith.constant 0 : index
    %15 = vector.load %arg6[%c0_13, %c6, %c0_14] : memref<1x8x2048xf32, #tpu.memory_space<vmem>>, vector<1x1x2048xf32>
    %16 = vector.shape_cast %15 : vector<1x1x2048xf32> to vector<1x2048xf32>
    %c0_15 = arith.constant 0 : index
    %c0_16 = arith.constant 0 : index
    %c0_17 = arith.constant 0 : index
    %17 = vector.load %arg12[%c0_15, %c0_16, %c0_17] : memref<2x16x512xf32, #tpu.memory_space<vmem>>, vector<2x16x512xf32>
    %18 = vector.shape_cast %17 : vector<2x16x512xf32> to vector<32x512xf32>
    %19 = arith.truncf %18 : vector<32x512xf32> to vector<32x512xbf16>
    %c0_18 = arith.constant 0 : index
    %c0_19 = arith.constant 0 : index
    %c0_20 = arith.constant 0 : index
    %20 = vector.load %arg2[%c0_18, %c0_19, %c0_20] : memref<1x512x1536xbf16, #tpu.memory_space<vmem>>, vector<1x512x1536xbf16>
    %21 = vector.shape_cast %20 : vector<1x512x1536xbf16> to vector<512x1536xbf16>
    %cst = arith.constant dense<0.000000e+00> : vector<32x1536xf32>
    %22 = tpu.matmul %19, %21, %cst {dimension_numbers = #tpu.dot_dimension_numbers<[1], [0], [0], [1], [0, 0, 1, 1], [], []>} : vector<32x512xbf16>, vector<512x1536xbf16>, vector<32x1536xf32> -> vector<32x1536xf32>
    %23 = arith.truncf %22 : vector<32x1536xf32> to vector<32x1536xbf16>
    %24 = vector.extract_strided_slice %23 {offsets = [0, 0], sizes = [32, 512], strides = [1, 1]} : vector<32x1536xbf16> to vector<32x512xbf16>
    %25 = vector.shape_cast %24 : vector<32x512xbf16> to vector<2x16x512xbf16>
    %26 = vector.extract_strided_slice %23 {offsets = [0, 512], sizes = [32, 512], strides = [1, 1]} : vector<32x1536xbf16> to vector<32x512xbf16>
    %27 = vector.shape_cast %26 : vector<32x512xbf16> to vector<2x16x512xbf16>
    %28 = vector.extract_strided_slice %23 {offsets = [0, 1024], sizes = [32, 512], strides = [1, 1]} : vector<32x1536xbf16> to vector<32x512xbf16>
    %29 = vector.shape_cast %28 : vector<32x512xbf16> to vector<2x16x512xbf16>
    %30 = tpu.iota {dimensions = array<i32: 0>} : vector<16x16xi32>
    %31 = tpu.iota {dimensions = array<i32: 1>} : vector<16x16xi32>
    %32 = arith.cmpi sge, %30, %31 : vector<16x16xi32>
    %33 = vector.shape_cast %32 : vector<16x16xi1> to vector<1x16x16xi1>
    %34 = vector.extract_strided_slice %25 {offsets = [0, 0, 0], sizes = [2, 16, 64], strides = [1, 1, 1]} : vector<2x16x512xbf16> to vector<2x16x64xbf16>
    %35 = vector.extract_strided_slice %27 {offsets = [0, 0, 0], sizes = [2, 16, 64], strides = [1, 1, 1]} : vector<2x16x512xbf16> to vector<2x16x64xbf16>
    %36 = vector.extract_strided_slice %29 {offsets = [0, 0, 0], sizes = [2, 16, 64], strides = [1, 1, 1]} : vector<2x16x512xbf16> to vector<2x16x64xbf16>
    "tpu.trace_start"() <{level = 10 : i32, message = "bqd,bkd->bqk"}> : () -> ()
    %cst_21 = arith.constant dense<0.000000e+00> : vector<2x16x16xf32>
    %37 = tpu.matmul %34, %35, %cst_21 {dimension_numbers = #tpu.dot_dimension_numbers<[2], [2], [1], [1], [0, 0, 0, 1, 1, 1], [0], [0]>} : vector<2x16x64xbf16>, vector<2x16x64xbf16>, vector<2x16x16xf32> -> vector<2x16x16xf32>
    "tpu.trace_stop"() : () -> ()
    %cst_22 = arith.constant 0.0441941731 : f32
    %38 = vector.broadcast %cst_22 : f32 to vector<2x16x16xf32>
    %39 = arith.mulf %37, %38 : vector<2x16x16xf32>
    %cst_23 = arith.constant -1.000000e+30 : f32
    %40 = vector.shape_cast %33 : vector<1x16x16xi1> to vector<1x16x16xi1>
    %41 = vector.broadcast %40 : vector<1x16x16xi1> to vector<2x16x16xi1>
    %42 = vector.broadcast %cst_23 : f32 to vector<2x16x16xf32>
    %43 = arith.select %41, %39, %42 : vector<2x16x16xi1>, vector<2x16x16xf32>
    %cst_24 = arith.constant dense<0xFF800000> : vector<2x16xf32>
    %44 = vector.multi_reduction <maximumf>, %43, %cst_24 [2] : vector<2x16x16xf32> to vector<2x16xf32>
    %45 = vector.shape_cast %44 : vector<2x16xf32> to vector<2x16x1xf32>
    %46 = vector.broadcast %45 : vector<2x16x1xf32> to vector<2x16x16xf32>
    %47 = arith.subf %43, %46 : vector<2x16x16xf32>
    %48 = math.exp %47 : vector<2x16x16xf32>
    %cst_25 = arith.constant dense<0.000000e+00> : vector<2x16xf32>
    %49 = vector.multi_reduction <add>, %48, %cst_25 [2] : vector<2x16x16xf32> to vector<2x16xf32>
    %50 = vector.shape_cast %49 : vector<2x16xf32> to vector<2x16x1xf32>
    %51 = tpu.reciprocal %50 {approx = true} : vector<2x16x1xf32> -> vector<2x16x1xf32>
    %52 = vector.broadcast %51 : vector<2x16x1xf32> to vector<2x16x16xf32>
    %53 = arith.mulf %48, %52 : vector<2x16x16xf32>
    %54 = arith.truncf %53 : vector<2x16x16xf32> to vector<2x16x16xbf16>
    "tpu.trace_start"() <{level = 10 : i32, message = "bqk,bkd->bqd"}> : () -> ()
    %cst_26 = arith.constant dense<0.000000e+00> : vector<2x16x64xf32>
    %55 = tpu.matmul %54, %36, %cst_26 {dimension_numbers = #tpu.dot_dimension_numbers<[2], [1], [1], [2], [0, 0, 0, 1, 1, 2], [0], [0]>} : vector<2x16x16xbf16>, vector<2x16x64xbf16>, vector<2x16x64xf32> -> vector<2x16x64xf32>
    "tpu.trace_stop"() : () -> ()
    %56 = arith.truncf %55 : vector<2x16x64xf32> to vector<2x16x64xbf16>
    %57 = vector.extract_strided_slice %25 {offsets = [0, 0, 64], sizes = [2, 16, 64], strides = [1, 1, 1]} : vector<2x16x512xbf16> to vector<2x16x64xbf16>
    %58 = vector.extract_strided_slice %27 {offsets = [0, 0, 64], sizes = [2, 16, 64], strides = [1, 1, 1]} : vector<2x16x512xbf16> to vector<2x16x64xbf16>
    %59 = vector.extract_strided_slice %29 {offsets = [0, 0, 64], sizes = [2, 16, 64], strides = [1, 1, 1]} : vector<2x16x512xbf16> to vector<2x16x64xbf16>
    "tpu.trace_start"() <{level = 10 : i32, message = "bqd,bkd->bqk"}> : () -> ()
    %cst_27 = arith.constant dense<0.000000e+00> : vector<2x16x16xf32>
    %60 = tpu.matmul %57, %58, %cst_27 {dimension_numbers = #tpu.dot_dimension_numbers<[2], [2], [1], [1], [0, 0, 0, 1, 1, 1], [0], [0]>} : vector<2x16x64xbf16>, vector<2x16x64xbf16>, vector<2x16x16xf32> -> vector<2x16x16xf32>
    "tpu.trace_stop"() : () -> ()
    %cst_28 = arith.constant 0.0441941731 : f32
    %61 = vector.broadcast %cst_28 : f32 to vector<2x16x16xf32>
    %62 = arith.mulf %60, %61 : vector<2x16x16xf32>
    %cst_29 = arith.constant -1.000000e+30 : f32
    %63 = vector.shape_cast %33 : vector<1x16x16xi1> to vector<1x16x16xi1>
    %64 = vector.broadcast %63 : vector<1x16x16xi1> to vector<2x16x16xi1>
    %65 = vector.broadcast %cst_29 : f32 to vector<2x16x16xf32>
    %66 = arith.select %64, %62, %65 : vector<2x16x16xi1>, vector<2x16x16xf32>
    %cst_30 = arith.constant dense<0xFF800000> : vector<2x16xf32>
    %67 = vector.multi_reduction <maximumf>, %66, %cst_30 [2] : vector<2x16x16xf32> to vector<2x16xf32>
    %68 = vector.shape_cast %67 : vector<2x16xf32> to vector<2x16x1xf32>
    %69 = vector.broadcast %68 : vector<2x16x1xf32> to vector<2x16x16xf32>
    %70 = arith.subf %66, %69 : vector<2x16x16xf32>
    %71 = math.exp %70 : vector<2x16x16xf32>
    %cst_31 = arith.constant dense<0.000000e+00> : vector<2x16xf32>
    %72 = vector.multi_reduction <add>, %71, %cst_31 [2] : vector<2x16x16xf32> to vector<2x16xf32>
    %73 = vector.shape_cast %72 : vector<2x16xf32> to vector<2x16x1xf32>
    %74 = tpu.reciprocal %73 {approx = true} : vector<2x16x1xf32> -> vector<2x16x1xf32>
    %75 = vector.broadcast %74 : vector<2x16x1xf32> to vector<2x16x16xf32>
    %76 = arith.mulf %71, %75 : vector<2x16x16xf32>
    %77 = arith.truncf %76 : vector<2x16x16xf32> to vector<2x16x16xbf16>
    "tpu.trace_start"() <{level = 10 : i32, message = "bqk,bkd->bqd"}> : () -> ()
    %cst_32 = arith.constant dense<0.000000e+00> : vector<2x16x64xf32>
    %78 = tpu.matmul %77, %59, %cst_32 {dimension_numbers = #tpu.dot_dimension_numbers<[2], [1], [1], [2], [0, 0, 0, 1, 1, 2], [0], [0]>} : vector<2x16x16xbf16>, vector<2x16x64xbf16>, vector<2x16x64xf32> -> vector<2x16x64xf32>
    "tpu.trace_stop"() : () -> ()
    %79 = arith.truncf %78 : vector<2x16x64xf32> to vector<2x16x64xbf16>
    %80 = vector.extract_strided_slice %25 {offsets = [0, 0, 128], sizes = [2, 16, 64], strides = [1, 1, 1]} : vector<2x16x512xbf16> to vector<2x16x64xbf16>
    %81 = vector.extract_strided_slice %27 {offsets = [0, 0, 128], sizes = [2, 16, 64], strides = [1, 1, 1]} : vector<2x16x512xbf16> to vector<2x16x64xbf16>
    %82 = vector.extract_strided_slice %29 {offsets = [0, 0, 128], sizes = [2, 16, 64], strides = [1, 1, 1]} : vector<2x16x512xbf16> to vector<2x16x64xbf16>
    "tpu.trace_start"() <{level = 10 : i32, message = "bqd,bkd->bqk"}> : () -> ()
    %cst_33 = arith.constant dense<0.000000e+00> : vector<2x16x16xf32>
    %83 = tpu.matmul %80, %81, %cst_33 {dimension_numbers = #tpu.dot_dimension_numbers<[2], [2], [1], [1], [0, 0, 0, 1, 1, 1], [0], [0]>} : vector<2x16x64xbf16>, vector<2x16x64xbf16>, vector<2x16x16xf32> -> vector<2x16x16xf32>
    "tpu.trace_stop"() : () -> ()
    %cst_34 = arith.constant 0.0441941731 : f32
    %84 = vector.broadcast %cst_34 : f32 to vector<2x16x16xf32>
    %85 = arith.mulf %83, %84 : vector<2x16x16xf32>
    %cst_35 = arith.constant -1.000000e+30 : f32
    %86 = vector.shape_cast %33 : vector<1x16x16xi1> to vector<1x16x16xi1>
    %87 = vector.broadcast %86 : vector<1x16x16xi1> to vector<2x16x16xi1>
    %88 = vector.broadcast %cst_35 : f32 to vector<2x16x16xf32>
    %89 = arith.select %87, %85, %88 : vector<2x16x16xi1>, vector<2x16x16xf32>
    %cst_36 = arith.constant dense<0xFF800000> : vector<2x16xf32>
    %90 = vector.multi_reduction <maximumf>, %89, %cst_36 [2] : vector<2x16x16xf32> to vector<2x16xf32>
    %91 = vector.shape_cast %90 : vector<2x16xf32> to vector<2x16x1xf32>
    %92 = vector.broadcast %91 : vector<2x16x1xf32> to vector<2x16x16xf32>
    %93 = arith.subf %89, %92 : vector<2x16x16xf32>
    %94 = math.exp %93 : vector<2x16x16xf32>
    %cst_37 = arith.constant dense<0.000000e+00> : vector<2x16xf32>
    %95 = vector.multi_reduction <add>, %94, %cst_37 [2] : vector<2x16x16xf32> to vector<2x16xf32>
    %96 = vector.shape_cast %95 : vector<2x16xf32> to vector<2x16x1xf32>
    %97 = tpu.reciprocal %96 {approx = true} : vector<2x16x1xf32> -> vector<2x16x1xf32>
    %98 = vector.broadcast %97 : vector<2x16x1xf32> to vector<2x16x16xf32>
    %99 = arith.mulf %94, %98 : vector<2x16x16xf32>
    %100 = arith.truncf %99 : vector<2x16x16xf32> to vector<2x16x16xbf16>
    "tpu.trace_start"() <{level = 10 : i32, message = "bqk,bkd->bqd"}> : () -> ()
    %cst_38 = arith.constant dense<0.000000e+00> : vector<2x16x64xf32>
    %101 = tpu.matmul %100, %82, %cst_38 {dimension_numbers = #tpu.dot_dimension_numbers<[2], [1], [1], [2], [0, 0, 0, 1, 1, 2], [0], [0]>} : vector<2x16x16xbf16>, vector<2x16x64xbf16>, vector<2x16x64xf32> -> vector<2x16x64xf32>
    "tpu.trace_stop"() : () -> ()
    %102 = arith.truncf %101 : vector<2x16x64xf32> to vector<2x16x64xbf16>
    %103 = vector.extract_strided_slice %25 {offsets = [0, 0, 192], sizes = [2, 16, 64], strides = [1, 1, 1]} : vector<2x16x512xbf16> to vector<2x16x64xbf16>
    %104 = vector.extract_strided_slice %27 {offsets = [0, 0, 192], sizes = [2, 16, 64], strides = [1, 1, 1]} : vector<2x16x512xbf16> to vector<2x16x64xbf16>
    %105 = vector.extract_strided_slice %29 {offsets = [0, 0, 192], sizes = [2, 16, 64], strides = [1, 1, 1]} : vector<2x16x512xbf16> to vector<2x16x64xbf16>
    "tpu.trace_start"() <{level = 10 : i32, message = "bqd,bkd->bqk"}> : () -> ()
    %cst_39 = arith.constant dense<0.000000e+00> : vector<2x16x16xf32>
    %106 = tpu.matmul %103, %104, %cst_39 {dimension_numbers = #tpu.dot_dimension_numbers<[2], [2], [1], [1], [0, 0, 0, 1, 1, 1], [0], [0]>} : vector<2x16x64xbf16>, vector<2x16x64xbf16>, vector<2x16x16xf32> -> vector<2x16x16xf32>
    "tpu.trace_stop"() : () -> ()
    %cst_40 = arith.constant 0.0441941731 : f32
    %107 = vector.broadcast %cst_40 : f32 to vector<2x16x16xf32>
    %108 = arith.mulf %106, %107 : vector<2x16x16xf32>
    %cst_41 = arith.constant -1.000000e+30 : f32
    %109 = vector.shape_cast %33 : vector<1x16x16xi1> to vector<1x16x16xi1>
    %110 = vector.broadcast %109 : vector<1x16x16xi1> to vector<2x16x16xi1>
    %111 = vector.broadcast %cst_41 : f32 to vector<2x16x16xf32>
    %112 = arith.select %110, %108, %111 : vector<2x16x16xi1>, vector<2x16x16xf32>
    %cst_42 = arith.constant dense<0xFF800000> : vector<2x16xf32>
    %113 = vector.multi_reduction <maximumf>, %112, %cst_42 [2] : vector<2x16x16xf32> to vector<2x16xf32>
    %114 = vector.shape_cast %113 : vector<2x16xf32> to vector<2x16x1xf32>
    %115 = vector.broadcast %114 : vector<2x16x1xf32> to vector<2x16x16xf32>
    %116 = arith.subf %112, %115 : vector<2x16x16xf32>
    %117 = math.exp %116 : vector<2x16x16xf32>
    %cst_43 = arith.constant dense<0.000000e+00> : vector<2x16xf32>
    %118 = vector.multi_reduction <add>, %117, %cst_43 [2] : vector<2x16x16xf32> to vector<2x16xf32>
    %119 = vector.shape_cast %118 : vector<2x16xf32> to vector<2x16x1xf32>
    %120 = tpu.reciprocal %119 {approx = true} : vector<2x16x1xf32> -> vector<2x16x1xf32>
    %121 = vector.broadcast %120 : vector<2x16x1xf32> to vector<2x16x16xf32>
    %122 = arith.mulf %117, %121 : vector<2x16x16xf32>
    %123 = arith.truncf %122 : vector<2x16x16xf32> to vector<2x16x16xbf16>
    "tpu.trace_start"() <{level = 10 : i32, message = "bqk,bkd->bqd"}> : () -> ()
    %cst_44 = arith.constant dense<0.000000e+00> : vector<2x16x64xf32>
    %124 = tpu.matmul %123, %105, %cst_44 {dimension_numbers = #tpu.dot_dimension_numbers<[2], [1], [1], [2], [0, 0, 0, 1, 1, 2], [0], [0]>} : vector<2x16x16xbf16>, vector<2x16x64xbf16>, vector<2x16x64xf32> -> vector<2x16x64xf32>
    "tpu.trace_stop"() : () -> ()
    %125 = arith.truncf %124 : vector<2x16x64xf32> to vector<2x16x64xbf16>
    %126 = vector.extract_strided_slice %25 {offsets = [0, 0, 256], sizes = [2, 16, 64], strides = [1, 1, 1]} : vector<2x16x512xbf16> to vector<2x16x64xbf16>
    %127 = vector.extract_strided_slice %27 {offsets = [0, 0, 256], sizes = [2, 16, 64], strides = [1, 1, 1]} : vector<2x16x512xbf16> to vector<2x16x64xbf16>
    %128 = vector.extract_strided_slice %29 {offsets = [0, 0, 256], sizes = [2, 16, 64], strides = [1, 1, 1]} : vector<2x16x512xbf16> to vector<2x16x64xbf16>
    "tpu.trace_start"() <{level = 10 : i32, message = "bqd,bkd->bqk"}> : () -> ()
    %cst_45 = arith.constant dense<0.000000e+00> : vector<2x16x16xf32>
    %129 = tpu.matmul %126, %127, %cst_45 {dimension_numbers = #tpu.dot_dimension_numbers<[2], [2], [1], [1], [0, 0, 0, 1, 1, 1], [0], [0]>} : vector<2x16x64xbf16>, vector<2x16x64xbf16>, vector<2x16x16xf32> -> vector<2x16x16xf32>
    "tpu.trace_stop"() : () -> ()
    %cst_46 = arith.constant 0.0441941731 : f32
    %130 = vector.broadcast %cst_46 : f32 to vector<2x16x16xf32>
    %131 = arith.mulf %129, %130 : vector<2x16x16xf32>
    %cst_47 = arith.constant -1.000000e+30 : f32
    %132 = vector.shape_cast %33 : vector<1x16x16xi1> to vector<1x16x16xi1>
    %133 = vector.broadcast %132 : vector<1x16x16xi1> to vector<2x16x16xi1>
    %134 = vector.broadcast %cst_47 : f32 to vector<2x16x16xf32>
    %135 = arith.select %133, %131, %134 : vector<2x16x16xi1>, vector<2x16x16xf32>
    %cst_48 = arith.constant dense<0xFF800000> : vector<2x16xf32>
    %136 = vector.multi_reduction <maximumf>, %135, %cst_48 [2] : vector<2x16x16xf32> to vector<2x16xf32>
    %137 = vector.shape_cast %136 : vector<2x16xf32> to vector<2x16x1xf32>
    %138 = vector.broadcast %137 : vector<2x16x1xf32> to vector<2x16x16xf32>
    %139 = arith.subf %135, %138 : vector<2x16x16xf32>
    %140 = math.exp %139 : vector<2x16x16xf32>
    %cst_49 = arith.constant dense<0.000000e+00> : vector<2x16xf32>
    %141 = vector.multi_reduction <add>, %140, %cst_49 [2] : vector<2x16x16xf32> to vector<2x16xf32>
    %142 = vector.shape_cast %141 : vector<2x16xf32> to vector<2x16x1xf32>
    %143 = tpu.reciprocal %142 {approx = true} : vector<2x16x1xf32> -> vector<2x16x1xf32>
    %144 = vector.broadcast %143 : vector<2x16x1xf32> to vector<2x16x16xf32>
    %145 = arith.mulf %140, %144 : vector<2x16x16xf32>
    %146 = arith.truncf %145 : vector<2x16x16xf32> to vector<2x16x16xbf16>
    "tpu.trace_start"() <{level = 10 : i32, message = "bqk,bkd->bqd"}> : () -> ()
    %cst_50 = arith.constant dense<0.000000e+00> : vector<2x16x64xf32>
    %147 = tpu.matmul %146, %128, %cst_50 {dimension_numbers = #tpu.dot_dimension_numbers<[2], [1], [1], [2], [0, 0, 0, 1, 1, 2], [0], [0]>} : vector<2x16x16xbf16>, vector<2x16x64xbf16>, vector<2x16x64xf32> -> vector<2x16x64xf32>
    "tpu.trace_stop"() : () -> ()
    %148 = arith.truncf %147 : vector<2x16x64xf32> to vector<2x16x64xbf16>
    %149 = vector.extract_strided_slice %25 {offsets = [0, 0, 320], sizes = [2, 16, 64], strides = [1, 1, 1]} : vector<2x16x512xbf16> to vector<2x16x64xbf16>
    %150 = vector.extract_strided_slice %27 {offsets = [0, 0, 320], sizes = [2, 16, 64], strides = [1, 1, 1]} : vector<2x16x512xbf16> to vector<2x16x64xbf16>
    %151 = vector.extract_strided_slice %29 {offsets = [0, 0, 320], sizes = [2, 16, 64], strides = [1, 1, 1]} : vector<2x16x512xbf16> to vector<2x16x64xbf16>
    "tpu.trace_start"() <{level = 10 : i32, message = "bqd,bkd->bqk"}> : () -> ()
    %cst_51 = arith.constant dense<0.000000e+00> : vector<2x16x16xf32>
    %152 = tpu.matmul %149, %150, %cst_51 {dimension_numbers = #tpu.dot_dimension_numbers<[2], [2], [1], [1], [0, 0, 0, 1, 1, 1], [0], [0]>} : vector<2x16x64xbf16>, vector<2x16x64xbf16>, vector<2x16x16xf32> -> vector<2x16x16xf32>
    "tpu.trace_stop"() : () -> ()
    %cst_52 = arith.constant 0.0441941731 : f32
    %153 = vector.broadcast %cst_52 : f32 to vector<2x16x16xf32>
    %154 = arith.mulf %152, %153 : vector<2x16x16xf32>
    %cst_53 = arith.constant -1.000000e+30 : f32
    %155 = vector.shape_cast %33 : vector<1x16x16xi1> to vector<1x16x16xi1>
    %156 = vector.broadcast %155 : vector<1x16x16xi1> to vector<2x16x16xi1>
    %157 = vector.broadcast %cst_53 : f32 to vector<2x16x16xf32>
    %158 = arith.select %156, %154, %157 : vector<2x16x16xi1>, vector<2x16x16xf32>
    %cst_54 = arith.constant dense<0xFF800000> : vector<2x16xf32>
    %159 = vector.multi_reduction <maximumf>, %158, %cst_54 [2] : vector<2x16x16xf32> to vector<2x16xf32>
    %160 = vector.shape_cast %159 : vector<2x16xf32> to vector<2x16x1xf32>
    %161 = vector.broadcast %160 : vector<2x16x1xf32> to vector<2x16x16xf32>
    %162 = arith.subf %158, %161 : vector<2x16x16xf32>
    %163 = math.exp %162 : vector<2x16x16xf32>
    %cst_55 = arith.constant dense<0.000000e+00> : vector<2x16xf32>
    %164 = vector.multi_reduction <add>, %163, %cst_55 [2] : vector<2x16x16xf32> to vector<2x16xf32>
    %165 = vector.shape_cast %164 : vector<2x16xf32> to vector<2x16x1xf32>
    %166 = tpu.reciprocal %165 {approx = true} : vector<2x16x1xf32> -> vector<2x16x1xf32>
    %167 = vector.broadcast %166 : vector<2x16x1xf32> to vector<2x16x16xf32>
    %168 = arith.mulf %163, %167 : vector<2x16x16xf32>
    %169 = arith.truncf %168 : vector<2x16x16xf32> to vector<2x16x16xbf16>
    "tpu.trace_start"() <{level = 10 : i32, message = "bqk,bkd->bqd"}> : () -> ()
    %cst_56 = arith.constant dense<0.000000e+00> : vector<2x16x64xf32>
    %170 = tpu.matmul %169, %151, %cst_56 {dimension_numbers = #tpu.dot_dimension_numbers<[2], [1], [1], [2], [0, 0, 0, 1, 1, 2], [0], [0]>} : vector<2x16x16xbf16>, vector<2x16x64xbf16>, vector<2x16x64xf32> -> vector<2x16x64xf32>
    "tpu.trace_stop"() : () -> ()
    %171 = arith.truncf %170 : vector<2x16x64xf32> to vector<2x16x64xbf16>
    %172 = vector.extract_strided_slice %25 {offsets = [0, 0, 384], sizes = [2, 16, 64], strides = [1, 1, 1]} : vector<2x16x512xbf16> to vector<2x16x64xbf16>
    %173 = vector.extract_strided_slice %27 {offsets = [0, 0, 384], sizes = [2, 16, 64], strides = [1, 1, 1]} : vector<2x16x512xbf16> to vector<2x16x64xbf16>
    %174 = vector.extract_strided_slice %29 {offsets = [0, 0, 384], sizes = [2, 16, 64], strides = [1, 1, 1]} : vector<2x16x512xbf16> to vector<2x16x64xbf16>
    "tpu.trace_start"() <{level = 10 : i32, message = "bqd,bkd->bqk"}> : () -> ()
    %cst_57 = arith.constant dense<0.000000e+00> : vector<2x16x16xf32>
    %175 = tpu.matmul %172, %173, %cst_57 {dimension_numbers = #tpu.dot_dimension_numbers<[2], [2], [1], [1], [0, 0, 0, 1, 1, 1], [0], [0]>} : vector<2x16x64xbf16>, vector<2x16x64xbf16>, vector<2x16x16xf32> -> vector<2x16x16xf32>
    "tpu.trace_stop"() : () -> ()
    %cst_58 = arith.constant 0.0441941731 : f32
    %176 = vector.broadcast %cst_58 : f32 to vector<2x16x16xf32>
    %177 = arith.mulf %175, %176 : vector<2x16x16xf32>
    %cst_59 = arith.constant -1.000000e+30 : f32
    %178 = vector.shape_cast %33 : vector<1x16x16xi1> to vector<1x16x16xi1>
    %179 = vector.broadcast %178 : vector<1x16x16xi1> to vector<2x16x16xi1>
    %180 = vector.broadcast %cst_59 : f32 to vector<2x16x16xf32>
    %181 = arith.select %179, %177, %180 : vector<2x16x16xi1>, vector<2x16x16xf32>
    %cst_60 = arith.constant dense<0xFF800000> : vector<2x16xf32>
    %182 = vector.multi_reduction <maximumf>, %181, %cst_60 [2] : vector<2x16x16xf32> to vector<2x16xf32>
    %183 = vector.shape_cast %182 : vector<2x16xf32> to vector<2x16x1xf32>
    %184 = vector.broadcast %183 : vector<2x16x1xf32> to vector<2x16x16xf32>
    %185 = arith.subf %181, %184 : vector<2x16x16xf32>
    %186 = math.exp %185 : vector<2x16x16xf32>
    %cst_61 = arith.constant dense<0.000000e+00> : vector<2x16xf32>
    %187 = vector.multi_reduction <add>, %186, %cst_61 [2] : vector<2x16x16xf32> to vector<2x16xf32>
    %188 = vector.shape_cast %187 : vector<2x16xf32> to vector<2x16x1xf32>
    %189 = tpu.reciprocal %188 {approx = true} : vector<2x16x1xf32> -> vector<2x16x1xf32>
    %190 = vector.broadcast %189 : vector<2x16x1xf32> to vector<2x16x16xf32>
    %191 = arith.mulf %186, %190 : vector<2x16x16xf32>
    %192 = arith.truncf %191 : vector<2x16x16xf32> to vector<2x16x16xbf16>
    "tpu.trace_start"() <{level = 10 : i32, message = "bqk,bkd->bqd"}> : () -> ()
    %cst_62 = arith.constant dense<0.000000e+00> : vector<2x16x64xf32>
    %193 = tpu.matmul %192, %174, %cst_62 {dimension_numbers = #tpu.dot_dimension_numbers<[2], [1], [1], [2], [0, 0, 0, 1, 1, 2], [0], [0]>} : vector<2x16x16xbf16>, vector<2x16x64xbf16>, vector<2x16x64xf32> -> vector<2x16x64xf32>
    "tpu.trace_stop"() : () -> ()
    %194 = arith.truncf %193 : vector<2x16x64xf32> to vector<2x16x64xbf16>
    %195 = vector.extract_strided_slice %25 {offsets = [0, 0, 448], sizes = [2, 16, 64], strides = [1, 1, 1]} : vector<2x16x512xbf16> to vector<2x16x64xbf16>
    %196 = vector.extract_strided_slice %27 {offsets = [0, 0, 448], sizes = [2, 16, 64], strides = [1, 1, 1]} : vector<2x16x512xbf16> to vector<2x16x64xbf16>
    %197 = vector.extract_strided_slice %29 {offsets = [0, 0, 448], sizes = [2, 16, 64], strides = [1, 1, 1]} : vector<2x16x512xbf16> to vector<2x16x64xbf16>
    "tpu.trace_start"() <{level = 10 : i32, message = "bqd,bkd->bqk"}> : () -> ()
    %cst_63 = arith.constant dense<0.000000e+00> : vector<2x16x16xf32>
    %198 = tpu.matmul %195, %196, %cst_63 {dimension_numbers = #tpu.dot_dimension_numbers<[2], [2], [1], [1], [0, 0, 0, 1, 1, 1], [0], [0]>} : vector<2x16x64xbf16>, vector<2x16x64xbf16>, vector<2x16x16xf32> -> vector<2x16x16xf32>
    "tpu.trace_stop"() : () -> ()
    %cst_64 = arith.constant 0.0441941731 : f32
    %199 = vector.broadcast %cst_64 : f32 to vector<2x16x16xf32>
    %200 = arith.mulf %198, %199 : vector<2x16x16xf32>
    %cst_65 = arith.constant -1.000000e+30 : f32
    %201 = vector.shape_cast %33 : vector<1x16x16xi1> to vector<1x16x16xi1>
    %202 = vector.broadcast %201 : vector<1x16x16xi1> to vector<2x16x16xi1>
    %203 = vector.broadcast %cst_65 : f32 to vector<2x16x16xf32>
    %204 = arith.select %202, %200, %203 : vector<2x16x16xi1>, vector<2x16x16xf32>
    %cst_66 = arith.constant dense<0xFF800000> : vector<2x16xf32>
    %205 = vector.multi_reduction <maximumf>, %204, %cst_66 [2] : vector<2x16x16xf32> to vector<2x16xf32>
    %206 = vector.shape_cast %205 : vector<2x16xf32> to vector<2x16x1xf32>
    %207 = vector.broadcast %206 : vector<2x16x1xf32> to vector<2x16x16xf32>
    %208 = arith.subf %204, %207 : vector<2x16x16xf32>
    %209 = math.exp %208 : vector<2x16x16xf32>
    %cst_67 = arith.constant dense<0.000000e+00> : vector<2x16xf32>
    %210 = vector.multi_reduction <add>, %209, %cst_67 [2] : vector<2x16x16xf32> to vector<2x16xf32>
    %211 = vector.shape_cast %210 : vector<2x16xf32> to vector<2x16x1xf32>
    %212 = tpu.reciprocal %211 {approx = true} : vector<2x16x1xf32> -> vector<2x16x1xf32>
    %213 = vector.broadcast %212 : vector<2x16x1xf32> to vector<2x16x16xf32>
    %214 = arith.mulf %209, %213 : vector<2x16x16xf32>
    %215 = arith.truncf %214 : vector<2x16x16xf32> to vector<2x16x16xbf16>
    "tpu.trace_start"() <{level = 10 : i32, message = "bqk,bkd->bqd"}> : () -> ()
    %cst_68 = arith.constant dense<0.000000e+00> : vector<2x16x64xf32>
    %216 = tpu.matmul %215, %197, %cst_68 {dimension_numbers = #tpu.dot_dimension_numbers<[2], [1], [1], [2], [0, 0, 0, 1, 1, 2], [0], [0]>} : vector<2x16x16xbf16>, vector<2x16x64xbf16>, vector<2x16x64xf32> -> vector<2x16x64xf32>
    "tpu.trace_stop"() : () -> ()
    %217 = arith.truncf %216 : vector<2x16x64xf32> to vector<2x16x64xbf16>
    %218 = tpu.concatenate %56, %79, %102, %125, %148, %171, %194, %217 in 2 : vector<2x16x64xbf16>, vector<2x16x64xbf16>, vector<2x16x64xbf16>, vector<2x16x64xbf16>, vector<2x16x64xbf16>, vector<2x16x64xbf16>, vector<2x16x64xbf16>, vector<2x16x64xbf16> -> vector<2x16x512xbf16>
    %219 = vector.shape_cast %218 : vector<2x16x512xbf16> to vector<32x512xbf16>
    %c0_69 = arith.constant 0 : index
    %c0_70 = arith.constant 0 : index
    %c0_71 = arith.constant 0 : index
    %220 = vector.load %arg3[%c0_69, %c0_70, %c0_71] : memref<1x512x512xbf16, #tpu.memory_space<vmem>>, vector<1x512x512xbf16>
    %221 = vector.shape_cast %220 : vector<1x512x512xbf16> to vector<512x512xbf16>
    %cst_72 = arith.constant dense<0.000000e+00> : vector<32x512xf32>
    %222 = tpu.matmul %219, %221, %cst_72 {dimension_numbers = #tpu.dot_dimension_numbers<[1], [0], [0], [1], [0, 0, 1, 1], [], []>} : vector<32x512xbf16>, vector<512x512xbf16>, vector<32x512xf32> -> vector<32x512xf32>
    %223 = vector.broadcast %4 : vector<1x512xf32> to vector<32x512xf32>
    %224 = arith.addf %222, %223 : vector<32x512xf32>
    %cst_73 = arith.constant dense<0.000000e+00> : vector<32xf32>
    %225 = vector.multi_reduction <add>, %224, %cst_73 [1] : vector<32x512xf32> to vector<32xf32>
    %226 = vector.shape_cast %225 : vector<32xf32> to vector<32x1xf32>
    %cst_74 = arith.constant 5.120000e+02 : f32
    %227 = vector.broadcast %cst_74 : f32 to vector<32x1xf32>
    %228 = arith.divf %226, %227 : vector<32x1xf32>
    %229 = vector.broadcast %228 : vector<32x1xf32> to vector<32x512xf32>
    %230 = arith.subf %224, %229 : vector<32x512xf32>
    %231 = arith.mulf %230, %230 : vector<32x512xf32>
    %cst_75 = arith.constant dense<0.000000e+00> : vector<32xf32>
    %232 = vector.multi_reduction <add>, %231, %cst_75 [1] : vector<32x512xf32> to vector<32xf32>
    %233 = vector.shape_cast %232 : vector<32xf32> to vector<32x1xf32>
    %cst_76 = arith.constant 5.120000e+02 : f32
    %234 = vector.broadcast %cst_76 : f32 to vector<32x1xf32>
    %235 = arith.divf %233, %234 : vector<32x1xf32>
    %236 = vector.broadcast %228 : vector<32x1xf32> to vector<32x512xf32>
    %237 = arith.subf %224, %236 : vector<32x512xf32>
    %cst_77 = arith.constant 9.99999974E-6 : f32
    %238 = vector.broadcast %cst_77 : f32 to vector<32x1xf32>
    %239 = arith.addf %235, %238 : vector<32x1xf32>
    %240 = math.rsqrt %239 : vector<32x1xf32>
    %241 = vector.broadcast %240 : vector<32x1xf32> to vector<32x512xf32>
    %242 = arith.mulf %237, %241 : vector<32x512xf32>
    %243 = vector.broadcast %6 : vector<1x512xf32> to vector<32x512xf32>
    %244 = arith.mulf %242, %243 : vector<32x512xf32>
    %245 = vector.broadcast %8 : vector<1x512xf32> to vector<32x512xf32>
    %246 = arith.addf %244, %245 : vector<32x512xf32>
    %247 = arith.addf %18, %246 : vector<32x512xf32>
    %248 = arith.truncf %247 : vector<32x512xf32> to vector<32x512xbf16>
    %c0_78 = arith.constant 0 : index
    %c0_79 = arith.constant 0 : index
    %c0_80 = arith.constant 0 : index
    %249 = vector.load %arg4[%c0_78, %c0_79, %c0_80] : memref<1x512x2048xbf16, #tpu.memory_space<vmem>>, vector<1x512x2048xbf16>
    %250 = vector.shape_cast %249 : vector<1x512x2048xbf16> to vector<512x2048xbf16>
    %cst_81 = arith.constant dense<0.000000e+00> : vector<32x2048xf32>
    %251 = tpu.matmul %248, %250, %cst_81 {dimension_numbers = #tpu.dot_dimension_numbers<[1], [0], [0], [1], [0, 0, 1, 1], [], []>} : vector<32x512xbf16>, vector<512x2048xbf16>, vector<32x2048xf32> -> vector<32x2048xf32>
    %252 = vector.broadcast %16 : vector<1x2048xf32> to vector<32x2048xf32>
    %253 = arith.addf %251, %252 : vector<32x2048xf32>
    %cst_82 = arith.constant 0.000000e+00 : f32
    %254 = vector.broadcast %cst_82 : f32 to vector<32x2048xf32>
    %255 = arith.maximumf %253, %254 : vector<32x2048xf32>
    %256 = arith.truncf %255 : vector<32x2048xf32> to vector<32x2048xbf16>
    %c0_83 = arith.constant 0 : index
    %c0_84 = arith.constant 0 : index
    %c0_85 = arith.constant 0 : index
    %257 = vector.load %arg5[%c0_83, %c0_84, %c0_85] : memref<1x2048x512xbf16, #tpu.memory_space<vmem>>, vector<1x2048x512xbf16>
    %258 = vector.shape_cast %257 : vector<1x2048x512xbf16> to vector<2048x512xbf16>
    %cst_86 = arith.constant dense<0.000000e+00> : vector<32x512xf32>
    %259 = tpu.matmul %256, %258, %cst_86 {dimension_numbers = #tpu.dot_dimension_numbers<[1], [0], [0], [1], [0, 0, 1, 1], [], []>} : vector<32x2048xbf16>, vector<2048x512xbf16>, vector<32x512xf32> -> vector<32x512xf32>
    %260 = vector.broadcast %10 : vector<1x512xf32> to vector<32x512xf32>
    %261 = arith.addf %259, %260 : vector<32x512xf32>
    %cst_87 = arith.constant dense<0.000000e+00> : vector<32xf32>
    %262 = vector.multi_reduction <add>, %261, %cst_87 [1] : vector<32x512xf32> to vector<32xf32>
    %263 = vector.shape_cast %262 : vector<32xf32> to vector<32x1xf32>
    %cst_88 = arith.constant 5.120000e+02 : f32
    %264 = vector.broadcast %cst_88 : f32 to vector<32x1xf32>
    %265 = arith.divf %263, %264 : vector<32x1xf32>
    %266 = vector.broadcast %265 : vector<32x1xf32> to vector<32x512xf32>
    %267 = arith.subf %261, %266 : vector<32x512xf32>
    %268 = arith.mulf %267, %267 : vector<32x512xf32>
    %cst_89 = arith.constant dense<0.000000e+00> : vector<32xf32>
    %269 = vector.multi_reduction <add>, %268, %cst_89 [1] : vector<32x512xf32> to vector<32xf32>
    %270 = vector.shape_cast %269 : vector<32xf32> to vector<32x1xf32>
    %cst_90 = arith.constant 5.120000e+02 : f32
    %271 = vector.broadcast %cst_90 : f32 to vector<32x1xf32>
    %272 = arith.divf %270, %271 : vector<32x1xf32>
    %273 = vector.broadcast %265 : vector<32x1xf32> to vector<32x512xf32>
    %274 = arith.subf %261, %273 : vector<32x512xf32>
    %cst_91 = arith.constant 9.99999974E-6 : f32
    %275 = vector.broadcast %cst_91 : f32 to vector<32x1xf32>
    %276 = arith.addf %272, %275 : vector<32x1xf32>
    %277 = math.rsqrt %276 : vector<32x1xf32>
    %278 = vector.broadcast %277 : vector<32x1xf32> to vector<32x512xf32>
    %279 = arith.mulf %274, %278 : vector<32x512xf32>
    %280 = vector.broadcast %12 : vector<1x512xf32> to vector<32x512xf32>
    %281 = arith.mulf %279, %280 : vector<32x512xf32>
    %282 = vector.broadcast %14 : vector<1x512xf32> to vector<32x512xf32>
    %283 = arith.addf %281, %282 : vector<32x512xf32>
    %284 = arith.addf %247, %283 : vector<32x512xf32>
    %285 = vector.shape_cast %284 : vector<32x512xf32> to vector<2x16x512xf32>
    %c0_92 = arith.constant 0 : index
    %c0_93 = arith.constant 0 : index
    %c0_94 = arith.constant 0 : index
    %286 = vector.load %arg12[%c0_92, %c0_93, %c0_94] : memref<2x16x512xf32, #tpu.memory_space<vmem>>, vector<2x16x512xf32>
    tpu.vector_store %arg12[%c0_92, %c0_93, %c0_94], %285 {strides = array<i32>} : memref<2x16x512xf32, #tpu.memory_space<vmem>>, vector<2x16x512xf32>,
    %c5_i32 = arith.constant 5 : i32
    %287 = arith.cmpi eq, %arg0, %c5_i32 : i32
    %288 = arith.extui %287 : i1 to i32
    %c0_i32_95 = arith.constant 0 : i32
    %289 = arith.cmpi ne, %288, %c0_i32_95 : i32
    scf.if %289 {
      %c0_96 = arith.constant 0 : index
      %c0_97 = arith.constant 0 : index
      %290 = vector.load %arg7[%c0_96, %c0_97] : memref<1x512xf32, #tpu.memory_space<vmem>>, vector<1x512xf32>
      %c0_98 = arith.constant 0 : index
      %c0_99 = arith.constant 0 : index
      %291 = vector.load %arg8[%c0_98, %c0_99] : memref<1x512xf32, #tpu.memory_space<vmem>>, vector<1x512xf32>
      %cst_100 = arith.constant dense<0.000000e+00> : vector<32xf32>
      %292 = vector.multi_reduction <add>, %284, %cst_100 [1] : vector<32x512xf32> to vector<32xf32>
      %293 = vector.shape_cast %292 : vector<32xf32> to vector<32x1xf32>
      %cst_101 = arith.constant 5.120000e+02 : f32
      %294 = vector.broadcast %cst_101 : f32 to vector<32x1xf32>
      %295 = arith.divf %293, %294 : vector<32x1xf32>
      %296 = vector.broadcast %295 : vector<32x1xf32> to vector<32x512xf32>
      %297 = arith.subf %284, %296 : vector<32x512xf32>
      %298 = arith.mulf %297, %297 : vector<32x512xf32>
      %cst_102 = arith.constant dense<0.000000e+00> : vector<32xf32>
      %299 = vector.multi_reduction <add>, %298, %cst_102 [1] : vector<32x512xf32> to vector<32xf32>
      %300 = vector.shape_cast %299 : vector<32xf32> to vector<32x1xf32>
      %cst_103 = arith.constant 5.120000e+02 : f32
      %301 = vector.broadcast %cst_103 : f32 to vector<32x1xf32>
      %302 = arith.divf %300, %301 : vector<32x1xf32>
      %303 = vector.broadcast %295 : vector<32x1xf32> to vector<32x512xf32>
      %304 = arith.subf %284, %303 : vector<32x512xf32>
      %cst_104 = arith.constant 9.99999974E-6 : f32
      %305 = vector.broadcast %cst_104 : f32 to vector<32x1xf32>
      %306 = arith.addf %302, %305 : vector<32x1xf32>
      %307 = math.rsqrt %306 : vector<32x1xf32>
      %308 = vector.broadcast %307 : vector<32x1xf32> to vector<32x512xf32>
      %309 = arith.mulf %304, %308 : vector<32x512xf32>
      %310 = vector.broadcast %290 : vector<1x512xf32> to vector<32x512xf32>
      %311 = arith.mulf %309, %310 : vector<32x512xf32>
      %312 = vector.broadcast %291 : vector<1x512xf32> to vector<32x512xf32>
      %313 = arith.addf %311, %312 : vector<32x512xf32>
      %314 = arith.truncf %313 : vector<32x512xf32> to vector<32x512xbf16>
      %c0_105 = arith.constant 0 : index
      %c0_106 = arith.constant 0 : index
      %315 = vector.load %arg9[%c0_105, %c0_106] : memref<512x512xbf16, #tpu.memory_space<vmem>>, vector<512x512xbf16>
      %cst_107 = arith.constant dense<0.000000e+00> : vector<32x512xf32>
      %316 = tpu.matmul %314, %315, %cst_107 {dimension_numbers = #tpu.dot_dimension_numbers<[1], [0], [0], [1], [0, 0, 1, 1], [], []>} : vector<32x512xbf16>, vector<512x512xbf16>, vector<32x512xf32> -> vector<32x512xf32>
      %c0_108 = arith.constant 0 : index
      %c0_109 = arith.constant 0 : index
      %317 = vector.load %arg10[%c0_108, %c0_109] : memref<1x512xf32, #tpu.memory_space<vmem>>, vector<1x512xf32>
      %318 = vector.broadcast %317 : vector<1x512xf32> to vector<32x512xf32>
      %319 = arith.addf %316, %318 : vector<32x512xf32>
      %320 = vector.shape_cast %319 : vector<32x512xf32> to vector<2x16x512xf32>
      %c0_110 = arith.constant 0 : index
      %c0_111 = arith.constant 0 : index
      %c0_112 = arith.constant 0 : index
      %321 = vector.load %arg11[%c0_110, %c0_111, %c0_112] : memref<2x16x512xf32, #tpu.memory_space<vmem>>, vector<2x16x512xf32>
      tpu.vector_store %arg11[%c0_110, %c0_111, %c0_112], %320 {strides = array<i32>} : memref<2x16x512xf32, #tpu.memory_space<vmem>>, vector<2x16x512xf32>,
    } else {
    }
    return
  }
  func.func @transform_0(%arg0: i32) -> (i32, i32, i32) {
    %c0_i32 = arith.constant 0 : i32
    %c0_i32_0 = arith.constant 0 : i32
    %c0_i32_1 = arith.constant 0 : i32
    %c0_i32_2 = arith.constant 0 : i32
    return %c0_i32, %c0_i32_0, %c0_i32_1 : i32, i32, i32
  }
  func.func @transform_1(%arg0: i32) -> (i32, i32, i32) {
    %c0_i32 = arith.constant 0 : i32
    %c0_i32_0 = arith.constant 0 : i32
    %c0_i32_1 = arith.constant 0 : i32
    return %arg0, %c0_i32, %c0_i32_0 : i32, i32, i32
  }
  func.func @transform_2(%arg0: i32) -> (i32, i32, i32) {
    %c0_i32 = arith.constant 0 : i32
    %c0_i32_0 = arith.constant 0 : i32
    %c0_i32_1 = arith.constant 0 : i32
    return %arg0, %c0_i32, %c0_i32_0 : i32, i32, i32
  }
  func.func @transform_3(%arg0: i32) -> (i32, i32, i32) {
    %c0_i32 = arith.constant 0 : i32
    %c0_i32_0 = arith.constant 0 : i32
    %c0_i32_1 = arith.constant 0 : i32
    return %arg0, %c0_i32, %c0_i32_0 : i32, i32, i32
  }
  func.func @transform_4(%arg0: i32) -> (i32, i32, i32) {
    %c0_i32 = arith.constant 0 : i32
    %c0_i32_0 = arith.constant 0 : i32
    %c0_i32_1 = arith.constant 0 : i32
    return %arg0, %c0_i32, %c0_i32_0 : i32, i32, i32
  }
  func.func @transform_5(%arg0: i32) -> (i32, i32, i32) {
    %c0_i32 = arith.constant 0 : i32
    %c0_i32_0 = arith.constant 0 : i32
    %c0_i32_1 = arith.constant 0 : i32
    return %arg0, %c0_i32, %c0_i32_0 : i32, i32, i32
  }
  func.func @transform_6(%arg0: i32) -> (i32, i32) {
    %c0_i32 = arith.constant 0 : i32
    %c0_i32_0 = arith.constant 0 : i32
    %c0_i32_1 = arith.constant 0 : i32
    return %c0_i32, %c0_i32_0 : i32, i32
  }
  func.func @transform_7(%arg0: i32) -> (i32, i32) {
    %c0_i32 = arith.constant 0 : i32
    %c0_i32_0 = arith.constant 0 : i32
    %c0_i32_1 = arith.constant 0 : i32
    return %c0_i32, %c0_i32_0 : i32, i32
  }
  func.func @transform_8(%arg0: i32) -> (i32, i32) {
    %c0_i32 = arith.constant 0 : i32
    %c0_i32_0 = arith.constant 0 : i32
    %c0_i32_1 = arith.constant 0 : i32
    return %c0_i32, %c0_i32_0 : i32, i32
  }
  func.func @transform_9(%arg0: i32) -> (i32, i32) {
    %c0_i32 = arith.constant 0 : i32
    %c0_i32_0 = arith.constant 0 : i32
    %c0_i32_1 = arith.constant 0 : i32
    return %c0_i32, %c0_i32_0 : i32, i32
  }
  func.func @transform_10(%arg0: i32) -> (i32, i32, i32) {
    %c0_i32 = arith.constant 0 : i32
    %c0_i32_0 = arith.constant 0 : i32
    %c0_i32_1 = arith.constant 0 : i32
    %c0_i32_2 = arith.constant 0 : i32
    return %c0_i32, %c0_i32_0, %c0_i32_1 : i32, i32, i32
  }
}

</mosaic_0001>

<bundles_post_ra>
// kernel: transformer_forward.1
= control target key start
LH: loop header
LB: loop body
LE: loop exit
PB: predicated region body
PF: predicated region fallthrough
CT: control target
= control target key end

     0   :  { %s24997_s0 = inlined_call_operand.vmem [shape: f32[2,16,512], index: 0, kind: input, shape index: {}]   ;;  %s24998_s1 = inlined_call_operand.hbm [shape: bf16[6,512,1536], index: 1, kind: input, shape index: {}]   ;;  %s24999_s2 = inlined_call_operand.hbm [shape: bf16[6,512,512], index: 2, kind: input, shape index: {}]   ;;  %s25000_s3 = inlined_call_operand.hbm [shape: bf16[6,512,2048], index: 3, kind: input, shape index: {}]   ;;  %s25001_s4 = inlined_call_operand.hbm [shape: bf16[6,2048,512], index: 4, kind: input, shape index: {}]   ;;  %s25002_s5 = inlined_call_operand.hbm [shape: f32[6,8,2048], index: 5, kind: input, shape index: {}]   ;;  %s25003_s6 = inlined_call_operand.hbm [shape: f32[1,512], index: 6, kind: input, shape index: {}]   ;;  %s25004_s7 = inlined_call_operand.hbm [shape: f32[1,512], index: 7, kind: input, shape index: {}]   ;;  %s25005_s8 = inlined_call_operand.hbm [shape: bf16[512,512], index: 8, kind: input, shape index: {}]   ;;  %s25006_s9 = inlined_call_operand.hbm [shape: f32[1,512], index: 9, kind: input, shape index: {}]   ;;  %s25007_s10 = inlined_call_operand.hbm [shape: f32[2,16,512], index: 10, kind: output, shape index: {}]  }
   0x1   :  { %25045 = sst [smem:[#allocation36_spill]] %s24997_s0 }
   0x2   :  { %25046 = sst [smem:[#allocation37_spill]] %s24999_s2 }
   0x3   :  { %25047 = sst [smem:[#allocation38_spill]] %s25003_s6 }
   0x4   :  { %25048 = sst [smem:[#allocation39_spill]] %s25005_s8 }
   0x5   :  { %25049 = sst [smem:[#allocation40_spill]] %s25007_s10 }
   0x6   :  { %15 = vsyncpa [#allocation4], 0 }
   0x7   :  { %17 = vsyncpa [#allocation4 + $0x1], 0 }
   0x8   :  { %18 = vsyncpa [#allocation7], 0 }
   0x9   :  { %20 = vsyncpa [#allocation7 + $0x1], 0 }
   0xa   :  { %21 = vsyncpa [#allocation10], 0 }
   0xb   :  { %23 = vsyncpa [#allocation10 + $0x1], 0 }
   0xc   :  { %24 = vsyncpa [#allocation13], 0 }
   0xd   :  { %25 = vsyncpa [#allocation16], 0 }
   0xe   :  { %26 = vsyncpa [#allocation5], 0  ;;  %s21318_s13 = smov 0   ;;  %s21320_s14 = smov 0  }
   0xf   :  { %s21322_s15 = smov 0   ;;  %s21324_s16 = smov 0  }
  0x10 LB: > { %25050 = sst [smem:[#allocation25_spill]] %s21232_s14  ;;  %s21337_s17 = sadd.s32 4294967295, %s21240_s16   ;;  %s21240_s16 = sphi %s21324_s16, %s25107_s16   ;;  %s21236_s15 = sphi %s21322_s15, %s25110_s15   ;;  %s21232_s14 = sphi %s21320_s14, %s25109_s14   ;;  %s21228_s13 = sphi %s21318_s13, %s25108_s13  }
  0x11   : > { %25051 = sst [smem:[#allocation26_spill]] %s21236_s15  ;;  %p73_p0 = scmp.ne.s32.totalorder %s21232_s14, %s21228_s13 }
  0x12   : > { %25052 = sst [smem:[#allocation27_spill]] %s21337_s17  ;;  %p25008_p1 = scmp.eq.s32.totalorder %s21337_s17, 0 }
  0x13   : > { %p16514_p2 = scmp.ge.s32.totalorder %s21240_s16, 1  ;;  %p293_p3 = scmp.lt.s32.totalorder %s21240_s16, 7 }
  0x14   : > { %p21346_p5 = por %p25008_p1, %p73_p0  ;;  %s21242_s20 = smov [#allocation12]  }
  0x15   : > { %p21350_p6 = pnand %p16514_p2, %p293_p3  ;;  %s309_s21 = sshll.u32 %s21242_s20, 4  ;;  %s310_s21 = int_to_ptr.vmem [resolvable:$true] %s309_s21 }
  0x16   : > { %s25053_s18 = scalar_select %p21346_p5, 1, 0 }
  0x17   : > { %s25055_s19 = scalar_select %p21350_p6, 1, 0 }
  0x18   : > { %25054 = sst [smem:[#allocation28_spill]] %s25053_s18  ;;  %p18914_p7 = pneg %p21350_p6 }
  0x19   : > { %s21243_s22 = smov [#allocation15]   ;;  %s25057_s6 = sld [smem:[#allocation38_spill]] }
  0x1a   : > { %s330_s23 = sshll.u32 %s21243_s22, 4  ;;  %p21358_p8 = pnand %p18914_p7, %p25008_p1  ;;  %s21362_s23 = int_to_ptr.vmem [resolvable:$true] %s330_s23 }
  0x1c   : > { %s25056_s24 = scalar_select %p21358_p8, 1, 0 }
  0x1d   : > { %p21372_p10 = pneg %p21358_p8 }
  0x1f   : > { %s20898_s27 = scalar_lea.hbm %s25057_s6, 64 }
  0x20   : > { %p20899_p9 = scmp.ne.s32.totalorder %s25057_s6, %s20898_s27  ;;  %p20905_p13 = scmp.lt.u32.totalorder %s20898_s27, %s25057_s6 }
  0x21   : > { %s25058_s30 = scalar_select %p21372_p10, 1, 0 }
  0x22   : > { %p20901_p11 = pnand %p21372_p10, %p20899_p9 }
  0x24   : > { %p20902_p12 = pneg %p20901_p11 }
  0x26   : > { %p20907_p0 = pnand %p20905_p13, %p20902_p12 }
  0x28   : > { %20910 = shalt.err (!%p20907_p0)
}
  0x29   : > { %s20911_s13 = scalar_lea.vmem %s310_s21, 64  ;;  %p20919_p4 = scmp.lt.s32.totalorder %s310_s21, %s310_s21 }
  0x2a   : > { %p20912_p2 = scmp.ne.s32.totalorder %s310_s21, %s20911_s13  ;;  %p20920_p1 = scmp.lt.s32.totalorder %s20911_s13, %s20911_s13 }
  0x2c   : > { %p20914_p3 = pnand %p20912_p2, %p21372_p10  ;;  %p20921_p5 = por %p20920_p1, %p20919_p4 }
  0x2e   : > { %p20915_p7 = pneg %p20914_p3 }
  0x30   : > { %p20922_p6 = pnand %p20921_p5, %p20915_p7 }
  0x32   : > { %20925 = shalt.err (!%p20922_p6)
}
  0x33   : > { %18917 = dma.hbm_to_vmem [thread:$0]  (!%p21358_p8), %s25057_s6, 64, %s310_s21, [#allocation13]  }
  0x34   : > { %s25059_s8 = sld [smem:[#allocation39_spill]] }
  0x3a   : > { %s20926_s27 = scalar_lea.hbm %s25059_s8, 16384 }
  0x3b   : > { %p20927_p9 = scmp.ne.s32.totalorder %s25059_s8, %s20926_s27  ;;  %p20933_p4 = scmp.lt.u32.totalorder %s20926_s27, %s25059_s8 }
  0x3d   : > { %p20929_p11 = pnand %p20927_p9, %p21372_p10 }
  0x3f   : > { %p20930_p1 = pneg %p20929_p11 }
  0x41   : > { %p20935_p5 = pnand %p20933_p4, %p20930_p1 }
  0x43   : > { %20938 = shalt.err (!%p20935_p5)
}
  0x44   : > { %s20939_s21 = scalar_lea.vmem %s21362_s23, 16384  ;;  %p20947_p0 = scmp.lt.s32.totalorder %s21362_s23, %s21362_s23 }
  0x45   : > { %p20940_p6 = scmp.ne.s32.totalorder %s21362_s23, %s20939_s21  ;;  %p20948_p2 = scmp.lt.s32.totalorder %s20939_s21, %s20939_s21 }
  0x47   : > { %p20942_p12 = pnand %p20940_p6, %p21372_p10  ;;  %p20949_p3 = por %p20948_p2, %p20947_p0 }
  0x49   : > { %p20943_p13 = pneg %p20942_p12 }
  0x4b   : > { %p20950_p7 = pnand %p20949_p3, %p20943_p13 }
  0x4d   : > { %20953 = shalt.err (!%p20950_p7)
}
  0x4e   : > { %s25011_s13 = smov 256   ;;  %s25013_s20 = smov 16  }
  0x4f   : > { %18923 = dma.hbm_to_vmem [thread:$0]  (!%p21358_p8), %s25059_s8, 16384, %s21362_s23, [#allocation16], %s25011_s13, %s25011_s13, %s25013_s20  }
  0x50   : > { %s21415_s26 = sadd.s32 1, %s21240_s16   ;;  %s60_s27 = sadd.s32 1, %s21236_s15 }
  0x51   : > { %25060 = sst [smem:[#allocation29_spill]] %s21415_s26  ;;  %s57_s28 = ssub.s32 %s21240_s16, %s21415_s26 }
  0x52   : > { %p67_p9 = scmp.ne.s32.totalorder %s21236_s15, %s21232_s14  ;;  %p58_p11 = scmp.eq.s32.totalorder %s57_s28, 0 }
  0x53   : > { %p68_p1 = scmp.eq.s32.totalorder %s21240_s16, 0  ;;  %p18947_p4 = scmp.lt.s32.totalorder %s21240_s16, 6 }
  0x54   : > { %s21425_s29 = sand.u32 1, %s21236_s15   ;;  %s25015_s12 = sand.u32 1, %s21240_s16  }
  0x55   : > { %s21428_s11 = scalar_select %p58_p11, %s21236_s15, %s60_s27  }
  0x56   : > { %p69_p5 = por %p68_p1, %p67_p9  ;;  %s16521_s21 = sshll.u32 %s21425_s29, 10 }
  0x57   : > { %25061 = sst [smem:[#allocation30_spill]] %s21428_s11  ;;  %s18253_s22 = sshll.u32 %s21240_s16, 14 }
  0x58   : > { %p21432_p6 = pnand %p18947_p4, %p69_p5  ;;  %s380_s25 = scalar_lea.vmem [#allocation6], %s16521_s21 }
  0x59   : > { %s387_s13 = sshll.u32 %s380_s25, 4  ;;  %s25063_s2 = sld [smem:[#allocation37_spill]]  ;;  %s21442_s13 = int_to_ptr.vmem [resolvable:$true] %s387_s13 }
  0x5a   : > { %s25062_s23 = scalar_select %p21432_p6, 1, 0 }
  0x5b   : > { %s21447_s8 = scalar_lea.sflag [#allocation7], %s25015_s12  ;;  %p21453_p13 = pneg %p21432_p6 }
  0x5d   : > { %s25064_s21 = scalar_select %p21453_p13, 1, 0 }
  0x5f   : > { %s21440_s6 = scalar_lea.hbm %s25063_s2, %s18253_s22  ;;  %s20959_s25 = scalar_lea.hbm %s25063_s2, 98304 }
  0x60   : > { %s20954_s11 = scalar_lea.hbm %s21440_s6, 16384  ;;  %p20960_p3 = scmp.lt.u32.totalorder %s21440_s6, %s25063_s2 }
  0x61   : > { %p20955_p12 = scmp.ne.s32.totalorder %s21440_s6, %s20954_s11  ;;  %p20961_p7 = scmp.lt.u32.totalorder %s20959_s25, %s20954_s11 }
  0x62   : > { %p20963_p11 = scmp.lt.u32.totalorder %s20954_s11, %s21440_s6 }
  0x63   : > { %p20957_p0 = pnand %p21453_p13, %p20955_p12  ;;  %p20962_p9 = por %p20961_p7, %p20960_p3 }
  0x65   : > { %p20958_p2 = pneg %p20957_p0  ;;  %p20964_p1 = por %p20963_p11, %p20962_p9 }
  0x67   : > { %p20965_p4 = pnand %p20964_p1, %p20958_p2 }
  0x69   : > { %20968 = shalt.err (!%p20965_p4)
}
  0x6a   : > { %s20969_s12 = scalar_lea.vmem %s21442_s13, 16384  ;;  %s21246_s20 = smov [#allocation6]  }
  0x6b   : > { %p20970_p5 = scmp.ne.s32.totalorder %s21442_s13, %s20969_s12  ;;  %s20974_s22 = sshll.u32 %s21246_s20, 4  ;;  %s20975_s22 = int_to_ptr.vmem [resolvable:$false] %s20974_s22 }
  0x6c   : > { %s20976_s27 = scalar_lea.vmem %s20975_s22, 32768  ;;  %p20977_p8 = scmp.lt.s32.totalorder %s21442_s13, %s20975_s22 }
  0x6d   : > { %p20972_p12 = pnand %p20970_p5, %p21453_p13  ;;  %p20978_p10 = scmp.lt.s32.totalorder %s20976_s27, %s20969_s12 }
  0x6f   : > { %p20973_p0 = pneg %p20972_p12  ;;  %p20979_p3 = por %p20978_p10, %p20977_p8 }
  0x71   : > { %p20980_p7 = pnand %p20979_p3, %p20973_p0 }
  0x73   : > { %20983 = shalt.err (!%p20980_p7)
}
  0x74   : > { %s25065_s11 = smov 16   ;;  %s25066_s25 = smov 256  }
  0x75   : > { %18933 = dma.hbm_to_vmem [thread:$0]  (!%p21432_p6), %s21440_s6, 16384, %s21442_s13, %s21447_s8, %s25066_s25, %s25066_s25, %s25065_s11  }
  0x76   : > { %s18254_s28 = sshll.u32 %s21240_s16, 16  ;;  %s25067_s27 = sshll.u32 %s21425_s29, 12 }
  0x77   : > { %s21484_s22 = scalar_lea.hbm %s25000_s3, %s18254_s28  ;;  %s401_s2 = scalar_lea.vmem [#allocation8], %s25067_s27 }
  0x78   : > { %s408_s15 = sshll.u32 %s401_s2, 4  ;;  %s21493_s0 = scalar_lea.hbm %s25001_s4, %s18254_s28  ;;  %s21488_s15 = int_to_ptr.vmem [resolvable:$true] %s408_s15 }
  0x79   : > { %s25068_s17 = smov %s25067_s27  ;;  %s21247_s20 = smov [#allocation14]  }
  0x7a   : > { %s422_s6 = scalar_lea.vmem [#allocation9], %s25068_s17  ;;  %s21499_s12 = sshll.u32 %s21247_s20, 4  ;;  %s321_s12 = int_to_ptr.vmem [resolvable:$true] %s21499_s12 }
  0x7b   : > { %s429_s13 = sshll.u32 %s422_s6, 4  ;;  %s25069_s2 = sand.u32 1, %s21240_s16   ;;  %s21497_s13 = int_to_ptr.vmem [resolvable:$true] %s429_s13 }
  0x7c   : > { %s21503_s27 = scalar_lea.sflag [#allocation10], %s25069_s2  ;;  %s20984_s18 = scalar_lea.hbm %s21493_s0, 65536 }
  0x7d   : > { %p20985_p8 = scmp.ne.s32.totalorder %s21493_s0, %s20984_s18  ;;  %s20989_s28 = scalar_lea.hbm %s25001_s4, 393216 }
  0x7e   : > { %p20990_p9 = scmp.lt.u32.totalorder %s21493_s0, %s25001_s4  ;;  %p20991_p11 = scmp.lt.u32.totalorder %s20989_s28, %s20984_s18 }
  0x7f   : > { %p20987_p10 = pnand %p20985_p8, %p21453_p13  ;;  %p20993_p4 = scmp.lt.u32.totalorder %s20984_s18, %s21493_s0 }
  0x80   : > { %p20992_p1 = por %p20991_p11, %p20990_p9 }
  0x81   : > { %p20988_p2 = pneg %p20987_p10 }
  0x82   : > { %p20994_p5 = por %p20993_p4, %p20992_p1 }
  0x84   : > { %p20995_p12 = pnand %p20994_p5, %p20988_p2 }
  0x86   : > { %20998 = shalt.err (!%p20995_p12)
}
  0x87   : > { %s20999_s6 = scalar_lea.vmem %s21497_s13, 65536  ;;  %s21248_s20 = smov [#allocation9]  }
  0x88   : > { %p21000_p0 = scmp.ne.s32.totalorder %s21497_s13, %s20999_s6  ;;  %s21004_s2 = sshll.u32 %s21248_s20, 4  ;;  %s21005_s2 = int_to_ptr.vmem [resolvable:$false] %s21004_s2 }
  0x89   : > { %s21006_s14 = scalar_lea.vmem %s21005_s2, 131072  ;;  %p21007_p8 = scmp.lt.s32.totalorder %s21497_s13, %s21005_s2 }
  0x8a   : > { %p21002_p3 = pnand %p21000_p0, %p21453_p13  ;;  %p21008_p10 = scmp.lt.s32.totalorder %s21006_s14, %s20999_s6 }
  0x8c   : > { %p21003_p7 = pneg %p21002_p3  ;;  %p21009_p9 = por %p21008_p10, %p21007_p8 }
  0x8e   : > { %p21010_p11 = pnand %p21009_p9, %p21003_p7 }
  0x90   : > { %21013 = shalt.err (!%p21010_p11)
}
  0x91   : > { %18939 = dma.hbm_to_vmem [thread:$0]  (!%p21432_p6), %s21493_s0, 65536, %s21497_s13, %s21503_s27, %s25066_s25, %s25066_s25, %s25065_s11  }
  0x92   : > { %s21014_s26 = scalar_lea.hbm %s25004_s7, 64  ;;  %p25070_p1 = scmp.ne.s32.totalorder %s25058_s30, 0 }
  0x93   : > { %p21015_p2 = scmp.ne.s32.totalorder %s25004_s7, %s21014_s26  ;;  %p21021_p12 = scmp.lt.u32.totalorder %s21014_s26, %s25004_s7 }
  0x95   : > { %p21017_p4 = pnand %p21015_p2, %p25070_p1 }
  0x97   : > { %p21018_p5 = pneg %p21017_p4 }
  0x99   : > { %p21023_p0 = pnand %p21021_p12, %p21018_p5 }
  0x9b   : > { %21026 = shalt.err (!%p21023_p0)
}
  0x9c   : > { %s21027_s2 = scalar_lea.vmem %s321_s12, 64  ;;  %p21035_p10 = scmp.lt.s32.totalorder %s321_s12, %s321_s12 }
  0x9d   : > { %p21028_p3 = scmp.ne.s32.totalorder %s321_s12, %s21027_s2  ;;  %p21036_p9 = scmp.lt.s32.totalorder %s21027_s2, %s21027_s2 }
  0x9f   : > { %p21030_p7 = pnand %p21028_p3, %p25070_p1  ;;  %p21037_p11 = por %p21036_p9, %p21035_p10 }
  0xa1   : > { %p21031_p8 = pneg %p21030_p7 }
  0xa3   : > { %p21038_p6 = pnand %p21037_p11, %p21031_p8 }
  0xa5   : > { %21041 = shalt.err (!%p21038_p6)
}
  0xa6   : > { %p25071_p2 = scmp.ne.s32.totalorder %s25056_s24, 0  ;;  %s21249_s25 = smov [#allocation17]  }
  0xa7   : > { %s344_s13 = sshll.u32 %s21249_s25, 4  ;;  %s18881_s14 = smul.u32 3072, %s21425_s29  ;;  %s345_s13 = int_to_ptr.vmem [resolvable:$true] %s344_s13 }
  0xa8   : > { %18920 = dma.hbm_to_vmem [thread:$0]  (!%p25071_p2), %s25004_s7, 64, %s321_s12, [#allocation13]  }
  0xa9   : > { %s21042_s26 = scalar_lea.hbm %s25006_s9, 64 }
  0xaa   : > { %p21043_p6 = scmp.ne.s32.totalorder %s25006_s9, %s21042_s26  ;;  %p21049_p12 = scmp.lt.u32.totalorder %s21042_s26, %s25006_s9 }
  0xac   : > { %p21045_p4 = pnand %p21043_p6, %p25070_p1 }
  0xae   : > { %p21046_p5 = pneg %p21045_p4 }
  0xb0   : > { %p21051_p0 = pnand %p21049_p12, %p21046_p5 }
  0xb2   : > { %21054 = shalt.err (!%p21051_p0)
}
  0xb3   : > { %s21055_s12 = scalar_lea.vmem %s345_s13, 64  ;;  %p21063_p10 = scmp.lt.s32.totalorder %s345_s13, %s345_s13 }
  0xb4   : > { %p21056_p3 = scmp.ne.s32.totalorder %s345_s13, %s21055_s12  ;;  %p21064_p9 = scmp.lt.s32.totalorder %s21055_s12, %s21055_s12 }
  0xb6   : > { %p21058_p7 = pnand %p21056_p3, %p25070_p1  ;;  %p21065_p11 = por %p21064_p9, %p21063_p10 }
  0xb8   : > { %p21059_p8 = pneg %p21058_p7 }
  0xba   : > { %p21066_p13 = pnand %p21065_p11, %p21059_p8 }
  0xbc   : > { %21069 = shalt.err (!%p21066_p13)
}
  0xbd   : > { %18926 = dma.hbm_to_vmem [thread:$0]  (!%p25071_p2), %s25006_s9, 64, %s345_s13, [#allocation16]  }
  0xbe   : > { %s18882_s11 = smul.u32 49152, %s21240_s16  ;;  %s359_s25 = scalar_lea.vmem [#allocation3], %s18881_s14 }
  0xbf   : > { %s366_s18 = sshll.u32 %s359_s25, 4  ;;  %s356_s24 = scalar_lea.sflag [#allocation4], %s21425_s29  ;;  %s21574_s18 = int_to_ptr.vmem [resolvable:$true] %s366_s18 }
  0xc0   : > { %s21572_s26 = scalar_lea.hbm %s24998_s1, %s18882_s11  ;;  %p25072_p1 = scmp.ne.s32.totalorder %s25064_s21, 0 }
  0xc1   : > { %s21070_s28 = scalar_lea.hbm %s21572_s26, 49152  ;;  %s21075_s17 = scalar_lea.hbm %s24998_s1, 294912 }
  0xc2   : > { %p21071_p13 = scmp.ne.s32.totalorder %s21572_s26, %s21070_s28  ;;  %p21076_p4 = scmp.lt.u32.totalorder %s21572_s26, %s24998_s1 }
  0xc3   : > { %p21077_p5 = scmp.lt.u32.totalorder %s21075_s17, %s21070_s28  ;;  %p21079_p0 = scmp.lt.u32.totalorder %s21070_s28, %s21572_s26 }
  0xc4   : > { %p21073_p6 = pnand %p21071_p13, %p25072_p1 }
  0xc5   : > { %p21078_p12 = por %p21077_p5, %p21076_p4 }
  0xc6   : > { %p21074_p2 = pneg %p21073_p6 }
  0xc7   : > { %p21080_p3 = por %p21079_p0, %p21078_p12 }
  0xc9   : > { %p21081_p7 = pnand %p21080_p3, %p21074_p2 }
  0xcb   : > { %21084 = shalt.err (!%p21081_p7)
}
  0xcc   : > { %s21085_s12 = scalar_lea.vmem %s21574_s18, 49152  ;;  %s21250_s2 = smov [#allocation3]  }
  0xcd   : > { %p21086_p8 = scmp.ne.s32.totalorder %s21574_s18, %s21085_s12  ;;  %s21090_s0 = sshll.u32 %s21250_s2, 4  ;;  %s21091_s0 = int_to_ptr.vmem [resolvable:$false] %s21090_s0 }
  0xce   : > { %s21092_s11 = scalar_lea.vmem %s21091_s0, 98304  ;;  %p21093_p11 = scmp.lt.s32.totalorder %s21574_s18, %s21091_s0 }
  0xcf   : > { %p21088_p10 = pnand %p21086_p8, %p25072_p1  ;;  %p21094_p13 = scmp.lt.s32.totalorder %s21092_s11, %s21085_s12 }
  0xd1   : > { %p21089_p9 = pneg %p21088_p10  ;;  %p21095_p6 = por %p21094_p13, %p21093_p11 }
  0xd3   : > { %p21096_p4 = pnand %p21095_p6, %p21089_p9 }
  0xd5   : > { %21099 = shalt.err (!%p21096_p4)
}
  0xd6   : > { %s21251_s25 = smov 768   ;;  %s21252_s30 = smov 48  }
  0xd7   : > { %p25073_p2 = scmp.ne.s32.totalorder %s25062_s23, 0  ;;  %s16530_s10 = sshll.u32 %s21425_s29, 7 }
  0xd8   : > { %s21100_s28 = scalar_lea.hbm %s21484_s22, 65536  ;;  %s21105_s17 = scalar_lea.hbm %s25000_s3, 393216 }
  0xd9   : > { %18930 = dma.hbm_to_vmem [thread:$0]  (!%p25073_p2), %s21572_s26, 49152, %s21574_s18, %s356_s24, %s21251_s25, %s21251_s25, %s21252_s30  }
  0xda   : > { %p21101_p5 = scmp.ne.s32.totalorder %s21484_s22, %s21100_s28  ;;  %p21106_p3 = scmp.lt.u32.totalorder %s21484_s22, %s25000_s3 }
  0xdb   : > { %p21107_p7 = scmp.lt.u32.totalorder %s21105_s17, %s21100_s28  ;;  %p21109_p10 = scmp.lt.u32.totalorder %s21100_s28, %s21484_s22 }
  0xdc   : > { %p21103_p12 = pnand %p21101_p5, %p25072_p1 }
  0xdd   : > { %p21108_p8 = por %p21107_p7, %p21106_p3 }
  0xde   : > { %p21104_p0 = pneg %p21103_p12 }
  0xdf   : > { %p21110_p9 = por %p21109_p10, %p21108_p8 }
  0xe1   : > { %p21111_p11 = pnand %p21110_p9, %p21104_p0 }
  0xe3   : > { %21114 = shalt.err (!%p21111_p11)
}
  0xe4   : > { %s21115_s18 = scalar_lea.vmem %s21488_s15, 65536  ;;  %s21253_s26 = smov [#allocation8]  }
  0xe5   : > { %p21116_p13 = scmp.ne.s32.totalorder %s21488_s15, %s21115_s18  ;;  %s21120_s24 = sshll.u32 %s21253_s26, 4  ;;  %s21121_s24 = int_to_ptr.vmem [resolvable:$false] %s21120_s24 }
  0xe6   : > { %s21122_s12 = scalar_lea.vmem %s21121_s24, 131072  ;;  %p21123_p5 = scmp.lt.s32.totalorder %s21488_s15, %s21121_s24 }
  0xe7   : > { %p21118_p6 = pnand %p21116_p13, %p25072_p1  ;;  %p21124_p12 = scmp.lt.s32.totalorder %s21122_s12, %s21115_s18 }
  0xe9   : > { %p21119_p4 = pneg %p21118_p6  ;;  %p21125_p3 = por %p21124_p12, %p21123_p5 }
  0xeb   : > { %p21126_p7 = pnand %p21125_p3, %p21119_p4 }
  0xed   : > { %21129 = shalt.err (!%p21126_p7)
}
  0xee   : > { %s21254_s2 = smov 1024   ;;  %s21255_s0 = smov 64  }
  0xef   : > { %18936 = dma.hbm_to_vmem [thread:$0]  (!%p25073_p2), %s21484_s22, 65536, %s21488_s15, %s21447_s8, %s21254_s2, %s21254_s2, %s21255_s0  }
  0xf0   : > { %s18256_s11 = sshll.u32 %s21240_s16, 11  ;;  %s443_s13 = scalar_lea.vmem [#allocation11], %s16530_s10 }
  0xf1   : > { %s21627_s28 = scalar_lea.hbm %s25002_s5, %s18256_s11  ;;  %s451_s14 = sshll.u32 %s443_s13, 4  ;;  %s452_s14 = int_to_ptr.vmem [resolvable:$true] %s451_s14 }
  0xf2   : > { %s21130_s17 = scalar_lea.hbm %s21627_s28, 2048  ;;  %s21135_s16 = scalar_lea.hbm %s25002_s5, 12288 }
  0xf3   : > { %p21131_p0 = scmp.ne.s32.totalorder %s21627_s28, %s21130_s17  ;;  %p21136_p9 = scmp.lt.u32.totalorder %s21627_s28, %s25002_s5 }
  0xf4   : > { %p21137_p11 = scmp.lt.u32.totalorder %s21135_s16, %s21130_s17  ;;  %p21139_p6 = scmp.lt.u32.totalorder %s21130_s17, %s21627_s28 }
  0xf5   : > { %p21133_p8 = pnand %p21131_p0, %p25072_p1 }
  0xf6   : > { %p21138_p13 = por %p21137_p11, %p21136_p9 }
  0xf7   : > { %p21134_p10 = pneg %p21133_p8 }
  0xf8   : > { %p21140_p4 = por %p21139_p6, %p21138_p13 }
  0xfa   : > { %p21141_p5 = pnand %p21140_p4, %p21134_p10 }
  0xfc   : > { %21144 = shalt.err (!%p21141_p5)
}
  0xfd   : > { %s21145_s29 = scalar_lea.vmem %s452_s14, 2048  ;;  %s21256_s10 = smov [#allocation11]  }
  0xfe   : > { %p21146_p12 = scmp.ne.s32.totalorder %s452_s14, %s21145_s29  ;;  %s21150_s20 = sshll.u32 %s21256_s10, 4  ;;  %s21151_s20 = int_to_ptr.vmem [resolvable:$false] %s21150_s20 }
  0xff   : > { %s21152_s18 = scalar_lea.vmem %s21151_s20, 4096  ;;  %p21153_p0 = scmp.lt.s32.totalorder %s452_s14, %s21151_s20 }
 0x100   : > { %p21148_p3 = pnand %p21146_p12, %p25072_p1  ;;  %p21154_p8 = scmp.lt.s32.totalorder %s21152_s18, %s21145_s29 }
 0x102   : > { %p21149_p7 = pneg %p21148_p3  ;;  %p21155_p2 = por %p21154_p8, %p21153_p0 }
 0x104   : > { %p21156_p9 = pnand %p21155_p2, %p21149_p7 }
 0x106   : > { %21159 = shalt.err (!%p21156_p9)
}
 0x107   : > { %p25074_p11 = scmp.ne.s32.totalorder %s25062_s23, 0  ;;  %p25075_p10 = scmp.ne.s32.totalorder %s25055_s19, 0 }
 0x109   : > { %18942 = dma.hbm_to_vmem [thread:$0]  (!%p25074_p11), %s21627_s28, 2048, %s452_s14, %s21503_s27  }
 0x10a   : > { %460 = sbr.rel (%p25075_p10) target bundleno = 8189 (0x1ffd), region = 60 }
 0x111   : > { %s25076_s21 = sld [smem:[#allocation25_spill]]  ;;  %s25077_s26 = sld [smem:[#allocation28_spill]] }
 0x117   : > { %s462_s24 = sand.u32 1, %s25076_s21   ;;  %p25078_p1 = scmp.ne.s32.totalorder %s25077_s26, 0 }
 0x118   : > { %s18883_s12 = smul.u32 3072, %s462_s24  ;;  %s463_s2 = scalar_lea.sflag [#allocation4], %s462_s24 }
 0x11a   : > { %s21652_s0 = scalar_lea.vmem [#allocation3], %s18883_s12 }
 0x11b   : > { %21203 = dma.done.wait (%p25078_p1), %s463_s2, 49152  }
 0x11c   : > { %21205 = vsyncadd (%p25078_p1), %s463_s2, 4294918144  ;;  %s25079_s11 = sld [smem:[#allocation27_spill]]  ;;  %s16534_s25 = sshll.u32 %s462_s24, 10 }
 0x11d   : > { %s21659_s30 = scalar_lea.vmem [#allocation6], %s16534_s25 }
 0x122   : > { %s471_s23 = sand.u32 1, %s25079_s11  }
 0x123   : > { %s472_s27 = scalar_lea.sflag [#allocation7], %s471_s23 }
 0x124   : > { %21207 = dma.done.wait (%p25078_p1), %s472_s27, 81920  }
 0x125   : > { %21209 = vsyncadd (%p25078_p1), %s472_s27, 4294885376  ;;  %s16535_s19 = sshll.u32 %s462_s24, 12  ;;  %s490_s13 = scalar_lea.sflag [#allocation10], %s471_s23 }
 0x126   : > { %s21665_s28 = scalar_lea.vmem [#allocation8], %s16535_s19  ;;  %s21667_s14 = scalar_lea.vmem [#allocation9], %s16535_s19 }
 0x127   : > { %21211 = dma.done.wait (%p25078_p1), %s490_s13, 67584  }
 0x128   : > { %21213 = vsyncadd (%p25078_p1), %s490_s13, 4294899712  ;;  %s16537_s17 = sshll.u32 %s462_s24, 7  ;;  %p25080_p2 = scmp.eq.s32.totalorder %s25079_s11, 0 }
 0x129   : > { %s21673_s8 = scalar_lea.vmem [#allocation11], %s16537_s17 }
 0x12a   : > { %21215 = dma.done.wait (%p25080_p2), [#allocation13], 128   ;;  %p25081_p13 = pmov %p25080_p2 }
 0x12b   : > { %p25082_p6 = pmov %p25080_p2 }
 0x12c   : > { %21217 = vsyncadd (%p25081_p13), [#allocation13], 4294967168 }
 0x12d   : > { %21219 = dma.done.wait (%p25082_p6), [#allocation16], 16448   ;;  %p25083_p4 = pmov %p25080_p2 }
 0x12e   : > { %p25084_p5 = scmp.ne.s32.totalorder %s25079_s11, 0 }
 0x12f   : > { %21221 = vsyncadd (%p25083_p4), [#allocation16], 4294950848  ;;  %s25085_s22 = sld [smem:[#allocation36_spill]] (!%p25084_p5) }
 0x130   : > { %574 = sbr.rel (%p25084_p5) target bundleno = 318 (0x13e), region = 100 }
 0x135   : > { %v575_v0 = vld [vmem:[%s25085_s22] sm:$0xff] (!%p25084_p5)  ;;  %v576_v1 = vld [vmem:[%s25085_s22 + $0x8] sm:$0xff] (!%p25084_p5)  ;;  %v577_v2 = vld [vmem:[%s25085_s22 + $0x10] sm:$0xff] (!%p25084_p5) }
 0x136   : > { %591 = vst [vmem:[#allocation2] sm:$0xff] (!%p25084_p5), %v575_v0  ;;  %592 = vst [vmem:[#allocation2 + $0x8] sm:$0xff] (!%p25084_p5), %v576_v1  ;;  %v578_v3 = vld [vmem:[%s25085_s22 + $0x18] sm:$0xff] (!%p25084_p5)  ;;  %v579_v4 = vld [vmem:[%s25085_s22 + $0x20] sm:$0xff] (!%p25084_p5) }
 0x137   : > { %593 = vst [vmem:[#allocation2 + $0x10] sm:$0xff] %v577_v2  ;;  %v580_v5 = vld [vmem:[%s25085_s22 + $0x28] sm:$0xff]  ;;  %594 = vst [vmem:[#allocation2 + $0x18] sm:$0xff] %v578_v3  ;;  %v581_v6 = vld [vmem:[%s25085_s22 + $0x30] sm:$0xff] }
 0x138   : > { %595 = vst [vmem:[#allocation2 + $0x20] sm:$0xff] %v579_v4  ;;  %596 = vst [vmem:[#allocation2 + $0x28] sm:$0xff] %v580_v5  ;;  %v582_v7 = vld [vmem:[%s25085_s22 + $0x38] sm:$0xff]  ;;  %v583_v8 = vld [vmem:[%s25085_s22 + $0x40] sm:$0xff] }
 0x139   : > { %597 = vst [vmem:[#allocation2 + $0x30] sm:$0xff] %v581_v6  ;;  %598 = vst [vmem:[#allocation2 + $0x38] sm:$0xff] %v582_v7  ;;  %v584_v9 = vld [vmem:[%s25085_s22 + $0x48] sm:$0xff]  ;;  %v585_v10 = vld [vmem:[%s25085_s22 + $0x50] sm:$0xff] }
 0x13a   : > { %599 = vst [vmem:[#allocation2 + $0x40] sm:$0xff] %v583_v8  ;;  %v586_v11 = vld [vmem:[%s25085_s22 + $0x58] sm:$0xff]  ;;  %600 = vst [vmem:[#allocation2 + $0x48] sm:$0xff] %v584_v9  ;;  %v587_v12 = vld [vmem:[%s25085_s22 + $0x60] sm:$0xff] }
 0x13b   : > { %601 = vst [vmem:[#allocation2 + $0x50] sm:$0xff] %v585_v10  ;;  %602 = vst [vmem:[#allocation2 + $0x58] sm:$0xff] %v586_v11  ;;  %v588_v13 = vld [vmem:[%s25085_s22 + $0x68] sm:$0xff]  ;;  %v589_v14 = vld [vmem:[%s25085_s22 + $0x70] sm:$0xff] }
 0x13c   : > { %603 = vst [vmem:[#allocation2 + $0x60] sm:$0xff] %v587_v12  ;;  %604 = vst [vmem:[#allocation2 + $0x68] sm:$0xff] %v588_v13  ;;  %v590_v15 = vld [vmem:[%s25085_s22 + $0x78] sm:$0xff] }
 0x13d   : > { %605 = vst [vmem:[#allocation2 + $0x70] sm:$0xff] %v589_v14  ;;  %606 = vst [vmem:[#allocation2 + $0x78] sm:$0xff] %v590_v15 }
 0x13e PF: > { %v19002_v16 = vld [vmem:[%s21652_s0 + $0x4] ss:$48 sps:$4 sm:$0xff]   ;;  %v19004_v17 = vld [vmem:[%s21652_s0] ss:$48 sps:$4 sm:$0xff]   ;;  %v19056_v34 = vld [vmem:[%s21652_s0 + $0xc] ss:$48 sps:$4 sm:$0xff]  }
 0x13f   : > { %2954 = vmatprep.subr.bf16.mxu0 %v19002_v16  ;;  %v19005_v18 = vld [vmem:[%s21652_s0 + $0x64] ss:$48 sps:$4 sm:$0xff]   ;;  %v19007_v19 = vld [vmem:[%s21652_s0 + $0x60] ss:$48 sps:$4 sm:$0xff]   ;;  %v631_v30 = vld [vmem:[#allocation2 + $0x28] sm:$0xff]  ;;  %3060 = vmatprep.subr.bf16.mxu1 %v19056_v34  ;;  %vm21258_vm0 = vmmov 0  }
 0x140   : > { %2955 = vmatpush1.bf16.msra.mxu0 %v19004_v17  ;;  %v19008_v20 = vld [vmem:[%s21652_s0 + $0xc4] ss:$48 sps:$4 sm:$0xff]   ;;  %v19010_v21 = vld [vmem:[%s21652_s0 + $0xc0] ss:$48 sps:$4 sm:$0xff]   ;;  %v19058_v35 = vld [vmem:[%s21652_s0 + $0x8] ss:$48 sps:$4 sm:$0xff]  }
 0x141   : > { %2956 = vmatprep.subr.bf16.mxu0 %v19005_v18  ;;  %v19011_v22 = vld [vmem:[%s21652_s0 + $0x124] ss:$48 sps:$4 sm:$0xff]   ;;  %v19013_v23 = vld [vmem:[%s21652_s0 + $0x120] ss:$48 sps:$4 sm:$0xff]   ;;  %v19062_v38 = vld [vmem:[%s21652_s0 + $0x6c] ss:$48 sps:$4 sm:$0xff]   ;;  %3061 = vmatpush1.bf16.msra.mxu1 %v19058_v35 }
 0x142   : > { %v19014_v24 = vld [vmem:[%s21652_s0 + $0x184] ss:$48 sps:$4 sm:$0xff]   ;;  %v19016_v25 = vld [vmem:[%s21652_s0 + $0x180] ss:$48 sps:$4 sm:$0xff]   ;;  %v19064_v39 = vld [vmem:[%s21652_s0 + $0x68] ss:$48 sps:$4 sm:$0xff]   ;;  %3062 = vmatprep.subr.bf16.mxu1 %v19062_v38 }
 0x143   : > { %v19017_v26 = vld [vmem:[%s21652_s0 + $0x1e4] ss:$48 sps:$4 sm:$0xff]   ;;  %v19019_v27 = vld [vmem:[%s21652_s0 + $0x1e0] ss:$48 sps:$4 sm:$0xff]   ;;  %v19068_v41 = vld [vmem:[%s21652_s0 + $0xcc] ss:$48 sps:$4 sm:$0xff]  }
 0x144   : > { %2957 = vmatpush1.bf16.msra.mxu0 %v19007_v19  ;;  %v19020_v28 = vld [vmem:[%s21652_s0 + $0x244] ss:$48 sps:$4 sm:$0xff]   ;;  %v627_v29 = vld [vmem:[#allocation2 + $0x8] sm:$0xff]  ;;  %v19022_v32 = vld [vmem:[%s21652_s0 + $0x240] ss:$48 sps:$4 sm:$0xff]   ;;  %vm3621_vm1 = vcmask 523264  }
 0x145   : > { %2958 = vmatprep.subr.bf16.mxu0 %v19008_v20  ;;  %v21746_v31 = vpack.c.bf16 %v631_v30, %v627_v29  ;;  %v19023_v33 = vld [vmem:[%s21652_s0 + $0x2a4] ss:$48 sps:$4 sm:$0xff]   ;;  %v19025_v36 = vld [vmem:[%s21652_s0 + $0x2a0] ss:$48 sps:$4 sm:$0xff]   ;;  %3063 = vmatpush1.bf16.msra.mxu1 %v19064_v39  ;;  %v19070_v43 = vld [vmem:[%s21652_s0 + $0xc8] ss:$48 sps:$4 sm:$0xff]  }
 0x146   : > { %v19026_v37 = vld [vmem:[%s21652_s0 + $0x304] ss:$48 sps:$4 sm:$0xff]   ;;  %v19028_v40 = vld [vmem:[%s21652_s0 + $0x300] ss:$48 sps:$4 sm:$0xff]   ;;  %3064 = vmatprep.subr.bf16.mxu1 %v19068_v41  ;;  %v19074_v44 = vld [vmem:[%s21652_s0 + $0x12c] ss:$48 sps:$4 sm:$0xff]  }
 0x147   : > { %2986 = vmatprep.mubr.bf16.mxu0 %v21746_v31  ;;  %3092 = vmatprep.mubr.bf16.mxu1 %v21746_v31  ;;  %v19029_v42 = vld [vmem:[%s21652_s0 + $0x364] ss:$48 sps:$4 sm:$0xff]   ;;  %v19031_v45 = vld [vmem:[%s21652_s0 + $0x360] ss:$48 sps:$4 sm:$0xff]   ;;  %v19076_v47 = vld [vmem:[%s21652_s0 + $0x128] ss:$48 sps:$4 sm:$0xff]  }
 0x148   : > { %2959 = vmatpush1.bf16.msra.mxu0 %v19010_v21  ;;  %v19032_v46 = vld [vmem:[%s21652_s0 + $0x3c4] ss:$48 sps:$4 sm:$0xff]   ;;  %v19080_v48 = vld [vmem:[%s21652_s0 + $0x18c] ss:$48 sps:$4 sm:$0xff]   ;;  %v19034_v49 = vld [vmem:[%s21652_s0 + $0x3c0] ss:$48 sps:$4 sm:$0xff]  }
 0x149   : > { %2960 = vmatprep.subr.bf16.mxu0 %v19011_v22  ;;  %3065 = vmatpush1.bf16.msra.mxu1 %v19070_v43  ;;  %v19035_v50 = vld [vmem:[%s21652_s0 + $0x424] ss:$48 sps:$4 sm:$0xff]   ;;  %v19082_v51 = vld [vmem:[%s21652_s0 + $0x188] ss:$48 sps:$4 sm:$0xff]   ;;  %v19086_v52 = vld [vmem:[%s21652_s0 + $0x1ec] ss:$48 sps:$4 sm:$0xff]  }
 0x14a   : > { %3066 = vmatprep.subr.bf16.mxu1 %v19074_v44  ;;  %v19037_v53 = vld [vmem:[%s21652_s0 + $0x420] ss:$48 sps:$4 sm:$0xff]   ;;  %v19038_v54 = vld [vmem:[%s21652_s0 + $0x484] ss:$48 sps:$4 sm:$0xff]   ;;  %v19088_v55 = vld [vmem:[%s21652_s0 + $0x1e8] ss:$48 sps:$4 sm:$0xff]  }
 0x14b   : > { %v19092_v56 = vld [vmem:[%s21652_s0 + $0x24c] ss:$48 sps:$4 sm:$0xff]   ;;  %v19040_v57 = vld [vmem:[%s21652_s0 + $0x480] ss:$48 sps:$4 sm:$0xff]   ;;  %v19041_v58 = vld [vmem:[%s21652_s0 + $0x4e4] ss:$48 sps:$4 sm:$0xff]  }
 0x14c   : > { %2961 = vmatpush1.bf16.msra.mxu0 %v19013_v23  ;;  %v19094_v59 = vld [vmem:[%s21652_s0 + $0x248] ss:$48 sps:$4 sm:$0xff]   ;;  %v19098_v60 = vld [vmem:[%s21652_s0 + $0x2ac] ss:$48 sps:$4 sm:$0xff]   ;;  %v19043_v61 = vld [vmem:[%s21652_s0 + $0x4e0] ss:$48 sps:$4 sm:$0xff]  }
 0x14d   : > { %2962 = vmatprep.subr.bf16.mxu0 %v19014_v24  ;;  %3067 = vmatpush1.bf16.msra.mxu1 %v19076_v47  ;;  %v19044_v62 = vld [vmem:[%s21652_s0 + $0x544] ss:$48 sps:$4 sm:$0xff]   ;;  %v19100_v63 = vld [vmem:[%s21652_s0 + $0x2a8] ss:$48 sps:$4 sm:$0xff]   ;;  %v19104_v0 = vld [vmem:[%s21652_s0 + $0x30c] ss:$48 sps:$4 sm:$0xff]  }
 0x14e   : > { %3068 = vmatprep.subr.bf16.mxu1 %v19080_v48  ;;  %v19046_v1 = vld [vmem:[%s21652_s0 + $0x540] ss:$48 sps:$4 sm:$0xff]   ;;  %v19047_v2 = vld [vmem:[%s21652_s0 + $0x5a4] ss:$48 sps:$4 sm:$0xff]   ;;  %v19106_v3 = vld [vmem:[%s21652_s0 + $0x308] ss:$48 sps:$4 sm:$0xff]  }
 0x14f   : > { %v19049_v4 = vld [vmem:[%s21652_s0 + $0x5a0] ss:$48 sps:$4 sm:$0xff]   ;;  %v19052_v5 = vld [vmem:[%s21652_s0 + $0x604] ss:$48 sps:$4 sm:$0xff]   ;;  %v19110_v6 = vld [vmem:[%s21652_s0 + $0x36c] ss:$48 sps:$4 sm:$0xff]  }
 0x150   : > { %2963 = vmatpush1.bf16.msra.mxu0 %v19016_v25  ;;  %v626_v7 = vld [vmem:[#allocation2] sm:$0xff]  ;;  %v635_v9 = vld [vmem:[#allocation2 + $0x48] sm:$0xff]  ;;  %v629_v23 = vld [vmem:[#allocation2 + $0x18] sm:$0xff]  ;;  %vm3728_vm3 = vcmask 130048  }
 0x151   : > { %2964 = vmatprep.subr.bf16.mxu0 %v19017_v26  ;;  %3069 = vmatpush1.bf16.msra.mxu1 %v19082_v51  ;;  %v630_v8 = vld [vmem:[#allocation2 + $0x20] sm:$0xff]  ;;  %v639_v10 = vld [vmem:[#allocation2 + $0x68] sm:$0xff]  ;;  %v633_v24 = vld [vmem:[#allocation2 + $0x38] sm:$0xff] }
 0x152   : > { %3070 = vmatprep.subr.bf16.mxu1 %v19086_v52  ;;  %v19112_v11 = vld [vmem:[%s21652_s0 + $0x368] ss:$48 sps:$4 sm:$0xff]   ;;  %v21790_v12 = vpack.c.bf16 %v630_v8, %v626_v7  ;;  %v19116_v13 = vld [vmem:[%s21652_s0 + $0x3cc] ss:$48 sps:$4 sm:$0xff]   ;;  %v19050_v14 = vld [vmem:[%s21652_s0 + $0x600] ss:$48 sps:$4 sm:$0xff]   ;;  %v21794_v15 = vpack.c.bf16 %v639_v10, %v635_v9  ;;  %v21808_v29 = vpack.c.bf16 %v633_v24, %v629_v23 }
 0x153   : > { %v19055_v16 = vld [vmem:[%s21652_s0 + $0x664] ss:$48 sps:$4 sm:$0xff]   ;;  %v19053_v17 = vld [vmem:[%s21652_s0 + $0x660] ss:$48 sps:$4 sm:$0xff]   ;;  %v19118_v18 = vld [vmem:[%s21652_s0 + $0x3c8] ss:$48 sps:$4 sm:$0xff]  }
 0x154   : > { %2965 = vmatpush1.bf16.msra.mxu0 %v19019_v27  ;;  %v19061_v19 = vld [vmem:[%s21652_s0 + $0x6c4] ss:$48 sps:$4 sm:$0xff]   ;;  %v19122_v20 = vld [vmem:[%s21652_s0 + $0x42c] ss:$48 sps:$4 sm:$0xff]   ;;  %v19124_v25 = vld [vmem:[%s21652_s0 + $0x428] ss:$48 sps:$4 sm:$0xff]  }
 0x155   : > { %2966 = vmatprep.subr.bf16.mxu0 %v19020_v28  ;;  %3071 = vmatpush1.bf16.msra.mxu1 %v19088_v55  ;;  %v634_v21 = vld [vmem:[#allocation2 + $0x40] sm:$0xff]  ;;  %v19128_v26 = vld [vmem:[%s21652_s0 + $0x48c] ss:$48 sps:$4 sm:$0xff]   ;;  %v19148_v44 = vld [vmem:[%s21652_s0 + $0x5a8] ss:$48 sps:$4 sm:$0xff]  }
 0x156   : > { %3072 = vmatprep.subr.bf16.mxu1 %v19092_v56  ;;  %v638_v22 = vld [vmem:[#allocation2 + $0x60] sm:$0xff]  ;;  %v19146_v41 = vld [vmem:[%s21652_s0 + $0x5ac] ss:$48 sps:$4 sm:$0xff]   ;;  %v19152_v48 = vld [vmem:[%s21652_s0 + $0x608] ss:$48 sps:$4 sm:$0xff]  }
 0x157   : > { %v21805_v27 = vpack.c.bf16 %v638_v22, %v634_v21  ;;  %v19059_v28 = vld [vmem:[%s21652_s0 + $0x6c0] ss:$48 sps:$4 sm:$0xff]   ;;  %v19067_v30 = vld [vmem:[%s21652_s0 + $0x724] ss:$48 sps:$4 sm:$0xff]   ;;  %v19158_v52 = vld [vmem:[%s21652_s0 + $0x668] ss:$48 sps:$4 sm:$0xff]  }
 0x158   : > { %2967 = vmatpush1.bf16.msra.mxu0 %v19022_v32  ;;  %v19130_v32 = vld [vmem:[%s21652_s0 + $0x488] ss:$48 sps:$4 sm:$0xff]   ;;  %v19065_v34 = vld [vmem:[%s21652_s0 + $0x720] ss:$48 sps:$4 sm:$0xff]   ;;  %v19073_v35 = vld [vmem:[%s21652_s0 + $0x784] ss:$48 sps:$4 sm:$0xff]  }
 0x159   : > { %2968 = vmatprep.subr.bf16.mxu0 %v19023_v33  ;;  %3073 = vmatpush1.bf16.msra.mxu1 %v19094_v59  ;;  %v19134_v33 = vld [vmem:[%s21652_s0 + $0x4ec] ss:$48 sps:$4 sm:$0xff]   ;;  %v19071_v38 = vld [vmem:[%s21652_s0 + $0x780] ss:$48 sps:$4 sm:$0xff]   ;;  %v19079_v39 = vld [vmem:[%s21652_s0 + $0x7e4] ss:$48 sps:$4 sm:$0xff]  }
 0x15a   : > { %3074 = vmatprep.subr.bf16.mxu1 %v19098_v60  ;;  %v19085_v43 = vld [vmem:[%s21652_s0 + $0x844] ss:$48 sps:$4 sm:$0xff]   ;;  %v19164_v56 = vld [vmem:[%s21652_s0 + $0x6c8] ss:$48 sps:$4 sm:$0xff]   ;;  %v19196_v9 = vld [vmem:[%s21652_s0 + $0x8ac] ss:$48 sps:$4 sm:$0xff]  }
 0x15b   : > { %v19091_v47 = vld [vmem:[%s21652_s0 + $0x8a4] ss:$48 sps:$4 sm:$0xff]   ;;  %v19170_v60 = vld [vmem:[%s21652_s0 + $0x728] ss:$48 sps:$4 sm:$0xff]   ;;  %v19125_v10 = vld [vmem:[%s21652_s0 + $0xae0] ss:$48 sps:$4 sm:$0xff]  }
 0x15c   : > { %2969 = vmatpush1.bf16.msra.mxu0 %v19025_v36  ;;  %v19136_v36 = vld [vmem:[%s21652_s0 + $0x4e8] ss:$48 sps:$4 sm:$0xff]   ;;  %v19097_v51 = vld [vmem:[%s21652_s0 + $0x904] ss:$48 sps:$4 sm:$0xff]   ;;  %v19208_v22 = vld [vmem:[%s21652_s0 + $0x96c] ss:$48 sps:$4 sm:$0xff]  }
 0x15d   : > { %2970 = vmatprep.subr.bf16.mxu0 %v19026_v37  ;;  %3075 = vmatpush1.bf16.msra.mxu1 %v19100_v63  ;;  %v19140_v37 = vld [vmem:[%s21652_s0 + $0x54c] ss:$48 sps:$4 sm:$0xff]   ;;  %v19103_v55 = vld [vmem:[%s21652_s0 + $0x964] ss:$48 sps:$4 sm:$0xff]   ;;  %v19188_v8 = vld [vmem:[%s21652_s0 + $0x848] ss:$48 sps:$4 sm:$0xff]  }
 0x15e   : > { %3076 = vmatprep.subr.bf16.mxu1 %v19104_v0  ;;  %v19109_v59 = vld [vmem:[%s21652_s0 + $0x9c4] ss:$48 sps:$4 sm:$0xff]   ;;  %v19176_v0 = vld [vmem:[%s21652_s0 + $0x788] ss:$48 sps:$4 sm:$0xff]  }
 0x15f   : > { %v19115_v63 = vld [vmem:[%s21652_s0 + $0xa24] ss:$48 sps:$4 sm:$0xff]   ;;  %v637_v24 = vld [vmem:[#allocation2 + $0x58] sm:$0xff] }
 0x160   : > { %2971 = vmatpush1.bf16.msra.mxu0 %v19028_v40  ;;  %v19142_v40 = vld [vmem:[%s21652_s0 + $0x548] ss:$48 sps:$4 sm:$0xff]   ;;  %v19127_v7 = vld [vmem:[%s21652_s0 + $0xae4] ss:$48 sps:$4 sm:$0xff]  }
 0x161   : > { %2972 = vmatprep.subr.bf16.mxu0 %v19029_v42  ;;  %3077 = vmatpush1.bf16.msra.mxu1 %v19106_v3  ;;  %v19077_v42 = vld [vmem:[%s21652_s0 + $0x7e0] ss:$48 sps:$4 sm:$0xff]   ;;  %v19121_v3 = vld [vmem:[%s21652_s0 + $0xa84] ss:$48 sps:$4 sm:$0xff]  }
 0x162   : > { %3078 = vmatprep.subr.bf16.mxu1 %v19110_v6  ;;  %v19119_v6 = vld [vmem:[%s21652_s0 + $0xa80] ss:$48 sps:$4 sm:$0xff]   ;;  %v19145_v23 = vld [vmem:[%s21652_s0 + $0x14] ss:$48 sps:$4 sm:$0xff]  }
 0x163   : > { %v632_v21 = vld [vmem:[#allocation2 + $0x30] sm:$0xff] }
 0x164   : > { %2973 = vmatpush1.bf16.msra.mxu0 %v19031_v45  ;;  %v19154_v45 = vld [vmem:[%s21652_s0 + $0x60c] ss:$48 sps:$4 sm:$0xff]  }
 0x165   : > { %2974 = vmatprep.subr.bf16.mxu0 %v19032_v46  ;;  %3079 = vmatpush1.bf16.msra.mxu1 %v19112_v11  ;;  %v19083_v46 = vld [vmem:[%s21652_s0 + $0x840] ss:$48 sps:$4 sm:$0xff]   ;;  %v19133_v11 = vld [vmem:[%s21652_s0 + $0xb44] ss:$48 sps:$4 sm:$0xff]  }
 0x166   : > { %3080 = vmatprep.subr.bf16.mxu1 %v19116_v13  ;;  %v19194_v13 = vld [vmem:[%s21652_s0 + $0x8a8] ss:$48 sps:$4 sm:$0xff]  }
 0x168   : > { %2975 = vmatpush1.bf16.msra.mxu0 %v19034_v49  ;;  %v19160_v49 = vld [vmem:[%s21652_s0 + $0x66c] ss:$48 sps:$4 sm:$0xff]  }
 0x169   : > { %2976 = vmatprep.subr.bf16.mxu0 %v19035_v50  ;;  %3081 = vmatpush1.bf16.msra.mxu1 %v19118_v18  ;;  %v19089_v50 = vld [vmem:[%s21652_s0 + $0x8a0] ss:$48 sps:$4 sm:$0xff]  }
 0x16a   : > { %3082 = vmatprep.subr.bf16.mxu1 %v19122_v20  ;;  %v19137_v18 = vld [vmem:[%s21652_s0 + $0xba0] ss:$48 sps:$4 sm:$0xff]   ;;  %v19200_v20 = vld [vmem:[%s21652_s0 + $0x908] ss:$48 sps:$4 sm:$0xff]  }
 0x16c   : > { %2977 = vmatpush1.bf16.msra.mxu0 %v19037_v53  ;;  %v19166_v53 = vld [vmem:[%s21652_s0 + $0x6cc] ss:$48 sps:$4 sm:$0xff]  }
 0x16d   : > { %2978 = vmatprep.subr.bf16.mxu0 %v19038_v54  ;;  %3083 = vmatpush1.bf16.msra.mxu1 %v19124_v25  ;;  %v19095_v54 = vld [vmem:[%s21652_s0 + $0x900] ss:$48 sps:$4 sm:$0xff]   ;;  %v641_v25 = vld [vmem:[#allocation2 + $0x78] sm:$0xff] }
 0x16e   : > { %3084 = vmatprep.subr.bf16.mxu1 %v19128_v26  ;;  %v19206_v26 = vld [vmem:[%s21652_s0 + $0x968] ss:$48 sps:$4 sm:$0xff]  }
 0x170   : > { %2979 = vmatpush1.bf16.msra.mxu0 %v19040_v57  ;;  %v19172_v57 = vld [vmem:[%s21652_s0 + $0x72c] ss:$48 sps:$4 sm:$0xff]  }
 0x171   : > { %2980 = vmatprep.subr.bf16.mxu0 %v19041_v58  ;;  %3085 = vmatpush1.bf16.msra.mxu1 %v19130_v32  ;;  %v19101_v58 = vld [vmem:[%s21652_s0 + $0x960] ss:$48 sps:$4 sm:$0xff]  }
 0x172   : > { %3086 = vmatprep.subr.bf16.mxu1 %v19134_v33  ;;  %v19143_v32 = vld [vmem:[%s21652_s0 + $0x10] ss:$48 sps:$4 sm:$0xff]   ;;  %v21874_v33 = vpack.c.bf16 %v641_v25, %v637_v24  ;;  %v19284_v24 = vld [vmem:[%s21652_s0 + $0x258] ss:$48 sps:$4 sm:$0xff]   ;;  %v19292_v25 = vld [vmem:[%s21652_s0 + $0x2bc] ss:$48 sps:$4 sm:$0xff]  }
 0x174   : > { %2981 = vmatpush1.bf16.msra.mxu0 %v19043_v61  ;;  %v19178_v61 = vld [vmem:[%s21652_s0 + $0x78c] ss:$48 sps:$4 sm:$0xff]  }
 0x175   : > { %2982 = vmatprep.subr.bf16.mxu0 %v19044_v62  ;;  %3087 = vmatpush1.bf16.msra.mxu1 %v19136_v36  ;;  %v19107_v62 = vld [vmem:[%s21652_s0 + $0x9c0] ss:$48 sps:$4 sm:$0xff]  }
 0x176   : > { %3088 = vmatprep.subr.bf16.mxu1 %v19140_v37  ;;  %v19149_v36 = vld [vmem:[%s21652_s0 + $0x70] ss:$48 sps:$4 sm:$0xff]   ;;  %v19220_v37 = vld [vmem:[%s21652_s0 + $0xa2c] ss:$48 sps:$4 sm:$0xff]  }
 0x178   : > { %2983 = vmatpush1.bf16.msra.mxu0 %v19046_v1  ;;  %v19184_v1 = vld [vmem:[%s21652_s0 + $0x7ec] ss:$48 sps:$4 sm:$0xff]  }
 0x179   : > { %2984 = vmatprep.subr.bf16.mxu0 %v19047_v2  ;;  %3089 = vmatpush1.bf16.msra.mxu1 %v19142_v40  ;;  %v19113_v2 = vld [vmem:[%s21652_s0 + $0xa20] ss:$48 sps:$4 sm:$0xff]   ;;  %v19157_v40 = vld [vmem:[%s21652_s0 + $0xd4] ss:$48 sps:$4 sm:$0xff]  }
 0x17a   : > { %3090 = vmatprep.subr.bf16.mxu1 %v19146_v41  ;;  %v19218_v41 = vld [vmem:[%s21652_s0 + $0xa28] ss:$48 sps:$4 sm:$0xff]  }
 0x17c   : > { %2985 = vmatpush1.bf16.msra.mxu0 %v19049_v4  ;;  %v19182_v4 = vld [vmem:[%s21652_s0 + $0x7e8] ss:$48 sps:$4 sm:$0xff]  }
 0x17d   : > { %3007 = vmatprep.subr.bf16.mxu0 %v19052_v5  ;;  %3091 = vmatpush1.bf16.msra.mxu1 %v19148_v44  ;;  %v19190_v5 = vld [vmem:[%s21652_s0 + $0x84c] ss:$48 sps:$4 sm:$0xff]   ;;  %v19155_v44 = vld [vmem:[%s21652_s0 + $0xd0] ss:$48 sps:$4 sm:$0xff]  }
 0x17e   : > { %3113 = vmatprep.subr.bf16.mxu1 %v19154_v45  ;;  %v19163_v45 = vld [vmem:[%s21652_s0 + $0x134] ss:$48 sps:$4 sm:$0xff]  }
 0x17f   : > { %2987 = vmatmul.mubr.bf16.vlgmr.msra.gmra.mrb[0].mxu0 %v21790_v12 }
 0x180   : > { %3008 = vmatpush1.bf16.msra.mxu0 %v19050_v14  ;;  %2996 = vmatprep.mubr.bf16.mxu0 %v21794_v15  ;;  %v19202_v14 = vld [vmem:[%s21652_s0 + $0x90c] ss:$48 sps:$4 sm:$0xff]  }
 0x181   : > { %3009 = vmatprep.subr.bf16.mxu0 %v19055_v16  ;;  %3093 = vmatmul.mubr.bf16.vlgmr.msra.gmra.mrb[0].mxu1 %v21790_v12  ;;  %v19131_v16 = vld [vmem:[%s21652_s0 + $0xb40] ss:$48 sps:$4 sm:$0xff]  }
 0x182   : > { %3114 = vmatpush1.bf16.msra.mxu1 %v19152_v48  ;;  %3102 = vmatprep.mubr.bf16.mxu1 %v21794_v15  ;;  %v19161_v48 = vld [vmem:[%s21652_s0 + $0x130] ss:$48 sps:$4 sm:$0xff]  }
 0x183   : > { %3115 = vmatprep.subr.bf16.mxu1 %v19160_v49  ;;  %v19169_v49 = vld [vmem:[%s21652_s0 + $0x194] ss:$48 sps:$4 sm:$0xff]  }
 0x184   : > { %3010 = vmatpush1.bf16.msra.mxu0 %v19053_v17  ;;  %v19139_v17 = vld [vmem:[%s21652_s0 + $0xba4] ss:$48 sps:$4 sm:$0xff]  }
 0x185   : > { %3011 = vmatprep.subr.bf16.mxu0 %v19061_v19  ;;  %v628_v19 = vld [vmem:[#allocation2 + $0x10] sm:$0xff] }
 0x186   : > { %3116 = vmatpush1.bf16.msra.mxu1 %v19158_v52  ;;  %v19167_v52 = vld [vmem:[%s21652_s0 + $0x190] ss:$48 sps:$4 sm:$0xff]  }
 0x187   : > { %2997 = vmatmul.mubr.bf16.gmra.mrb[4].mxu0 %v21805_v27  ;;  %3117 = vmatprep.subr.bf16.mxu1 %v19166_v53  ;;  %v19175_v53 = vld [vmem:[%s21652_s0 + $0x1f4] ss:$48 sps:$4 sm:$0xff]  }
 0x188   : > { %3012 = vmatpush1.bf16.msra.mxu0 %v19059_v28  ;;  %3039 = vmatprep.mubr.bf16.mxu0 %v21808_v29  ;;  %v21870_v28 = vpack.c.bf16 %v632_v21, %v628_v19  ;;  %v19217_v19 = vld [vmem:[%s21652_s0 + $0x494] ss:$48 sps:$4 sm:$0xff]   ;;  %v19286_v21 = vld [vmem:[%s21652_s0 + $0x25c] ss:$48 sps:$4 sm:$0xff]  }
 0x189   : > { %3013 = vmatprep.subr.bf16.mxu0 %v19067_v30  ;;  %3103 = vmatmul.mubr.bf16.gmra.mrb[4].mxu1 %v21805_v27  ;;  %v19214_v30 = vld [vmem:[%s21652_s0 + $0x9cc] ss:$48 sps:$4 sm:$0xff]  }
 0x18a   : > { %3118 = vmatpush1.bf16.msra.mxu1 %v19164_v56  ;;  %3145 = vmatprep.mubr.bf16.mxu1 %v21808_v29  ;;  %v19173_v56 = vld [vmem:[%s21652_s0 + $0x1f0] ss:$48 sps:$4 sm:$0xff]  }
 0x18b   : > { %3119 = vmatprep.subr.bf16.mxu1 %v19172_v57  ;;  %v19181_v57 = vld [vmem:[%s21652_s0 + $0x254] ss:$48 sps:$4 sm:$0xff]  }
 0x18c   : > { %3014 = vmatpush1.bf16.msra.mxu0 %v19065_v34  ;;  %v19151_v34 = vld [vmem:[%s21652_s0 + $0x74] ss:$48 sps:$4 sm:$0xff]  }
 0x18d   : > { %3015 = vmatprep.subr.bf16.mxu0 %v19073_v35  ;;  %v19212_v35 = vld [vmem:[%s21652_s0 + $0x9c8] ss:$48 sps:$4 sm:$0xff]  }
 0x18e   : > { %3120 = vmatpush1.bf16.msra.mxu1 %v19170_v60  ;;  %v19179_v60 = vld [vmem:[%s21652_s0 + $0x250] ss:$48 sps:$4 sm:$0xff]  }
 0x18f   : > { %3121 = vmatprep.subr.bf16.mxu1 %v19178_v61  ;;  %v19187_v61 = vld [vmem:[%s21652_s0 + $0x2b4] ss:$48 sps:$4 sm:$0xff]  }
 0x190   : > { %3016 = vmatpush1.bf16.msra.mxu0 %v19071_v38  ;;  %v636_v38 = vld [vmem:[#allocation2 + $0x50] sm:$0xff] }
 0x191   : > { %3017 = vmatprep.subr.bf16.mxu0 %v19079_v39  ;;  %v640_v39 = vld [vmem:[#allocation2 + $0x70] sm:$0xff] }
 0x192   : > { %3122 = vmatpush1.bf16.msra.mxu1 %v19176_v0  ;;  %v19185_v0 = vld [vmem:[%s21652_s0 + $0x2b0] ss:$48 sps:$4 sm:$0xff]  }
 0x193   : > { %3123 = vmatprep.subr.bf16.mxu1 %v19184_v1  ;;  %v19193_v1 = vld [vmem:[%s21652_s0 + $0x314] ss:$48 sps:$4 sm:$0xff]  }
 0x194   : > { %3018 = vmatpush1.bf16.msra.mxu0 %v19077_v42  ;;  %v21884_v42 = vpack.c.bf16 %v640_v39, %v636_v38  ;;  %v19304_v38 = vld [vmem:[%s21652_s0 + $0x37c] ss:$48 sps:$4 sm:$0xff]   ;;  %v19233_v39 = vld [vmem:[%s21652_s0 + $0x5b0] ss:$48 sps:$4 sm:$0xff]  }
 0x195   : > { %3019 = vmatprep.subr.bf16.mxu0 %v19085_v43  ;;  %v19226_v43 = vld [vmem:[%s21652_s0 + $0xa8c] ss:$48 sps:$4 sm:$0xff]  }
 0x196   : > { %3124 = vmatpush1.bf16.msra.mxu1 %v19182_v4  ;;  %v19191_v4 = vld [vmem:[%s21652_s0 + $0x310] ss:$48 sps:$4 sm:$0xff]  }
 0x197   : > { %3125 = vmatprep.subr.bf16.mxu1 %v19190_v5  ;;  %v19199_v5 = vld [vmem:[%s21652_s0 + $0x374] ss:$48 sps:$4 sm:$0xff]  }
 0x198   : > { %3020 = vmatpush1.bf16.msra.mxu0 %v19083_v46  ;;  %v19224_v46 = vld [vmem:[%s21652_s0 + $0xa88] ss:$48 sps:$4 sm:$0xff]  }
 0x199   : > { %3021 = vmatprep.subr.bf16.mxu0 %v19091_v47  ;;  %v19232_v47 = vld [vmem:[%s21652_s0 + $0xaec] ss:$48 sps:$4 sm:$0xff]  }
 0x19a   : > { %3126 = vmatpush1.bf16.msra.mxu1 %v19188_v8  ;;  %v19197_v8 = vld [vmem:[%s21652_s0 + $0x370] ss:$48 sps:$4 sm:$0xff]  }
 0x19b   : > { %3127 = vmatprep.subr.bf16.mxu1 %v19196_v9  ;;  %v19205_v9 = vld [vmem:[%s21652_s0 + $0x3d4] ss:$48 sps:$4 sm:$0xff]  }
 0x19c   : > { %3022 = vmatpush1.bf16.msra.mxu0 %v19089_v50  ;;  %v19230_v50 = vld [vmem:[%s21652_s0 + $0xae8] ss:$48 sps:$4 sm:$0xff]  }
 0x19d   : > { %3023 = vmatprep.subr.bf16.mxu0 %v19097_v51  ;;  %v19238_v51 = vld [vmem:[%s21652_s0 + $0xb4c] ss:$48 sps:$4 sm:$0xff]  }
 0x19e   : > { %3128 = vmatpush1.bf16.msra.mxu1 %v19194_v13  ;;  %v19203_v13 = vld [vmem:[%s21652_s0 + $0x3d0] ss:$48 sps:$4 sm:$0xff]  }
 0x19f   : > { %3129 = vmatprep.subr.bf16.mxu1 %v19202_v14  ;;  %v19211_v14 = vld [vmem:[%s21652_s0 + $0x434] ss:$48 sps:$4 sm:$0xff]  }
 0x1a0   : > { %3024 = vmatpush1.bf16.msra.mxu0 %v19095_v54  ;;  %v19236_v54 = vld [vmem:[%s21652_s0 + $0xb48] ss:$48 sps:$4 sm:$0xff]  }
 0x1a1   : > { %3025 = vmatprep.subr.bf16.mxu0 %v19103_v55  ;;  %v19244_v55 = vld [vmem:[%s21652_s0 + $0xbac] ss:$48 sps:$4 sm:$0xff]  }
 0x1a2   : > { %3130 = vmatpush1.bf16.msra.mxu1 %v19200_v20  ;;  %v19278_v20 = vld [vmem:[%s21652_s0 + $0x1f8] ss:$48 sps:$4 sm:$0xff]  }
 0x1a3   : > { %3131 = vmatprep.subr.bf16.mxu1 %v19208_v22  ;;  %v19215_v22 = vld [vmem:[%s21652_s0 + $0x490] ss:$48 sps:$4 sm:$0xff]  }
 0x1a4   : > { %3026 = vmatpush1.bf16.msra.mxu0 %v19101_v58  ;;  %v19242_v58 = vld [vmem:[%s21652_s0 + $0xba8] ss:$48 sps:$4 sm:$0xff]  }
 0x1a5   : > { %3027 = vmatprep.subr.bf16.mxu0 %v19109_v59  ;;  %v19250_v59 = vld [vmem:[%s21652_s0 + $0x1c] ss:$48 sps:$4 sm:$0xff]  }
 0x1a6   : > { %3132 = vmatpush1.bf16.msra.mxu1 %v19206_v26  ;;  %v19221_v26 = vld [vmem:[%s21652_s0 + $0x4f0] ss:$48 sps:$4 sm:$0xff]  }
 0x1a7   : > { %3133 = vmatprep.subr.bf16.mxu1 %v19214_v30  ;;  %v19229_v30 = vld [vmem:[%s21652_s0 + $0x554] ss:$48 sps:$4 sm:$0xff]  }
 0x1a8   : > { %3028 = vmatpush1.bf16.msra.mxu0 %v19107_v62  ;;  %v19248_v62 = vld [vmem:[%s21652_s0 + $0x18] ss:$48 sps:$4 sm:$0xff]  }
 0x1a9   : > { %3029 = vmatprep.subr.bf16.mxu0 %v19115_v63  ;;  %v19256_v63 = vld [vmem:[%s21652_s0 + $0x7c] ss:$48 sps:$4 sm:$0xff]  }
 0x1aa   : > { %3134 = vmatpush1.bf16.msra.mxu1 %v19212_v35  ;;  %v19227_v35 = vld [vmem:[%s21652_s0 + $0x550] ss:$48 sps:$4 sm:$0xff]  }
 0x1ab   : > { %3135 = vmatprep.subr.bf16.mxu1 %v19220_v37  ;;  %v19296_v37 = vld [vmem:[%s21652_s0 + $0x318] ss:$48 sps:$4 sm:$0xff]  }
 0x1ac   : > { %3030 = vmatpush1.bf16.msra.mxu0 %v19113_v2  ;;  %v19254_v2 = vld [vmem:[%s21652_s0 + $0x78] ss:$48 sps:$4 sm:$0xff]  }
 0x1ad   : > { %3031 = vmatprep.subr.bf16.mxu0 %v19121_v3  ;;  %v19262_v3 = vld [vmem:[%s21652_s0 + $0xdc] ss:$48 sps:$4 sm:$0xff]  }
 0x1ae   : > { %3136 = vmatpush1.bf16.msra.mxu1 %v19218_v41  ;;  %v19302_v41 = vld [vmem:[%s21652_s0 + $0x378] ss:$48 sps:$4 sm:$0xff]  }
 0x1af   : > { %3137 = vmatprep.subr.bf16.mxu1 %v19226_v43  ;;  %v19310_v43 = vld [vmem:[%s21652_s0 + $0x3dc] ss:$48 sps:$4 sm:$0xff]  }
 0x1b0   : > { %3032 = vmatpush1.bf16.msra.mxu0 %v19119_v6  ;;  %v19260_v6 = vld [vmem:[%s21652_s0 + $0xd8] ss:$48 sps:$4 sm:$0xff]  }
 0x1b1   : > { %3033 = vmatprep.subr.bf16.mxu0 %v19127_v7  ;;  %v19268_v7 = vld [vmem:[%s21652_s0 + $0x13c] ss:$48 sps:$4 sm:$0xff]  }
 0x1b2   : > { %3138 = vmatpush1.bf16.msra.mxu1 %v19224_v46  ;;  %v19308_v46 = vld [vmem:[%s21652_s0 + $0x3d8] ss:$48 sps:$4 sm:$0xff]  }
 0x1b3   : > { %3139 = vmatprep.subr.bf16.mxu1 %v19232_v47  ;;  %v19316_v47 = vld [vmem:[%s21652_s0 + $0x43c] ss:$48 sps:$4 sm:$0xff]  }
 0x1b4   : > { %3034 = vmatpush1.bf16.msra.mxu0 %v19125_v10  ;;  %v19266_v10 = vld [vmem:[%s21652_s0 + $0x138] ss:$48 sps:$4 sm:$0xff]  }
 0x1b5   : > { %3035 = vmatprep.subr.bf16.mxu0 %v19133_v11  ;;  %v19274_v11 = vld [vmem:[%s21652_s0 + $0x19c] ss:$48 sps:$4 sm:$0xff]  }
 0x1b6   : > { %3140 = vmatpush1.bf16.msra.mxu1 %v19230_v50  ;;  %v19314_v50 = vld [vmem:[%s21652_s0 + $0x438] ss:$48 sps:$4 sm:$0xff]  }
 0x1b7   : > { %3141 = vmatprep.subr.bf16.mxu1 %v19238_v51  ;;  %v19322_v51 = vld [vmem:[%s21652_s0 + $0x49c] ss:$48 sps:$4 sm:$0xff]  }
 0x1b8   : > { %3036 = vmatpush1.bf16.msra.mxu0 %v19131_v16  ;;  %v19272_v16 = vld [vmem:[%s21652_s0 + $0x198] ss:$48 sps:$4 sm:$0xff]  }
 0x1b9   : > { %3037 = vmatprep.subr.bf16.mxu0 %v19139_v17  ;;  %v19280_v17 = vld [vmem:[%s21652_s0 + $0x1fc] ss:$48 sps:$4 sm:$0xff]  }
 0x1ba   : > { %3142 = vmatpush1.bf16.msra.mxu1 %v19236_v54  ;;  %v19320_v54 = vld [vmem:[%s21652_s0 + $0x498] ss:$48 sps:$4 sm:$0xff]  }
 0x1bb   : > { %3143 = vmatprep.subr.bf16.mxu1 %v19244_v55  ;;  %v19257_v55 = vld [vmem:[%s21652_s0 + $0x730] ss:$48 sps:$4 sm:$0xff]  }
 0x1bc   : > { %3038 = vmatpush1.bf16.msra.mxu0 %v19137_v18  ;;  %v19209_v18 = vld [vmem:[%s21652_s0 + $0x430] ss:$48 sps:$4 sm:$0xff]  }
 0x1bd   : > { %3166 = vmatprep.subr.bf16.mxu0 %v19145_v23  ;;  %v19223_v23 = vld [vmem:[%s21652_s0 + $0x4f4] ss:$48 sps:$4 sm:$0xff]  }
 0x1be   : > { %3144 = vmatpush1.bf16.msra.mxu1 %v19242_v58  ;;  %v19326_v58 = vld [vmem:[%s21652_s0 + $0x4f8] ss:$48 sps:$4 sm:$0xff]  }
 0x1bf   : > { %3040 = vmatmul.mubr.bf16.vlgmr.msra.gmra.mrb[0].mxu0 %v21870_v28  ;;  %3272 = vmatprep.subr.bf16.mxu1 %v19250_v59  ;;  %v19334_v59 = vld [vmem:[%s21652_s0 + $0x55c] ss:$48 sps:$4 sm:$0xff]  }
 0x1c0   : > { %3167 = vmatpush1.bf16.msra.mxu0 %v19143_v32  ;;  %3049 = vmatprep.mubr.bf16.mxu0 %v21874_v33  ;;  %v19290_v32 = vld [vmem:[%s21652_s0 + $0x2b8] ss:$48 sps:$4 sm:$0xff]  }
 0x1c1   : > { %3168 = vmatprep.subr.bf16.mxu0 %v19151_v34  ;;  %3146 = vmatmul.mubr.bf16.vlgmr.msra.gmra.mrb[0].mxu1 %v21870_v28  ;;  %v19298_v34 = vld [vmem:[%s21652_s0 + $0x31c] ss:$48 sps:$4 sm:$0xff]  }
 0x1c2   : > { %3273 = vmatpush1.bf16.msra.mxu1 %v19248_v62  ;;  %3155 = vmatprep.mubr.bf16.mxu1 %v21874_v33  ;;  %v19332_v62 = vld [vmem:[%s21652_s0 + $0x558] ss:$48 sps:$4 sm:$0xff]  }
 0x1c3   : > { %3274 = vmatprep.subr.bf16.mxu1 %v19256_v63  ;;  %v19337_v63 = vld [vmem:[%s21652_s0 + $0x5bc] ss:$48 sps:$4 sm:$0xff]  }
 0x1c4   : > { %3169 = vmatpush1.bf16.msra.mxu0 %v19149_v36  ;;  %v19235_v36 = vld [vmem:[%s21652_s0 + $0x5b4] ss:$48 sps:$4 sm:$0xff]  }
 0x1c5   : > { %3170 = vmatprep.subr.bf16.mxu0 %v19157_v40  ;;  %v19241_v40 = vld [vmem:[%s21652_s0 + $0x614] ss:$48 sps:$4 sm:$0xff]  }
 0x1c6   : > { %3275 = vmatpush1.bf16.msra.mxu1 %v19254_v2  ;;  %v19335_v2 = vld [vmem:[%s21652_s0 + $0x5b8] ss:$48 sps:$4 sm:$0xff]  }
 0x1c7   : > { %3050 = vmatmul.mubr.bf16.gmra.mrb[4].mxu0 %v21884_v42  ;;  %3276 = vmatprep.subr.bf16.mxu1 %v19262_v3  ;;  %v19340_v3 = vld [vmem:[%s21652_s0 + $0x61c] ss:$48 sps:$4 sm:$0xff]  }
 0x1c8   : > { %3171 = vmatpush1.bf16.msra.mxu0 %v19155_v44  ;;  %3198 = vmatprep.mubr.bf16.mxu0 %v21746_v31  ;;  %v19239_v44 = vld [vmem:[%s21652_s0 + $0x610] ss:$48 sps:$4 sm:$0xff]  }
 0x1c9   : > { %3172 = vmatprep.subr.bf16.mxu0 %v19163_v45  ;;  %3156 = vmatmul.mubr.bf16.gmra.mrb[4].mxu1 %v21884_v42  ;;  %v19247_v45 = vld [vmem:[%s21652_s0 + $0x674] ss:$48 sps:$4 sm:$0xff]  }
 0x1ca   : > { %3277 = vmatpush1.bf16.msra.mxu1 %v19260_v6  ;;  %3304 = vmatprep.mubr.bf16.mxu1 %v21746_v31  ;;  %v19338_v6 = vld [vmem:[%s21652_s0 + $0x618] ss:$48 sps:$4 sm:$0xff]  }
 0x1cb   : > { %3278 = vmatprep.subr.bf16.mxu1 %v19268_v7  ;;  %v19343_v7 = vld [vmem:[%s21652_s0 + $0x67c] ss:$48 sps:$4 sm:$0xff]  }
 0x1cc   : > { %3173 = vmatpush1.bf16.msra.mxu0 %v19161_v48  ;;  %v19245_v48 = vld [vmem:[%s21652_s0 + $0x670] ss:$48 sps:$4 sm:$0xff]  }
 0x1cd   : > { %3174 = vmatprep.subr.bf16.mxu0 %v19169_v49  ;;  %v19253_v49 = vld [vmem:[%s21652_s0 + $0x6d4] ss:$48 sps:$4 sm:$0xff]  }
 0x1ce   : > { %3279 = vmatpush1.bf16.msra.mxu1 %v19266_v10  ;;  %v19341_v10 = vld [vmem:[%s21652_s0 + $0x678] ss:$48 sps:$4 sm:$0xff]  }
 0x1cf   : > { %3280 = vmatprep.subr.bf16.mxu1 %v19274_v11  ;;  %v19346_v11 = vld [vmem:[%s21652_s0 + $0x6dc] ss:$48 sps:$4 sm:$0xff]  }
 0x1d0   : > { %3175 = vmatpush1.bf16.msra.mxu0 %v19167_v52  ;;  %v19251_v52 = vld [vmem:[%s21652_s0 + $0x6d0] ss:$48 sps:$4 sm:$0xff]  }
 0x1d1   : > { %3176 = vmatprep.subr.bf16.mxu0 %v19175_v53  ;;  %v19259_v53 = vld [vmem:[%s21652_s0 + $0x734] ss:$48 sps:$4 sm:$0xff]  }
 0x1d2   : > { %3281 = vmatpush1.bf16.msra.mxu1 %v19272_v16  ;;  %v19344_v16 = vld [vmem:[%s21652_s0 + $0x6d8] ss:$48 sps:$4 sm:$0xff]  }
 0x1d3   : > { %3282 = vmatprep.subr.bf16.mxu1 %v19280_v17  ;;  %v19352_v17 = vld [vmem:[%s21652_s0 + $0x73c] ss:$48 sps:$4 sm:$0xff]  }
 0x1d4   : > { %3177 = vmatpush1.bf16.msra.mxu0 %v19173_v56  ;;  %v19328_v56 = vld [vmem:[%s21652_s0 + $0x4fc] ss:$48 sps:$4 sm:$0xff]  }
 0x1d5   : > { %3178 = vmatprep.subr.bf16.mxu0 %v19181_v57  ;;  %v19265_v57 = vld [vmem:[%s21652_s0 + $0x794] ss:$48 sps:$4 sm:$0xff]  }
 0x1d6   : > { %3283 = vmatpush1.bf16.msra.mxu1 %v19278_v20  ;;  %v19350_v20 = vld [vmem:[%s21652_s0 + $0x738] ss:$48 sps:$4 sm:$0xff]  }
 0x1d7   : > { %3284 = vmatprep.subr.bf16.mxu1 %v19286_v21  ;;  %v19358_v21 = vld [vmem:[%s21652_s0 + $0x79c] ss:$48 sps:$4 sm:$0xff]  }
 0x1d8   : > { %3179 = vmatpush1.bf16.msra.mxu0 %v19179_v60  ;;  %v19263_v60 = vld [vmem:[%s21652_s0 + $0x790] ss:$48 sps:$4 sm:$0xff]  }
 0x1d9   : > { %3180 = vmatprep.subr.bf16.mxu0 %v19187_v61  ;;  %v19271_v61 = vld [vmem:[%s21652_s0 + $0x7f4] ss:$48 sps:$4 sm:$0xff]  }
 0x1da   : > { %3285 = vmatpush1.bf16.msra.mxu1 %v19284_v24  ;;  %v19356_v24 = vld [vmem:[%s21652_s0 + $0x798] ss:$48 sps:$4 sm:$0xff]  }
 0x1db   : > { %3286 = vmatprep.subr.bf16.mxu1 %v19292_v25  ;;  %v19364_v25 = vld [vmem:[%s21652_s0 + $0x7fc] ss:$48 sps:$4 sm:$0xff]  }
 0x1dc   : > { %3181 = vmatpush1.bf16.msra.mxu0 %v19185_v0  ;;  %v19269_v0 = vld [vmem:[%s21652_s0 + $0x7f0] ss:$48 sps:$4 sm:$0xff]  }
 0x1dd   : > { %3182 = vmatprep.subr.bf16.mxu0 %v19193_v1  ;;  %v19277_v1 = vld [vmem:[%s21652_s0 + $0x854] ss:$48 sps:$4 sm:$0xff]  }
 0x1de   : > { %3287 = vmatpush1.bf16.msra.mxu1 %v19290_v32  ;;  %v19362_v32 = vld [vmem:[%s21652_s0 + $0x7f8] ss:$48 sps:$4 sm:$0xff]  }
 0x1df   : > { %3288 = vmatprep.subr.bf16.mxu1 %v19298_v34  ;;  %v19370_v34 = vld [vmem:[%s21652_s0 + $0x85c] ss:$48 sps:$4 sm:$0xff]  }
 0x1e0   : > { %3183 = vmatpush1.bf16.msra.mxu0 %v19191_v4  ;;  %v19275_v4 = vld [vmem:[%s21652_s0 + $0x850] ss:$48 sps:$4 sm:$0xff]  }
 0x1e1   : > { %3184 = vmatprep.subr.bf16.mxu0 %v19199_v5  ;;  %v19283_v5 = vld [vmem:[%s21652_s0 + $0x8b4] ss:$48 sps:$4 sm:$0xff]  }
 0x1e2   : > { %3289 = vmatpush1.bf16.msra.mxu1 %v19296_v37  ;;  %v19368_v37 = vld [vmem:[%s21652_s0 + $0x858] ss:$48 sps:$4 sm:$0xff]  }
 0x1e3   : > { %3290 = vmatprep.subr.bf16.mxu1 %v19304_v38  ;;  %v19376_v38 = vld [vmem:[%s21652_s0 + $0x8bc] ss:$48 sps:$4 sm:$0xff]  }
 0x1e4   : > { %3185 = vmatpush1.bf16.msra.mxu0 %v19197_v8  ;;  %v19281_v8 = vld [vmem:[%s21652_s0 + $0x8b0] ss:$48 sps:$4 sm:$0xff]  }
 0x1e5   : > { %3186 = vmatprep.subr.bf16.mxu0 %v19205_v9  ;;  %v19289_v9 = vld [vmem:[%s21652_s0 + $0x914] ss:$48 sps:$4 sm:$0xff]  }
 0x1e6   : > { %3291 = vmatpush1.bf16.msra.mxu1 %v19302_v41  ;;  %v19374_v41 = vld [vmem:[%s21652_s0 + $0x8b8] ss:$48 sps:$4 sm:$0xff]  }
 0x1e7   : > { %3292 = vmatprep.subr.bf16.mxu1 %v19310_v43  ;;  %v19382_v43 = vld [vmem:[%s21652_s0 + $0x91c] ss:$48 sps:$4 sm:$0xff]  }
 0x1e8   : > { %3187 = vmatpush1.bf16.msra.mxu0 %v19203_v13  ;;  %v19287_v13 = vld [vmem:[%s21652_s0 + $0x910] ss:$48 sps:$4 sm:$0xff]  }
 0x1e9   : > { %3188 = vmatprep.subr.bf16.mxu0 %v19211_v14  ;;  %v19295_v14 = vld [vmem:[%s21652_s0 + $0x974] ss:$48 sps:$4 sm:$0xff]  }
 0x1ea   : > { %3293 = vmatpush1.bf16.msra.mxu1 %v19308_v46  ;;  %v19380_v46 = vld [vmem:[%s21652_s0 + $0x918] ss:$48 sps:$4 sm:$0xff]  }
 0x1eb   : > { %3294 = vmatprep.subr.bf16.mxu1 %v19316_v47  ;;  %v19388_v47 = vld [vmem:[%s21652_s0 + $0x97c] ss:$48 sps:$4 sm:$0xff]  }
 0x1ec   : > { %3189 = vmatpush1.bf16.msra.mxu0 %v19209_v18  ;;  %v19293_v18 = vld [vmem:[%s21652_s0 + $0x970] ss:$48 sps:$4 sm:$0xff]  }
 0x1ed   : > { %3190 = vmatprep.subr.bf16.mxu0 %v19217_v19  ;;  %v19301_v19 = vld [vmem:[%s21652_s0 + $0x9d4] ss:$48 sps:$4 sm:$0xff]  }
 0x1ee   : > { %3295 = vmatpush1.bf16.msra.mxu1 %v19314_v50  ;;  %v19386_v50 = vld [vmem:[%s21652_s0 + $0x978] ss:$48 sps:$4 sm:$0xff]  }
 0x1ef   : > { %3296 = vmatprep.subr.bf16.mxu1 %v19322_v51  ;;  %v19394_v51 = vld [vmem:[%s21652_s0 + $0x9dc] ss:$48 sps:$4 sm:$0xff]  }
 0x1f0   : > { %3191 = vmatpush1.bf16.msra.mxu0 %v19215_v22  ;;  %v19299_v22 = vld [vmem:[%s21652_s0 + $0x9d0] ss:$48 sps:$4 sm:$0xff]  }
 0x1f1   : > { %3192 = vmatprep.subr.bf16.mxu0 %v19223_v23  ;;  %v19307_v23 = vld [vmem:[%s21652_s0 + $0xa34] ss:$48 sps:$4 sm:$0xff]  }
 0x1f2   : > { %3297 = vmatpush1.bf16.msra.mxu1 %v19320_v54  ;;  %v19392_v54 = vld [vmem:[%s21652_s0 + $0x9d8] ss:$48 sps:$4 sm:$0xff]  }
 0x1f3   : > { %3298 = vmatprep.subr.bf16.mxu1 %v19328_v56  ;;  %v19353_v56 = vld [vmem:[%s21652_s0 + $0x80] ss:$48 sps:$4 sm:$0xff]  }
 0x1f4   : > { %3193 = vmatpush1.bf16.msra.mxu0 %v19221_v26  ;;  %v19305_v26 = vld [vmem:[%s21652_s0 + $0xa30] ss:$48 sps:$4 sm:$0xff]  }
 0x1f5   : > { %3194 = vmatprep.subr.bf16.mxu0 %v19229_v30  ;;  %v19313_v30 = vld [vmem:[%s21652_s0 + $0xa94] ss:$48 sps:$4 sm:$0xff]  }
 0x1f6   : > { %3299 = vmatpush1.bf16.msra.mxu1 %v19326_v58  ;;  %v19398_v58 = vld [vmem:[%s21652_s0 + $0xa38] ss:$48 sps:$4 sm:$0xff]  }
 0x1f7   : > { %3300 = vmatprep.subr.bf16.mxu1 %v19334_v59  ;;  %v19406_v59 = vld [vmem:[%s21652_s0 + $0xa9c] ss:$48 sps:$4 sm:$0xff]  }
 0x1f8   : > { %3195 = vmatpush1.bf16.msra.mxu0 %v19227_v35  ;;  %v19311_v35 = vld [vmem:[%s21652_s0 + $0xa90] ss:$48 sps:$4 sm:$0xff]  }
 0x1f9   : > { %3196 = vmatprep.subr.bf16.mxu0 %v19235_v36  ;;  %v19319_v36 = vld [vmem:[%s21652_s0 + $0xaf4] ss:$48 sps:$4 sm:$0xff]  }
 0x1fa   : > { %3301 = vmatpush1.bf16.msra.mxu1 %v19332_v62  ;;  %v19365_v62 = vld [vmem:[%s21652_s0 + $0x140] ss:$48 sps:$4 sm:$0xff]  }
 0x1fb   : > { %3302 = vmatprep.subr.bf16.mxu1 %v19337_v63  ;;  %v19404_v63 = vld [vmem:[%s21652_s0 + $0xa98] ss:$48 sps:$4 sm:$0xff]  }
 0x1fc   : > { %3197 = vmatpush1.bf16.msra.mxu0 %v19233_v39  ;;  %v19317_v39 = vld [vmem:[%s21652_s0 + $0xaf0] ss:$48 sps:$4 sm:$0xff]  }
 0x1fd   : > { %3219 = vmatprep.subr.bf16.mxu0 %v19241_v40  ;;  %v19325_v40 = vld [vmem:[%s21652_s0 + $0xb54] ss:$48 sps:$4 sm:$0xff]  }
 0x1fe   : > { %3303 = vmatpush1.bf16.msra.mxu1 %v19335_v2  ;;  %v19371_v2 = vld [vmem:[%s21652_s0 + $0x1a0] ss:$48 sps:$4 sm:$0xff]  }
 0x1ff   : > { %3199 = vmatmul.mubr.bf16.vlgmr.msra.gmra.mrb[8].mxu0 %v21790_v12  ;;  %3325 = vmatprep.subr.bf16.mxu1 %v19340_v3  ;;  %v19410_v3 = vld [vmem:[%s21652_s0 + $0xaf8] ss:$48 sps:$4 sm:$0xff]  }
 0x200   : > { %3220 = vmatpush1.bf16.msra.mxu0 %v19239_v44  ;;  %3208 = vmatprep.mubr.bf16.mxu0 %v21794_v15  ;;  %v19323_v44 = vld [vmem:[%s21652_s0 + $0xb50] ss:$48 sps:$4 sm:$0xff]  }
 0x201   : > { %3221 = vmatprep.subr.bf16.mxu0 %v19247_v45  ;;  %3305 = vmatmul.mubr.bf16.vlgmr.msra.gmra.mrb[8].mxu1 %v21790_v12  ;;  %v19331_v45 = vld [vmem:[%s21652_s0 + $0xbb4] ss:$48 sps:$4 sm:$0xff]  }
 0x202   : > { %3326 = vmatpush1.bf16.msra.mxu1 %v19338_v6  ;;  %3314 = vmatprep.mubr.bf16.mxu1 %v21794_v15  ;;  %v19377_v6 = vld [vmem:[%s21652_s0 + $0x200] ss:$48 sps:$4 sm:$0xff]  }
 0x203   : > { %3327 = vmatprep.subr.bf16.mxu1 %v19343_v7  ;;  %v19416_v7 = vld [vmem:[%s21652_s0 + $0xb58] ss:$48 sps:$4 sm:$0xff]  }
 0x204   : > { %3222 = vmatpush1.bf16.msra.mxu0 %v19245_v48  ;;  %v19329_v48 = vld [vmem:[%s21652_s0 + $0xbb0] ss:$48 sps:$4 sm:$0xff]  }
 0x205   : > { %3223 = vmatprep.subr.bf16.mxu0 %v19253_v49  ;;  %v19349_v49 = vld [vmem:[%s21652_s0 + $0x24] ss:$48 sps:$4 sm:$0xff]  }
 0x206   : > { %3328 = vmatpush1.bf16.msra.mxu1 %v19341_v10  ;;  %v19383_v10 = vld [vmem:[%s21652_s0 + $0x260] ss:$48 sps:$4 sm:$0xff]  }
 0x207   : > { %3209 = vmatmul.mubr.bf16.gmra.mrb[12].mxu0 %v21805_v27  ;;  %3329 = vmatprep.subr.bf16.mxu1 %v19346_v11  ;;  %v19422_v11 = vld [vmem:[%s21652_s0 + $0xbb8] ss:$48 sps:$4 sm:$0xff]  }
 0x208   : > { %3224 = vmatpush1.bf16.msra.mxu0 %v19251_v52  ;;  %3251 = vmatprep.mubr.bf16.mxu0 %v21808_v29  ;;  %v19347_v52 = vld [vmem:[%s21652_s0 + $0x20] ss:$48 sps:$4 sm:$0xff]  }
 0x209   : > { %3225 = vmatprep.subr.bf16.mxu0 %v19259_v53  ;;  %3315 = vmatmul.mubr.bf16.gmra.mrb[12].mxu1 %v21805_v27  ;;  %v19355_v53 = vld [vmem:[%s21652_s0 + $0x84] ss:$48 sps:$4 sm:$0xff]  }
 0x20a   : > { %3330 = vmatpush1.bf16.msra.mxu1 %v19344_v16  ;;  %3357 = vmatprep.mubr.bf16.mxu1 %v21808_v29  ;;  %v19428_v16 = vld [vmem:[%s21652_s0 + $0x28] ss:$48 sps:$4 sm:$0xff]  }
 0x20b   : > { %3331 = vmatprep.subr.bf16.mxu1 %v19352_v17  ;;  %v19436_v17 = vld [vmem:[%s21652_s0 + $0x8c] ss:$48 sps:$4 sm:$0xff]  }
 0x20c   : > { %3226 = vmatpush1.bf16.msra.mxu0 %v19257_v55  ;;  %v19400_v55 = vld [vmem:[%s21652_s0 + $0xa3c] ss:$48 sps:$4 sm:$0xff]  }
 0x20d   : > { %3227 = vmatprep.subr.bf16.mxu0 %v19265_v57  ;;  %v19361_v57 = vld [vmem:[%s21652_s0 + $0xe4] ss:$48 sps:$4 sm:$0xff]  }
 0x20e   : > { %3332 = vmatpush1.bf16.msra.mxu1 %v19350_v20  ;;  %v19434_v20 = vld [vmem:[%s21652_s0 + $0x88] ss:$48 sps:$4 sm:$0xff]  }
 0x20f   : > { %3333 = vmatprep.subr.bf16.mxu1 %v19358_v21  ;;  %v19442_v21 = vld [vmem:[%s21652_s0 + $0xec] ss:$48 sps:$4 sm:$0xff]  }
 0x210   : > { %3228 = vmatpush1.bf16.msra.mxu0 %v19263_v60  ;;  %v19359_v60 = vld [vmem:[%s21652_s0 + $0xe0] ss:$48 sps:$4 sm:$0xff]  }
 0x211   : > { %3229 = vmatprep.subr.bf16.mxu0 %v19271_v61  ;;  %v19367_v61 = vld [vmem:[%s21652_s0 + $0x144] ss:$48 sps:$4 sm:$0xff]  }
 0x212   : > { %3334 = vmatpush1.bf16.msra.mxu1 %v19356_v24  ;;  %v19440_v24 = vld [vmem:[%s21652_s0 + $0xe8] ss:$48 sps:$4 sm:$0xff]  }
 0x213   : > { %3335 = vmatprep.subr.bf16.mxu1 %v19364_v25  ;;  %v19448_v25 = vld [vmem:[%s21652_s0 + $0x14c] ss:$48 sps:$4 sm:$0xff]  }
 0x214   : > { %3230 = vmatpush1.bf16.msra.mxu0 %v19269_v0  ;;  %v19412_v0 = vld [vmem:[%s21652_s0 + $0xafc] ss:$48 sps:$4 sm:$0xff]  }
 0x215   : > { %3231 = vmatprep.subr.bf16.mxu0 %v19277_v1  ;;  %v19373_v1 = vld [vmem:[%s21652_s0 + $0x1a4] ss:$48 sps:$4 sm:$0xff]  }
 0x216   : > { %3336 = vmatpush1.bf16.msra.mxu1 %v19362_v32  ;;  %v19446_v32 = vld [vmem:[%s21652_s0 + $0x148] ss:$48 sps:$4 sm:$0xff]  }
 0x217   : > { %3337 = vmatprep.subr.bf16.mxu1 %v19370_v34  ;;  %v19454_v34 = vld [vmem:[%s21652_s0 + $0x1ac] ss:$48 sps:$4 sm:$0xff]  }
 0x218   : > { %3232 = vmatpush1.bf16.msra.mxu0 %v19275_v4  ;;  %v19418_v4 = vld [vmem:[%s21652_s0 + $0xb5c] ss:$48 sps:$4 sm:$0xff]  }
 0x219   : > { %3233 = vmatprep.subr.bf16.mxu0 %v19283_v5  ;;  %v19379_v5 = vld [vmem:[%s21652_s0 + $0x204] ss:$48 sps:$4 sm:$0xff]  }
 0x21a   : > { %3338 = vmatpush1.bf16.msra.mxu1 %v19368_v37  ;;  %v19452_v37 = vld [vmem:[%s21652_s0 + $0x1a8] ss:$48 sps:$4 sm:$0xff]  }
 0x21b   : > { %3339 = vmatprep.subr.bf16.mxu1 %v19376_v38  ;;  %v19460_v38 = vld [vmem:[%s21652_s0 + $0x20c] ss:$48 sps:$4 sm:$0xff]  }
 0x21c   : > { %3234 = vmatpush1.bf16.msra.mxu0 %v19281_v8  ;;  %v19424_v8 = vld [vmem:[%s21652_s0 + $0xbbc] ss:$48 sps:$4 sm:$0xff]  }
 0x21d   : > { %3235 = vmatprep.subr.bf16.mxu0 %v19289_v9  ;;  %v19385_v9 = vld [vmem:[%s21652_s0 + $0x264] ss:$48 sps:$4 sm:$0xff]  }
 0x21e   : > { %3340 = vmatpush1.bf16.msra.mxu1 %v19374_v41  ;;  %v19458_v41 = vld [vmem:[%s21652_s0 + $0x208] ss:$48 sps:$4 sm:$0xff]  }
 0x21f   : > { %3341 = vmatprep.subr.bf16.mxu1 %v19382_v43  ;;  %v19419_v43 = vld [vmem:[%s21652_s0 + $0x4a0] ss:$48 sps:$4 sm:$0xff]  }
 0x220   : > { %3236 = vmatpush1.bf16.msra.mxu0 %v19287_v13  ;;  %v19430_v13 = vld [vmem:[%s21652_s0 + $0x2c] ss:$48 sps:$4 sm:$0xff]  }
 0x221   : > { %3237 = vmatprep.subr.bf16.mxu0 %v19295_v14  ;;  %v19391_v14 = vld [vmem:[%s21652_s0 + $0x2c4] ss:$48 sps:$4 sm:$0xff]  }
 0x222   : > { %3342 = vmatpush1.bf16.msra.mxu1 %v19380_v46  ;;  %v19472_v46 = vld [vmem:[%s21652_s0 + $0x2cc] ss:$48 sps:$4 sm:$0xff]  }
 0x223   : > { %3343 = vmatprep.subr.bf16.mxu1 %v19388_v47  ;;  %v19425_v47 = vld [vmem:[%s21652_s0 + $0x500] ss:$48 sps:$4 sm:$0xff]  }
 0x224   : > { %3238 = vmatpush1.bf16.msra.mxu0 %v19293_v18  ;;  %v19389_v18 = vld [vmem:[%s21652_s0 + $0x2c0] ss:$48 sps:$4 sm:$0xff]  }
 0x225   : > { %3239 = vmatprep.subr.bf16.mxu0 %v19301_v19  ;;  %v19397_v19 = vld [vmem:[%s21652_s0 + $0x324] ss:$48 sps:$4 sm:$0xff]  }
 0x226   : > { %3344 = vmatpush1.bf16.msra.mxu1 %v19386_v50  ;;  %v19478_v50 = vld [vmem:[%s21652_s0 + $0x32c] ss:$48 sps:$4 sm:$0xff]  }
 0x227   : > { %3345 = vmatprep.subr.bf16.mxu1 %v19394_v51  ;;  %v19431_v51 = vld [vmem:[%s21652_s0 + $0x560] ss:$48 sps:$4 sm:$0xff]  }
 0x228   : > { %3240 = vmatpush1.bf16.msra.mxu0 %v19299_v22  ;;  %v19395_v22 = vld [vmem:[%s21652_s0 + $0x320] ss:$48 sps:$4 sm:$0xff]  }
 0x229   : > { %3241 = vmatprep.subr.bf16.mxu0 %v19307_v23  ;;  %v19403_v23 = vld [vmem:[%s21652_s0 + $0x384] ss:$48 sps:$4 sm:$0xff]  }
 0x22a   : > { %3346 = vmatpush1.bf16.msra.mxu1 %v19392_v54  ;;  %v19484_v54 = vld [vmem:[%s21652_s0 + $0x38c] ss:$48 sps:$4 sm:$0xff]  }
 0x22b   : > { %3347 = vmatprep.subr.bf16.mxu1 %v19400_v55  ;;  %v19437_v55 = vld [vmem:[%s21652_s0 + $0x5c0] ss:$48 sps:$4 sm:$0xff]  }
 0x22c   : > { %3242 = vmatpush1.bf16.msra.mxu0 %v19305_v26  ;;  %v19401_v26 = vld [vmem:[%s21652_s0 + $0x380] ss:$48 sps:$4 sm:$0xff]  }
 0x22d   : > { %3243 = vmatprep.subr.bf16.mxu0 %v19313_v30  ;;  %v19409_v30 = vld [vmem:[%s21652_s0 + $0x3e4] ss:$48 sps:$4 sm:$0xff]  }
 0x22e   : > { %3348 = vmatpush1.bf16.msra.mxu1 %v19398_v58  ;;  %v19490_v58 = vld [vmem:[%s21652_s0 + $0x3ec] ss:$48 sps:$4 sm:$0xff]  }
 0x22f   : > { %3349 = vmatprep.subr.bf16.mxu1 %v19406_v59  ;;  %v19443_v59 = vld [vmem:[%s21652_s0 + $0x620] ss:$48 sps:$4 sm:$0xff]  }
 0x230   : > { %3244 = vmatpush1.bf16.msra.mxu0 %v19311_v35  ;;  %v19407_v35 = vld [vmem:[%s21652_s0 + $0x3e0] ss:$48 sps:$4 sm:$0xff]  }
 0x231   : > { %3245 = vmatprep.subr.bf16.mxu0 %v19319_v36  ;;  %v19415_v36 = vld [vmem:[%s21652_s0 + $0x444] ss:$48 sps:$4 sm:$0xff]  }
 0x232   : > { %3350 = vmatpush1.bf16.msra.mxu1 %v19404_v63  ;;  %v19449_v63 = vld [vmem:[%s21652_s0 + $0x680] ss:$48 sps:$4 sm:$0xff]  }
 0x233   : > { %3351 = vmatprep.subr.bf16.mxu1 %v19412_v0  ;;  %v19457_v0 = vld [vmem:[%s21652_s0 + $0x6e4] ss:$48 sps:$4 sm:$0xff]  }
 0x234   : > { %3246 = vmatpush1.bf16.msra.mxu0 %v19317_v39  ;;  %v19413_v39 = vld [vmem:[%s21652_s0 + $0x440] ss:$48 sps:$4 sm:$0xff]  }
 0x235   : > { %3247 = vmatprep.subr.bf16.mxu0 %v19325_v40  ;;  %v19421_v40 = vld [vmem:[%s21652_s0 + $0x4a4] ss:$48 sps:$4 sm:$0xff]  }
 0x236   : > { %3352 = vmatpush1.bf16.msra.mxu1 %v19410_v3  ;;  %v19455_v3 = vld [vmem:[%s21652_s0 + $0x6e0] ss:$48 sps:$4 sm:$0xff]  }
 0x237   : > { %3353 = vmatprep.subr.bf16.mxu1 %v19418_v4  ;;  %v19463_v4 = vld [vmem:[%s21652_s0 + $0x744] ss:$48 sps:$4 sm:$0xff]  }
 0x238   : > { %3248 = vmatpush1.bf16.msra.mxu0 %v19323_v44  ;;  %v19427_v44 = vld [vmem:[%s21652_s0 + $0x504] ss:$48 sps:$4 sm:$0xff]  }
 0x239   : > { %3249 = vmatprep.subr.bf16.mxu0 %v19331_v45  ;;  %v19464_v45 = vld [vmem:[%s21652_s0 + $0x268] ss:$48 sps:$4 sm:$0xff]  }
 0x23a   : > { %3354 = vmatpush1.bf16.msra.mxu1 %v19416_v7  ;;  %v19461_v7 = vld [vmem:[%s21652_s0 + $0x740] ss:$48 sps:$4 sm:$0xff]  }
 0x23b   : > { %3355 = vmatprep.subr.bf16.mxu1 %v19424_v8  ;;  %v19469_v8 = vld [vmem:[%s21652_s0 + $0x7a4] ss:$48 sps:$4 sm:$0xff]  }
 0x23c   : > { %3250 = vmatpush1.bf16.msra.mxu0 %v19329_v48  ;;  %v19433_v48 = vld [vmem:[%s21652_s0 + $0x564] ss:$48 sps:$4 sm:$0xff]  }
 0x23d   : > { %3378 = vmatprep.subr.bf16.mxu0 %v19349_v49  ;;  %v19470_v49 = vld [vmem:[%s21652_s0 + $0x2c8] ss:$48 sps:$4 sm:$0xff]  }
 0x23e   : > { %3356 = vmatpush1.bf16.msra.mxu1 %v19422_v11  ;;  %v19467_v11 = vld [vmem:[%s21652_s0 + $0x7a0] ss:$48 sps:$4 sm:$0xff]  }
 0x23f   : > { %3252 = vmatmul.mubr.bf16.vlgmr.msra.gmra.mrb[8].mxu0 %v21870_v28  ;;  %3484 = vmatprep.subr.bf16.mxu1 %v19430_v13  ;;  %v19475_v13 = vld [vmem:[%s21652_s0 + $0x804] ss:$48 sps:$4 sm:$0xff]  }
 0x240   : > { %3261 = vmatprep.mubr.bf16.mxu0 %v21874_v33  ;;  %3379 = vmatpush1.bf16.msra.mxu0 %v19347_v52  ;;  %v19439_v52 = vld [vmem:[%s21652_s0 + $0x5c4] ss:$48 sps:$4 sm:$0xff]  }
 0x241   : > { %3380 = vmatprep.subr.bf16.mxu0 %v19355_v53  ;;  %3358 = vmatmul.mubr.bf16.vlgmr.msra.gmra.mrb[8].mxu1 %v21870_v28  ;;  %v19476_v53 = vld [vmem:[%s21652_s0 + $0x328] ss:$48 sps:$4 sm:$0xff]  }
 0x242   : > { %3485 = vmatpush1.bf16.msra.mxu1 %v19428_v16  ;;  %3367 = vmatprep.mubr.bf16.mxu1 %v21874_v33  ;;  %v19520_v16 = vld [vmem:[%s21652_s0 + $0x5cc] ss:$48 sps:$4 sm:$0xff]  }
 0x243   : > { %3486 = vmatprep.subr.bf16.mxu1 %v19436_v17  ;;  %v19473_v17 = vld [vmem:[%s21652_s0 + $0x800] ss:$48 sps:$4 sm:$0xff]  }
 0x244   : > { %3381 = vmatpush1.bf16.msra.mxu0 %v19353_v56  ;;  %v19445_v56 = vld [vmem:[%s21652_s0 + $0x624] ss:$48 sps:$4 sm:$0xff]  }
 0x245   : > { %3382 = vmatprep.subr.bf16.mxu0 %v19361_v57  ;;  %v19482_v57 = vld [vmem:[%s21652_s0 + $0x388] ss:$48 sps:$4 sm:$0xff]  }
 0x246   : > { %3487 = vmatpush1.bf16.msra.mxu1 %v19434_v20  ;;  %v19526_v20 = vld [vmem:[%s21652_s0 + $0x62c] ss:$48 sps:$4 sm:$0xff]  }
 0x247   : > { %3262 = vmatmul.mubr.bf16.gmra.mrb[12].mxu0 %v21884_v42  ;;  %3488 = vmatprep.subr.bf16.mxu1 %v19442_v21 }
 0x248   : > { %3383 = vmatpush1.bf16.msra.mxu0 %v19359_v60  ;;  %3410 = vmatprep.mubr.bf16.mxu0 %v21746_v31  ;;  %v19451_v60 = vld [vmem:[%s21652_s0 + $0x684] ss:$48 sps:$4 sm:$0xff]  }
 0x249   : > { %3384 = vmatprep.subr.bf16.mxu0 %v19367_v61  ;;  %3368 = vmatmul.mubr.bf16.gmra.mrb[12].mxu1 %v21884_v42  ;;  %v19488_v61 = vld [vmem:[%s21652_s0 + $0x3e8] ss:$48 sps:$4 sm:$0xff]  }
 0x24a   : > { %3489 = vmatpush1.bf16.msra.mxu1 %v19440_v24  ;;  %3516 = vmatprep.mubr.bf16.mxu1 %v21746_v31  ;;  %v19466_v31 = vld [vmem:[%s21652_s0 + $0x26c] ss:$48 sps:$4 sm:$0xff]   ;;  %v19487_v24 = vld [vmem:[%s21652_s0 + $0x8c4] ss:$48 sps:$4 sm:$0xff]  }
 0x24b   : > { %3490 = vmatprep.subr.bf16.mxu1 %v19448_v25 }
 0x24c   : > { %3385 = vmatpush1.bf16.msra.mxu0 %v19365_v62  ;;  %v19496_v62 = vld [vmem:[%s21652_s0 + $0x44c] ss:$48 sps:$4 sm:$0xff]  }
 0x24d   : > { %3386 = vmatprep.subr.bf16.mxu0 %v19373_v1  ;;  %v19494_v1 = vld [vmem:[%s21652_s0 + $0x448] ss:$48 sps:$4 sm:$0xff]  }
 0x24e   : > { %3491 = vmatpush1.bf16.msra.mxu1 %v19446_v32 }
 0x24f   : > { %3492 = vmatprep.subr.bf16.mxu1 %v19454_v34  ;;  %v19532_v34 = vld [vmem:[%s21652_s0 + $0x68c] ss:$48 sps:$4 sm:$0xff]  }
 0x250   : > { %3387 = vmatpush1.bf16.msra.mxu0 %v19371_v2  ;;  %v19502_v2 = vld [vmem:[%s21652_s0 + $0x4ac] ss:$48 sps:$4 sm:$0xff]  }
 0x251   : > { %3388 = vmatprep.subr.bf16.mxu0 %v19379_v5  ;;  %v19500_v5 = vld [vmem:[%s21652_s0 + $0x4a8] ss:$48 sps:$4 sm:$0xff]  }
 0x252   : > { %3493 = vmatpush1.bf16.msra.mxu1 %v19452_v37  ;;  %v19493_v37 = vld [vmem:[%s21652_s0 + $0x924] ss:$48 sps:$4 sm:$0xff]  }
 0x253   : > { %3494 = vmatprep.subr.bf16.mxu1 %v19460_v38  ;;  %v19530_v38 = vld [vmem:[%s21652_s0 + $0x688] ss:$48 sps:$4 sm:$0xff]  }
 0x254   : > { %3389 = vmatpush1.bf16.msra.mxu0 %v19377_v6  ;;  %v19508_v6 = vld [vmem:[%s21652_s0 + $0x50c] ss:$48 sps:$4 sm:$0xff]  }
 0x255   : > { %3390 = vmatprep.subr.bf16.mxu0 %v19385_v9  ;;  %v19506_v9 = vld [vmem:[%s21652_s0 + $0x508] ss:$48 sps:$4 sm:$0xff]  }
 0x256   : > { %3495 = vmatpush1.bf16.msra.mxu1 %v19458_v41  ;;  %v19491_v41 = vld [vmem:[%s21652_s0 + $0x920] ss:$48 sps:$4 sm:$0xff]  }
 0x257   : > { %3496 = vmatprep.subr.bf16.mxu1 %v19466_v31 }
 0x258   : > { %3391 = vmatpush1.bf16.msra.mxu0 %v19383_v10  ;;  %v19514_v10 = vld [vmem:[%s21652_s0 + $0x56c] ss:$48 sps:$4 sm:$0xff]  }
 0x259   : > { %3392 = vmatprep.subr.bf16.mxu0 %v19391_v14  ;;  %v19512_v14 = vld [vmem:[%s21652_s0 + $0x568] ss:$48 sps:$4 sm:$0xff]  }
 0x25a   : > { %3497 = vmatpush1.bf16.msra.mxu1 %v19464_v45  ;;  %v19536_v45 = vld [vmem:[%s21652_s0 + $0x6e8] ss:$48 sps:$4 sm:$0xff]  }
 0x25b   : > { %3498 = vmatprep.subr.bf16.mxu1 %v19472_v46 }
 0x25c   : > { %3393 = vmatpush1.bf16.msra.mxu0 %v19389_v18  ;;  %v19481_v18 = vld [vmem:[%s21652_s0 + $0x864] ss:$48 sps:$4 sm:$0xff]  }
 0x25d   : > { %3394 = vmatprep.subr.bf16.mxu0 %v19397_v19  ;;  %v19518_v19 = vld [vmem:[%s21652_s0 + $0x5c8] ss:$48 sps:$4 sm:$0xff]  }
 0x25e   : > { %3499 = vmatpush1.bf16.msra.mxu1 %v19470_v49  ;;  %v19497_v49 = vld [vmem:[%s21652_s0 + $0x980] ss:$48 sps:$4 sm:$0xff]  }
 0x25f   : > { %3500 = vmatprep.subr.bf16.mxu1 %v19478_v50  ;;  %v19539_v50 = vld [vmem:[%s21652_s0 + $0x748] ss:$48 sps:$4 sm:$0xff]  }
 0x260   : > { %3395 = vmatpush1.bf16.msra.mxu0 %v19395_v22  ;;  %v19479_v22 = vld [vmem:[%s21652_s0 + $0x860] ss:$48 sps:$4 sm:$0xff]  }
 0x261   : > { %3396 = vmatprep.subr.bf16.mxu0 %v19403_v23 }
 0x262   : > { %3501 = vmatpush1.bf16.msra.mxu1 %v19476_v53  ;;  %v19511_v53 = vld [vmem:[%s21652_s0 + $0xa44] ss:$48 sps:$4 sm:$0xff]  }
 0x263   : > { %3502 = vmatprep.subr.bf16.mxu1 %v19484_v54  ;;  %v19542_v54 = vld [vmem:[%s21652_s0 + $0x7a8] ss:$48 sps:$4 sm:$0xff]  }
 0x264   : > { %3397 = vmatpush1.bf16.msra.mxu0 %v19401_v26  ;;  %v19524_v26 = vld [vmem:[%s21652_s0 + $0x628] ss:$48 sps:$4 sm:$0xff]  }
 0x265   : > { %3398 = vmatprep.subr.bf16.mxu0 %v19409_v30 }
 0x266   : > { %3503 = vmatpush1.bf16.msra.mxu1 %v19482_v57  ;;  %v19517_v57 = vld [vmem:[%s21652_s0 + $0xaa4] ss:$48 sps:$4 sm:$0xff]  }
 0x267   : > { %3504 = vmatprep.subr.bf16.mxu1 %v19490_v58  ;;  %v19550_v58 = vld [vmem:[%s21652_s0 + $0x86c] ss:$48 sps:$4 sm:$0xff]  }
 0x268   : > { %3399 = vmatpush1.bf16.msra.mxu0 %v19407_v35 }
 0x269   : > { %3400 = vmatprep.subr.bf16.mxu0 %v19415_v36  ;;  %v19485_v36 = vld [vmem:[%s21652_s0 + $0x8c0] ss:$48 sps:$4 sm:$0xff]  }
 0x26a   : > { %3505 = vmatpush1.bf16.msra.mxu1 %v19488_v61  ;;  %v19548_v61 = vld [vmem:[%s21652_s0 + $0x868] ss:$48 sps:$4 sm:$0xff]  }
 0x26b   : > { %3506 = vmatprep.subr.bf16.mxu1 %v19496_v62 }
 0x26c   : > { %3401 = vmatpush1.bf16.msra.mxu0 %v19413_v39  ;;  %v19538_v39 = vld [vmem:[%s21652_s0 + $0x6ec] ss:$48 sps:$4 sm:$0xff]  }
 0x26d   : > { %3402 = vmatprep.subr.bf16.mxu0 %v19421_v40 }
 0x26e   : > { %3507 = vmatpush1.bf16.msra.mxu1 %v19494_v1 }
 0x26f   : > { %3508 = vmatprep.subr.bf16.mxu1 %v19502_v2  ;;  %v19529_v2 = vld [vmem:[%s21652_s0 + $0xb64] ss:$48 sps:$4 sm:$0xff]  }
 0x270   : > { %3403 = vmatpush1.bf16.msra.mxu0 %v19419_v43  ;;  %v19499_v43 = vld [vmem:[%s21652_s0 + $0x984] ss:$48 sps:$4 sm:$0xff]  }
 0x271   : > { %3404 = vmatprep.subr.bf16.mxu0 %v19427_v44 }
 0x272   : > { %3509 = vmatpush1.bf16.msra.mxu1 %v19500_v5 }
 0x273   : > { %3510 = vmatprep.subr.bf16.mxu1 %v19508_v6  ;;  %v19551_v6 = vld [vmem:[%s21652_s0 + $0x8c8] ss:$48 sps:$4 sm:$0xff]  }
 0x274   : > { %3405 = vmatpush1.bf16.msra.mxu0 %v19425_v47  ;;  %v19541_v47 = vld [vmem:[%s21652_s0 + $0x74c] ss:$48 sps:$4 sm:$0xff]  }
 0x275   : > { %3406 = vmatprep.subr.bf16.mxu0 %v19433_v48 }
 0x276   : > { %3511 = vmatpush1.bf16.msra.mxu1 %v19506_v9  ;;  %v19535_v9 = vld [vmem:[%s21652_s0 + $0xbc4] ss:$48 sps:$4 sm:$0xff]  }
 0x277   : > { %3512 = vmatprep.subr.bf16.mxu1 %v19514_v10  ;;  %v19554_v10 = vld [vmem:[%s21652_s0 + $0x928] ss:$48 sps:$4 sm:$0xff]  }
 0x278   : > { %3407 = vmatpush1.bf16.msra.mxu0 %v19431_v51  ;;  %v19544_v51 = vld [vmem:[%s21652_s0 + $0x7ac] ss:$48 sps:$4 sm:$0xff]  }
 0x279   : > { %3408 = vmatprep.subr.bf16.mxu0 %v19439_v52  ;;  %v19503_v52 = vld [vmem:[%s21652_s0 + $0x9e0] ss:$48 sps:$4 sm:$0xff]  }
 0x27a   : > { %3513 = vmatpush1.bf16.msra.mxu1 %v19512_v14 }
 0x27b   : > { %3514 = vmatprep.subr.bf16.mxu1 %v19520_v16  ;;  %v19533_v16 = vld [vmem:[%s21652_s0 + $0xbc0] ss:$48 sps:$4 sm:$0xff]  }
 0x27c   : > { %3409 = vmatpush1.bf16.msra.mxu0 %v19437_v55  ;;  %v19547_v55 = vld [vmem:[%s21652_s0 + $0x80c] ss:$48 sps:$4 sm:$0xff]  }
 0x27d   : > { %3431 = vmatprep.subr.bf16.mxu0 %v19445_v56  ;;  %v19509_v56 = vld [vmem:[%s21652_s0 + $0xa40] ss:$48 sps:$4 sm:$0xff]  }
 0x27e   : > { %3515 = vmatpush1.bf16.msra.mxu1 %v19518_v19 }
 0x27f   : > { %3411 = vmatmul.mubr.bf16.vlgmr.msra.gmra.mrb[16].mxu0 %v21790_v12  ;;  %3537 = vmatprep.subr.bf16.mxu1 %v19526_v20  ;;  %v19557_v20 = vld [vmem:[%s21652_s0 + $0x988] ss:$48 sps:$4 sm:$0xff]  }
 0x280   : > { %3432 = vmatpush1.bf16.msra.mxu0 %v19443_v59  ;;  %3420 = vmatprep.mubr.bf16.mxu0 %v21794_v15  ;;  %v19523_v59 = vld [vmem:[%s21652_s0 + $0xb04] ss:$48 sps:$4 sm:$0xff]  }
 0x281   : > { %3433 = vmatprep.subr.bf16.mxu0 %v19451_v60  ;;  %3517 = vmatmul.mubr.bf16.vlgmr.msra.gmra.mrb[16].mxu1 %v21790_v12 }
 0x282   : > { %3538 = vmatpush1.bf16.msra.mxu1 %v19524_v26  ;;  %3526 = vmatprep.mubr.bf16.mxu1 %v21794_v15  ;;  %v19505_v15 = vld [vmem:[%s21652_s0 + $0x9e4] ss:$48 sps:$4 sm:$0xff]   ;;  %v19563_v26 = vld [vmem:[%s21652_s0 + $0xa48] ss:$48 sps:$4 sm:$0xff]  }
 0x283   : > { %3539 = vmatprep.subr.bf16.mxu1 %v19532_v34  ;;  %v19566_v34 = vld [vmem:[%s21652_s0 + $0xaa8] ss:$48 sps:$4 sm:$0xff]  }
 0x284   : > { %3434 = vmatpush1.bf16.msra.mxu0 %v19449_v63  ;;  %v19553_v63 = vld [vmem:[%s21652_s0 + $0x8cc] ss:$48 sps:$4 sm:$0xff]  }
 0x285   : > { %3435 = vmatprep.subr.bf16.mxu0 %v19457_v0  ;;  %v19521_v0 = vld [vmem:[%s21652_s0 + $0xb00] ss:$48 sps:$4 sm:$0xff]  }
 0x286   : > { %3540 = vmatpush1.bf16.msra.mxu1 %v19530_v38  ;;  %v19574_v38 = vld [vmem:[%s21652_s0 + $0xb6c] ss:$48 sps:$4 sm:$0xff]  }
 0x287   : > { %3421 = vmatmul.mubr.bf16.gmra.mrb[20].mxu0 %v21805_v27  ;;  %3541 = vmatprep.subr.bf16.mxu1 %v19538_v39  ;;  %v19572_v39 = vld [vmem:[%s21652_s0 + $0xb68] ss:$48 sps:$4 sm:$0xff]  }
 0x288   : > { %3436 = vmatpush1.bf16.msra.mxu0 %v19455_v3  ;;  %3463 = vmatprep.mubr.bf16.mxu0 %v21808_v29 }
 0x289   : > { %3437 = vmatprep.subr.bf16.mxu0 %v19463_v4  ;;  %3527 = vmatmul.mubr.bf16.gmra.mrb[20].mxu1 %v21805_v27  ;;  %v19545_v27 = vld [vmem:[%s21652_s0 + $0x808] ss:$48 sps:$4 sm:$0xff]  }
 0x28a   : > { %3542 = vmatpush1.bf16.msra.mxu1 %v19536_v45  ;;  %3569 = vmatprep.mubr.bf16.mxu1 %v21808_v29  ;;  %v19515_v29 = vld [vmem:[%s21652_s0 + $0xaa0] ss:$48 sps:$4 sm:$0xff]  }
 0x28b   : > { %3543 = vmatprep.subr.bf16.mxu1 %v19541_v47 }
 0x28c   : > { %3438 = vmatpush1.bf16.msra.mxu0 %v19461_v7  ;;  %v19556_v7 = vld [vmem:[%s21652_s0 + $0x92c] ss:$48 sps:$4 sm:$0xff]  }
 0x28d   : > { %3439 = vmatprep.subr.bf16.mxu0 %v19469_v8  ;;  %v19527_v8 = vld [vmem:[%s21652_s0 + $0xb60] ss:$48 sps:$4 sm:$0xff]  }
 0x28e   : > { %3544 = vmatpush1.bf16.msra.mxu1 %v19539_v50 }
 0x28f   : > { %3545 = vmatprep.subr.bf16.mxu1 %v19544_v51 }
 0x290   : > { %3440 = vmatpush1.bf16.msra.mxu0 %v19467_v11 }
 0x291   : > { %3441 = vmatprep.subr.bf16.mxu0 %v19475_v13  ;;  %v19559_v13 = vld [vmem:[%s21652_s0 + $0x98c] ss:$48 sps:$4 sm:$0xff]  }
 0x292   : > { %v3041_v21 = vpop.f32.mrb[0].mxu0  ;;  %3546 = vmatpush1.bf16.msra.mxu1 %v19542_v54 }
 0x293   : > { %v3043_v23 = vpop.f32.mrb[1].mxu0  ;;  %3547 = vmatprep.subr.bf16.mxu1 %v19547_v55 }
 0x294   : > { %v3045_v25 = vpop.f32.mrb[2].mxu0  ;;  %3442 = vmatpush1.bf16.msra.mxu0 %v19473_v17  ;;  %v3147_v60 = vpop.f32.mrb[0].mxu1 }
 0x295   : > { %v22124_v30 = vpack.c.bf16 %v3045_v25, %v3041_v21  ;;  %v3047_v32 = vpop.f32.mrb[3].mxu0  ;;  %3443 = vmatprep.subr.bf16.mxu0 %v19481_v18  ;;  %v3149_v62 = vpop.f32.mrb[1].mxu1  ;;  %v21257_v25 = vmov 0.0  }
 0x296   : > { %v22127_v35 = vpack.c.bf16 %v3047_v32, %v3043_v23  ;;  %v3151_v1 = vpop.f32.mrb[2].mxu1  ;;  %3548 = vmatpush1.bf16.msra.mxu1 %v19545_v27  ;;  %v19560_v23 = vld [vmem:[%s21652_s0 + $0x9e8] ss:$48 sps:$4 sm:$0xff]   ;;  %v19568_v32 = vld [vmem:[%s21652_s0 + $0xaac] ss:$48 sps:$4 sm:$0xff]  }
 0x297   : > { %v22163_v3 = vpack.c.bf16 %v3151_v1, %v3147_v60  ;;  %v3153_v4 = vpop.f32.mrb[3].mxu1  ;;  %3549 = vmatprep.subr.bf16.mxu1 %v19550_v58 }
 0x298   : > { %3444 = vmatpush1.bf16.msra.mxu0 %v19479_v22  ;;  %v22165_v5 = vpack.c.bf16 %v3153_v4, %v3149_v62  ;;  %v19562_v22 = vld [vmem:[%s21652_s0 + $0x9ec] ss:$48 sps:$4 sm:$0xff]  }
 0x299   : > { %3445 = vmatprep.subr.bf16.mxu0 %v19487_v24  ;;  %v19565_v24 = vld [vmem:[%s21652_s0 + $0xa4c] ss:$48 sps:$4 sm:$0xff]  }
 0x29a   : > { %v3051_v40 = vpop.f32.mrb[4].mxu0  ;;  %3550 = vmatpush1.bf16.msra.mxu1 %v19548_v61 }
 0x29b   : > { %v3053_v31 = vpop.f32.mrb[5].mxu0  ;;  %3551 = vmatprep.subr.bf16.mxu1 %v19553_v63 }
 0x29c   : > { %v3055_v44 = vpop.f32.mrb[6].mxu0  ;;  %3446 = vmatpush1.bf16.msra.mxu0 %v19485_v36  ;;  %v3157_v11 = vpop.f32.mrb[4].mxu1  ;;  %v19571_v36 = vld [vmem:[%s21652_s0 + $0xb0c] ss:$48 sps:$4 sm:$0xff]  }
 0x29d   : > { %v22138_v46 = vpack.c.bf16 %v3055_v44, %v3051_v40  ;;  %v3057_v12 = vpop.f32.mrb[7].mxu0  ;;  %3447 = vmatprep.subr.bf16.mxu0 %v19493_v37  ;;  %v3159_v14 = vpop.f32.mrb[5].mxu1  ;;  %v19569_v37 = vld [vmem:[%s21652_s0 + $0xb08] ss:$48 sps:$4 sm:$0xff]   ;;  %v19577_v40 = vld [vmem:[%s21652_s0 + $0xbcc] ss:$48 sps:$4 sm:$0xff]  }
 0x29e   : > { %v22141_v48 = vpack.c.bf16 %v3057_v12, %v3053_v31  ;;  %3552 = vmatpush1.bf16.msra.mxu1 %v19551_v6  ;;  %v3161_v17 = vpop.f32.mrb[6].mxu1 }
 0x29f   : > { %3553 = vmatprep.subr.bf16.mxu1 %v19556_v7  ;;  %v22174_v18 = vpack.c.bf16 %v3161_v17, %v3157_v11  ;;  %v3163_v19 = vpop.f32.mrb[7].mxu1 }
 0x2a0   : > { %3448 = vmatpush1.bf16.msra.mxu0 %v19491_v41  ;;  %v22177_v21 = vpack.c.bf16 %v3163_v19, %v3159_v14  ;;  %v19575_v41 = vld [vmem:[%s21652_s0 + $0xbc8] ss:$48 sps:$4 sm:$0xff]   ;;  %s21259_s0 = smov 64  }
 0x2a1   : > { %3449 = vmatprep.subr.bf16.mxu0 %v19499_v43 }
 0x2a2   : > { %3554 = vmatpush1.bf16.msra.mxu1 %v19554_v10 }
 0x2a3   : > { %3555 = vmatprep.subr.bf16.mxu1 %v19559_v13 }
 0x2a4   : > { %3450 = vmatpush1.bf16.msra.mxu0 %v19497_v49 }
 0x2a5   : > { %3451 = vmatprep.subr.bf16.mxu0 %v19505_v15 }
 0x2a6   : > { %3556 = vmatpush1.bf16.msra.mxu1 %v19557_v20 }
 0x2a7   : > { %3557 = vmatprep.subr.bf16.mxu1 %v19562_v22 }
 0x2a8   : > { %3452 = vmatpush1.bf16.msra.mxu0 %v19503_v52 }
 0x2a9   : > { %3453 = vmatprep.subr.bf16.mxu0 %v19511_v53 }
 0x2aa   : > { %3558 = vmatpush1.bf16.msra.mxu1 %v19560_v23 }
 0x2ab   : > { %3559 = vmatprep.subr.bf16.mxu1 %v19565_v24 }
 0x2ac   : > { %3454 = vmatpush1.bf16.msra.mxu0 %v19509_v56 }
 0x2ad   : > { %3455 = vmatprep.subr.bf16.mxu0 %v19517_v57 }
 0x2ae   : > { %3560 = vmatpush1.bf16.msra.mxu1 %v19563_v26 }
 0x2af   : > { %3561 = vmatprep.subr.bf16.mxu1 %v19568_v32 }
 0x2b0   : > { %3456 = vmatpush1.bf16.msra.mxu0 %v19515_v29 }
 0x2b1   : > { %3457 = vmatprep.subr.bf16.mxu0 %v19523_v59 }
 0x2b2   : > { %3562 = vmatpush1.bf16.msra.mxu1 %v19566_v34 }
 0x2b3   : > { %3563 = vmatprep.subr.bf16.mxu1 %v19571_v36 }
 0x2b4   : > { %3458 = vmatpush1.bf16.msra.mxu0 %v19521_v0 }
 0x2b5   : > { %3459 = vmatprep.subr.bf16.mxu0 %v19529_v2 }
 0x2b6   : > { %3564 = vmatpush1.bf16.msra.mxu1 %v19569_v37  ;;  %v3614_v37 = vlaneseq }
 0x2b7   : > { %3565 = vmatprep.subr.bf16.mxu1 %v19574_v38 }
 0x2b8   : > { %3460 = vmatpush1.bf16.msra.mxu0 %v19527_v8  ;;  %v22253_v38 = vshrl.u32 %v3614_v37, 7 }
 0x2b9   : > { %3461 = vmatprep.subr.bf16.mxu0 %v19535_v9 }
 0x2ba   : > { %3566 = vmatpush1.bf16.msra.mxu1 %v19572_v39  ;;  %v3618_v39 = vand.u32 127, %v3614_v37 }
 0x2bb   : > { %3567 = vmatprep.subr.bf16.mxu1 %v19577_v40  ;;  %v3616_v40 = vadd.s32 8, %v22253_v38 }
 0x2bc   : > { %3462 = vmatpush1.bf16.msra.mxu0 %v19533_v16  ;;  %vm22257_vm2 = vcmp.ge.s32.totalorder %v22253_v38, %v3618_v39 }
 0x2bd   : > { %18321 = vmatprep.subr.bf16.mxu0 %v21257_v25  ;;  %vm22261_vm4 = vcmp.ge.s32.totalorder %v3616_v40, %v3618_v39 }
 0x2be   : > { %3568 = vmatpush1.bf16.msra.mxu1 %v19575_v41 }
 0x2bf   : > { %3464 = vmatmul.mubr.bf16.vlgmr.msra.gmra.mrb[16].mxu0 %v21870_v28  ;;  %18327 = vmatprep.subr.bf16.mxu1 %v21257_v25 }
 0x2c0   : > { %3473 = vmatprep.mubr.bf16.mxu0 %v21874_v33 }
 0x2c1   : > { %3570 = vmatmul.mubr.bf16.vlgmr.msra.gmra.mrb[16].mxu1 %v21870_v28 }
 0x2c2   : > { %3579 = vmatprep.mubr.bf16.mxu1 %v21874_v33 }
 0x2c7   : > { %3474 = vmatmul.mubr.bf16.gmra.mrb[20].mxu0 %v21884_v42 }
 0x2c8   : > { %18323 = vmatprep.mubr.msk.bf16.mxu0 %vm21258_vm0, %v21257_v25 }
 0x2c9   : > { %3580 = vmatmul.mubr.bf16.gmra.mrb[20].mxu1 %v21884_v42 }
 0x2ca   : > { %18329 = vmatprep.mubr.msk.bf16.mxu1 %vm21258_vm0, %v21257_v25 }
 0x312   : > { %v3253_v31 = vpop.f32.mrb[8].mxu0 }
 0x313   : > { %v3255_v43 = vpop.f32.mrb[9].mxu0 }
 0x314   : > { %v3257_v44 = vpop.f32.mrb[10].mxu0  ;;  %v3359_v53 = vpop.f32.mrb[8].mxu1 }
 0x315   : > { %v22203_v45 = vpack.c.bf16 %v3257_v44, %v3253_v31  ;;  %v3259_v12 = vpop.f32.mrb[11].mxu0  ;;  %v3361_v54 = vpop.f32.mrb[9].mxu1 }
 0x316   : > { %v22205_v47 = vpack.c.bf16 %v3259_v12, %v3255_v43  ;;  %v3363_v55 = vpop.f32.mrb[10].mxu1 }
 0x317   : > { %v3626_v49 = vsel %vm3621_vm1, %v22203_v45, 0  ;;  %v22225_v56 = vpack.c.bf16 %v3363_v55, %v3359_v53  ;;  %v3365_v57 = vpop.f32.mrb[11].mxu1 }
 0x318   : > { %18322 = vmatpush3.bf16.xpose.msra.mxu0 %v3626_v49  ;;  %v22227_v27 = vpack.c.bf16 %v3365_v57, %v3361_v54 }
 0x319   : > { %18333 = vmatprep.subr.bf16.mxu0 %v21257_v25 }
 0x31a   : > { %v3263_v28 = vpop.f32.mrb[12].mxu0 }
 0x31b   : > { %v3265_v33 = vpop.f32.mrb[13].mxu0 }
 0x31c   : > { %v3267_v42 = vpop.f32.mrb[14].mxu0  ;;  %v3369_v58 = vpop.f32.mrb[12].mxu1 }
 0x31d   : > { %v22210_v15 = vpack.c.bf16 %v3267_v42, %v3263_v28  ;;  %v3269_v50 = vpop.f32.mrb[15].mxu0  ;;  %v3371_v29 = vpop.f32.mrb[13].mxu1 }
 0x31e   : > { %v22212_v51 = vpack.c.bf16 %v3269_v50, %v3265_v33  ;;  %v3373_v59 = vpop.f32.mrb[14].mxu1 }
 0x31f   : > { %v3673_v52 = vsel %vm3621_vm1, %v22210_v15, 0  ;;  %18324 = vmatmul.mubr.msk.bf16.vlgmr.msra.gmra.mrb[24].mxu0 %vm3621_vm1, %v22124_v30  ;;  %v22229_v60 = vpack.c.bf16 %v3373_v59, %v3369_v58  ;;  %v3375_v61 = vpop.f32.mrb[15].mxu1 }
 0x320   : > { %18328 = vmatpush3.bf16.xpose.msra.mxu1 %v3673_v52  ;;  %18335 = vmatprep.mubr.msk.bf16.mxu0 %vm21258_vm0, %v21257_v25  ;;  %v22231_v62 = vpack.c.bf16 %v3375_v61, %v3371_v29 }
 0x321   : > { %18339 = vmatprep.subr.bf16.mxu1 %v21257_v25 }
 0x327   : > { %18330 = vmatmul.mubr.msk.bf16.vlgmr.msra.gmra.mrb[24].mxu1 %vm3621_vm1, %v22138_v46 }
 0x328   : > { %18341 = vmatprep.mubr.msk.bf16.mxu1 %vm21258_vm0, %v21257_v25 }
 0x392   : > { %v3465_v63 = vpop.f32.mrb[16].mxu0 }
 0x393   : > { %v3467_v0 = vpop.f32.mrb[17].mxu0 }
 0x394   : > { %v3469_v1 = vpop.f32.mrb[18].mxu0  ;;  %v3571_v14 = vpop.f32.mrb[16].mxu1 }
 0x395   : > { %v22233_v2 = vpack.c.bf16 %v3469_v1, %v3465_v63  ;;  %v3471_v4 = vpop.f32.mrb[19].mxu0  ;;  %v3573_v16 = vpop.f32.mrb[17].mxu1 }
 0x396   : > { %v22235_v6 = vpack.c.bf16 %v3471_v4, %v3467_v0  ;;  %v3575_v17 = vpop.f32.mrb[18].mxu1 }
 0x397   : > { %18334 = vmatpush3.bf16.msra.mxu0 %v22233_v2  ;;  %v22245_v19 = vpack.c.bf16 %v3575_v17, %v3571_v14  ;;  %v3577_v20 = vpop.f32.mrb[19].mxu1 }
 0x398   : > { %18345 = vmatprep.subr.bf16.mxu0 %v21257_v25  ;;  %v22247_v22 = vpack.c.bf16 %v3577_v20, %v3573_v16 }
 0x39a   : > { %v3475_v7 = vpop.f32.mrb[20].mxu0 }
 0x39b   : > { %v3477_v8 = vpop.f32.mrb[21].mxu0 }
 0x39c   : > { %v3479_v9 = vpop.f32.mrb[22].mxu0  ;;  %v3581_v23 = vpop.f32.mrb[20].mxu1 }
 0x39d   : > { %v22239_v10 = vpack.c.bf16 %v3479_v9, %v3475_v7  ;;  %v3481_v11 = vpop.f32.mrb[23].mxu0  ;;  %v3583_v24 = vpop.f32.mrb[21].mxu1 }
 0x39e   : > { %v22241_v13 = vpack.c.bf16 %v3481_v11, %v3477_v8  ;;  %v3585_v26 = vpop.f32.mrb[22].mxu1 }
 0x39f   : > { %18340 = vmatpush3.bf16.msra.mxu1 %v22239_v10  ;;  %v22249_v32 = vpack.c.bf16 %v3585_v26, %v3581_v23  ;;  %v3587_v34 = vpop.f32.mrb[23].mxu1 }
 0x3a0   : > { %18351 = vmatprep.subr.bf16.mxu1 %v21257_v25  ;;  %v22251_v36 = vpack.c.bf16 %v3587_v34, %v3583_v24 }
 0x3f2   : > { %v3662_v41 = vpop.f32.mrb[24].mxu0 }
 0x3f3   : > { %v3716_v43 = vmul.f32 0.044194173, %v3662_v41  ;;  %v18325_v44 = vpop.f32.mrb[25].mxu0 }
 0x3f4   : > { %v3665_v12 = vpop.f32.mrb[26].mxu0 }
 0x3f5   : > { %v3717_v28 = vmul.f32 0.044194173, %v3665_v12  ;;  %v18326_v33 = vpop.f32.mrb[27].mxu0  ;;  %v3724_v42 = vsel %vm22257_vm2, %v3716_v43, -1e+30 }
 0x3f6   : > { %v3729_v50 = vsel %vm3728_vm3, %v3724_v42, -inf }
 0x3f7   : > { %3730 = vmax.xlane.f32.xlu0 %v3729_v50  ;;  %v3725_v52 = vsel %vm22261_vm4, %v3717_v28, -1e+30 }
 0x3f8   : > { %v3732_v54 = vsel %vm3728_vm3, %v3725_v52, -inf }
 0x3fa   : > { %v3709_v53 = vpop.f32.mrb[24].mxu1 }
 0x3fb   : > { %v3718_v55 = vmul.f32 0.044194173, %v3709_v53  ;;  %v18331_v57 = vpop.f32.mrb[25].mxu1  ;;  %3733 = vmax.xlane.f32.xlu0 %v3732_v54 }
 0x3fc   : > { %v3712_v58 = vpop.f32.mrb[26].mxu1 }
 0x3fd   : > { %v3719_v29 = vmul.f32 0.044194173, %v3712_v58  ;;  %v18332_v59 = vpop.f32.mrb[27].mxu1  ;;  %v3726_v61 = vsel %vm22257_vm2, %v3718_v55, -1e+30 }
 0x3fe   : > { %v3735_v63 = vsel %vm3728_vm3, %v3726_v61, -inf }
 0x3ff   : > { %3736 = vmax.xlane.f32.xlu1 %v3735_v63  ;;  %v3727_v0 = vsel %vm22261_vm4, %v3719_v29, -1e+30 }
 0x400   : > { %v3738_v1 = vsel %vm3728_vm3, %v3727_v0, -inf }
 0x403   : > { %3739 = vmax.xlane.f32.xlu1 %v3738_v1 }
 0x484   : > { %v3731_v4 = vpop.xlane.xlu0 %3730 }
 0x485   : > { %v3741_v7 = vsub.f32 %v3724_v42, %v3731_v4 }
 0x487   : > { %v3745_v8 = vmul.f32 1.442695, %v3741_v7 }
 0x488   : > { %v3734_v9 = vpop.xlane.xlu0 %3733 }
 0x489   : > { %20538 = vpow2.f32 %v3745_v8  ;;  %v3742_v11 = vsub.f32 %v3725_v52, %v3734_v9 }
 0x48b   : > { %v3747_v14 = vmul.f32 1.442695, %v3742_v11 }
 0x48c   : > { %v3737_v24 = vpop.xlane.xlu1 %3736 }
 0x48d   : > { %20540 = vpow2.f32 %v3747_v14  ;;  %v3743_v37 = vsub.f32 %v3726_v61, %v3737_v24 }
 0x48f   : > { %v3749_v40 = vmul.f32 1.442695, %v3743_v37 }
 0x490   : > { %v3740_v26 = vpop.xlane.xlu1 %3739 }
 0x491   : > { %v3744_v34 = vsub.f32 %v3727_v0, %v3740_v26 }
 0x493   : > { %v20539_v16 = vpop.eup %20538  ;;  %v3751_v39 = vmul.f32 1.442695, %v3744_v34 }
 0x494   : > { %v3753_v17 = vsel %vm3728_vm3, %v20539_v16, 0.0 }
 0x495   : > { %3754 = vadd.xlane.f32.xlu0 %v3753_v17  ;;  %20542 = vpow2.f32 %v3751_v39 }
 0x496   : > { %20544 = vpow2.f32 %v3749_v40 }
 0x497   : > { %v20541_v20 = vpop.eup %20540 }
 0x498   : > { %v3756_v23 = vsel %vm3728_vm3, %v20541_v20, 0.0 }
 0x499   : > { %3757 = vadd.xlane.f32.xlu1 %v3756_v23 }
 0x49f   : > { %v20543_v41 = vpop.eup %20542 }
 0x4a0   : > { %v3762_v43 = vsel %vm3728_vm3, %v20543_v41, 0.0  ;;  %v20545_v44 = vpop.eup %20544 }
 0x4a1   : > { %v3759_v12 = vsel %vm3728_vm3, %v20545_v44, 0.0 }
 0x4aa   : > { %3866 = vrot.lane.b32.xlu1 %v22124_v30, %s21259_s0 }
 0x4ab   : > { %3869 = vrot.lane.b32.xlu0 %v22203_v45, %s21259_s0 }
 0x4ca   : > { %3763 = vadd.xlane.f32.xlu0 %v3762_v43 }
 0x4ce   : > { %3760 = vadd.xlane.f32.xlu1 %v3759_v12 }
 0x4df   : > { %3919 = vrot.lane.b32.xlu1 %v22138_v46, %s21259_s0 }
 0x4e0   : > { %3922 = vrot.lane.b32.xlu0 %v22210_v15, %s21259_s0 }
 0x522   : > { %v3755_v30 = vpop.xlane.xlu0 %3754 }
 0x523   : > { %20546 = vrcp.f32 %v3755_v30 }
 0x526   : > { %v3758_v45 = vpop.xlane.xlu1 %3757  ;;  %v3870_v52 = vpop.permute.xlu0 %3869 }
 0x527   : > { %20548 = vrcp.f32 %v3758_v45  ;;  %v3875_v54 = vsel %vm3621_vm1, %v3870_v52, 0 }
 0x52a   : > { %v3867_v46 = vpop.permute.xlu1 %3866 }
 0x52d   : > { %v20547_v28 = vpop.eup %20546 }
 0x52e   : > { %v3769_v42 = vmul.f32 %v20547_v28, %v20539_v16 }
 0x531   : > { %v20549_v33 = vpop.eup %20548 }
 0x532   : > { %v3770_v50 = vmul.f32 %v20549_v33, %v20541_v20 }
 0x534   : > { %v3773_v53 = vpack.c.bf16 %v3770_v50, %v3769_v42 }
 0x536   : > { %18336 = vmatmul.mubr.msk.bf16.vlgmr.msra.gmra.mrb[28].mxu0 %vm3728_vm3, %v3773_v53 }
 0x537   : > { %18346 = vmatpush3.bf16.xpose.msra.mxu0 %v3875_v54  ;;  %18347 = vmatprep.mubr.msk.bf16.mxu0 %vm21258_vm0, %v21257_v25 }
 0x538   : > { %18357 = vmatprep.subr.bf16.mxu0 %v21257_v25 }
 0x53e   : > { %18348 = vmatmul.mubr.msk.bf16.vlgmr.msra.gmra.mrb[32].mxu0 %vm3621_vm1, %v3867_v46 }
 0x53f   : > { %18359 = vmatprep.mubr.msk.bf16.mxu0 %vm21258_vm0, %v21257_v25 }
 0x557   : > { %v3764_v15 = vpop.xlane.xlu0 %3763 }
 0x558   : > { %20550 = vrcp.f32 %v3764_v15 }
 0x55b   : > { %v3761_v55 = vpop.xlane.xlu1 %3760  ;;  %v3923_v61 = vpop.permute.xlu0 %3922 }
 0x55c   : > { %20552 = vrcp.f32 %v3761_v55  ;;  %v3928_v0 = vsel %vm3621_vm1, %v3923_v61, 0 }
 0x55f   : > { %v3920_v1 = vpop.permute.xlu1 %3919 }
 0x562   : > { %v20551_v57 = vpop.eup %20550 }
 0x563   : > { %v3772_v29 = vmul.f32 %v20551_v57, %v20543_v41 }
 0x566   : > { %v20553_v58 = vpop.eup %20552 }
 0x567   : > { %v3771_v59 = vmul.f32 %v20553_v58, %v20545_v44 }
 0x569   : > { %v3774_v63 = vpack.c.bf16 %v3772_v29, %v3771_v59 }
 0x56b   : > { %18342 = vmatmul.mubr.msk.bf16.vlgmr.msra.gmra.mrb[28].mxu1 %vm3728_vm3, %v3774_v63 }
 0x56c   : > { %18352 = vmatpush3.bf16.xpose.msra.mxu1 %v3928_v0  ;;  %18353 = vmatprep.mubr.msk.bf16.mxu1 %vm21258_vm0, %v21257_v25 }
 0x56d   : > { %18363 = vmatprep.subr.bf16.mxu1 %v21257_v25 }
 0x573   : > { %18354 = vmatmul.mubr.msk.bf16.vlgmr.msra.gmra.mrb[32].mxu1 %vm3621_vm1, %v3920_v1 }
 0x574   : > { %18365 = vmatprep.mubr.msk.bf16.mxu1 %vm21258_vm0, %v21257_v25 }
 0x609   : > { %v22305_v4 = vpop.f32.mrb[28].mxu0 }
 0x60a   : > { %v18337_v7 = vpop.f32.mrb[29].mxu0 }
 0x60b   : > { %v22307_v8 = vpop.f32.mrb[30].mxu0 }
 0x60c   : > { %v3863_v9 = vpack.c.bf16 %v22307_v8, %v22305_v4  ;;  %v18338_v11 = vpop.f32.mrb[31].mxu0  ;;  %v19629_v8 = vld [vmem:[%s21659_s30 + $0x28] ss:$16 sps:$4 sm:$0xff]  }
 0x611   : > { %v3911_v14 = vpop.f32.mrb[32].mxu0 }
 0x612   : > { %v3971_v16 = vmul.f32 0.044194173, %v3911_v14  ;;  %v18349_v17 = vpop.f32.mrb[33].mxu0 }
 0x613   : > { %v3914_v20 = vpop.f32.mrb[34].mxu0 }
 0x614   : > { %v3972_v23 = vmul.f32 0.044194173, %v3914_v20  ;;  %v18350_v24 = vpop.f32.mrb[35].mxu0  ;;  %v3975_v26 = vsel %vm22257_vm2, %v3971_v16, -1e+30 }
 0x615   : > { %v3979_v34 = vsel %vm3728_vm3, %v3975_v26, -inf }
 0x616   : > { %3980 = vmax.xlane.f32.xlu1 %v3979_v34  ;;  %v3976_v37 = vsel %vm22261_vm4, %v3972_v23, -1e+30 }
 0x617   : > { %v3982_v39 = vsel %vm3728_vm3, %v3976_v37, -inf }
 0x618   : > { %3983 = vmax.xlane.f32.xlu0 %v3982_v39 }
 0x63e   : > { %v22317_v40 = vpop.f32.mrb[28].mxu1 }
 0x63f   : > { %v18343_v41 = vpop.f32.mrb[29].mxu1 }
 0x640   : > { %v22319_v43 = vpop.f32.mrb[30].mxu1 }
 0x641   : > { %v3864_v44 = vpack.c.bf16 %v22319_v43, %v22317_v40  ;;  %v18344_v12 = vpop.f32.mrb[31].mxu1  ;;  %v19640_v40 = vld [vmem:[%s21659_s30 + $0x8c] ss:$16 sps:$4 sm:$0xff]   ;;  %v19638_v43 = vld [vmem:[%s21659_s30 + $0x88] ss:$16 sps:$4 sm:$0xff]  }
 0x646   : > { %v3964_v30 = vpop.f32.mrb[32].mxu1 }
 0x647   : > { %v3973_v45 = vmul.f32 0.044194173, %v3964_v30  ;;  %v18355_v28 = vpop.f32.mrb[33].mxu1 }
 0x648   : > { %v3967_v33 = vpop.f32.mrb[34].mxu1 }
 0x649   : > { %v3974_v42 = vmul.f32 0.044194173, %v3967_v33  ;;  %v18356_v50 = vpop.f32.mrb[35].mxu1  ;;  %v3977_v52 = vsel %vm22257_vm2, %v3973_v45, -1e+30  ;;  %v4127_v33 = vsel %vm3621_vm1, %v22205_v47, 0 }
 0x64a   : > { %v3985_v53 = vsel %vm3728_vm3, %v3977_v52, -inf }
 0x64b   : > { %3986 = vmax.xlane.f32.xlu0 %v3985_v53  ;;  %v3978_v54 = vsel %vm22261_vm4, %v3974_v42, -1e+30 }
 0x64c   : > { %v3988_v46 = vsel %vm3728_vm3, %v3978_v54, -inf }
 0x64d   : > { %3989 = vmax.xlane.f32.xlu1 %v3988_v46 }
 0x6a3   : > { %v3981_v15 = vpop.xlane.xlu1 %3980 }
 0x6a4   : > { %v3991_v55 = vsub.f32 %v3975_v26, %v3981_v15 }
 0x6a5   : > { %v3984_v57 = vpop.xlane.xlu0 %3983 }
 0x6a6   : > { %v3995_v58 = vmul.f32 1.442695, %v3991_v55  ;;  %v3992_v29 = vsub.f32 %v3976_v37, %v3984_v57  ;;  %v4174_v55 = vsel %vm3621_vm1, %v22212_v51, 0 }
 0x6a8   : > { %20554 = vpow2.f32 %v3995_v58  ;;  %v3997_v59 = vmul.f32 1.442695, %v3992_v29 }
 0x6aa   : > { %20556 = vpow2.f32 %v3997_v59 }
 0x6b2   : > { %v20555_v61 = vpop.eup %20554 }
 0x6b3   : > { %v4003_v63 = vsel %vm3728_vm3, %v20555_v61, 0.0 }
 0x6b4   : > { %v20557_v0 = vpop.eup %20556  ;;  %4004 = vadd.xlane.f32.xlu0 %v4003_v63 }
 0x6b5   : > { %v4006_v1 = vsel %vm3728_vm3, %v20557_v0, 0.0 }
 0x6b6   : > { %4007 = vadd.xlane.f32.xlu1 %v4006_v1 }
 0x6ca   : > { %4026 = vrot.lane.b32.xlu0 %v22233_v2, %s21259_s0 }
 0x6d8   : > { %v3987_v7 = vpop.xlane.xlu0 %3986 }
 0x6d9   : > { %v3993_v11 = vsub.f32 %v3977_v52, %v3987_v7 }
 0x6da   : > { %v3990_v14 = vpop.xlane.xlu1 %3989 }
 0x6db   : > { %v3999_v16 = vmul.f32 1.442695, %v3993_v11  ;;  %v3994_v17 = vsub.f32 %v3978_v54, %v3990_v14 }
 0x6dd   : > { %20558 = vpow2.f32 %v3999_v16  ;;  %v4001_v20 = vmul.f32 1.442695, %v3994_v17 }
 0x6df   : > { %20560 = vpow2.f32 %v4001_v20 }
 0x6e7   : > { %v20559_v23 = vpop.eup %20558 }
 0x6e8   : > { %v4009_v24 = vsel %vm3728_vm3, %v20559_v23, 0.0 }
 0x6e9   : > { %v20561_v26 = vpop.eup %20560  ;;  %4010 = vadd.xlane.f32.xlu1 %v4009_v24 }
 0x6ea   : > { %v4012_v34 = vsel %vm3728_vm3, %v20561_v26, 0.0 }
 0x6ed   : > { %4013 = vadd.xlane.f32.xlu1 %v4012_v34 }
 0x6fe   : > { %4074 = vrot.lane.b32.xlu1 %v22239_v10, %s21259_s0 }
 0x741   : > { %v4005_v2 = vpop.xlane.xlu0 %4004 }
 0x742   : > { %20562 = vrcp.f32 %v4005_v2 }
 0x743   : > { %v4008_v37 = vpop.xlane.xlu1 %4007 }
 0x744   : > { %20564 = vrcp.f32 %v4008_v37 }
 0x745   : > { %v4027_v39 = vpop.permute.xlu0 %4026 }
 0x746   : > { %18358 = vmatpush3.bf16.msra.mxu0 %v4027_v39 }
 0x747   : > { %18369 = vmatprep.subr.bf16.mxu0 %v21257_v25 }
 0x74c   : > { %v20563_v41 = vpop.eup %20562 }
 0x74d   : > { %v4019_v30 = vmul.f32 %v20563_v41, %v20555_v61 }
 0x74e   : > { %v20565_v12 = vpop.eup %20564 }
 0x74f   : > { %v4020_v45 = vmul.f32 %v20565_v12, %v20557_v0 }
 0x751   : > { %v4023_v28 = vpack.c.bf16 %v4020_v45, %v4019_v30 }
 0x753   : > { %18360 = vmatmul.mubr.msk.bf16.vlgmr.msra.gmra.mrb[36].mxu0 %vm3728_vm3, %v4023_v28 }
 0x754   : > { %18370 = vmatpush3.bf16.xpose.msra.mxu0 %v4127_v33  ;;  %18371 = vmatprep.mubr.msk.bf16.mxu0 %vm21258_vm0, %v21257_v25 }
 0x755   : > { %18381 = vmatprep.subr.bf16.mxu0 %v21257_v25 }
 0x75b   : > { %18372 = vmatmul.mubr.msk.bf16.vlgmr.msra.gmra.mrb[40].mxu0 %vm3621_vm1, %v22127_v35 }
 0x75c   : > { %18382 = vmatpush3.bf16.msra.mxu0 %v22235_v6  ;;  %18383 = vmatprep.mubr.msk.bf16.mxu0 %vm21258_vm0, %v21257_v25 }
 0x75d   : > { %18393 = vmatprep.subr.bf16.mxu0 %v21257_v25 }
 0x776   : > { %v4011_v10 = vpop.xlane.xlu1 %4010 }
 0x777   : > { %20566 = vrcp.f32 %v4011_v10 }
 0x77a   : > { %v4014_v42 = vpop.xlane.xlu1 %4013 }
 0x77b   : > { %20568 = vrcp.f32 %v4014_v42 }
 0x77e   : > { %v4075_v50 = vpop.permute.xlu1 %4074 }
 0x77f   : > { %18364 = vmatpush3.bf16.msra.mxu1 %v4075_v50 }
 0x780   : > { %18375 = vmatprep.subr.bf16.mxu1 %v21257_v25 }
 0x781   : > { %v20567_v52 = vpop.eup %20566 }
 0x782   : > { %v4021_v54 = vmul.f32 %v20567_v52, %v20559_v23 }
 0x785   : > { %v20569_v53 = vpop.eup %20568 }
 0x786   : > { %v4022_v46 = vmul.f32 %v20569_v53, %v20561_v26 }
 0x788   : > { %v4024_v15 = vpack.c.bf16 %v4022_v46, %v4021_v54 }
 0x78a   : > { %18366 = vmatmul.mubr.msk.bf16.vlgmr.msra.gmra.mrb[36].mxu1 %vm3728_vm3, %v4024_v15 }
 0x78b   : > { %18376 = vmatpush3.bf16.xpose.msra.mxu1 %v4174_v55  ;;  %18377 = vmatprep.mubr.msk.bf16.mxu1 %vm21258_vm0, %v21257_v25 }
 0x78c   : > { %18387 = vmatprep.subr.bf16.mxu1 %v21257_v25 }
 0x792   : > { %18378 = vmatmul.mubr.msk.bf16.vlgmr.msra.gmra.mrb[40].mxu1 %vm3621_vm1, %v22141_v48 }
 0x793   : > { %18388 = vmatpush3.bf16.msra.mxu1 %v22241_v13  ;;  %18389 = vmatprep.mubr.msk.bf16.mxu1 %vm21258_vm0, %v21257_v25 }
 0x794   : > { %18399 = vmatprep.subr.bf16.mxu1 %v21257_v25 }
 0x826   : > { %v22363_v57 = vpop.f32.mrb[36].mxu0 }
 0x827   : > { %v18361_v58 = vpop.f32.mrb[37].mxu0 }
 0x828   : > { %v22365_v29 = vpop.f32.mrb[38].mxu0 }
 0x829   : > { %v4121_v59 = vpack.c.bf16 %v22365_v29, %v22363_v57  ;;  %v18362_v61 = vpop.f32.mrb[39].mxu0  ;;  %v19580_v29 = vld [vmem:[%s21659_s30 + $0x4] ss:$16 sps:$4 sm:$0xff]  }
 0x82e   : > { %v4163_v63 = vpop.f32.mrb[40].mxu0 }
 0x82f   : > { %v4217_v0 = vmul.f32 0.044194173, %v4163_v63  ;;  %v18373_v1 = vpop.f32.mrb[41].mxu0 }
 0x830   : > { %v4166_v7 = vpop.f32.mrb[42].mxu0 }
 0x831   : > { %v4218_v11 = vmul.f32 0.044194173, %v4166_v7  ;;  %v18374_v14 = vpop.f32.mrb[43].mxu0  ;;  %v4221_v16 = vsel %vm22257_vm2, %v4217_v0, -1e+30 }
 0x832   : > { %v4225_v17 = vsel %vm3728_vm3, %v4221_v16, -inf }
 0x833   : > { %4226 = vmax.xlane.f32.xlu0 %v4225_v17  ;;  %v4222_v20 = vsel %vm22261_vm4, %v4218_v11, -1e+30 }
 0x834   : > { %v4228_v23 = vsel %vm3728_vm3, %v4222_v20, -inf }
 0x835   : > { %4229 = vmax.xlane.f32.xlu1 %v4228_v23 }
 0x85d   : > { %v22375_v24 = vpop.f32.mrb[36].mxu1 }
 0x85e   : > { %v18367_v26 = vpop.f32.mrb[37].mxu1 }
 0x85f   : > { %v22377_v34 = vpop.f32.mrb[38].mxu1 }
 0x860   : > { %v4122_v2 = vpack.c.bf16 %v22377_v34, %v22375_v24  ;;  %v18368_v37 = vpop.f32.mrb[39].mxu1 }
 0x865   : > { %v4210_v39 = vpop.f32.mrb[40].mxu1 }
 0x866   : > { %v4219_v41 = vmul.f32 0.044194173, %v4210_v39  ;;  %v18379_v12 = vpop.f32.mrb[41].mxu1 }
 0x867   : > { %v4213_v30 = vpop.f32.mrb[42].mxu1 }
 0x868   : > { %v4220_v45 = vmul.f32 0.044194173, %v4213_v30  ;;  %v18380_v28 = vpop.f32.mrb[43].mxu1  ;;  %v4223_v33 = vsel %vm22257_vm2, %v4219_v41, -1e+30 }
 0x869   : > { %v4231_v10 = vsel %vm3728_vm3, %v4223_v33, -inf }
 0x86a   : > { %4232 = vmax.xlane.f32.xlu0 %v4231_v10  ;;  %v4224_v42 = vsel %vm22261_vm4, %v4220_v45, -1e+30 }
 0x86b   : > { %v4234_v50 = vsel %vm3728_vm3, %v4224_v42, -inf }
 0x86e   : > { %4235 = vmax.xlane.f32.xlu0 %v4234_v50 }
 0x8c0   : > { %v4227_v52 = vpop.xlane.xlu0 %4226 }
 0x8c1   : > { %v4237_v53 = vsub.f32 %v4221_v16, %v4227_v52 }
 0x8c2   : > { %v4230_v54 = vpop.xlane.xlu1 %4229 }
 0x8c3   : > { %v4241_v46 = vmul.f32 1.442695, %v4237_v53  ;;  %v4238_v15 = vsub.f32 %v4222_v20, %v4230_v54 }
 0x8c5   : > { %20570 = vpow2.f32 %v4241_v46  ;;  %v4243_v55 = vmul.f32 1.442695, %v4238_v15 }
 0x8c7   : > { %20572 = vpow2.f32 %v4243_v55 }
 0x8cf   : > { %v20571_v58 = vpop.eup %20570 }
 0x8d0   : > { %v4249_v61 = vsel %vm3728_vm3, %v20571_v58, 0.0 }
 0x8d1   : > { %v20573_v63 = vpop.eup %20572  ;;  %4250 = vadd.xlane.f32.xlu0 %v4249_v61 }
 0x8d2   : > { %v4252_v0 = vsel %vm3728_vm3, %v20573_v63, 0.0 }
 0x8d3   : > { %4253 = vadd.xlane.f32.xlu1 %v4252_v0 }
 0x8e4   : > { %4362 = vrot.lane.b32.xlu1 %v22127_v35, %s21259_s0 }
 0x8e7   : > { %4365 = vrot.lane.b32.xlu0 %v22205_v47, %s21259_s0 }
 0x8f7   : > { %v4233_v1 = vpop.xlane.xlu0 %4232 }
 0x8f8   : > { %v4239_v7 = vsub.f32 %v4223_v33, %v4233_v1 }
 0x8fa   : > { %v4245_v11 = vmul.f32 1.442695, %v4239_v7 }
 0x8fb   : > { %v4236_v14 = vpop.xlane.xlu0 %4235 }
 0x8fc   : > { %20574 = vpow2.f32 %v4245_v11  ;;  %v4240_v16 = vsub.f32 %v4224_v42, %v4236_v14 }
 0x8fe   : > { %v4247_v17 = vmul.f32 1.442695, %v4240_v16 }
 0x900   : > { %20576 = vpow2.f32 %v4247_v17 }
 0x906   : > { %v20575_v20 = vpop.eup %20574 }
 0x907   : > { %v4255_v23 = vsel %vm3728_vm3, %v20575_v20, 0.0 }
 0x908   : > { %4256 = vadd.xlane.f32.xlu1 %v4255_v23 }
 0x90a   : > { %v20577_v26 = vpop.eup %20576 }
 0x90b   : > { %v4258_v37 = vsel %vm3728_vm3, %v20577_v26, 0.0 }
 0x90c   : > { %4259 = vadd.xlane.f32.xlu0 %v4258_v37 }
 0x919   : > { %4415 = vrot.lane.b32.xlu1 %v22141_v48, %s21259_s0 }
 0x922   : > { %4418 = vrot.lane.b32.xlu0 %v22212_v51, %s21259_s0 }
 0x95e   : > { %v4251_v35 = vpop.xlane.xlu0 %4250 }
 0x95f   : > { %20578 = vrcp.f32 %v4251_v35 }
 0x960   : > { %v4254_v47 = vpop.xlane.xlu1 %4253 }
 0x961   : > { %20580 = vrcp.f32 %v4254_v47 }
 0x962   : > { %v4366_v45 = vpop.permute.xlu0 %4365 }
 0x963   : > { %v4371_v33 = vsel %vm3621_vm1, %v4366_v45, 0 }
 0x964   : > { %v4363_v48 = vpop.permute.xlu1 %4362 }
 0x969   : > { %v20579_v39 = vpop.eup %20578 }
 0x96a   : > { %v4265_v12 = vmul.f32 %v20579_v39, %v20571_v58 }
 0x96b   : > { %v20581_v41 = vpop.eup %20580 }
 0x96c   : > { %v4266_v30 = vmul.f32 %v20581_v41, %v20573_v63 }
 0x96e   : > { %v4269_v28 = vpack.c.bf16 %v4266_v30, %v4265_v12 }
 0x970   : > { %18384 = vmatmul.mubr.msk.bf16.vlgmr.msra.gmra.mrb[44].mxu0 %vm3728_vm3, %v4269_v28 }
 0x971   : > { %18394 = vmatpush3.bf16.xpose.msra.mxu0 %v4371_v33  ;;  %18395 = vmatprep.mubr.msk.bf16.mxu0 %vm21258_vm0, %v21257_v25 }
 0x972   : > { %18405 = vmatprep.subr.bf16.mxu0 %v21257_v25 }
 0x978   : > { %18396 = vmatmul.mubr.msk.bf16.vlgmr.msra.gmra.mrb[48].mxu0 %vm3621_vm1, %v4363_v48 }
 0x979   : > { %18407 = vmatprep.mubr.msk.bf16.mxu0 %vm21258_vm0, %v21257_v25 }
 0x995   : > { %v4257_v51 = vpop.xlane.xlu1 %4256 }
 0x996   : > { %20582 = vrcp.f32 %v4257_v51 }
 0x999   : > { %v4260_v10 = vpop.xlane.xlu0 %4259  ;;  %v4416_v55 = vpop.permute.xlu1 %4415 }
 0x99a   : > { %20584 = vrcp.f32 %v4260_v10 }
 0x99d   : > { %v4419_v54 = vpop.permute.xlu0 %4418 }
 0x99e   : > { %v4424_v15 = vsel %vm3621_vm1, %v4419_v54, 0 }
 0x9a0   : > { %v20583_v42 = vpop.eup %20582 }
 0x9a1   : > { %v4267_v52 = vmul.f32 %v20583_v42, %v20575_v20 }
 0x9a4   : > { %v20585_v50 = vpop.eup %20584 }
 0x9a5   : > { %v4268_v53 = vmul.f32 %v20585_v50, %v20577_v26 }
 0x9a7   : > { %v4270_v46 = vpack.c.bf16 %v4268_v53, %v4267_v52 }
 0x9a9   : > { %18390 = vmatmul.mubr.msk.bf16.vlgmr.msra.gmra.mrb[44].mxu1 %vm3728_vm3, %v4270_v46 }
 0x9aa   : > { %18400 = vmatpush3.bf16.xpose.msra.mxu1 %v4424_v15  ;;  %18401 = vmatprep.mubr.msk.bf16.mxu1 %vm21258_vm0, %v21257_v25 }
 0x9ab   : > { %18411 = vmatprep.subr.bf16.mxu1 %v21257_v25 }
 0x9b1   : > { %18402 = vmatmul.mubr.msk.bf16.vlgmr.msra.gmra.mrb[48].mxu1 %vm3621_vm1, %v4416_v55 }
 0x9b2   : > { %18413 = vmatprep.mubr.msk.bf16.mxu1 %vm21258_vm0, %v21257_v25 }
 0xa43   : > { %v22415_v58 = vpop.f32.mrb[44].mxu0 }
 0xa44   : > { %v18385_v61 = vpop.f32.mrb[45].mxu0 }
 0xa45   : > { %v22417_v63 = vpop.f32.mrb[46].mxu0 }
 0xa46   : > { %v4359_v0 = vpack.c.bf16 %v22417_v63, %v22415_v58  ;;  %v18386_v1 = vpop.f32.mrb[47].mxu0  ;;  %v19587_v58 = vld [vmem:[%s21659_s30 + $0x60] ss:$16 sps:$4 sm:$0xff]   ;;  %v19592_v63 = vld [vmem:[%s21659_s30 + $0x84] ss:$16 sps:$4 sm:$0xff]  }
 0xa4b   : > { %v4407_v7 = vpop.f32.mrb[48].mxu0 }
 0xa4c   : > { %v4467_v11 = vmul.f32 0.044194173, %v4407_v7  ;;  %v18397_v14 = vpop.f32.mrb[49].mxu0 }
 0xa4d   : > { %v4410_v16 = vpop.f32.mrb[50].mxu0 }
 0xa4e   : > { %v4468_v17 = vmul.f32 0.044194173, %v4410_v16  ;;  %v18398_v20 = vpop.f32.mrb[51].mxu0  ;;  %v4471_v23 = vsel %vm22257_vm2, %v4467_v11, -1e+30 }
 0xa4f   : > { %v4475_v26 = vsel %vm3728_vm3, %v4471_v23, -inf }
 0xa50   : > { %4476 = vmax.xlane.f32.xlu1 %v4475_v26  ;;  %v4472_v37 = vsel %vm22261_vm4, %v4468_v17, -1e+30 }
 0xa51   : > { %v4478_v35 = vsel %vm3728_vm3, %v4472_v37, -inf }
 0xa52   : > { %4479 = vmax.xlane.f32.xlu0 %v4478_v35 }
 0xa7c   : > { %v22427_v47 = vpop.f32.mrb[44].mxu1 }
 0xa7d   : > { %v18391_v39 = vpop.f32.mrb[45].mxu1 }
 0xa7e   : > { %v22429_v41 = vpop.f32.mrb[46].mxu1 }
 0xa7f   : > { %v4360_v12 = vpack.c.bf16 %v22429_v41, %v22427_v47  ;;  %v18392_v30 = vpop.f32.mrb[47].mxu1  ;;  %v19632_v41 = vld [vmem:[%s21659_s30 + $0x48] ss:$16 sps:$4 sm:$0xff]  }
 0xa84   : > { %v4460_v45 = vpop.f32.mrb[48].mxu1 }
 0xa85   : > { %v4469_v28 = vmul.f32 0.044194173, %v4460_v45  ;;  %v18403_v33 = vpop.f32.mrb[49].mxu1 }
 0xa86   : > { %v4463_v48 = vpop.f32.mrb[50].mxu1 }
 0xa87   : > { %v4470_v51 = vmul.f32 0.044194173, %v4463_v48  ;;  %v18404_v10 = vpop.f32.mrb[51].mxu1  ;;  %v4473_v42 = vsel %vm22257_vm2, %v4469_v28, -1e+30 }
 0xa88   : > { %v4481_v50 = vsel %vm3728_vm3, %v4473_v42, -inf }
 0xa89   : > { %4482 = vmax.xlane.f32.xlu0 %v4481_v50  ;;  %v4474_v52 = vsel %vm22261_vm4, %v4470_v51, -1e+30 }
 0xa8a   : > { %v4484_v53 = vsel %vm3728_vm3, %v4474_v52, -inf }
 0xa8b   : > { %4485 = vmax.xlane.f32.xlu1 %v4484_v53  ;;  %v4623_v53 = vsel %vm3621_vm1, %v22225_v56, 0 }
 0xadd   : > { %v4477_v54 = vpop.xlane.xlu1 %4476 }
 0xade   : > { %v4487_v46 = vsub.f32 %v4471_v23, %v4477_v54 }
 0xadf   : > { %v4480_v15 = vpop.xlane.xlu0 %4479 }
 0xae0   : > { %v4491_v55 = vmul.f32 1.442695, %v4487_v46  ;;  %v4488_v61 = vsub.f32 %v4472_v37, %v4480_v15 }
 0xae2   : > { %20586 = vpow2.f32 %v4491_v55  ;;  %v4493_v1 = vmul.f32 1.442695, %v4488_v61 }
 0xae4   : > { %20588 = vpow2.f32 %v4493_v1 }
 0xaec   : > { %v20587_v7 = vpop.eup %20586 }
 0xaed   : > { %v4499_v11 = vsel %vm3728_vm3, %v20587_v7, 0.0 }
 0xaee   : > { %v20589_v14 = vpop.eup %20588  ;;  %4500 = vadd.xlane.f32.xlu0 %v4499_v11  ;;  %v4670_v11 = vsel %vm3621_vm1, %v22229_v60, 0 }
 0xaef   : > { %v4502_v16 = vsel %vm3728_vm3, %v20589_v14, 0.0 }
 0xaf0   : > { %4503 = vadd.xlane.f32.xlu1 %v4502_v16 }
 0xb04   : > { %4522 = vrot.lane.b32.xlu0 %v22235_v6, %s21259_s0 }
 0xb16   : > { %v4483_v17 = vpop.xlane.xlu0 %4482 }
 0xb17   : > { %v4489_v20 = vsub.f32 %v4473_v42, %v4483_v17 }
 0xb18   : > { %v4486_v23 = vpop.xlane.xlu1 %4485 }
 0xb19   : > { %v4495_v26 = vmul.f32 1.442695, %v4489_v20  ;;  %v4490_v35 = vsub.f32 %v4474_v52, %v4486_v23 }
 0xb1b   : > { %20590 = vpow2.f32 %v4495_v26  ;;  %v4497_v37 = vmul.f32 1.442695, %v4490_v35 }
 0xb1d   : > { %20592 = vpow2.f32 %v4497_v37 }
 0xb25   : > { %v20591_v39 = vpop.eup %20590 }
 0xb26   : > { %v4505_v30 = vsel %vm3728_vm3, %v20591_v39, 0.0 }
 0xb27   : > { %v20593_v45 = vpop.eup %20592  ;;  %4506 = vadd.xlane.f32.xlu1 %v4505_v30 }
 0xb28   : > { %v4508_v28 = vsel %vm3728_vm3, %v20593_v45, 0.0 }
 0xb2b   : > { %4509 = vadd.xlane.f32.xlu1 %v4508_v28 }
 0xb3c   : > { %4570 = vrot.lane.b32.xlu1 %v22241_v13, %s21259_s0 }
 0xb7b   : > { %v4501_v6 = vpop.xlane.xlu0 %4500 }
 0xb7c   : > { %20594 = vrcp.f32 %v4501_v6 }
 0xb7d   : > { %v4504_v33 = vpop.xlane.xlu1 %4503 }
 0xb7e   : > { %20596 = vrcp.f32 %v4504_v33 }
 0xb7f   : > { %v4523_v48 = vpop.permute.xlu0 %4522 }
 0xb80   : > { %18406 = vmatpush3.bf16.msra.mxu0 %v4523_v48 }
 0xb81   : > { %18417 = vmatprep.subr.bf16.mxu0 %v21257_v25 }
 0xb86   : > { %v20595_v51 = vpop.eup %20594 }
 0xb87   : > { %v4515_v42 = vmul.f32 %v20595_v51, %v20587_v7 }
 0xb88   : > { %v20597_v10 = vpop.eup %20596 }
 0xb89   : > { %v4516_v50 = vmul.f32 %v20597_v10, %v20589_v14 }
 0xb8b   : > { %v4519_v52 = vpack.c.bf16 %v4516_v50, %v4515_v42 }
 0xb8d   : > { %18408 = vmatmul.mubr.msk.bf16.vlgmr.msra.gmra.mrb[52].mxu0 %vm3728_vm3, %v4519_v52 }
 0xb8e   : > { %18418 = vmatpush3.bf16.xpose.msra.mxu0 %v4623_v53  ;;  %18419 = vmatprep.mubr.msk.bf16.mxu0 %vm21258_vm0, %v21257_v25 }
 0xb8f   : > { %18429 = vmatprep.subr.bf16.mxu0 %v21257_v25 }
 0xb95   : > { %18420 = vmatmul.mubr.msk.bf16.vlgmr.msra.gmra.mrb[56].mxu0 %vm3621_vm1, %v22163_v3 }
 0xb96   : > { %18430 = vmatpush3.bf16.msra.mxu0 %v22245_v19  ;;  %18431 = vmatprep.mubr.msk.bf16.mxu0 %vm21258_vm0, %v21257_v25 }
 0xb97   : > { %18441 = vmatprep.subr.bf16.mxu0 %v21257_v25 }
 0xbb4   : > { %v4507_v13 = vpop.xlane.xlu1 %4506 }
 0xbb5   : > { %20598 = vrcp.f32 %v4507_v13 }
 0xbb8   : > { %v4510_v54 = vpop.xlane.xlu1 %4509 }
 0xbb9   : > { %20600 = vrcp.f32 %v4510_v54 }
 0xbbc   : > { %v4571_v46 = vpop.permute.xlu1 %4570 }
 0xbbd   : > { %18412 = vmatpush3.bf16.msra.mxu1 %v4571_v46 }
 0xbbe   : > { %18423 = vmatprep.subr.bf16.mxu1 %v21257_v25 }
 0xbbf   : > { %v20599_v15 = vpop.eup %20598 }
 0xbc0   : > { %v4517_v61 = vmul.f32 %v20599_v15, %v20591_v39 }
 0xbc3   : > { %v20601_v55 = vpop.eup %20600 }
 0xbc4   : > { %v4518_v1 = vmul.f32 %v20601_v55, %v20593_v45 }
 0xbc6   : > { %v4520_v7 = vpack.c.bf16 %v4518_v1, %v4517_v61 }
 0xbc8   : > { %18414 = vmatmul.mubr.msk.bf16.vlgmr.msra.gmra.mrb[52].mxu1 %vm3728_vm3, %v4520_v7 }
 0xbc9   : > { %18424 = vmatpush3.bf16.xpose.msra.mxu1 %v4670_v11  ;;  %18425 = vmatprep.mubr.msk.bf16.mxu1 %vm21258_vm0, %v21257_v25 }
 0xbca   : > { %18435 = vmatprep.subr.bf16.mxu1 %v21257_v25 }
 0xbd0   : > { %18426 = vmatmul.mubr.msk.bf16.vlgmr.msra.gmra.mrb[56].mxu1 %vm3621_vm1, %v22174_v18 }
 0xbd1   : > { %18436 = vmatpush3.bf16.msra.mxu1 %v22249_v32  ;;  %18437 = vmatprep.mubr.msk.bf16.mxu1 %vm21258_vm0, %v21257_v25 }
 0xbd2   : > { %18447 = vmatprep.subr.bf16.mxu1 %v21257_v25 }
 0xc60   : > { %v22473_v14 = vpop.f32.mrb[52].mxu0 }
 0xc61   : > { %v18409_v16 = vpop.f32.mrb[53].mxu0 }
 0xc62   : > { %v22475_v17 = vpop.f32.mrb[54].mxu0 }
 0xc63   : > { %v4617_v20 = vpack.c.bf16 %v22475_v17, %v22473_v14  ;;  %v18410_v23 = vpop.f32.mrb[55].mxu0 }
 0xc68   : > { %v4659_v26 = vpop.f32.mrb[56].mxu0 }
 0xc69   : > { %v4713_v35 = vmul.f32 0.044194173, %v4659_v26  ;;  %v18421_v37 = vpop.f32.mrb[57].mxu0 }
 0xc6a   : > { %v4662_v39 = vpop.f32.mrb[58].mxu0 }
 0xc6b   : > { %v4714_v30 = vmul.f32 0.044194173, %v4662_v39  ;;  %v18422_v45 = vpop.f32.mrb[59].mxu0  ;;  %v4717_v28 = vsel %vm22257_vm2, %v4713_v35, -1e+30 }
 0xc6c   : > { %v4721_v6 = vsel %vm3728_vm3, %v4717_v28, -inf }
 0xc6d   : > { %4722 = vmax.xlane.f32.xlu0 %v4721_v6  ;;  %v4718_v33 = vsel %vm22261_vm4, %v4714_v30, -1e+30 }
 0xc6e   : > { %v4724_v48 = vsel %vm3728_vm3, %v4718_v33, -inf }
 0xc6f   : > { %4725 = vmax.xlane.f32.xlu1 %v4724_v48 }
 0xc9b   : > { %v22485_v51 = vpop.f32.mrb[52].mxu1 }
 0xc9c   : > { %v18415_v10 = vpop.f32.mrb[53].mxu1 }
 0xc9d   : > { %v22487_v42 = vpop.f32.mrb[54].mxu1 }
 0xc9e   : > { %v4618_v50 = vpack.c.bf16 %v22487_v42, %v22485_v51  ;;  %v18416_v52 = vpop.f32.mrb[55].mxu1 }
 0xca3   : > { %v4706_v53 = vpop.f32.mrb[56].mxu1 }
 0xca4   : > { %v4715_v13 = vmul.f32 0.044194173, %v4706_v53  ;;  %v18427_v54 = vpop.f32.mrb[57].mxu1 }
 0xca5   : > { %v4709_v46 = vpop.f32.mrb[58].mxu1 }
 0xca6   : > { %v4716_v15 = vmul.f32 0.044194173, %v4709_v46  ;;  %v18428_v55 = vpop.f32.mrb[59].mxu1  ;;  %v4719_v61 = vsel %vm22257_vm2, %v4715_v13, -1e+30 }
 0xca7   : > { %v4727_v1 = vsel %vm3728_vm3, %v4719_v61, -inf }
 0xca8   : > { %4728 = vmax.xlane.f32.xlu0 %v4727_v1  ;;  %v4720_v7 = vsel %vm22261_vm4, %v4716_v15, -1e+30 }
 0xca9   : > { %v4730_v11 = vsel %vm3728_vm3, %v4720_v7, -inf }
 0xcac   : > { %4731 = vmax.xlane.f32.xlu0 %v4730_v11 }
 0xcfa   : > { %v4723_v16 = vpop.xlane.xlu0 %4722 }
 0xcfb   : > { %v4733_v23 = vsub.f32 %v4717_v28, %v4723_v16 }
 0xcfc   : > { %v4726_v26 = vpop.xlane.xlu1 %4725 }
 0xcfd   : > { %v4737_v35 = vmul.f32 1.442695, %v4733_v23  ;;  %v4734_v37 = vsub.f32 %v4718_v33, %v4726_v26 }
 0xcff   : > { %20602 = vpow2.f32 %v4737_v35  ;;  %v4739_v39 = vmul.f32 1.442695, %v4734_v37 }
 0xd01   : > { %20604 = vpow2.f32 %v4739_v39 }
 0xd09   : > { %v20603_v30 = vpop.eup %20602 }
 0xd0a   : > { %v4745_v45 = vsel %vm3728_vm3, %v20603_v30, 0.0 }
 0xd0b   : > { %v20605_v6 = vpop.eup %20604  ;;  %4746 = vadd.xlane.f32.xlu0 %v4745_v45 }
 0xd0c   : > { %v4748_v48 = vsel %vm3728_vm3, %v20605_v6, 0.0 }
 0xd0d   : > { %4749 = vadd.xlane.f32.xlu1 %v4748_v48 }
 0xd1e   : > { %4858 = vrot.lane.b32.xlu1 %v22163_v3, %s21259_s0 }
 0xd21   : > { %4861 = vrot.lane.b32.xlu0 %v22225_v56, %s21259_s0 }
 0xd35   : > { %v4729_v28 = vpop.xlane.xlu0 %4728 }
 0xd36   : > { %v4735_v10 = vsub.f32 %v4719_v61, %v4729_v28 }
 0xd38   : > { %v4741_v33 = vmul.f32 1.442695, %v4735_v10 }
 0xd39   : > { %v4732_v52 = vpop.xlane.xlu0 %4731 }
 0xd3a   : > { %20606 = vpow2.f32 %v4741_v33  ;;  %v4736_v53 = vsub.f32 %v4720_v7, %v4732_v52 }
 0xd3c   : > { %v4743_v13 = vmul.f32 1.442695, %v4736_v53 }
 0xd3e   : > { %20608 = vpow2.f32 %v4743_v13 }
 0xd44   : > { %v20607_v54 = vpop.eup %20606 }
 0xd45   : > { %v4751_v46 = vsel %vm3728_vm3, %v20607_v54, 0.0 }
 0xd46   : > { %4752 = vadd.xlane.f32.xlu1 %v4751_v46 }
 0xd48   : > { %v20609_v15 = vpop.eup %20608 }
 0xd49   : > { %v4754_v55 = vsel %vm3728_vm3, %v20609_v15, 0.0 }
 0xd4a   : > { %4755 = vadd.xlane.f32.xlu0 %v4754_v55 }
 0xd57   : > { %4911 = vrot.lane.b32.xlu1 %v22174_v18, %s21259_s0 }
 0xd60   : > { %4914 = vrot.lane.b32.xlu0 %v22229_v60, %s21259_s0 }
 0xd98   : > { %v4747_v3 = vpop.xlane.xlu0 %4746 }
 0xd99   : > { %20610 = vrcp.f32 %v4747_v3 }
 0xd9a   : > { %v4750_v56 = vpop.xlane.xlu1 %4749 }
 0xd9b   : > { %20612 = vrcp.f32 %v4750_v56 }
 0xd9c   : > { %v4862_v16 = vpop.permute.xlu0 %4861 }
 0xd9d   : > { %v4867_v26 = vsel %vm3621_vm1, %v4862_v16, 0 }
 0xd9e   : > { %v4859_v18 = vpop.permute.xlu1 %4858 }
 0xda3   : > { %v20611_v61 = vpop.eup %20610 }
 0xda4   : > { %v4761_v7 = vmul.f32 %v20611_v61, %v20603_v30 }
 0xda5   : > { %v20613_v1 = vpop.eup %20612 }
 0xda6   : > { %v4762_v11 = vmul.f32 %v20613_v1, %v20605_v6 }
 0xda8   : > { %v4765_v23 = vpack.c.bf16 %v4762_v11, %v4761_v7 }
 0xdaa   : > { %18432 = vmatmul.mubr.msk.bf16.vlgmr.msra.gmra.mrb[60].mxu0 %vm3728_vm3, %v4765_v23 }
 0xdab   : > { %18442 = vmatpush3.bf16.xpose.msra.mxu0 %v4867_v26  ;;  %18443 = vmatprep.mubr.msk.bf16.mxu0 %vm21258_vm0, %v21257_v25 }
 0xdac   : > { %18453 = vmatprep.subr.bf16.mxu0 %v21257_v25 }
 0xdb2   : > { %18444 = vmatmul.mubr.msk.bf16.vlgmr.msra.gmra.mrb[64].mxu0 %vm3621_vm1, %v4859_v18 }
 0xdb3   : > { %18455 = vmatprep.mubr.msk.bf16.mxu0 %vm21258_vm0, %v21257_v25 }
 0xdd3   : > { %v4753_v60 = vpop.xlane.xlu1 %4752 }
 0xdd4   : > { %20614 = vrcp.f32 %v4753_v60 }
 0xdd7   : > { %v4756_v35 = vpop.xlane.xlu0 %4755  ;;  %v4912_v10 = vpop.permute.xlu1 %4911 }
 0xdd8   : > { %20616 = vrcp.f32 %v4756_v35 }
 0xddb   : > { %v4915_v6 = vpop.permute.xlu0 %4914 }
 0xddc   : > { %v4920_v28 = vsel %vm3621_vm1, %v4915_v6, 0 }
 0xdde   : > { %v20615_v37 = vpop.eup %20614 }
 0xddf   : > { %v4763_v30 = vmul.f32 %v20615_v37, %v20607_v54 }
 0xde2   : > { %v20617_v39 = vpop.eup %20616 }
 0xde3   : > { %v4764_v45 = vmul.f32 %v20617_v39, %v20609_v15 }
 0xde5   : > { %v4766_v48 = vpack.c.bf16 %v4764_v45, %v4763_v30 }
 0xde7   : > { %18438 = vmatmul.mubr.msk.bf16.vlgmr.msra.gmra.mrb[60].mxu1 %vm3728_vm3, %v4766_v48 }
 0xde8   : > { %18448 = vmatpush3.bf16.xpose.msra.mxu1 %v4920_v28  ;;  %18449 = vmatprep.mubr.msk.bf16.mxu1 %vm21258_vm0, %v21257_v25 }
 0xde9   : > { %18459 = vmatprep.subr.bf16.mxu1 %v21257_v25 }
 0xdef   : > { %18450 = vmatmul.mubr.msk.bf16.vlgmr.msra.gmra.mrb[64].mxu1 %vm3621_vm1, %v4912_v10 }
 0xdf0   : > { %18461 = vmatprep.mubr.msk.bf16.mxu1 %vm21258_vm0, %v21257_v25 }
 0xe7d   : > { %v22525_v33 = vpop.f32.mrb[60].mxu0 }
 0xe7e   : > { %v18433_v52 = vpop.f32.mrb[61].mxu0 }
 0xe7f   : > { %v22527_v53 = vpop.f32.mrb[62].mxu0 }
 0xe80   : > { %v4855_v13 = vpack.c.bf16 %v22527_v53, %v22525_v33  ;;  %v18434_v54 = vpop.f32.mrb[63].mxu0  ;;  %v22880_v53 = vsub.s32 0, %v22253_v38 }
 0xe85   : > { %v4903_v46 = vpop.f32.mrb[64].mxu0 }
 0xe86   : > { %v4963_v15 = vmul.f32 0.044194173, %v4903_v46  ;;  %v18445_v55 = vpop.f32.mrb[65].mxu0 }
 0xe87   : > { %v4906_v3 = vpop.f32.mrb[66].mxu0 }
 0xe88   : > { %v4964_v56 = vmul.f32 0.044194173, %v4906_v3  ;;  %v18446_v61 = vpop.f32.mrb[67].mxu0  ;;  %v4967_v1 = vsel %vm22257_vm2, %v4963_v15, -1e+30 }
 0xe89   : > { %v4971_v7 = vsel %vm3728_vm3, %v4967_v1, -inf }
 0xe8a   : > { %4972 = vmax.xlane.f32.xlu1 %v4971_v7  ;;  %v4968_v11 = vsel %vm22261_vm4, %v4964_v56, -1e+30 }
 0xe8b   : > { %v4974_v16 = vsel %vm3728_vm3, %v4968_v11, -inf }
 0xe8c   : > { %4975 = vmax.xlane.f32.xlu0 %v4974_v16 }
 0xeba   : > { %v22537_v23 = vpop.f32.mrb[60].mxu1 }
 0xebb   : > { %v18439_v26 = vpop.f32.mrb[61].mxu1 }
 0xebc   : > { %v22539_v18 = vpop.f32.mrb[62].mxu1 }
 0xebd   : > { %v4856_v60 = vpack.c.bf16 %v22539_v18, %v22537_v23  ;;  %v18440_v35 = vpop.f32.mrb[63].mxu1  ;;  %v22892_v23 = vsub.s32 3, %v22253_v38 }
 0xec2   : > { %v4956_v37 = vpop.f32.mrb[64].mxu1 }
 0xec3   : > { %v4965_v39 = vmul.f32 0.044194173, %v4956_v37  ;;  %v18451_v30 = vpop.f32.mrb[65].mxu1 }
 0xec4   : > { %v4959_v45 = vpop.f32.mrb[66].mxu1 }
 0xec5   : > { %v4966_v6 = vmul.f32 0.044194173, %v4959_v45  ;;  %v18452_v48 = vpop.f32.mrb[67].mxu1  ;;  %v4969_v28 = vsel %vm22257_vm2, %v4965_v39, -1e+30 }
 0xec6   : > { %v4977_v10 = vsel %vm3728_vm3, %v4969_v28, -inf }
 0xec7   : > { %4978 = vmax.xlane.f32.xlu0 %v4977_v10  ;;  %v4970_v52 = vsel %vm22261_vm4, %v4966_v6, -1e+30 }
 0xec8   : > { %v4980_v54 = vsel %vm3728_vm3, %v4970_v52, -inf }
 0xec9   : > { %4981 = vmax.xlane.f32.xlu1 %v4980_v54 }
 0xf17   : > { %v4973_v46 = vpop.xlane.xlu1 %4972 }
 0xf18   : > { %v4983_v15 = vsub.f32 %v4967_v1, %v4973_v46 }
 0xf19   : > { %v4976_v55 = vpop.xlane.xlu0 %4975 }
 0xf1a   : > { %v4987_v3 = vmul.f32 1.442695, %v4983_v15  ;;  %v4984_v56 = vsub.f32 %v4968_v11, %v4976_v55 }
 0xf1c   : > { %20618 = vpow2.f32 %v4987_v3  ;;  %v4989_v61 = vmul.f32 1.442695, %v4984_v56 }
 0xf1e   : > { %20620 = vpow2.f32 %v4989_v61  ;;  %v5119_v61 = vsel %vm3621_vm1, %v22227_v27, 0 }
 0xf26   : > { %v20619_v7 = vpop.eup %20618 }
 0xf27   : > { %v4995_v16 = vsel %vm3728_vm3, %v20619_v7, 0.0 }
 0xf28   : > { %v20621_v26 = vpop.eup %20620  ;;  %4996 = vadd.xlane.f32.xlu0 %v4995_v16 }
 0xf29   : > { %v4998_v35 = vsel %vm3728_vm3, %v20621_v26, 0.0 }
 0xf2a   : > { %4999 = vadd.xlane.f32.xlu1 %v4998_v35 }
 0xf3e   : > { %5018 = vrot.lane.b32.xlu0 %v22245_v19, %s21259_s0 }
 0xf54   : > { %v4979_v37 = vpop.xlane.xlu0 %4978 }
 0xf55   : > { %v4985_v39 = vsub.f32 %v4969_v28, %v4979_v37 }
 0xf56   : > { %v4982_v1 = vpop.xlane.xlu1 %4981 }
 0xf57   : > { %v4991_v30 = vmul.f32 1.442695, %v4985_v39  ;;  %v4986_v45 = vsub.f32 %v4970_v52, %v4982_v1 }
 0xf59   : > { %20622 = vpow2.f32 %v4991_v30  ;;  %v4993_v11 = vmul.f32 1.442695, %v4986_v45  ;;  %v5166_v30 = vsel %vm3621_vm1, %v22231_v62, 0 }
 0xf5b   : > { %20624 = vpow2.f32 %v4993_v11 }
 0xf63   : > { %v20623_v6 = vpop.eup %20622 }
 0xf64   : > { %v5001_v48 = vsel %vm3728_vm3, %v20623_v6, 0.0 }
 0xf65   : > { %v20625_v10 = vpop.eup %20624  ;;  %5002 = vadd.xlane.f32.xlu1 %v5001_v48 }
 0xf66   : > { %v5004_v54 = vsel %vm3728_vm3, %v20625_v10, 0.0 }
 0xf69   : > { %5005 = vadd.xlane.f32.xlu1 %v5004_v54 }
 0xf7a   : > { %5066 = vrot.lane.b32.xlu1 %v22249_v32, %s21259_s0 }
 0xfb5   : > { %v4997_v19 = vpop.xlane.xlu0 %4996 }
 0xfb6   : > { %20626 = vrcp.f32 %v4997_v19 }
 0xfb7   : > { %v5000_v28 = vpop.xlane.xlu1 %4999 }
 0xfb8   : > { %20628 = vrcp.f32 %v5000_v28 }
 0xfb9   : > { %v5019_v46 = vpop.permute.xlu0 %5018 }
 0xfba   : > { %18454 = vmatpush3.bf16.msra.mxu0 %v5019_v46 }
 0xfbb   : > { %18465 = vmatprep.subr.bf16.mxu0 %v21257_v25 }
 0xfc0   : > { %v20627_v52 = vpop.eup %20626 }
 0xfc1   : > { %v5011_v55 = vmul.f32 %v20627_v52, %v20619_v7 }
 0xfc2   : > { %v20629_v15 = vpop.eup %20628 }
 0xfc3   : > { %v5012_v3 = vmul.f32 %v20629_v15, %v20621_v26 }
 0xfc5   : > { %v5015_v56 = vpack.c.bf16 %v5012_v3, %v5011_v55 }
 0xfc7   : > { %18456 = vmatmul.mubr.msk.bf16.vlgmr.msra.gmra.mrb[68].mxu0 %vm3728_vm3, %v5015_v56 }
 0xfc8   : > { %18466 = vmatpush3.bf16.xpose.msra.mxu0 %v5119_v61  ;;  %18467 = vmatprep.mubr.msk.bf16.mxu0 %vm21258_vm0, %v21257_v25 }
 0xfc9   : > { %18477 = vmatprep.subr.bf16.mxu0 %v21257_v25 }
 0xfcf   : > { %18468 = vmatmul.mubr.msk.bf16.vlgmr.msra.gmra.mrb[72].mxu0 %vm3621_vm1, %v22165_v5 }
 0xfd0   : > { %18478 = vmatpush3.bf16.msra.mxu0 %v22247_v22  ;;  %18479 = vmatprep.mubr.msk.bf16.mxu0 %vm21258_vm0, %v21257_v25 }
 0xfd1   : > { %18489 = vmatprep.subr.bf16.mxu0 %v21257_v25 }
 0xff2   : > { %v5003_v32 = vpop.xlane.xlu1 %5002 }
 0xff3   : > { %20630 = vrcp.f32 %v5003_v32 }
 0xff6   : > { %v5006_v7 = vpop.xlane.xlu1 %5005 }
 0xff7   : > { %20632 = vrcp.f32 %v5006_v7 }
 0xffa   : > { %v5067_v16 = vpop.permute.xlu1 %5066 }
 0xffb   : > { %18460 = vmatpush3.bf16.msra.mxu1 %v5067_v16 }
 0xffc   : > { %18471 = vmatprep.subr.bf16.mxu1 %v21257_v25 }
 0xffd   : > { %v20631_v26 = vpop.eup %20630 }
 0xffe   : > { %v5013_v37 = vmul.f32 %v20631_v26, %v20623_v6 }
0x1001   : > { %v20633_v35 = vpop.eup %20632 }
0x1002   : > { %v5014_v39 = vmul.f32 %v20633_v35, %v20625_v10 }
0x1004   : > { %v5016_v1 = vpack.c.bf16 %v5014_v39, %v5013_v37 }
0x1006   : > { %18462 = vmatmul.mubr.msk.bf16.vlgmr.msra.gmra.mrb[68].mxu1 %vm3728_vm3, %v5016_v1 }
0x1007   : > { %18472 = vmatpush3.bf16.xpose.msra.mxu1 %v5166_v30  ;;  %18473 = vmatprep.mubr.msk.bf16.mxu1 %vm21258_vm0, %v21257_v25 }
0x1008   : > { %18483 = vmatprep.subr.bf16.mxu1 %v21257_v25 }
0x100e   : > { %18474 = vmatmul.mubr.msk.bf16.vlgmr.msra.gmra.mrb[72].mxu1 %vm3621_vm1, %v22177_v21 }
0x100f   : > { %18484 = vmatpush3.bf16.msra.mxu1 %v22251_v36  ;;  %18485 = vmatprep.mubr.msk.bf16.mxu1 %vm21258_vm0, %v21257_v25 }
0x1010   : > { %18495 = vmatprep.subr.bf16.mxu1 %v21257_v25 }
0x109a   : > { %v22583_v45 = vpop.f32.mrb[68].mxu0 }
0x109b   : > { %v18457_v11 = vpop.f32.mrb[69].mxu0 }
0x109c   : > { %v22585_v6 = vpop.f32.mrb[70].mxu0 }
0x109d   : > { %v5113_v48 = vpack.c.bf16 %v22585_v6, %v22583_v45  ;;  %v18458_v10 = vpop.f32.mrb[71].mxu0  ;;  %v19583_v6 = vld [vmem:[%s21659_s30 + $0x24] ss:$16 sps:$4 sm:$0xff]  }
0x10a2   : > { %v5155_v54 = vpop.f32.mrb[72].mxu0 }
0x10a3   : > { %v5209_v19 = vmul.f32 0.044194173, %v5155_v54  ;;  %v18469_v28 = vpop.f32.mrb[73].mxu0 }
0x10a4   : > { %v5158_v46 = vpop.f32.mrb[74].mxu0 }
0x10a5   : > { %v5210_v52 = vmul.f32 0.044194173, %v5158_v46  ;;  %v18470_v15 = vpop.f32.mrb[75].mxu0  ;;  %v5213_v55 = vsel %vm22257_vm2, %v5209_v19, -1e+30 }
0x10a6   : > { %v5217_v3 = vsel %vm3728_vm3, %v5213_v55, -inf }
0x10a7   : > { %5218 = vmax.xlane.f32.xlu0 %v5217_v3  ;;  %v5214_v56 = vsel %vm22261_vm4, %v5210_v52, -1e+30 }
0x10a8   : > { %v5220_v61 = vsel %vm3728_vm3, %v5214_v56, -inf }
0x10a9   : > { %5221 = vmax.xlane.f32.xlu1 %v5220_v61 }
0x10d9   : > { %v22595_v32 = vpop.f32.mrb[68].mxu1 }
0x10da   : > { %v18463_v7 = vpop.f32.mrb[69].mxu1 }
0x10db   : > { %v22597_v16 = vpop.f32.mrb[70].mxu1 }
0x10dc   : > { %v5114_v26 = vpack.c.bf16 %v22597_v16, %v22595_v32  ;;  %v18464_v35 = vpop.f32.mrb[71].mxu1  ;;  %v19581_v32 = vld [vmem:[%s21659_s30 + $0x20] ss:$16 sps:$4 sm:$0xff]   ;;  %v19586_v16 = vld [vmem:[%s21659_s30 + $0x44] ss:$16 sps:$4 sm:$0xff]  }
0x10e1   : > { %v5202_v37 = vpop.f32.mrb[72].mxu1 }
0x10e2   : > { %v5211_v39 = vmul.f32 0.044194173, %v5202_v37  ;;  %v18475_v1 = vpop.f32.mrb[73].mxu1 }
0x10e3   : > { %v5205_v30 = vpop.f32.mrb[74].mxu1 }
0x10e4   : > { %v5212_v11 = vmul.f32 0.044194173, %v5205_v30  ;;  %v18476_v10 = vpop.f32.mrb[75].mxu1  ;;  %v5215_v54 = vsel %vm22257_vm2, %v5211_v39, -1e+30 }
0x10e5   : > { %v5223_v19 = vsel %vm3728_vm3, %v5215_v54, -inf }
0x10e6   : > { %5224 = vmax.xlane.f32.xlu0 %v5223_v19  ;;  %v5216_v28 = vsel %vm22261_vm4, %v5212_v11, -1e+30 }
0x10e7   : > { %v5226_v46 = vsel %vm3728_vm3, %v5216_v28, -inf }
0x10ea   : > { %5227 = vmax.xlane.f32.xlu0 %v5226_v46 }
0x1134   : > { %v5219_v52 = vpop.xlane.xlu0 %5218 }
0x1135   : > { %v5229_v15 = vsub.f32 %v5213_v55, %v5219_v52 }
0x1136   : > { %v5222_v3 = vpop.xlane.xlu1 %5221 }
0x1137   : > { %v5233_v61 = vmul.f32 1.442695, %v5229_v15  ;;  %v5230_v7 = vsub.f32 %v5214_v56, %v5222_v3 }
0x1139   : > { %20634 = vpow2.f32 %v5233_v61  ;;  %v5235_v35 = vmul.f32 1.442695, %v5230_v7 }
0x113b   : > { %20636 = vpow2.f32 %v5235_v35 }
0x1143   : > { %v20635_v37 = vpop.eup %20634 }
0x1144   : > { %v5241_v39 = vsel %vm3728_vm3, %v20635_v37, 0.0 }
0x1145   : > { %v20637_v1 = vpop.eup %20636  ;;  %5242 = vadd.xlane.f32.xlu0 %v5241_v39 }
0x1146   : > { %v5244_v30 = vsel %vm3728_vm3, %v20637_v1, 0.0 }
0x1147   : > { %5245 = vadd.xlane.f32.xlu1 %v5244_v30 }
0x1158   : > { %5354 = vrot.lane.b32.xlu1 %v22165_v5, %s21259_s0 }
0x115b   : > { %5357 = vrot.lane.b32.xlu0 %v22227_v27, %s21259_s0 }
0x1173   : > { %v5225_v55 = vpop.xlane.xlu0 %5224 }
0x1174   : > { %v5231_v11 = vsub.f32 %v5215_v54, %v5225_v55 }
0x1176   : > { %v5237_v56 = vmul.f32 1.442695, %v5231_v11 }
0x1177   : > { %v5228_v10 = vpop.xlane.xlu0 %5227 }
0x1178   : > { %20638 = vpow2.f32 %v5237_v56  ;;  %v5232_v19 = vsub.f32 %v5216_v28, %v5228_v10 }
0x117a   : > { %v5239_v46 = vmul.f32 1.442695, %v5232_v19 }
0x117c   : > { %20640 = vpow2.f32 %v5239_v46 }
0x1182   : > { %v20639_v52 = vpop.eup %20638 }
0x1183   : > { %v5247_v15 = vsel %vm3728_vm3, %v20639_v52, 0.0 }
0x1184   : > { %5248 = vadd.xlane.f32.xlu1 %v5247_v15 }
0x1186   : > { %v20641_v3 = vpop.eup %20640 }
0x1187   : > { %v5250_v61 = vsel %vm3728_vm3, %v20641_v3, 0.0 }
0x1188   : > { %5251 = vadd.xlane.f32.xlu0 %v5250_v61 }
0x1195   : > { %5407 = vrot.lane.b32.xlu1 %v22177_v21, %s21259_s0 }
0x119e   : > { %5410 = vrot.lane.b32.xlu0 %v22231_v62, %s21259_s0 }
0x11d2   : > { %v5243_v5 = vpop.xlane.xlu0 %5242 }
0x11d3   : > { %20642 = vrcp.f32 %v5243_v5 }
0x11d4   : > { %v5246_v27 = vpop.xlane.xlu1 %5245 }
0x11d5   : > { %20644 = vrcp.f32 %v5246_v27 }
0x11d6   : > { %v5358_v39 = vpop.permute.xlu0 %5357 }
0x11d7   : > { %v5363_v55 = vsel %vm3621_vm1, %v5358_v39, 0 }
0x11d8   : > { %v5355_v21 = vpop.permute.xlu1 %5354 }
0x11dd   : > { %v20643_v54 = vpop.eup %20642 }
0x11de   : > { %v5257_v7 = vmul.f32 %v20643_v54, %v20635_v37 }
0x11df   : > { %v20645_v28 = vpop.eup %20644 }
0x11e0   : > { %v5258_v35 = vmul.f32 %v20645_v28, %v20637_v1 }
0x11e2   : > { %v5261_v30 = vpack.c.bf16 %v5258_v35, %v5257_v7 }
0x11e4   : > { %18480 = vmatmul.mubr.msk.bf16.vlgmr.msra.gmra.mrb[76].mxu0 %vm3728_vm3, %v5261_v30 }
0x11e5   : > { %18490 = vmatpush3.bf16.xpose.msra.mxu0 %v5363_v55  ;;  %18491 = vmatprep.mubr.msk.bf16.mxu0 %vm21258_vm0, %v21257_v25 }
0x11e6   : > { %18501 = vmatprep.subr.bf16.mxu0 %v21257_v25 }
0x11ec   : > { %18492 = vmatmul.mubr.msk.bf16.vlgmr.msra.gmra.mrb[80].mxu0 %vm3621_vm1, %v5355_v21 }
0x11ed   : > { %18503 = vmatprep.mubr.msk.bf16.mxu0 %vm21258_vm0, %v21257_v25 }
0x1211   : > { %v5249_v62 = vpop.xlane.xlu1 %5248 }
0x1212   : > { %20646 = vrcp.f32 %v5249_v62 }
0x1215   : > { %v5252_v37 = vpop.xlane.xlu0 %5251  ;;  %v5408_v61 = vpop.permute.xlu1 %5407 }
0x1216   : > { %20648 = vrcp.f32 %v5252_v37 }
0x1219   : > { %v5411_v19 = vpop.permute.xlu0 %5410 }
0x121a   : > { %v5416_v15 = vsel %vm3621_vm1, %v5411_v19, 0 }
0x121c   : > { %v20647_v1 = vpop.eup %20646 }
0x121d   : > { %v5259_v56 = vmul.f32 %v20647_v1, %v20639_v52 }
0x1220   : > { %v20649_v11 = vpop.eup %20648 }
0x1221   : > { %v5260_v10 = vmul.f32 %v20649_v11, %v20641_v3 }
0x1223   : > { %v5262_v46 = vpack.c.bf16 %v5260_v10, %v5259_v56 }
0x1225   : > { %18486 = vmatmul.mubr.msk.bf16.vlgmr.msra.gmra.mrb[76].mxu1 %vm3728_vm3, %v5262_v46 }
0x1226   : > { %18496 = vmatpush3.bf16.xpose.msra.mxu1 %v5416_v15  ;;  %18497 = vmatprep.mubr.msk.bf16.mxu1 %vm21258_vm0, %v21257_v25 }
0x1227   : > { %18507 = vmatprep.subr.bf16.mxu1 %v21257_v25 }
0x122d   : > { %18498 = vmatmul.mubr.msk.bf16.vlgmr.msra.gmra.mrb[80].mxu1 %vm3621_vm1, %v5408_v61 }
0x122e   : > { %18509 = vmatprep.mubr.msk.bf16.mxu1 %vm21258_vm0, %v21257_v25 }
0x12b7   : > { %v22635_v52 = vpop.f32.mrb[76].mxu0 }
0x12b8   : > { %v18481_v3 = vpop.f32.mrb[77].mxu0 }
0x12b9   : > { %v22637_v5 = vpop.f32.mrb[78].mxu0 }
0x12ba   : > { %v5351_v27 = vpack.c.bf16 %v22637_v5, %v22635_v52  ;;  %v18482_v54 = vpop.f32.mrb[79].mxu0  ;;  %v22884_v52 = vsub.s32 1, %v22253_v38  ;;  %v22887_v5 = vsub.s32 2, %v22253_v38 }
0x12bf   : > { %v5399_v28 = vpop.f32.mrb[80].mxu0 }
0x12c0   : > { %v5459_v7 = vmul.f32 0.044194173, %v5399_v28  ;;  %v18493_v35 = vpop.f32.mrb[81].mxu0 }
0x12c1   : > { %v5402_v39 = vpop.f32.mrb[82].mxu0 }
0x12c2   : > { %v5460_v30 = vmul.f32 0.044194173, %v5402_v39  ;;  %v18494_v55 = vpop.f32.mrb[83].mxu0  ;;  %v5463_v21 = vsel %vm22257_vm2, %v5459_v7, -1e+30 }
0x12c3   : > { %v5467_v25 = vsel %vm3728_vm3, %v5463_v21, -inf }
0x12c4   : > { %5468 = vmax.xlane.f32.xlu1 %v5467_v25  ;;  %v5464_v62 = vsel %vm22261_vm4, %v5460_v30, -1e+30 }
0x12c5   : > { %v5470_v37 = vsel %vm3728_vm3, %v5464_v62, -inf }
0x12c6   : > { %5471 = vmax.xlane.f32.xlu0 %v5470_v37 }
0x12f8   : > { %v22647_v1 = vpop.f32.mrb[76].mxu1 }
0x12f9   : > { %v18487_v11 = vpop.f32.mrb[77].mxu1 }
0x12fa   : > { %v22649_v56 = vpop.f32.mrb[78].mxu1 }
0x12fb   : > { %v5352_v10 = vpack.c.bf16 %v22649_v56, %v22647_v1  ;;  %v18488_v19 = vpop.f32.mrb[79].mxu1 }
0x1300   : > { %v5452_v46 = vpop.f32.mrb[80].mxu1 }
0x1301   : > { %v5461_v15 = vmul.f32 0.044194173, %v5452_v46  ;;  %v18499_v61 = vpop.f32.mrb[81].mxu1 }
0x1302   : > { %v5455_v3 = vpop.f32.mrb[82].mxu1 }
0x1303   : > { %v5462_v54 = vmul.f32 0.044194173, %v5455_v3  ;;  %v18500_v28 = vpop.f32.mrb[83].mxu1  ;;  %v5465_v7 = vsel %vm22257_vm2, %v5461_v15, -1e+30 }
0x1304   : > { %v5473_v35 = vsel %vm3728_vm3, %v5465_v7, -inf }
0x1305   : > { %5474 = vmax.xlane.f32.xlu0 %v5473_v35  ;;  %v5466_v39 = vsel %vm22261_vm4, %v5462_v54, -1e+30 }
0x1306   : > { %v5476_v30 = vsel %vm3728_vm3, %v5466_v39, -inf }
0x1307   : > { %5477 = vmax.xlane.f32.xlu1 %v5476_v30  ;;  %v19593_v30 = vld [vmem:[%s21659_s30 + $0xa0] ss:$16 sps:$4 sm:$0xff]  }
0x1351   : > { %v5469_v55 = vpop.xlane.xlu1 %5468 }
0x1352   : > { %v5479_v25 = vsub.f32 %v5463_v21, %v5469_v55  ;;  %v19598_v55 = vld [vmem:[%s21659_s30 + $0xc4] ss:$16 sps:$4 sm:$0xff]  }
0x1353   : > { %v5472_v37 = vpop.xlane.xlu0 %5471 }
0x1354   : > { %v5483_v11 = vmul.f32 1.442695, %v5479_v25  ;;  %v5480_v19 = vsub.f32 %v5464_v62, %v5472_v37  ;;  %v19596_v25 = vld [vmem:[%s21659_s30 + $0xc0] ss:$16 sps:$4 sm:$0xff]   ;;  %v19601_v37 = vld [vmem:[%s21659_s30 + $0xe4] ss:$16 sps:$4 sm:$0xff]  }
0x1356   : > { %20650 = vpow2.f32 %v5483_v11  ;;  %v5485_v46 = vmul.f32 1.442695, %v5480_v19  ;;  %v19599_v11 = vld [vmem:[%s21659_s30 + $0xe0] ss:$16 sps:$4 sm:$0xff]   ;;  %v19604_v19 = vld [vmem:[%s21659_s30 + $0x104] ss:$16 sps:$4 sm:$0xff]  }
0x1358   : > { %20652 = vpow2.f32 %v5485_v46  ;;  %v19602_v46 = vld [vmem:[%s21659_s30 + $0x100] ss:$16 sps:$4 sm:$0xff]  }
0x1360   : > { %v20651_v61 = vpop.eup %20650 }
0x1361   : > { %v5491_v31 = vsel %vm3728_vm3, %v20651_v61, 0.0 }
0x1362   : > { %v20653_v15 = vpop.eup %20652  ;;  %5492 = vadd.xlane.f32.xlu0 %v5491_v31  ;;  %v19605_v31 = vld [vmem:[%s21659_s30 + $0x120] ss:$16 sps:$4 sm:$0xff]  }
0x1363   : > { %v5494_v3 = vsel %vm3728_vm3, %v20653_v15, 0.0 }
0x1364   : > { %5495 = vadd.xlane.f32.xlu1 %v5494_v3  ;;  %v19608_v3 = vld [vmem:[%s21659_s30 + $0x140] ss:$16 sps:$4 sm:$0xff]  }
0x1378   : > { %5514 = vrot.lane.b32.xlu0 %v22247_v22, %s21259_s0 }
0x137c   : > { %5619 = vrot.lane.b32.xlu0 %v4617_v20, %s21259_s0 }
0x1380   : > { %5621 = vrot.lane.b32.xlu0 %v4618_v50, %s21259_s0  ;;  %v19578_v50 = vld [vmem:[%s21659_s30] ss:$16 sps:$4 sm:$0xff]  }
0x1392   : > { %v5475_v49 = vpop.xlane.xlu0 %5474 }
0x1393   : > { %v5481_v21 = vsub.f32 %v5465_v7, %v5475_v49  ;;  %v19589_v7 = vld [vmem:[%s21659_s30 + $0x64] ss:$16 sps:$4 sm:$0xff]  }
0x1394   : > { %v5478_v62 = vpop.xlane.xlu1 %5477  ;;  %v19613_v49 = vld [vmem:[%s21659_s30 + $0x164] ss:$16 sps:$4 sm:$0xff]  }
0x1395   : > { %v5487_v54 = vmul.f32 1.442695, %v5481_v21  ;;  %v5482_v28 = vsub.f32 %v5466_v39, %v5478_v62  ;;  %v19595_v39 = vld [vmem:[%s21659_s30 + $0xa4] ss:$16 sps:$4 sm:$0xff]   ;;  %v19611_v21 = vld [vmem:[%s21659_s30 + $0x160] ss:$16 sps:$4 sm:$0xff]  }
0x1396   : > { %v19616_v62 = vld [vmem:[%s21659_s30 + $0x184] ss:$16 sps:$4 sm:$0xff]  }
0x1397   : > { %20654 = vpow2.f32 %v5487_v54  ;;  %v5489_v35 = vmul.f32 1.442695, %v5482_v28  ;;  %v19614_v54 = vld [vmem:[%s21659_s30 + $0x180] ss:$16 sps:$4 sm:$0xff]   ;;  %v19619_v28 = vld [vmem:[%s21659_s30 + $0x1a4] ss:$16 sps:$4 sm:$0xff]  }
0x1399   : > { %20656 = vpow2.f32 %v5489_v35 }
0x13a1   : > { %v22671_v22 = vpop.eup %20654 }
0x13a2   : > { %v5497_v14 = vsel %vm3728_vm3, %v22671_v22, 0.0 }
0x13a3   : > { %v22675_v17 = vpop.eup %20656  ;;  %5498 = vadd.xlane.f32.xlu1 %v5497_v14  ;;  %v19617_v14 = vld [vmem:[%s21659_s30 + $0x1a0] ss:$16 sps:$4 sm:$0xff]  }
0x13a4   : > { %v5500_v20 = vsel %vm3728_vm3, %v22675_v17, 0.0 }
0x13a7   : > { %5501 = vadd.xlane.f32.xlu1 %v5500_v20  ;;  %v19622_v20 = vld [vmem:[%s21659_s30 + $0x1c4] ss:$16 sps:$4 sm:$0xff]  }
0x13b8   : > { %5562 = vrot.lane.b32.xlu1 %v22251_v36, %s21259_s0 }
0x13bc   : > { %5613 = vrot.lane.b32.xlu1 %v4121_v59, %s21259_s0 }
0x13c0   : > { %5615 = vrot.lane.b32.xlu1 %v4122_v2, %s21259_s0 }
0x13c4   : > { %5625 = vrot.lane.b32.xlu1 %v5113_v48, %s21259_s0 }
0x13c8   : > { %5627 = vrot.lane.b32.xlu1 %v5114_v26, %s21259_s0  ;;  %v19584_v26 = vld [vmem:[%s21659_s30 + $0x40] ss:$16 sps:$4 sm:$0xff]  }
0x13ef   : > { %v5493_v36 = vpop.xlane.xlu0 %5492 }
0x13f0   : > { %20658 = vrcp.f32 %v5493_v36 }
0x13f1   : > { %v5496_v57 = vpop.xlane.xlu1 %5495 }
0x13f2   : > { %20660 = vrcp.f32 %v5496_v57  ;;  %v19620_v57 = vld [vmem:[%s21659_s30 + $0x1c0] ss:$16 sps:$4 sm:$0xff]  }
0x13f3   : > { %v5515_v59 = vpop.permute.xlu0 %5514 }
0x13f4   : > { %18502 = vmatpush3.bf16.msra.mxu0 %v5515_v59  ;;  %v19625_v59 = vld [vmem:[%s21659_s30 + $0x1e4] ss:$16 sps:$4 sm:$0xff]  }
0x13f5   : > { %6456 = vmatprep.subr.bf16.mxu0 %v19580_v29  ;;  %v19628_v29 = vld [vmem:[%s21659_s30 + $0xc] ss:$16 sps:$4 sm:$0xff]  }
0x13f7   : > { %v5620_v42 = vpop.permute.xlu0 %5619 }
0x13f8   : > { %v22705_v48 = vsel %vm3621_vm1, %v4359_v0, %v5620_v42  ;;  %v19590_v0 = vld [vmem:[%s21659_s30 + $0x80] ss:$16 sps:$4 sm:$0xff]  }
0x13fa   : > { %v20659_v24 = vpop.eup %20658 }
0x13fb   : > { %v5507_v2 = vmul.f32 %v20659_v24, %v20651_v61  ;;  %v19607_v61 = vld [vmem:[%s21659_s30 + $0x124] ss:$16 sps:$4 sm:$0xff]   ;;  %v5622_v42 = vpop.permute.xlu0 %5621 }
0x13fc   : > { %v20661_v34 = vpop.eup %20660 }
0x13fd   : > { %v5508_v51 = vmul.f32 %v20661_v34, %v20653_v15  ;;  %v19610_v15 = vld [vmem:[%s21659_s30 + $0x144] ss:$16 sps:$4 sm:$0xff]   ;;  %v19623_v34 = vld [vmem:[%s21659_s30 + $0x1e0] ss:$16 sps:$4 sm:$0xff]  }
0x13ff   : > { %v5511_v45 = vpack.c.bf16 %v5508_v51, %v5507_v2 }
0x1401   : > { %18504 = vmatmul.mubr.msk.bf16.vlgmr.msra.gmra.mrb[84].mxu0 %vm3728_vm3, %v5511_v45 }
0x1402   : > { %6457 = vmatpush1.bf16.msra.mxu0 %v19578_v50  ;;  %6488 = vmatprep.mubr.bf16.mxu0 %v22705_v48 }
0x1403   : > { %6458 = vmatprep.subr.bf16.mxu0 %v19583_v6 }
0x1406   : > { %6459 = vmatpush1.bf16.msra.mxu0 %v19581_v32 }
0x1407   : > { %6460 = vmatprep.subr.bf16.mxu0 %v19586_v16  ;;  %v22751_v16 = vsel %vm3621_vm1, %v4360_v12, %v5622_v42  ;;  %v19637_v12 = vld [vmem:[%s21659_s30 + $0x6c] ss:$16 sps:$4 sm:$0xff]   ;;  %v19689_v42 = vld [vmem:[%s21659_s30 + $0x248] ss:$16 sps:$4 sm:$0xff]  }
0x140a   : > { %6461 = vmatpush1.bf16.msra.mxu0 %v19584_v26  ;;  %v19626_v26 = vld [vmem:[%s21659_s30 + $0x8] ss:$16 sps:$4 sm:$0xff]  }
0x140b   : > { %6462 = vmatprep.subr.bf16.mxu0 %v19589_v7  ;;  %v19641_v7 = vld [vmem:[%s21659_s30 + $0xa8] ss:$16 sps:$4 sm:$0xff]  }
0x140e   : > { %6463 = vmatpush1.bf16.msra.mxu0 %v19587_v58  ;;  %v19646_v58 = vld [vmem:[%s21659_s30 + $0xcc] ss:$16 sps:$4 sm:$0xff]  }
0x140f   : > { %6464 = vmatprep.subr.bf16.mxu0 %v19592_v63  ;;  %v19644_v63 = vld [vmem:[%s21659_s30 + $0xc8] ss:$16 sps:$4 sm:$0xff]  }
0x1412   : > { %6465 = vmatpush1.bf16.msra.mxu0 %v19590_v0  ;;  %v19674_v0 = vld [vmem:[%s21659_s30 + $0x200] ss:$16 sps:$4 sm:$0xff]  }
0x1413   : > { %6466 = vmatprep.subr.bf16.mxu0 %v19595_v39  ;;  %v19676_v39 = vld [vmem:[%s21659_s30 + $0x204] ss:$16 sps:$4 sm:$0xff]  }
0x1416   : > { %6467 = vmatpush1.bf16.msra.mxu0 %v19593_v30  ;;  %v19649_v30 = vld [vmem:[%s21659_s30 + $0xec] ss:$16 sps:$4 sm:$0xff]  }
0x1417   : > { %6468 = vmatprep.subr.bf16.mxu0 %v19598_v55  ;;  %v19682_v55 = vld [vmem:[%s21659_s30 + $0x224] ss:$16 sps:$4 sm:$0xff]  }
0x141a   : > { %6469 = vmatpush1.bf16.msra.mxu0 %v19596_v25  ;;  %v19680_v25 = vld [vmem:[%s21659_s30 + $0x220] ss:$16 sps:$4 sm:$0xff]  }
0x141b   : > { %6470 = vmatprep.subr.bf16.mxu0 %v19601_v37  ;;  %v19647_v37 = vld [vmem:[%s21659_s30 + $0xe8] ss:$16 sps:$4 sm:$0xff]  }
0x141e   : > { %6471 = vmatpush1.bf16.msra.mxu0 %v19599_v11  ;;  %v19688_v11 = vld [vmem:[%s21659_s30 + $0x244] ss:$16 sps:$4 sm:$0xff]  }
0x141f   : > { %6472 = vmatprep.subr.bf16.mxu0 %v19604_v19  ;;  %v19652_v19 = vld [vmem:[%s21659_s30 + $0x10c] ss:$16 sps:$4 sm:$0xff]  }
0x1422   : > { %6473 = vmatpush1.bf16.msra.mxu0 %v19602_v46  ;;  %v19686_v46 = vld [vmem:[%s21659_s30 + $0x240] ss:$16 sps:$4 sm:$0xff]  }
0x1423   : > { %6474 = vmatprep.subr.bf16.mxu0 %v19607_v61  ;;  %v19650_v61 = vld [vmem:[%s21659_s30 + $0x108] ss:$16 sps:$4 sm:$0xff]  }
0x1426   : > { %6475 = vmatpush1.bf16.msra.mxu0 %v19605_v31  ;;  %v19655_v31 = vld [vmem:[%s21659_s30 + $0x12c] ss:$16 sps:$4 sm:$0xff]  }
0x1427   : > { %6476 = vmatprep.subr.bf16.mxu0 %v19610_v15  ;;  %v19653_v15 = vld [vmem:[%s21659_s30 + $0x128] ss:$16 sps:$4 sm:$0xff]  }
0x142a   : > { %6477 = vmatpush1.bf16.msra.mxu0 %v19608_v3  ;;  %v19658_v3 = vld [vmem:[%s21659_s30 + $0x14c] ss:$16 sps:$4 sm:$0xff]  }
0x142b   : > { %6478 = vmatprep.subr.bf16.mxu0 %v19613_v49  ;;  %v19656_v49 = vld [vmem:[%s21659_s30 + $0x148] ss:$16 sps:$4 sm:$0xff]  }
0x142e   : > { %6479 = vmatpush1.bf16.msra.mxu0 %v19611_v21  ;;  %v19661_v21 = vld [vmem:[%s21659_s30 + $0x16c] ss:$16 sps:$4 sm:$0xff]  }
0x142f   : > { %6480 = vmatprep.subr.bf16.mxu0 %v19616_v62  ;;  %v19659_v62 = vld [vmem:[%s21659_s30 + $0x168] ss:$16 sps:$4 sm:$0xff]  }
0x1430   : > { %v5499_v35 = vpop.xlane.xlu1 %5498 }
0x1431   : > { %20662 = vrcp.f32 %v5499_v35  ;;  %v19667_v35 = vld [vmem:[%s21659_s30 + $0x1ac] ss:$16 sps:$4 sm:$0xff]  }
0x1432   : > { %6481 = vmatpush1.bf16.msra.mxu0 %v19614_v54  ;;  %v19664_v54 = vld [vmem:[%s21659_s30 + $0x18c] ss:$16 sps:$4 sm:$0xff]  }
0x1433   : > { %6482 = vmatprep.subr.bf16.mxu0 %v19619_v28  ;;  %v19662_v28 = vld [vmem:[%s21659_s30 + $0x188] ss:$16 sps:$4 sm:$0xff]  }
0x1434   : > { %v5502_v36 = vpop.xlane.xlu1 %5501 }
0x1435   : > { %20664 = vrcp.f32 %v5502_v36  ;;  %v19668_v36 = vld [vmem:[%s21659_s30 + $0x1c8] ss:$16 sps:$4 sm:$0xff]  }
0x1436   : > { %6483 = vmatpush1.bf16.msra.mxu0 %v19617_v14  ;;  %v19665_v14 = vld [vmem:[%s21659_s30 + $0x1a8] ss:$16 sps:$4 sm:$0xff]  }
0x1437   : > { %6484 = vmatprep.subr.bf16.mxu0 %v19622_v20  ;;  %v19670_v20 = vld [vmem:[%s21659_s30 + $0x1cc] ss:$16 sps:$4 sm:$0xff]  }
0x1438   : > { %v5563_v24 = vpop.permute.xlu1 %5562 }
0x1439   : > { %18508 = vmatpush3.bf16.msra.mxu1 %v5563_v24  ;;  %v19677_v24 = vld [vmem:[%s21659_s30 + $0x208] ss:$16 sps:$4 sm:$0xff]  }
0x143a   : > { %6485 = vmatpush1.bf16.msra.mxu0 %v19620_v57  ;;  %6562 = vmatprep.subr.bf16.mxu1 %v19628_v29  ;;  %v19673_v57 = vld [vmem:[%s21659_s30 + $0x1ec] ss:$16 sps:$4 sm:$0xff]   ;;  %v19671_v29 = vld [vmem:[%s21659_s30 + $0x1e8] ss:$16 sps:$4 sm:$0xff]  }
0x143b   : > { %6486 = vmatprep.subr.bf16.mxu0 %v19625_v59  ;;  %v20663_v2 = vpop.eup %20662  ;;  %v19679_v59 = vld [vmem:[%s21659_s30 + $0x20c] ss:$16 sps:$4 sm:$0xff]  }
0x143c   : > { %v5614_v51 = vpop.permute.xlu1 %5613  ;;  %v5509_v45 = vmul.f32 %v20663_v2, %v22671_v22  ;;  %v19683_v2 = vld [vmem:[%s21659_s30 + $0x228] ss:$16 sps:$4 sm:$0xff]  }
0x143d   : > { %v22744_v32 = vsel %vm3621_vm1, %v3863_v9, %v5614_v51  ;;  %v19634_v9 = vld [vmem:[%s21659_s30 + $0x4c] ss:$16 sps:$4 sm:$0xff]  }
0x143e   : > { %6487 = vmatpush1.bf16.msra.mxu0 %v19623_v34  ;;  %v19685_v34 = vld [vmem:[%s21659_s30 + $0x22c] ss:$16 sps:$4 sm:$0xff]  }
0x143f   : > { %v20665_v50 = vpop.eup %20664  ;;  %6509 = vmatprep.subr.bf16.mxu0 %v19676_v39  ;;  %v19691_v51 = vld [vmem:[%s21659_s30 + $0x24c] ss:$16 sps:$4 sm:$0xff]   ;;  %v19722_v39 = vld [vmem:[%s21659_s30 + $0x300] ss:$16 sps:$4 sm:$0xff]  }
0x1440   : > { %v5510_v6 = vmul.f32 %v20665_v50, %v22675_v17  ;;  %v19631_v17 = vld [vmem:[%s21659_s30 + $0x2c] ss:$16 sps:$4 sm:$0xff]   ;;  %v5616_v4 = vpop.permute.xlu1 %5615  ;;  %v19694_v50 = vld [vmem:[%s21659_s30 + $0x264] ss:$16 sps:$4 sm:$0xff]  }
0x1441   : > { %6489 = vmatmul.mubr.bf16.vlgmr.msra.gmra.mrb[88].mxu0 %v22744_v32  ;;  %v22764_v47 = vsel %vm3621_vm1, %v3864_v44, %v5616_v4  ;;  %v19643_v44 = vld [vmem:[%s21659_s30 + $0xac] ss:$16 sps:$4 sm:$0xff]   ;;  %v19706_v4 = vld [vmem:[%s21659_s30 + $0x2a4] ss:$16 sps:$4 sm:$0xff]  }
0x1442   : > { %6498 = vmatprep.mubr.bf16.mxu0 %v22751_v16  ;;  %v5512_v22 = vpack.c.bf16 %v5510_v6, %v5509_v45  ;;  %6510 = vmatpush1.bf16.msra.mxu0 %v19674_v0  ;;  %v19697_v45 = vld [vmem:[%s21659_s30 + $0x26c] ss:$16 sps:$4 sm:$0xff]   ;;  %v19692_v6 = vld [vmem:[%s21659_s30 + $0x260] ss:$16 sps:$4 sm:$0xff]  }
0x1443   : > { %6511 = vmatprep.subr.bf16.mxu0 %v19682_v55  ;;  %v19727_v0 = vld [vmem:[%s21659_s30 + $0x30c] ss:$16 sps:$4 sm:$0xff]   ;;  %v19730_v55 = vld [vmem:[%s21659_s30 + $0x324] ss:$16 sps:$4 sm:$0xff]  }
0x1444   : > { %18510 = vmatmul.mubr.msk.bf16.vlgmr.msra.gmra.mrb[84].mxu1 %vm3728_vm3, %v5512_v22  ;;  %v19701_v22 = vld [vmem:[%s21659_s30 + $0x288] ss:$16 sps:$4 sm:$0xff]  }
0x1445   : > { %6563 = vmatpush1.bf16.msra.mxu1 %v19626_v26  ;;  %6594 = vmatprep.mubr.bf16.mxu1 %v22705_v48  ;;  %v19635_v48 = vld [vmem:[%s21659_s30 + $0x68] ss:$16 sps:$4 sm:$0xff]   ;;  %v19700_v26 = vld [vmem:[%s21659_s30 + $0x284] ss:$16 sps:$4 sm:$0xff]  }
0x1446   : > { %6564 = vmatprep.subr.bf16.mxu1 %v19631_v17  ;;  %6512 = vmatpush1.bf16.msra.mxu0 %v19680_v25  ;;  %v19703_v17 = vld [vmem:[%s21659_s30 + $0x28c] ss:$16 sps:$4 sm:$0xff]  }
0x1447   : > { %6513 = vmatprep.subr.bf16.mxu0 %v19688_v11  ;;  %v19733_v25 = vld [vmem:[%s21659_s30 + $0x32c] ss:$16 sps:$4 sm:$0xff]   ;;  %v19731_v11 = vld [vmem:[%s21659_s30 + $0x328] ss:$16 sps:$4 sm:$0xff]  }
0x1449   : > { %6499 = vmatmul.mubr.bf16.gmra.mrb[92].mxu0 %v22764_v47  ;;  %6565 = vmatpush1.bf16.msra.mxu1 %v19629_v8  ;;  %v19709_v8 = vld [vmem:[%s21659_s30 + $0x2ac] ss:$16 sps:$4 sm:$0xff]  }
0x144a   : > { %6566 = vmatprep.subr.bf16.mxu1 %v19634_v9  ;;  %6514 = vmatpush1.bf16.msra.mxu0 %v19686_v46  ;;  %v19704_v9 = vld [vmem:[%s21659_s30 + $0x2a0] ss:$16 sps:$4 sm:$0xff]   ;;  %v19739_v46 = vld [vmem:[%s21659_s30 + $0x34c] ss:$16 sps:$4 sm:$0xff]  }
0x144b   : > { %6515 = vmatprep.subr.bf16.mxu0 %v19694_v50  ;;  %v19767_v50 = vld [vmem:[%s21659_s30 + $0x3e8] ss:$16 sps:$4 sm:$0xff]  }
0x144d   : > { %6567 = vmatpush1.bf16.msra.mxu1 %v19632_v41  ;;  %v19712_v41 = vld [vmem:[%s21659_s30 + $0x2c4] ss:$16 sps:$4 sm:$0xff]  }
0x144e   : > { %6568 = vmatprep.subr.bf16.mxu1 %v19637_v12  ;;  %6516 = vmatpush1.bf16.msra.mxu0 %v19692_v6  ;;  %v19715_v12 = vld [vmem:[%s21659_s30 + $0x2cc] ss:$16 sps:$4 sm:$0xff]  }
0x144f   : > { %6517 = vmatprep.subr.bf16.mxu0 %v19700_v26 }
0x1451   : > { %6569 = vmatpush1.bf16.msra.mxu1 %v19635_v48  ;;  %v19710_v48 = vld [vmem:[%s21659_s30 + $0x2c0] ss:$16 sps:$4 sm:$0xff]  }
0x1452   : > { %6570 = vmatprep.subr.bf16.mxu1 %v19640_v40  ;;  %v19713_v40 = vld [vmem:[%s21659_s30 + $0x2c8] ss:$16 sps:$4 sm:$0xff]  }
0x1455   : > { %6571 = vmatpush1.bf16.msra.mxu1 %v19638_v43  ;;  %v19718_v43 = vld [vmem:[%s21659_s30 + $0x2e4] ss:$16 sps:$4 sm:$0xff]  }
0x1456   : > { %6572 = vmatprep.subr.bf16.mxu1 %v19643_v44  ;;  %v19721_v44 = vld [vmem:[%s21659_s30 + $0x2ec] ss:$16 sps:$4 sm:$0xff]  }
0x1459   : > { %6573 = vmatpush1.bf16.msra.mxu1 %v19641_v7  ;;  %v19716_v7 = vld [vmem:[%s21659_s30 + $0x2e0] ss:$16 sps:$4 sm:$0xff]  }
0x145a   : > { %6574 = vmatprep.subr.bf16.mxu1 %v19646_v58  ;;  %v19719_v58 = vld [vmem:[%s21659_s30 + $0x2e8] ss:$16 sps:$4 sm:$0xff]  }
0x145d   : > { %6575 = vmatpush1.bf16.msra.mxu1 %v19644_v63  ;;  %v19724_v63 = vld [vmem:[%s21659_s30 + $0x304] ss:$16 sps:$4 sm:$0xff]  }
0x145e   : > { %6576 = vmatprep.subr.bf16.mxu1 %v19649_v30  ;;  %v19725_v30 = vld [vmem:[%s21659_s30 + $0x308] ss:$16 sps:$4 sm:$0xff]  }
0x1461   : > { %6577 = vmatpush1.bf16.msra.mxu1 %v19647_v37  ;;  %v19728_v37 = vld [vmem:[%s21659_s30 + $0x320] ss:$16 sps:$4 sm:$0xff]  }
0x1462   : > { %6578 = vmatprep.subr.bf16.mxu1 %v19652_v19  ;;  %v19736_v19 = vld [vmem:[%s21659_s30 + $0x344] ss:$16 sps:$4 sm:$0xff]  }
0x1465   : > { %6579 = vmatpush1.bf16.msra.mxu1 %v19650_v61  ;;  %v19734_v61 = vld [vmem:[%s21659_s30 + $0x340] ss:$16 sps:$4 sm:$0xff]  }
0x1466   : > { %6580 = vmatprep.subr.bf16.mxu1 %v19655_v31  ;;  %v19737_v31 = vld [vmem:[%s21659_s30 + $0x348] ss:$16 sps:$4 sm:$0xff]  }
0x1469   : > { %6581 = vmatpush1.bf16.msra.mxu1 %v19653_v15  ;;  %v19742_v15 = vld [vmem:[%s21659_s30 + $0x364] ss:$16 sps:$4 sm:$0xff]  }
0x146a   : > { %6582 = vmatprep.subr.bf16.mxu1 %v19658_v3  ;;  %v19745_v3 = vld [vmem:[%s21659_s30 + $0x36c] ss:$16 sps:$4 sm:$0xff]  }
0x146d   : > { %6583 = vmatpush1.bf16.msra.mxu1 %v19656_v49  ;;  %v19740_v49 = vld [vmem:[%s21659_s30 + $0x360] ss:$16 sps:$4 sm:$0xff]  }
0x146e   : > { %6584 = vmatprep.subr.bf16.mxu1 %v19661_v21  ;;  %v19743_v21 = vld [vmem:[%s21659_s30 + $0x368] ss:$16 sps:$4 sm:$0xff]  }
0x1471   : > { %6585 = vmatpush1.bf16.msra.mxu1 %v19659_v62  ;;  %v19748_v62 = vld [vmem:[%s21659_s30 + $0x384] ss:$16 sps:$4 sm:$0xff]  }
0x1472   : > { %6586 = vmatprep.subr.bf16.mxu1 %v19664_v54  ;;  %v19751_v54 = vld [vmem:[%s21659_s30 + $0x38c] ss:$16 sps:$4 sm:$0xff]  }
0x1475   : > { %6587 = vmatpush1.bf16.msra.mxu1 %v19662_v28  ;;  %v19746_v28 = vld [vmem:[%s21659_s30 + $0x380] ss:$16 sps:$4 sm:$0xff]  }
0x1476   : > { %6588 = vmatprep.subr.bf16.mxu1 %v19667_v35  ;;  %v19749_v35 = vld [vmem:[%s21659_s30 + $0x388] ss:$16 sps:$4 sm:$0xff]  }
0x1479   : > { %6589 = vmatpush1.bf16.msra.mxu1 %v19665_v14  ;;  %v19754_v14 = vld [vmem:[%s21659_s30 + $0x3a4] ss:$16 sps:$4 sm:$0xff]  }
0x147a   : > { %6590 = vmatprep.subr.bf16.mxu1 %v19670_v20  ;;  %v19757_v20 = vld [vmem:[%s21659_s30 + $0x3ac] ss:$16 sps:$4 sm:$0xff]  }
0x147d   : > { %6591 = vmatpush1.bf16.msra.mxu1 %v19668_v36  ;;  %v19752_v36 = vld [vmem:[%s21659_s30 + $0x3a0] ss:$16 sps:$4 sm:$0xff]  }
0x147e   : > { %6592 = vmatprep.subr.bf16.mxu1 %v19673_v57  ;;  %v19755_v57 = vld [vmem:[%s21659_s30 + $0x3a8] ss:$16 sps:$4 sm:$0xff]  }
0x1481   : > { %6593 = vmatpush1.bf16.msra.mxu1 %v19671_v29  ;;  %v19760_v29 = vld [vmem:[%s21659_s30 + $0x3c4] ss:$16 sps:$4 sm:$0xff]  }
0x1482   : > { %6615 = vmatprep.subr.bf16.mxu1 %v19679_v59  ;;  %v19763_v59 = vld [vmem:[%s21659_s30 + $0x3cc] ss:$16 sps:$4 sm:$0xff]  }
0x1484   : > { %6595 = vmatmul.mubr.bf16.vlgmr.msra.gmra.mrb[88].mxu1 %v22744_v32  ;;  %v19695_v32 = vld [vmem:[%s21659_s30 + $0x268] ss:$16 sps:$4 sm:$0xff]  }
0x1485   : > { %6604 = vmatprep.mubr.bf16.mxu1 %v22751_v16  ;;  %6616 = vmatpush1.bf16.msra.mxu1 %v19677_v24  ;;  %v19698_v16 = vld [vmem:[%s21659_s30 + $0x280] ss:$16 sps:$4 sm:$0xff]  }
0x1486   : > { %6617 = vmatprep.subr.bf16.mxu1 %v19685_v34  ;;  %6518 = vmatpush1.bf16.msra.mxu0 %v19698_v16  ;;  %v19758_v24 = vld [vmem:[%s21659_s30 + $0x3c0] ss:$16 sps:$4 sm:$0xff]   ;;  %v19761_v34 = vld [vmem:[%s21659_s30 + $0x3c8] ss:$16 sps:$4 sm:$0xff]  }
0x1487   : > { %6519 = vmatprep.subr.bf16.mxu0 %v19706_v4 }
0x1489   : > { %6618 = vmatpush1.bf16.msra.mxu1 %v19683_v2  ;;  %v19766_v2 = vld [vmem:[%s21659_s30 + $0x3e4] ss:$16 sps:$4 sm:$0xff]  }
0x148a   : > { %6619 = vmatprep.subr.bf16.mxu1 %v19691_v51  ;;  %6520 = vmatpush1.bf16.msra.mxu0 %v19704_v9  ;;  %v19769_v51 = vld [vmem:[%s21659_s30 + $0x3ec] ss:$16 sps:$4 sm:$0xff]  }
0x148b   : > { %6521 = vmatprep.subr.bf16.mxu0 %v19712_v41 }
0x148c   : > { %6605 = vmatmul.mubr.bf16.gmra.mrb[92].mxu1 %v22764_v47  ;;  %v19707_v47 = vld [vmem:[%s21659_s30 + $0x2a8] ss:$16 sps:$4 sm:$0xff]  }
0x148d   : > { %6620 = vmatpush1.bf16.msra.mxu1 %v19689_v42  ;;  %v19764_v42 = vld [vmem:[%s21659_s30 + $0x3e0] ss:$16 sps:$4 sm:$0xff]   ;;  %s25104_s30 = sld [smem:[#allocation27_spill]] }
0x148e   : > { %6621 = vmatprep.subr.bf16.mxu1 %v19697_v45  ;;  %6522 = vmatpush1.bf16.msra.mxu0 %v19710_v48 }
0x148f   : > { %6523 = vmatprep.subr.bf16.mxu0 %v19718_v43 }
0x1491   : > { %6622 = vmatpush1.bf16.msra.mxu1 %v19695_v32 }
0x1492   : > { %6623 = vmatprep.subr.bf16.mxu1 %v19703_v17  ;;  %6524 = vmatpush1.bf16.msra.mxu0 %v19716_v7 }
0x1493   : > { %6525 = vmatprep.subr.bf16.mxu0 %v19724_v63  ;;  %p18120_p12 = scmp.ne.s32.totalorder %s25104_s30, 5 }
0x1495   : > { %6624 = vmatpush1.bf16.msra.mxu1 %v19701_v22 }
0x1496   : > { %6625 = vmatprep.subr.bf16.mxu1 %v19709_v8  ;;  %6526 = vmatpush1.bf16.msra.mxu0 %v19722_v39 }
0x1497   : > { %6527 = vmatprep.subr.bf16.mxu0 %v19730_v55 }
0x1499   : > { %6626 = vmatpush1.bf16.msra.mxu1 %v19707_v47  ;;  %v5626_v47 = vpop.permute.xlu1 %5625 }
0x149a   : > { %6627 = vmatprep.subr.bf16.mxu1 %v19715_v12  ;;  %6528 = vmatpush1.bf16.msra.mxu0 %v19728_v37  ;;  %v5653_v48 = vsel %vm3621_vm1, %v4855_v13, %v5626_v47  ;;  %v607_v13 = vld [vmem:[%s21673_s8] ss:$8 sm:$0xf] }
0x149b   : > { %6529 = vmatprep.subr.bf16.mxu0 %v19736_v19  ;;  %v5803_v1 = vrot.slane %v607_v13, %v22884_v52  ;;  %v6872_v47 = vld [vmem:[%s21665_s28 + $0x8] sm:$0xff] }
0x149d   : > { %6628 = vmatpush1.bf16.msra.mxu1 %v19713_v40  ;;  %v5628_v40 = vpop.permute.xlu1 %5627 }
0x149e   : > { %6629 = vmatprep.subr.bf16.mxu1 %v19721_v44  ;;  %6530 = vmatpush1.bf16.msra.mxu0 %v19734_v61  ;;  %v5657_v33 = vsel %vm3621_vm1, %v4856_v60, %v5628_v40  ;;  %v5807_v60 = vrot.slane %v607_v13, %v22887_v5  ;;  %v6887_v40 = vld [vmem:[%s21665_s28 + $0x80] sm:$0xff] }
0x149f   : > { %6531 = vmatprep.subr.bf16.mxu0 %v19742_v15 }
0x14a1   : > { %6630 = vmatpush1.bf16.msra.mxu1 %v19719_v58 }
0x14a2   : > { %6631 = vmatprep.subr.bf16.mxu1 %v19727_v0  ;;  %6532 = vmatpush1.bf16.msra.mxu0 %v19740_v49  ;;  %v5811_v0 = vrot.slane %v607_v13, %v22892_v23 }
0x14a3   : > { %6533 = vmatprep.subr.bf16.mxu0 %v19748_v62 }
0x14a5   : > { %6632 = vmatpush1.bf16.msra.mxu1 %v19725_v30 }
0x14a6   : > { %6633 = vmatprep.subr.bf16.mxu1 %v19733_v25  ;;  %6534 = vmatpush1.bf16.msra.mxu0 %v19746_v28 }
0x14a7   : > { %6535 = vmatprep.subr.bf16.mxu0 %v19754_v14 }
0x14a9   : > { %6634 = vmatpush1.bf16.msra.mxu1 %v19731_v11 }
0x14aa   : > { %6635 = vmatprep.subr.bf16.mxu1 %v19739_v46  ;;  %6536 = vmatpush1.bf16.msra.mxu0 %v19752_v36 }
0x14ab   : > { %6537 = vmatprep.subr.bf16.mxu0 %v19760_v29 }
0x14ad   : > { %6636 = vmatpush1.bf16.msra.mxu1 %v19737_v31 }
0x14ae   : > { %6637 = vmatprep.subr.bf16.mxu1 %v19745_v3  ;;  %6538 = vmatpush1.bf16.msra.mxu0 %v19758_v24 }
0x14af   : > { %6539 = vmatprep.subr.bf16.mxu0 %v19766_v2 }
0x14b1   : > { %6638 = vmatpush1.bf16.msra.mxu1 %v19743_v21 }
0x14b2   : > { %6639 = vmatprep.subr.bf16.mxu1 %v19751_v54  ;;  %6540 = vmatpush1.bf16.msra.mxu0 %v19764_v42 }
0x14b5   : > { %6640 = vmatpush1.bf16.msra.mxu1 %v19749_v35 }
0x14b6   : > { %6641 = vmatprep.subr.bf16.mxu1 %v19757_v20 }
0x14b9   : > { %6642 = vmatpush1.bf16.msra.mxu1 %v19755_v57 }
0x14ba   : > { %6643 = vmatprep.subr.bf16.mxu1 %v19763_v59 }
0x14bd   : > { %6644 = vmatpush1.bf16.msra.mxu1 %v19761_v34 }
0x14be   : > { %6645 = vmatprep.subr.bf16.mxu1 %v19769_v51 }
0x14c1   : > { %6646 = vmatpush1.bf16.msra.mxu1 %v19767_v50 }
0x14d4   : > { %v5554_v45 = vpop.f32.mrb[84].mxu0 }
0x14d5   : > { %v18505_v6 = vpop.f32.mrb[85].mxu0 }
0x14d6   : > { %v5557_v32 = vpop.f32.mrb[86].mxu0 }
0x14d7   : > { %v5609_v16 = vpack.c.bf16 %v5557_v32, %v5554_v45  ;;  %v18506_v26 = vpop.f32.mrb[87].mxu0 }
0x14d9   : > { %5631 = vrot.lane.b32.xlu0 %v5609_v16, %s21259_s0 }
0x1517   : > { %v5602_v22 = vpop.f32.mrb[84].mxu1 }
0x1518   : > { %v18511_v17 = vpop.f32.mrb[85].mxu1 }
0x1519   : > { %v5605_v4 = vpop.f32.mrb[86].mxu1 }
0x151a   : > { %v5610_v8 = vpack.c.bf16 %v5605_v4, %v5602_v22  ;;  %v18512_v9 = vpop.f32.mrb[87].mxu1 }
0x151b   : > { %v6879_v9 = vld [vmem:[%s21665_s28 + $0x40] sm:$0xff] }
0x151c   : > { %5633 = vrot.lane.b32.xlu0 %v5610_v8, %s21259_s0  ;;  %v6871_v8 = vld [vmem:[%s21665_s28] sm:$0xff] }
0x154b   : > { %v5632_v41 = vpop.permute.xlu0 %5631 }
0x154c   : > { %v5661_v12 = vsel %vm3621_vm1, %v5351_v27, %v5632_v41  ;;  %v5799_v27 = vrot.slane %v607_v13, %v22880_v53  ;;  %v17096_v41 = vcombine.low %v6871_v8, %v6879_v9 }
0x154d   : > { %6541 = vmatprep.mubr.bf16.mxu0 %v5661_v12  ;;  %6647 = vmatprep.mubr.bf16.mxu1 %v5661_v12  ;;  %v17097_v12 = vcombine.high %v6871_v8, %v6879_v9 }
0x154e   : > { %6542 = vmatmul.mubr.bf16.vlgmr.msra.gmra.mrb[88].mxu0 %v5653_v48  ;;  %6648 = vmatmul.mubr.bf16.vlgmr.msra.gmra.mrb[88].mxu1 %v5653_v48  ;;  %v6880_v48 = vld [vmem:[%s21665_s28 + $0x48] sm:$0xff] }
0x154f   : > { %10025 = vmatprep.subr.bf16.mxu0 %v17097_v12  ;;  %v6975_v12 = vld [vmem:[%s21665_s28 + $0x340] sm:$0xff] }
0x1550   : > { %10026 = vmatpush1.bf16.msra.mxu0 %v17096_v41  ;;  %v6967_v41 = vld [vmem:[%s21665_s28 + $0x300] sm:$0xff] }
0x158e   : > { %v5634_v43 = vpop.permute.xlu0 %5633 }
0x158f   : > { %v5665_v44 = vsel %vm3621_vm1, %v5352_v10, %v5634_v43  ;;  %v6895_v43 = vld [vmem:[%s21665_s28 + $0xc0] sm:$0xff] }
0x1590   : > { %6551 = vmatprep.mubr.bf16.mxu0 %v5665_v44  ;;  %6657 = vmatprep.mubr.bf16.mxu1 %v5665_v44  ;;  %v17098_v44 = vcombine.low %v6872_v47, %v6880_v48  ;;  %v17113_v13 = vcombine.high %v6887_v40, %v6895_v43 }
0x1591   : > { %6552 = vmatmul.mubr.bf16.gmra.mrb[92].mxu0 %v5657_v33  ;;  %6658 = vmatmul.mubr.bf16.gmra.mrb[92].mxu1 %v5657_v33  ;;  %v17099_v33 = vcombine.high %v6872_v47, %v6880_v48  ;;  %v6968_v48 = vld [vmem:[%s21665_s28 + $0x308] sm:$0xff] }
0x1592   : > { %10027 = vmatprep.subr.bf16.mxu0 %v17113_v13 }
0x1593   : > { %10131 = vmatprep.subr.bf16.mxu1 %v17099_v33  ;;  %v17193_v33 = vcombine.high %v6967_v41, %v6975_v12 }
0x1594   : > { %10132 = vmatpush1.bf16.msra.mxu1 %v17098_v44 }
0x1621   : > { %v6543_v18 = vpop.f32.mrb[88].mxu0  ;;  %v6649_v56 = vpop.f32.mrb[88].mxu1 }
0x1622   : > { %v22895_v10 = vadd.f32 %v6543_v18, %v5799_v27  ;;  %v6545_v7 = vpop.f32.mrb[89].mxu0  ;;  %v6651_v58 = vpop.f32.mrb[89].mxu1  ;;  %v22902_v11 = vadd.f32 %v6649_v56, %v5807_v60  ;;  %v6903_v18 = vld [vmem:[%s21665_s28 + $0x100] sm:$0xff] }
0x1623   : > { %v22897_v63 = vadd.f32 %v6545_v7, %v5803_v1  ;;  %v6547_v39 = vpop.f32.mrb[90].mxu0  ;;  %v6653_v30 = vpop.f32.mrb[90].mxu1  ;;  %v22908_v61 = vadd.f32 %v6651_v58, %v5811_v0  ;;  %v6911_v56 = vld [vmem:[%s21665_s28 + $0x140] sm:$0xff]  ;;  %v6904_v7 = vld [vmem:[%s21665_s28 + $0x108] sm:$0xff] }
0x1624   : > { %v22900_v55 = vadd.f32 %v6547_v39, %v5799_v27  ;;  %v6549_v25 = vpop.f32.mrb[91].mxu0  ;;  %v6655_v37 = vpop.f32.mrb[91].mxu1  ;;  %v22910_v31 = vadd.f32 %v6653_v30, %v5807_v60  ;;  %v6912_v58 = vld [vmem:[%s21665_s28 + $0x148] sm:$0xff]  ;;  %v17129_v30 = vcombine.high %v6903_v18, %v6911_v56 }
0x1625   : > { %v6668_v19 = vadd.f32 %v22897_v63, %v22895_v10  ;;  %v22906_v46 = vadd.f32 %v6549_v25, %v5803_v1  ;;  %v22915_v49 = vadd.f32 %v6655_v37, %v5811_v0  ;;  %v17131_v25 = vcombine.high %v6904_v7, %v6912_v58  ;;  %v6919_v37 = vld [vmem:[%s21665_s28 + $0x180] sm:$0xff] }
0x1627   : > { %v6673_v15 = vadd.f32 %v22906_v46, %v22900_v55  ;;  %v6669_v3 = vadd.f32 %v22902_v11, %v6668_v19  ;;  %v6927_v19 = vld [vmem:[%s21665_s28 + $0x1c0] sm:$0xff] }
0x1629   : > { %v6674_v21 = vadd.f32 %v22910_v31, %v6673_v15  ;;  %v6670_v62 = vadd.f32 %v22908_v61, %v6669_v3  ;;  %v6920_v15 = vld [vmem:[%s21665_s28 + $0x188] sm:$0xff] }
0x162a   : > { %v6928_v3 = vld [vmem:[%s21665_s28 + $0x1c8] sm:$0xff] }
0x162b   : > { %v6675_v54 = vadd.f32 %v22915_v49, %v6674_v21  ;;  %6671 = vadd.xlane.f32.xlu0 %v6670_v62  ;;  %v17128_v21 = vcombine.low %v6903_v18, %v6911_v56  ;;  %v17130_v62 = vcombine.low %v6904_v7, %v6912_v58  ;;  %v6984_v18 = vld [vmem:[%s21665_s28 + $0x388] sm:$0xff]  ;;  %v17192_v56 = vcombine.low %v6967_v41, %v6975_v12  ;;  %v7015_v12 = vld [vmem:[%s21665_s28 + $0x480] sm:$0xff] }
0x162d   : > { %6676 = vadd.xlane.f32.xlu1 %v6675_v54  ;;  %v17145_v54 = vcombine.high %v6919_v37, %v6927_v19 }
0x1664   : > { %v6553_v28 = vpop.f32.mrb[92].mxu0  ;;  %v6659_v35 = vpop.f32.mrb[92].mxu1 }
0x1665   : > { %v22920_v14 = vadd.f32 %v6553_v28, %v5799_v27  ;;  %v6555_v20 = vpop.f32.mrb[93].mxu0  ;;  %v6661_v36 = vpop.f32.mrb[93].mxu1  ;;  %v22926_v51 = vadd.f32 %v6659_v35, %v5807_v60  ;;  %v17147_v28 = vcombine.high %v6920_v15, %v6928_v3  ;;  %v6935_v35 = vld [vmem:[%s21665_s28 + $0x200] sm:$0xff] }
0x1666   : > { %v22922_v57 = vadd.f32 %v6555_v20, %v5803_v1  ;;  %v6557_v29 = vpop.f32.mrb[94].mxu0  ;;  %v6663_v59 = vpop.f32.mrb[94].mxu1  ;;  %v22932_v45 = vadd.f32 %v6661_v36, %v5811_v0  ;;  %v6943_v20 = vld [vmem:[%s21665_s28 + $0x240] sm:$0xff]  ;;  %v6936_v36 = vld [vmem:[%s21665_s28 + $0x208] sm:$0xff] }
0x1667   : > { %v22924_v24 = vadd.f32 %v6557_v29, %v5799_v27  ;;  %v6559_v34 = vpop.f32.mrb[95].mxu0  ;;  %v6665_v2 = vpop.f32.mrb[95].mxu1  ;;  %v22934_v6 = vadd.f32 %v6663_v59, %v5807_v60  ;;  %v6888_v27 = vld [vmem:[%s21665_s28 + $0x88] sm:$0xff]  ;;  %v17144_v59 = vcombine.low %v6919_v37, %v6927_v19 }
0x1668   : > { %v6678_v42 = vadd.f32 %v22922_v57, %v22920_v14  ;;  %v22930_v50 = vadd.f32 %v6559_v34, %v5803_v1  ;;  %v22941_v17 = vadd.f32 %v6665_v2, %v5811_v0  ;;  %v6896_v1 = vld [vmem:[%s21665_s28 + $0xc8] sm:$0xff]  ;;  %v17112_v0 = vcombine.low %v6887_v40, %v6895_v43 }
0x1669   : > { %v17115_v60 = vcombine.high %v6888_v27, %v6896_v1  ;;  %v17114_v39 = vcombine.low %v6888_v27, %v6896_v1  ;;  %v6944_v29 = vld [vmem:[%s21665_s28 + $0x248] sm:$0xff]  ;;  %v17146_v34 = vcombine.low %v6920_v15, %v6928_v3  ;;  %v17161_v2 = vcombine.high %v6935_v35, %v6943_v20  ;;  %v6983_v27 = vld [vmem:[%s21665_s28 + $0x380] sm:$0xff] }
0x166a   : > { %v6683_v32 = vadd.f32 %v22930_v50, %v22924_v24  ;;  %v6679_v16 = vadd.f32 %v22926_v51, %v6678_v42  ;;  %10028 = vmatpush1.bf16.msra.mxu0 %v17112_v0  ;;  %v17163_v42 = vcombine.high %v6936_v36, %v6944_v29  ;;  %v17162_v8 = vcombine.low %v6936_v36, %v6944_v29  ;;  %v6976_v40 = vld [vmem:[%s21665_s28 + $0x348] sm:$0xff]  ;;  %v6991_v1 = vld [vmem:[%s21665_s28 + $0x3c0] sm:$0xff] }
0x166b   : > { %10133 = vmatprep.subr.bf16.mxu1 %v17115_v60  ;;  %10029 = vmatprep.subr.bf16.mxu0 %v17129_v30  ;;  %v17195_v13 = vcombine.high %v6968_v48, %v6976_v40  ;;  %v6992_v60 = vld [vmem:[%s21665_s28 + $0x3c8] sm:$0xff]  ;;  %v17194_v7 = vcombine.low %v6968_v48, %v6976_v40  ;;  %v17209_v58 = vcombine.high %v6983_v27, %v6991_v1  ;;  %v7007_v30 = vld [vmem:[%s21665_s28 + $0x440] sm:$0xff] }
0x166c   : > { %v6684_v26 = vadd.f32 %v22934_v6, %v6683_v32  ;;  %v6680_v22 = vadd.f32 %v22932_v45, %v6679_v16  ;;  %10134 = vmatpush1.bf16.msra.mxu1 %v17114_v39  ;;  %v6951_v32 = vld [vmem:[%s21665_s28 + $0x280] sm:$0xff]  ;;  %v17211_v0 = vcombine.high %v6984_v18, %v6992_v60  ;;  %v7008_v37 = vld [vmem:[%s21665_s28 + $0x448] sm:$0xff]  ;;  %v17208_v19 = vcombine.low %v6983_v27, %v6991_v1 }
0x166d   : > { %10135 = vmatprep.subr.bf16.mxu1 %v17131_v25  ;;  %v6959_v16 = vld [vmem:[%s21665_s28 + $0x2c0] sm:$0xff]  ;;  %v7000_v25 = vld [vmem:[%s21665_s28 + $0x408] sm:$0xff]  ;;  %v17210_v15 = vcombine.low %v6984_v18, %v6992_v60 }
0x166e   : > { %6681 = vadd.xlane.f32.xlu0 %v6680_v22  ;;  %v6685_v4 = vadd.f32 %v22941_v17, %v6684_v26  ;;  %10030 = vmatpush1.bf16.msra.mxu0 %v17128_v21  ;;  %v6952_v26 = vld [vmem:[%s21665_s28 + $0x288] sm:$0xff]  ;;  %v17177_v9 = vcombine.high %v6951_v32, %v6959_v16  ;;  %v17176_v43 = vcombine.low %v6951_v32, %v6959_v16  ;;  %v6999_v39 = vld [vmem:[%s21665_s28 + $0x400] sm:$0xff] }
0x166f   : > { %10031 = vmatprep.subr.bf16.mxu0 %v17145_v54  ;;  %v6960_v22 = vld [vmem:[%s21665_s28 + $0x2c8] sm:$0xff]  ;;  %v17225_v3 = vcombine.high %v6999_v39, %v7007_v30  ;;  %v17227_v21 = vcombine.high %v7000_v25, %v7008_v37  ;;  %v17226_v54 = vcombine.low %v7000_v25, %v7008_v37  ;;  %v7023_v48 = vld [vmem:[%s21665_s28 + $0x4c0] sm:$0xff] }
0x1670   : > { %10136 = vmatpush1.bf16.msra.mxu1 %v17130_v62  ;;  %v17179_v47 = vcombine.high %v6952_v26, %v6960_v22  ;;  %v17178_v44 = vcombine.low %v6952_v26, %v6960_v22  ;;  %v17224_v62 = vcombine.low %v6999_v39, %v7007_v30  ;;  %v7016_v40 = vld [vmem:[%s21665_s28 + $0x488] sm:$0xff]  ;;  %v7031_v1 = vld [vmem:[%s21665_s28 + $0x500] sm:$0xff] }
0x1671   : > { %10137 = vmatprep.subr.bf16.mxu1 %v17147_v28  ;;  %v7039_v18 = vld [vmem:[%s21665_s28 + $0x540] sm:$0xff]  ;;  %v7032_v60 = vld [vmem:[%s21665_s28 + $0x508] sm:$0xff] }
0x1672   : > { %6686 = vadd.xlane.f32.xlu0 %v6685_v4  ;;  %10032 = vmatpush1.bf16.msra.mxu0 %v17144_v59  ;;  %v17160_v4 = vcombine.low %v6935_v35, %v6943_v20  ;;  %v7047_v30 = vld [vmem:[%s21665_s28 + $0x580] sm:$0xff]  ;;  %v7048_v37 = vld [vmem:[%s21665_s28 + $0x588] sm:$0xff] }
0x1673   : > { %10033 = vmatprep.subr.bf16.mxu0 %v17161_v2  ;;  %v7055_v25 = vld [vmem:[%s21665_s28 + $0x5c0] sm:$0xff] }
0x1674   : > { %10138 = vmatpush1.bf16.msra.mxu1 %v17146_v34 }
0x1675   : > { %10139 = vmatprep.subr.bf16.mxu1 %v17163_v42 }
0x1676   : > { %10034 = vmatpush1.bf16.msra.mxu0 %v17160_v4 }
0x1677   : > { %10035 = vmatprep.subr.bf16.mxu0 %v17177_v9 }
0x1678   : > { %10140 = vmatpush1.bf16.msra.mxu1 %v17162_v8 }
0x1679   : > { %10141 = vmatprep.subr.bf16.mxu1 %v17179_v47 }
0x167a   : > { %10036 = vmatpush1.bf16.msra.mxu0 %v17176_v43  ;;  %v17241_v43 = vcombine.high %v7015_v12, %v7023_v48 }
0x167b   : > { %10037 = vmatprep.subr.bf16.mxu0 %v17193_v33  ;;  %v17240_v33 = vcombine.low %v7015_v12, %v7023_v48 }
0x167c   : > { %10142 = vmatpush1.bf16.msra.mxu1 %v17178_v44  ;;  %v7024_v44 = vld [vmem:[%s21665_s28 + $0x4c8] sm:$0xff] }
0x167d   : > { %10143 = vmatprep.subr.bf16.mxu1 %v17195_v13  ;;  %v17242_v13 = vcombine.low %v7016_v40, %v7024_v44  ;;  %v17243_v27 = vcombine.high %v7016_v40, %v7024_v44  ;;  %v7119_v44 = vld [vmem:[%s21665_s28 + $0x7c0] sm:$0xff] }
0x167e   : > { %10038 = vmatpush1.bf16.msra.mxu0 %v17192_v56  ;;  %v17257_v56 = vcombine.high %v7031_v1, %v7039_v18 }
0x167f   : > { %10039 = vmatprep.subr.bf16.mxu0 %v17209_v58  ;;  %v17256_v58 = vcombine.low %v7031_v1, %v7039_v18 }
0x1680   : > { %10144 = vmatpush1.bf16.msra.mxu1 %v17194_v7  ;;  %v7040_v7 = vld [vmem:[%s21665_s28 + $0x548] sm:$0xff] }
0x1681   : > { %10145 = vmatprep.subr.bf16.mxu1 %v17211_v0  ;;  %v17258_v0 = vcombine.low %v7032_v60, %v7040_v7  ;;  %v17259_v39 = vcombine.high %v7032_v60, %v7040_v7 }
0x1682   : > { %10040 = vmatpush1.bf16.msra.mxu0 %v17208_v19  ;;  %v17272_v19 = vcombine.low %v7047_v30, %v7055_v25 }
0x1683   : > { %10041 = vmatprep.subr.bf16.mxu0 %v17225_v3  ;;  %v7056_v3 = vld [vmem:[%s21665_s28 + $0x5c8] sm:$0xff] }
0x1684   : > { %10146 = vmatpush1.bf16.msra.mxu1 %v17210_v15  ;;  %v17273_v15 = vcombine.high %v7047_v30, %v7055_v25 }
0x1685   : > { %10147 = vmatprep.subr.bf16.mxu1 %v17227_v21  ;;  %v7063_v21 = vld [vmem:[%s21665_s28 + $0x600] sm:$0xff] }
0x1686   : > { %10042 = vmatpush1.bf16.msra.mxu0 %v17224_v62  ;;  %v7071_v62 = vld [vmem:[%s21665_s28 + $0x640] sm:$0xff] }
0x1687   : > { %10043 = vmatprep.subr.bf16.mxu0 %v17241_v43  ;;  %v7111_v43 = vld [vmem:[%s21665_s28 + $0x780] sm:$0xff] }
0x1688   : > { %10148 = vmatpush1.bf16.msra.mxu1 %v17226_v54  ;;  %v17274_v54 = vcombine.low %v7048_v37, %v7056_v3  ;;  %v17337_v18 = vcombine.high %v7111_v43, %v7119_v44 }
0x1689   : > { %10149 = vmatprep.subr.bf16.mxu1 %v17243_v27 }
0x168a   : > { %10044 = vmatpush1.bf16.msra.mxu0 %v17240_v33  ;;  %v7112_v33 = vld [vmem:[%s21665_s28 + $0x788] sm:$0xff] }
0x168b   : > { %10045 = vmatprep.subr.bf16.mxu0 %v17257_v56  ;;  %v17336_v56 = vcombine.low %v7111_v43, %v7119_v44  ;;  %v16544_v43 = vld [vmem:[%s21673_s8 + $0x2] ss:$8 sm:$0xf] }
0x168c   : > { %10150 = vmatpush1.bf16.msra.mxu1 %v17242_v13  ;;  %v7120_v13 = vld [vmem:[%s21665_s28 + $0x7c8] sm:$0xff] }
0x168d   : > { %10151 = vmatprep.subr.bf16.mxu1 %v17259_v39  ;;  %v17339_v60 = vcombine.high %v7112_v33, %v7120_v13  ;;  %v17338_v7 = vcombine.low %v7112_v33, %v7120_v13  ;;  %v23055_v39 = vld [vmem:[%s21665_s28 + $0x808] sm:$0xff] }
0x168e   : > { %10046 = vmatpush1.bf16.msra.mxu0 %v17256_v58  ;;  %v23049_v58 = vld [vmem:[%s21665_s28 + $0x800] sm:$0xff] }
0x168f   : > { %10047 = vmatprep.subr.bf16.mxu0 %v17273_v15 }
0x1690   : > { %10152 = vmatpush1.bf16.msra.mxu1 %v17258_v0  ;;  %v23052_v0 = vld [vmem:[%s21665_s28 + $0x840] sm:$0xff] }
0x1691   : > { %v17352_v30 = vcombine.low %v23049_v58, %v23052_v0  ;;  %v17353_v25 = vcombine.high %v23049_v58, %v23052_v0 }
0x1692   : > { %10048 = vmatpush1.bf16.msra.mxu0 %v17272_v19 }
0x16b8   : > { %v6672_v28 = vpop.xlane.xlu0 %6671 }
0x16b9   : > { %v6689_v35 = vmul.f32 0.001953125, %v6672_v28  ;;  %v17275_v28 = vcombine.high %v7048_v37, %v7056_v3  ;;  %v23062_v37 = vld [vmem:[%s21665_s28 + $0x848] sm:$0xff] }
0x16ba   : > { %v6677_v20 = vpop.xlane.xlu1 %6676  ;;  %v17354_v19 = vcombine.low %v23055_v39, %v23062_v37  ;;  %v17355_v15 = vcombine.high %v23055_v39, %v23062_v37  ;;  %v7191_v37 = vld [vmem:[%s21665_s28 + $0xa00] sm:$0xff] }
0x16bb   : > { %v22981_v36 = vsub.f32 %v22895_v10, %v6689_v35  ;;  %v22984_v29 = vsub.f32 %v22897_v63, %v6689_v35  ;;  %v6690_v59 = vmul.f32 0.001953125, %v6677_v20  ;;  %v22987_v34 = vsub.f32 %v22902_v11, %v6689_v35  ;;  %v7064_v20 = vld [vmem:[%s21665_s28 + $0x608] sm:$0xff]  ;;  %10153 = vmatprep.subr.bf16.mxu1 %v17275_v28 }
0x16bc   : > { %v23001_v16 = vsub.f32 %v22908_v61, %v6689_v35  ;;  %v17289_v35 = vcombine.high %v7063_v21, %v7071_v62  ;;  %10154 = vmatpush1.bf16.msra.mxu1 %v17274_v54 }
0x16bd   : > { %v22990_v2 = vsub.f32 %v22900_v55, %v6690_v59  ;;  %v22993_v42 = vsub.f32 %v22906_v46, %v6690_v59  ;;  %v22996_v32 = vsub.f32 %v22910_v31, %v6690_v59  ;;  %v6709_v10 = vmul.f32 %v22981_v36, %v22981_v36 }
0x16be   : > { %v6710_v63 = vmul.f32 %v22984_v29, %v22984_v29  ;;  %v23006_v11 = vsub.f32 %v22915_v49, %v6690_v59  ;;  %v6711_v31 = vmul.f32 %v22987_v34, %v22987_v34  ;;  %v6712_v49 = vmul.f32 %v23001_v16, %v23001_v16  ;;  %v7072_v59 = vld [vmem:[%s21665_s28 + $0x648] sm:$0xff]  ;;  %10049 = vmatprep.subr.bf16.mxu0 %v17289_v35 }
0x16bf   : > { %v6713_v55 = vmul.f32 %v22990_v2, %v22990_v2  ;;  %v6714_v46 = vmul.f32 %v22993_v42, %v22993_v42  ;;  %v6715_v26 = vmul.f32 %v22996_v32, %v22996_v32 }
0x16c0   : > { %v6725_v61 = vadd.f32 %v6710_v63, %v6709_v10  ;;  %v6716_v8 = vmul.f32 %v23006_v11, %v23006_v11  ;;  %v7079_v10 = vld [vmem:[%s21665_s28 + $0x680] sm:$0xff]  ;;  %v17291_v63 = vcombine.high %v7064_v20, %v7072_v59 }
0x16c1   : > { %v6730_v22 = vadd.f32 %v6714_v46, %v6713_v55  ;;  %v7087_v55 = vld [vmem:[%s21665_s28 + $0x6c0] sm:$0xff]  ;;  %v7080_v46 = vld [vmem:[%s21665_s28 + $0x688] sm:$0xff] }
0x16c2   : > { %v6726_v4 = vadd.f32 %v6725_v61, %v6711_v31  ;;  %v7088_v31 = vld [vmem:[%s21665_s28 + $0x6c8] sm:$0xff]  ;;  %v17288_v61 = vcombine.low %v7063_v21, %v7071_v62  ;;  %10155 = vmatprep.subr.bf16.mxu1 %v17291_v63 }
0x16c3   : > { %v6731_v9 = vadd.f32 %v6730_v22, %v6715_v26  ;;  %v17290_v26 = vcombine.low %v7064_v20, %v7072_v59  ;;  %v17305_v22 = vcombine.high %v7079_v10, %v7087_v55  ;;  %v17306_v12 = vcombine.low %v7080_v46, %v7088_v31 }
0x16c4   : > { %v6727_v47 = vadd.f32 %v6726_v4, %v6712_v49  ;;  %v17307_v49 = vcombine.high %v7080_v46, %v7088_v31  ;;  %v7095_v4 = vld [vmem:[%s21665_s28 + $0x700] sm:$0xff]  ;;  %10050 = vmatpush1.bf16.msra.mxu0 %v17288_v61 }
0x16c5   : > { %v6732_v41 = vadd.f32 %v6731_v9, %v6716_v8  ;;  %v7103_v8 = vld [vmem:[%s21665_s28 + $0x740] sm:$0xff]  ;;  %v7096_v9 = vld [vmem:[%s21665_s28 + $0x708] sm:$0xff]  ;;  %10156 = vmatpush1.bf16.msra.mxu1 %v17290_v26  ;;  %10051 = vmatprep.subr.bf16.mxu0 %v17305_v22 }
0x16c6   : > { %6728 = vadd.xlane.f32.xlu0 %v6727_v47  ;;  %v7104_v47 = vld [vmem:[%s21665_s28 + $0x748] sm:$0xff]  ;;  %v17321_v48 = vcombine.high %v7095_v4, %v7103_v8  ;;  %10157 = vmatprep.subr.bf16.mxu1 %v17307_v49  ;;  %v17320_v27 = vcombine.low %v7095_v4, %v7103_v8 }
0x16c7   : > { %6733 = vadd.xlane.f32.xlu1 %v6732_v41  ;;  %v17304_v41 = vcombine.low %v7079_v10, %v7087_v55  ;;  %v17323_v40 = vcombine.high %v7096_v9, %v7104_v47  ;;  %v17322_v1 = vcombine.low %v7096_v9, %v7104_v47 }
0x16c9   : > { %10052 = vmatpush1.bf16.msra.mxu0 %v17304_v41  ;;  %10158 = vmatpush1.bf16.msra.mxu1 %v17306_v12 }
0x16ca   : > { %10053 = vmatprep.subr.bf16.mxu0 %v17321_v48  ;;  %10159 = vmatprep.subr.bf16.mxu1 %v17323_v40  ;;  %v16543_v40 = vld [vmem:[%s21673_s8 + $0x1] ss:$8 sm:$0xf] }
0x16cb   : > { %v23111_v44 = vrot.slane %v16543_v40, %v22884_v52  ;;  %v23114_v33 = vrot.slane %v16543_v40, %v22880_v53  ;;  %v23117_v13 = vrot.slane %v16543_v40, %v22892_v23 }
0x16cd   : > { %10054 = vmatpush1.bf16.msra.mxu0 %v17320_v27  ;;  %10160 = vmatpush1.bf16.msra.mxu1 %v17322_v1  ;;  %v23120_v27 = vrot.slane %v16543_v40, %v22887_v5  ;;  %v7151_v40 = vld [vmem:[%s21665_s28 + $0x8c0] sm:$0xff] }
0x16ce   : > { %10055 = vmatprep.subr.bf16.mxu0 %v17337_v18  ;;  %10161 = vmatprep.subr.bf16.mxu1 %v17339_v60  ;;  %v23123_v18 = vrot.slane %v16544_v43, %v22884_v52  ;;  %v23126_v60 = vrot.slane %v16544_v43, %v22880_v53 }
0x16d1   : > { %10056 = vmatpush1.bf16.msra.mxu0 %v17336_v56  ;;  %10162 = vmatpush1.bf16.msra.mxu1 %v17338_v7  ;;  %v23129_v56 = vrot.slane %v16544_v43, %v22892_v23  ;;  %v23132_v7 = vrot.slane %v16544_v43, %v22887_v5  ;;  %v7144_v43 = vld [vmem:[%s21665_s28 + $0x888] sm:$0xff] }
0x16d2   : > { %10078 = vmatprep.subr.bf16.mxu0 %v17353_v25  ;;  %10184 = vmatprep.subr.bf16.mxu1 %v17355_v15 }
0x16fb   : > { %v6682_v3 = vpop.xlane.xlu0 %6681 }
0x16fc   : > { %v6691_v21 = vmul.f32 0.001953125, %v6682_v3 }
0x16fe   : > { %v23069_v62 = vsub.f32 %v22920_v14, %v6691_v21  ;;  %v23072_v54 = vsub.f32 %v22922_v57, %v6691_v21  ;;  %v23075_v28 = vsub.f32 %v22926_v51, %v6691_v21  ;;  %v23078_v20 = vsub.f32 %v22932_v45, %v6691_v21 }
0x16ff   : > { %v6687_v35 = vpop.xlane.xlu0 %6686 }
0x1700   : > { %v6692_v59 = vmul.f32 0.001953125, %v6687_v35  ;;  %v6717_v10 = vmul.f32 %v23069_v62, %v23069_v62  ;;  %v6718_v63 = vmul.f32 %v23072_v54, %v23072_v54  ;;  %v6719_v14 = vmul.f32 %v23075_v28, %v23075_v28 }
0x1701   : > { %v6720_v46 = vmul.f32 %v23078_v20, %v23078_v20 }
0x1702   : > { %v23087_v57 = vsub.f32 %v22924_v24, %v6692_v59  ;;  %v23090_v51 = vsub.f32 %v22930_v50, %v6692_v59  ;;  %v23093_v55 = vsub.f32 %v22934_v6, %v6692_v59  ;;  %v6735_v45 = vadd.f32 %v6718_v63, %v6717_v10 }
0x1703   : > { %v23098_v61 = vsub.f32 %v22941_v17, %v6692_v59 }
0x1704   : > { %v6736_v31 = vadd.f32 %v6735_v45, %v6719_v14  ;;  %v6721_v26 = vmul.f32 %v23087_v57, %v23087_v57  ;;  %v6722_v24 = vmul.f32 %v23090_v51, %v23090_v51  ;;  %v6723_v50 = vmul.f32 %v23093_v55, %v23093_v55 }
0x1705   : > { %v6724_v49 = vmul.f32 %v23098_v61, %v23098_v61 }
0x1706   : > { %v6737_v22 = vadd.f32 %v6736_v31, %v6720_v46  ;;  %v6740_v6 = vadd.f32 %v6722_v24, %v6721_v26 }
0x1708   : > { %6738 = vadd.xlane.f32.xlu0 %v6737_v22  ;;  %v6741_v4 = vadd.f32 %v6740_v6, %v6723_v50 }
0x170a   : > { %v6742_v17 = vadd.f32 %v6741_v4, %v6724_v49  ;;  %v7143_v49 = vld [vmem:[%s21665_s28 + $0x880] sm:$0xff]  ;;  %v20682_v4 = vld [vmem:[#allocation2 + $0x8] sm:$0xff] }
0x170c   : > { %6743 = vadd.xlane.f32.xlu1 %v6742_v17 }
0x1753   : > { %v6729_v8 = vpop.xlane.xlu0 %6728 }
0x1754   : > { %v6745_v9 = vmul.f32 0.001953125, %v6729_v8  ;;  %v6734_v47 = vpop.xlane.xlu1 %6733  ;;  %v20683_v8 = vld [vmem:[#allocation2 + $0x28] sm:$0xff] }
0x1755   : > { %v6746_v41 = vmul.f32 0.001953125, %v6734_v47  ;;  %v20684_v47 = vld [vmem:[#allocation2] sm:$0xff] }
0x1756   : > { %v6749_v12 = vadd.f32 1e-05, %v6745_v9 }
0x1757   : > { %v6750_v48 = vadd.f32 1e-05, %v6746_v41 }
0x1758   : > { %20666 = vrsqrt.f32 %v6749_v12  ;;  %v20685_v12 = vld [vmem:[#allocation2 + $0x20] sm:$0xff] }
0x1759   : > { %20668 = vrsqrt.f32 %v6750_v48 }
0x1762   : > { %v20667_v1 = vpop.eup %20666 }
0x1763   : > { %v20669_v25 = vpop.eup %20668  ;;  %v6758_v15 = vmul.f32 %v20667_v1, %v22984_v29  ;;  %v6757_v3 = vmul.f32 %v20667_v1, %v22981_v36  ;;  %v6760_v21 = vmul.f32 %v20667_v1, %v23001_v16  ;;  %v6759_v35 = vmul.f32 %v20667_v1, %v22987_v34  ;;  %v7152_v1 = vld [vmem:[%s21665_s28 + $0x8c8] sm:$0xff] }
0x1764   : > { %v6762_v59 = vmul.f32 %v20669_v25, %v22993_v42  ;;  %v6761_v10 = vmul.f32 %v20669_v25, %v22990_v2  ;;  %v6764_v63 = vmul.f32 %v20669_v25, %v23006_v11  ;;  %v6763_v14 = vmul.f32 %v20669_v25, %v22996_v32 }
0x1765   : > { %v6795_v45 = vmul.f32 %v23111_v44, %v6758_v15  ;;  %v6794_v46 = vmul.f32 %v23114_v33, %v6757_v3  ;;  %v6797_v29 = vmul.f32 %v23117_v13, %v6760_v21  ;;  %v6796_v36 = vmul.f32 %v23120_v27, %v6759_v35  ;;  %v7159_v35 = vld [vmem:[%s21665_s28 + $0x900] sm:$0xff] }
0x1766   : > { %v6799_v16 = vmul.f32 %v23111_v44, %v6762_v59  ;;  %v6798_v34 = vmul.f32 %v23114_v33, %v6761_v10  ;;  %v6801_v42 = vmul.f32 %v23117_v13, %v6764_v63  ;;  %v6800_v2 = vmul.f32 %v23120_v27, %v6763_v14  ;;  %v7167_v59 = vld [vmem:[%s21665_s28 + $0x940] sm:$0xff]  ;;  %v7160_v10 = vld [vmem:[%s21665_s28 + $0x908] sm:$0xff] }
0x1767   : > { %v6832_v11 = vadd.f32 %v23123_v18, %v6795_v45  ;;  %v6831_v32 = vadd.f32 %v23126_v60, %v6794_v46  ;;  %v23153_v31 = vadd.f32 %v23129_v56, %v6797_v29  ;;  %v23156_v26 = vadd.f32 %v23132_v7, %v6796_v36  ;;  %v7168_v63 = vld [vmem:[%s21665_s28 + $0x948] sm:$0xff]  ;;  %v7175_v36 = vld [vmem:[%s21665_s28 + $0x980] sm:$0xff] }
0x1768   : > { %v6836_v24 = vadd.f32 %v23123_v18, %v6799_v16  ;;  %v6835_v22 = vadd.f32 %v23126_v60, %v6798_v34  ;;  %v23161_v50 = vadd.f32 %v23129_v56, %v6801_v42  ;;  %v23164_v6 = vadd.f32 %v23132_v7, %v6800_v2  ;;  %v7183_v16 = vld [vmem:[%s21665_s28 + $0x9c0] sm:$0xff]  ;;  %v7176_v34 = vld [vmem:[%s21665_s28 + $0x988] sm:$0xff] }
0x1769   : > { %v23167_v17 = vadd.f32 %v20682_v4, %v6832_v11  ;;  %v23171_v41 = vadd.f32 %v20684_v47, %v6831_v32  ;;  %v17369_v3 = vcombine.high %v7143_v49, %v7151_v40  ;;  %v17371_v21 = vcombine.high %v7144_v43, %v7152_v1  ;;  %v7184_v42 = vld [vmem:[%s21665_s28 + $0x9c8] sm:$0xff]  ;;  %v7207_v4 = vld [vmem:[%s21665_s28 + $0xa80] sm:$0xff] }
0x176a   : > { %v23169_v9 = vadd.f32 %v20683_v8, %v6836_v24  ;;  %v23173_v48 = vadd.f32 %v20685_v12, %v6835_v22  ;;  %v17368_v14 = vcombine.low %v7143_v49, %v7151_v40  ;;  %v17370_v45 = vcombine.low %v7144_v43, %v7152_v1  ;;  %v7192_v2 = vld [vmem:[%s21665_s28 + $0xa08] sm:$0xff]  ;;  %v7215_v8 = vld [vmem:[%s21665_s28 + $0xac0] sm:$0xff] }
0x176b   : > { %v17385_v46 = vcombine.high %v7159_v35, %v7167_v59  ;;  %v17387_v29 = vcombine.high %v7160_v10, %v7168_v63  ;;  %v17384_v58 = vcombine.low %v7159_v35, %v7167_v59  ;;  %v17386_v0 = vcombine.low %v7160_v10, %v7168_v63  ;;  %v7200_v11 = vld [vmem:[%s21665_s28 + $0xa48] sm:$0xff]  ;;  %v7231_v35 = vld [vmem:[%s21665_s28 + $0xb40] sm:$0xff] }
0x176c   : > { %v23180_v25 = vpack.c.bf16 %v23169_v9, %v23167_v17  ;;  %v23184_v15 = vpack.c.bf16 %v23173_v48, %v23171_v41  ;;  %v17401_v39 = vcombine.high %v7175_v36, %v7183_v16  ;;  %v17400_v32 = vcombine.low %v7175_v36, %v7183_v16  ;;  %v7208_v47 = vld [vmem:[%s21665_s28 + $0xa88] sm:$0xff]  ;;  %v7247_v36 = vld [vmem:[%s21665_s28 + $0xbc0] sm:$0xff] }
0x176d   : > { %v17402_v24 = vcombine.low %v7176_v34, %v7184_v42  ;;  %v17419_v49 = vcombine.high %v7192_v2, %v7200_v11  ;;  %v7216_v12 = vld [vmem:[%s21665_s28 + $0xac8] sm:$0xff]  ;;  %v17418_v43 = vcombine.low %v7192_v2, %v7200_v11  ;;  %v17433_v1 = vcombine.high %v7207_v4, %v7215_v8 }
0x176e   : > { %10057 = vmatprep.mubr.bf16.mxu0 %v23180_v25  ;;  %10163 = vmatprep.mubr.bf16.mxu1 %v23180_v25  ;;  %v7224_v59 = vld [vmem:[%s21665_s28 + $0xb08] sm:$0xff]  ;;  %v17432_v63 = vcombine.low %v7207_v4, %v7215_v8  ;;  %v7279_v4 = vld [vmem:[%s21665_s28 + $0xcc0] sm:$0xff] }
0x176f   : > { %10058 = vmatmul.mubr.bf16.vlgmr.msra.gmra.mrb[96].mxu0 %v23184_v15  ;;  %10164 = vmatmul.mubr.bf16.vlgmr.msra.gmra.mrb[96].mxu1 %v23184_v15  ;;  %v7232_v10 = vld [vmem:[%s21665_s28 + $0xb48] sm:$0xff] }
0x1770   : > { %10079 = vmatpush1.bf16.msra.mxu0 %v17352_v30  ;;  %10185 = vmatpush1.bf16.msra.mxu1 %v17354_v19  ;;  %v17403_v30 = vcombine.high %v7176_v34, %v7184_v42  ;;  %v7199_v19 = vld [vmem:[%s21665_s28 + $0xa40] sm:$0xff]  ;;  %v7240_v16 = vld [vmem:[%s21665_s28 + $0xb88] sm:$0xff] }
0x1771   : > { %10080 = vmatprep.subr.bf16.mxu0 %v17369_v3  ;;  %10186 = vmatprep.subr.bf16.mxu1 %v17371_v21  ;;  %v17417_v22 = vcombine.high %v7191_v37, %v7199_v19  ;;  %v17416_v40 = vcombine.low %v7191_v37, %v7199_v19  ;;  %v17435_v3 = vcombine.high %v7208_v47, %v7216_v12  ;;  %v7223_v21 = vld [vmem:[%s21665_s28 + $0xb00] sm:$0xff]  ;;  %v7248_v34 = vld [vmem:[%s21665_s28 + $0xbc8] sm:$0xff] }
0x1772   : > { %v17448_v42 = vcombine.low %v7223_v21, %v7231_v35  ;;  %v7263_v37 = vld [vmem:[%s21665_s28 + $0xc40] sm:$0xff]  ;;  %v7256_v19 = vld [vmem:[%s21665_s28 + $0xc08] sm:$0xff] }
0x1773   : > { %v7264_v2 = vld [vmem:[%s21665_s28 + $0xc48] sm:$0xff] }
0x1774   : > { %10081 = vmatpush1.bf16.msra.mxu0 %v17368_v14  ;;  %10187 = vmatpush1.bf16.msra.mxu1 %v17370_v45  ;;  %v17434_v14 = vcombine.low %v7208_v47, %v7216_v12  ;;  %v17449_v45 = vcombine.high %v7223_v21, %v7231_v35  ;;  %v7272_v8 = vld [vmem:[%s21665_s28 + $0xc88] sm:$0xff]  ;;  %v7295_v21 = vld [vmem:[%s21665_s28 + $0xd40] sm:$0xff] }
0x1775   : > { %10082 = vmatprep.subr.bf16.mxu0 %v17385_v46  ;;  %10188 = vmatprep.subr.bf16.mxu1 %v17387_v29  ;;  %v17451_v46 = vcombine.high %v7224_v59, %v7232_v10  ;;  %v7239_v29 = vld [vmem:[%s21665_s28 + $0xb80] sm:$0xff]  ;;  %v7280_v47 = vld [vmem:[%s21665_s28 + $0xcc8] sm:$0xff] }
0x1776   : > { %v17464_v11 = vcombine.low %v7239_v29, %v7247_v36  ;;  %v7288_v35 = vld [vmem:[%s21665_s28 + $0xd08] sm:$0xff] }
0x1778   : > { %10083 = vmatpush1.bf16.msra.mxu0 %v17384_v58  ;;  %10189 = vmatpush1.bf16.msra.mxu1 %v17386_v0  ;;  %v17450_v58 = vcombine.low %v7224_v59, %v7232_v10  ;;  %v17465_v0 = vcombine.high %v7239_v29, %v7247_v36  ;;  %v7296_v59 = vld [vmem:[%s21665_s28 + $0xd48] sm:$0xff]  ;;  %v7311_v29 = vld [vmem:[%s21665_s28 + $0xdc0] sm:$0xff] }
0x1779   : > { %10084 = vmatprep.subr.bf16.mxu0 %v17401_v39  ;;  %10190 = vmatprep.subr.bf16.mxu1 %v17403_v30  ;;  %v17467_v39 = vcombine.high %v7240_v16, %v7248_v34  ;;  %v7255_v30 = vld [vmem:[%s21665_s28 + $0xc00] sm:$0xff]  ;;  %v7304_v36 = vld [vmem:[%s21665_s28 + $0xd88] sm:$0xff] }
0x177a   : > { %v17480_v12 = vcombine.low %v7255_v30, %v7263_v37 }
0x177c   : > { %10085 = vmatpush1.bf16.msra.mxu0 %v17400_v32  ;;  %10191 = vmatpush1.bf16.msra.mxu1 %v17402_v24  ;;  %v17466_v32 = vcombine.low %v7240_v16, %v7248_v34  ;;  %v17481_v24 = vcombine.high %v7255_v30, %v7263_v37  ;;  %v7312_v16 = vld [vmem:[%s21665_s28 + $0xdc8] sm:$0xff]  ;;  %v7319_v30 = vld [vmem:[%s21665_s28 + $0xe00] sm:$0xff] }
0x177d   : > { %10086 = vmatprep.subr.bf16.mxu0 %v17417_v22  ;;  %10192 = vmatprep.subr.bf16.mxu1 %v17419_v49  ;;  %v17483_v22 = vcombine.high %v7256_v19, %v7264_v2  ;;  %v7271_v49 = vld [vmem:[%s21665_s28 + $0xc80] sm:$0xff] }
0x177e   : > { %v17496_v10 = vcombine.low %v7271_v49, %v7279_v4 }
0x1780   : > { %10087 = vmatpush1.bf16.msra.mxu0 %v17416_v40  ;;  %10193 = vmatpush1.bf16.msra.mxu1 %v17418_v43  ;;  %v17482_v40 = vcombine.low %v7256_v19, %v7264_v2  ;;  %v17497_v43 = vcombine.high %v7271_v49, %v7279_v4  ;;  %v7327_v19 = vld [vmem:[%s21665_s28 + $0xe40] sm:$0xff]  ;;  %v7320_v2 = vld [vmem:[%s21665_s28 + $0xe08] sm:$0xff] }
0x1781   : > { %10088 = vmatprep.subr.bf16.mxu0 %v17433_v1  ;;  %10194 = vmatprep.subr.bf16.mxu1 %v17435_v3  ;;  %v17499_v1 = vcombine.high %v7272_v8, %v7280_v47  ;;  %v7287_v3 = vld [vmem:[%s21665_s28 + $0xd00] sm:$0xff]  ;;  %v17545_v4 = vcombine.high %v7319_v30, %v7327_v19 }
0x1782   : > { %v17512_v34 = vcombine.low %v7287_v3, %v7295_v21 }
0x1784   : > { %10089 = vmatpush1.bf16.msra.mxu0 %v17432_v63  ;;  %10195 = vmatpush1.bf16.msra.mxu1 %v17434_v14  ;;  %v17498_v63 = vcombine.low %v7272_v8, %v7280_v47  ;;  %v17513_v14 = vcombine.high %v7287_v3, %v7295_v21  ;;  %v7335_v47 = vld [vmem:[%s21665_s28 + $0xe80] sm:$0xff]  ;;  %v17544_v21 = vcombine.low %v7319_v30, %v7327_v19 }
0x1785   : > { %10090 = vmatprep.subr.bf16.mxu0 %v17449_v45  ;;  %10196 = vmatprep.subr.bf16.mxu1 %v17451_v46  ;;  %v17515_v45 = vcombine.high %v7288_v35, %v7296_v59  ;;  %v7303_v46 = vld [vmem:[%s21665_s28 + $0xd80] sm:$0xff] }
0x1788   : > { %10091 = vmatpush1.bf16.msra.mxu0 %v17448_v42  ;;  %10197 = vmatpush1.bf16.msra.mxu1 %v17450_v58  ;;  %v17514_v42 = vcombine.low %v7288_v35, %v7296_v59 }
0x1789   : > { %10092 = vmatprep.subr.bf16.mxu0 %v17465_v0  ;;  %10198 = vmatprep.subr.bf16.mxu1 %v17467_v39  ;;  %v17529_v0 = vcombine.high %v7303_v46, %v7311_v29  ;;  %v17531_v39 = vcombine.high %v7304_v36, %v7312_v16 }
0x178c   : > { %10093 = vmatpush1.bf16.msra.mxu0 %v17464_v11  ;;  %10199 = vmatpush1.bf16.msra.mxu1 %v17466_v32  ;;  %v7328_v11 = vld [vmem:[%s21665_s28 + $0xe48] sm:$0xff] }
0x178d   : > { %10094 = vmatprep.subr.bf16.mxu0 %v17481_v24  ;;  %10200 = vmatprep.subr.bf16.mxu1 %v17483_v22  ;;  %v17528_v24 = vcombine.low %v7303_v46, %v7311_v29  ;;  %v17530_v22 = vcombine.low %v7304_v36, %v7312_v16  ;;  %v17547_v8 = vcombine.high %v7320_v2, %v7328_v11  ;;  %v7360_v46 = vld [vmem:[%s21665_s28 + $0xf48] sm:$0xff] }
0x178e   : > { %v17546_v35 = vcombine.low %v7320_v2, %v7328_v11 }
0x1790   : > { %10095 = vmatpush1.bf16.msra.mxu0 %v17480_v12  ;;  %10201 = vmatpush1.bf16.msra.mxu1 %v17482_v40  ;;  %v7343_v40 = vld [vmem:[%s21665_s28 + $0xec0] sm:$0xff] }
0x1791   : > { %10096 = vmatprep.subr.bf16.mxu0 %v17497_v43  ;;  %10202 = vmatprep.subr.bf16.mxu1 %v17499_v1  ;;  %v7336_v43 = vld [vmem:[%s21665_s28 + $0xe88] sm:$0xff]  ;;  %v17561_v59 = vcombine.high %v7335_v47, %v7343_v40  ;;  %v17560_v29 = vcombine.low %v7335_v47, %v7343_v40  ;;  %v23265_v47 = vld [vmem:[%s21665_s28 + $0x58] sm:$0xff] }
0x1792   : > { %v7344_v1 = vld [vmem:[%s21665_s28 + $0xec8] sm:$0xff] }
0x1793   : > { %v17562_v36 = vcombine.low %v7336_v43, %v7344_v1 }
0x1794   : > { %10097 = vmatpush1.bf16.msra.mxu0 %v17496_v10  ;;  %10203 = vmatpush1.bf16.msra.mxu1 %v17498_v63  ;;  %v17563_v10 = vcombine.high %v7336_v43, %v7344_v1  ;;  %v7351_v63 = vld [vmem:[%s21665_s28 + $0xf00] sm:$0xff] }
0x1795   : > { %v6739_v58 = vpop.xlane.xlu0 %6738  ;;  %10098 = vmatprep.subr.bf16.mxu0 %v17513_v14  ;;  %10204 = vmatprep.subr.bf16.mxu1 %v17515_v45  ;;  %v7359_v14 = vld [vmem:[%s21665_s28 + $0xf40] sm:$0xff]  ;;  %v7352_v45 = vld [vmem:[%s21665_s28 + $0xf08] sm:$0xff] }
0x1796   : > { %v6747_v37 = vmul.f32 0.001953125, %v6739_v58  ;;  %v17577_v16 = vcombine.high %v7351_v63, %v7359_v14  ;;  %v7375_v58 = vld [vmem:[%s21665_s28 + $0xfc0] sm:$0xff]  ;;  %v17578_v19 = vcombine.low %v7352_v45, %v7360_v46 }
0x1798   : > { %v6751_v32 = vadd.f32 1e-05, %v6747_v37  ;;  %10099 = vmatpush1.bf16.msra.mxu0 %v17512_v34  ;;  %10205 = vmatpush1.bf16.msra.mxu1 %v17514_v42  ;;  %v17579_v34 = vcombine.high %v7352_v45, %v7360_v46  ;;  %v7367_v42 = vld [vmem:[%s21665_s28 + $0xf80] sm:$0xff]  ;;  %v17576_v37 = vcombine.low %v7351_v63, %v7359_v14 }
0x1799   : > { %v6744_v49 = vpop.xlane.xlu1 %6743  ;;  %10100 = vmatprep.subr.bf16.mxu0 %v17529_v0  ;;  %10206 = vmatprep.subr.bf16.mxu1 %v17531_v39  ;;  %v7368_v0 = vld [vmem:[%s21665_s28 + $0xf88] sm:$0xff]  ;;  %v17593_v2 = vcombine.high %v7367_v42, %v7375_v58  ;;  %v17592_v1 = vcombine.low %v7367_v42, %v7375_v58 }
0x179a   : > { %20670 = vrsqrt.f32 %v6751_v32  ;;  %v6748_v12 = vmul.f32 0.001953125, %v6744_v49  ;;  %v7376_v39 = vld [vmem:[%s21665_s28 + $0xfc8] sm:$0xff] }
0x179b   : > { %v17595_v49 = vcombine.high %v7368_v0, %v7376_v39  ;;  %v20687_v58 = vld [vmem:[#allocation2 + $0x48] sm:$0xff] }
0x179c   : > { %v6752_v3 = vadd.f32 1e-05, %v6748_v12  ;;  %10101 = vmatpush1.bf16.msra.mxu0 %v17528_v24  ;;  %10207 = vmatpush1.bf16.msra.mxu1 %v17530_v22  ;;  %v23255_v24 = vld [vmem:[%s21665_s28 + $0x10] sm:$0xff] }
0x179d   : > { %10102 = vmatprep.subr.bf16.mxu0 %v17545_v4  ;;  %10208 = vmatprep.subr.bf16.mxu1 %v17547_v8  ;;  %v23259_v4 = vld [vmem:[%s21665_s28 + $0x50] sm:$0xff]  ;;  %v23262_v8 = vld [vmem:[%s21665_s28 + $0x18] sm:$0xff] }
0x179e   : > { %20672 = vrsqrt.f32 %v6752_v3 }
0x17a0   : > { %10103 = vmatpush1.bf16.msra.mxu0 %v17544_v21  ;;  %10209 = vmatpush1.bf16.msra.mxu1 %v17546_v35 }
0x17a1   : > { %10104 = vmatprep.subr.bf16.mxu0 %v17561_v59  ;;  %10210 = vmatprep.subr.bf16.mxu1 %v17563_v10  ;;  %v17103_v59 = vcombine.high %v23262_v8, %v23265_v47 }
0x17a4   : > { %v20671_v30 = vpop.eup %20670  ;;  %10105 = vmatpush1.bf16.msra.mxu0 %v17560_v29  ;;  %10211 = vmatpush1.bf16.msra.mxu1 %v17562_v36 }
0x17a5   : > { %v6766_v11 = vmul.f32 %v20671_v30, %v23072_v54  ;;  %10106 = vmatprep.subr.bf16.mxu0 %v17577_v16  ;;  %10212 = vmatprep.subr.bf16.mxu1 %v17579_v34  ;;  %v6765_v32 = vmul.f32 %v20671_v30, %v23069_v62  ;;  %v6768_v22 = vmul.f32 %v20671_v30, %v23078_v20  ;;  %v20686_v34 = vld [vmem:[#allocation2 + $0x38] sm:$0xff] }
0x17a6   : > { %v6767_v12 = vmul.f32 %v20671_v30, %v23075_v28  ;;  %v17594_v20 = vcombine.low %v7368_v0, %v7376_v39  ;;  %v17101_v28 = vcombine.high %v23255_v24, %v23259_v4 }
0x17a7   : > { %v6803_v40 = vmul.f32 %v23111_v44, %v6766_v11  ;;  %v6802_v54 = vmul.f32 %v23114_v33, %v6765_v32  ;;  %v6805_v43 = vmul.f32 %v23117_v13, %v6768_v22  ;;  %v6889_v11 = vld [vmem:[%s21665_s28 + $0x90] sm:$0xff] }
0x17a8   : > { %v20673_v62 = vpop.eup %20672  ;;  %10107 = vmatpush1.bf16.msra.mxu0 %v17576_v37  ;;  %10213 = vmatpush1.bf16.msra.mxu1 %v17578_v19  ;;  %v6804_v3 = vmul.f32 %v23120_v27, %v6767_v12  ;;  %v20693_v32 = vld [vmem:[#allocation2 + $0x10] sm:$0xff] }
0x17a9   : > { %v6770_v21 = vmul.f32 %v20673_v62, %v23090_v51  ;;  %v6769_v35 = vmul.f32 %v20673_v62, %v23087_v57  ;;  %10108 = vmatprep.subr.bf16.mxu0 %v17593_v2  ;;  %10214 = vmatprep.subr.bf16.mxu1 %v17595_v49  ;;  %v6772_v10 = vmul.f32 %v20673_v62, %v23098_v61  ;;  %v20694_v49 = vld [vmem:[#allocation2 + $0x78] sm:$0xff] }
0x17aa   : > { %v6842_v63 = vadd.f32 %v23129_v56, %v6805_v43  ;;  %v6771_v14 = vmul.f32 %v20673_v62, %v23093_v55  ;;  %v23282_v45 = vadd.f32 %v23132_v7, %v6804_v3  ;;  %v6840_v57 = vadd.f32 %v23123_v18, %v6803_v40  ;;  %v6897_v40 = vld [vmem:[%s21665_s28 + $0xd0] sm:$0xff]  ;;  %v6898_v43 = vld [vmem:[%s21665_s28 + $0xd8] sm:$0xff] }
0x17ab   : > { %v6807_v51 = vmul.f32 %v23111_v44, %v6770_v21  ;;  %v6806_v46 = vmul.f32 %v23114_v33, %v6769_v35  ;;  %v6839_v29 = vadd.f32 %v23126_v60, %v6802_v54  ;;  %v6809_v36 = vmul.f32 %v23117_v13, %v6772_v10  ;;  %v20688_v13 = vld [vmem:[#allocation2 + $0x68] sm:$0xff]  ;;  %v6890_v54 = vld [vmem:[%s21665_s28 + $0x98] sm:$0xff]  ;;  %v6905_v3 = vld [vmem:[%s21665_s28 + $0x110] sm:$0xff] }
0x17ac   : > { %10109 = vmatpush1.bf16.msra.mxu0 %v17592_v1  ;;  %10215 = vmatpush1.bf16.msra.mxu1 %v17594_v20  ;;  %v6808_v61 = vmul.f32 %v23120_v27, %v6771_v14  ;;  %v23293_v44 = vadd.f32 %v20686_v34, %v23161_v50  ;;  %v23297_v0 = vadd.f32 %v20687_v58, %v6840_v57  ;;  %v20689_v27 = vld [vmem:[#allocation2 + $0x40] sm:$0xff]  ;;  %v20695_v20 = vld [vmem:[#allocation2 + $0x58] sm:$0xff]  ;;  %v20696_v14 = vld [vmem:[#allocation2 + $0x70] sm:$0xff] }
0x17ad   : > { %v6844_v16 = vadd.f32 %v23123_v18, %v6807_v51  ;;  %v6843_v55 = vadd.f32 %v23126_v60, %v6806_v46  ;;  %10237 = vmatprep.subr.bf16.mxu0 %v17101_v28  ;;  %10343 = vmatprep.subr.bf16.mxu1 %v17103_v59  ;;  %v6846_v33 = vadd.f32 %v23129_v56, %v6809_v36  ;;  %v20690_v60 = vld [vmem:[#allocation2 + $0x60] sm:$0xff]  ;;  %v6913_v28 = vld [vmem:[%s21665_s28 + $0x150] sm:$0xff]  ;;  %v6906_v59 = vld [vmem:[%s21665_s28 + $0x118] sm:$0xff] }
0x17ae   : > { %v6845_v42 = vadd.f32 %v23132_v7, %v6808_v61  ;;  %v23301_v18 = vadd.f32 %v20689_v27, %v6839_v29  ;;  %v20691_v7 = vld [vmem:[#allocation2 + $0x18] sm:$0xff]  ;;  %v23331_v22 = vadd.f32 %v20693_v32, %v23156_v26  ;;  %v17100_v62 = vcombine.low %v23255_v24, %v23259_v4  ;;  %v6921_v57 = vld [vmem:[%s21665_s28 + $0x190] sm:$0xff] }
0x17af   : > { %v23299_v39 = vadd.f32 %v20688_v13, %v6844_v16  ;;  %v23303_v30 = vadd.f32 %v20690_v60, %v6843_v55  ;;  %v23314_v37 = vadd.f32 %v20691_v7, %v23153_v31  ;;  %v20692_v31 = vld [vmem:[#allocation2 + $0x30] sm:$0xff]  ;;  %v23333_v12 = vadd.f32 %v20694_v49, %v6846_v33  ;;  %v6914_v10 = vld [vmem:[%s21665_s28 + $0x158] sm:$0xff] }
0x17b0   : > { %v23327_v2 = vadd.f32 %v20692_v31, %v23164_v6  ;;  %v17102_v6 = vcombine.low %v23262_v8, %v23265_v47  ;;  %v23346_v26 = vadd.f32 %v20695_v20, %v6842_v63  ;;  %v17117_v21 = vcombine.high %v6889_v11, %v6897_v40  ;;  %v20697_v46 = vld [vmem:[#allocation2 + $0x50] sm:$0xff]  ;;  %v6922_v61 = vld [vmem:[%s21665_s28 + $0x198] sm:$0xff] }
0x17b1   : > { %25090 = vst [vmem:[#allocation31_spill] sm:$0xff] %v23299_v39  ;;  %25091 = vst [vmem:[#allocation32_spill] sm:$0xff] %v23303_v30  ;;  %v23307_v50 = vpack.c.bf16 %v23299_v39, %v23297_v0  ;;  %v23311_v56 = vpack.c.bf16 %v23303_v30, %v23301_v18  ;;  %v23320_v19 = vpack.c.bf16 %v23293_v44, %v23314_v37  ;;  %v6929_v36 = vld [vmem:[%s21665_s28 + $0x1d0] sm:$0xff]  ;;  %v6930_v16 = vld [vmem:[%s21665_s28 + $0x1d8] sm:$0xff] }
0x17b2   : > { %25092 = vst [vmem:[#allocation33_spill] sm:$0xff] %v23333_v12  ;;  %v23344_v1 = vpack.c.bf16 %v23327_v2, %v23331_v22  ;;  %25093 = vst [vmem:[#allocation34_spill] sm:$0xff] %v23346_v26  ;;  %v17119_v35 = vcombine.high %v6890_v54, %v6898_v43  ;;  %v23356_v24 = vpack.c.bf16 %v23333_v12, %v23346_v26  ;;  %v6938_v27 = vld [vmem:[%s21665_s28 + $0x218] sm:$0xff]  ;;  %v6953_v49 = vld [vmem:[%s21665_s28 + $0x290] sm:$0xff] }
0x17b3   : > { %10067 = vmatprep.mubr.bf16.mxu0 %v23307_v50  ;;  %10173 = vmatprep.mubr.bf16.mxu1 %v23307_v50  ;;  %v17116_v4 = vcombine.low %v6889_v11, %v6897_v40  ;;  %v17118_v8 = vcombine.low %v6890_v54, %v6898_v43  ;;  %v17133_v47 = vcombine.high %v6905_v3, %v6913_v28  ;;  %v6946_v60 = vld [vmem:[%s21665_s28 + $0x258] sm:$0xff]  ;;  %v6961_v40 = vld [vmem:[%s21665_s28 + $0x2d0] sm:$0xff] }
0x17b4   : > { %10068 = vmatmul.mubr.bf16.gmra.mrb[100].mxu0 %v23311_v56  ;;  %10174 = vmatmul.mubr.bf16.gmra.mrb[100].mxu1 %v23311_v56  ;;  %v17135_v63 = vcombine.high %v6906_v59, %v6914_v10  ;;  %v23360_v51 = vadd.f32 %v20696_v14, %v6845_v42  ;;  %v23364_v29 = vadd.f32 %v20697_v46, %v23282_v45  ;;  %v6937_v42 = vld [vmem:[%s21665_s28 + $0x210] sm:$0xff]  ;;  %v6954_v54 = vld [vmem:[%s21665_s28 + $0x298] sm:$0xff] }
0x17b5   : > { %10110 = vmatprep.mubr.bf16.mxu0 %v23320_v19  ;;  %10216 = vmatprep.mubr.bf16.mxu1 %v23320_v19  ;;  %v17132_v55 = vcombine.low %v6905_v3, %v6913_v28  ;;  %v17134_v34 = vcombine.low %v6906_v59, %v6914_v10  ;;  %v17149_v58 = vcombine.high %v6921_v57, %v6929_v36  ;;  %v6945_v45 = vld [vmem:[%s21665_s28 + $0x250] sm:$0xff]  ;;  %v6962_v43 = vld [vmem:[%s21665_s28 + $0x2d8] sm:$0xff] }
0x17b6   : > { %25094 = vst [vmem:[#allocation35_spill] sm:$0xff] %v23360_v51  ;;  %v23371_v33 = vpack.c.bf16 %v23360_v51, %v23364_v29  ;;  %v17151_v13 = vcombine.high %v6922_v61, %v6930_v16  ;;  %v17148_v7 = vcombine.low %v6921_v57, %v6929_v36  ;;  %v17150_v31 = vcombine.low %v6922_v61, %v6930_v16  ;;  %v6970_v28 = vld [vmem:[%s21665_s28 + $0x318] sm:$0xff]  ;;  %v6993_v14 = vld [vmem:[%s21665_s28 + $0x3d0] sm:$0xff]  ;;  %v7260_v51 = vld [vmem:[%s21665_s28 + $0xc28] sm:$0xff] }
0x17b7   : > { %v17165_v11 = vcombine.high %v6937_v42, %v6945_v45  ;;  %v17167_v32 = vcombine.high %v6938_v27, %v6946_v60  ;;  %v17181_v20 = vcombine.high %v6953_v49, %v6961_v40  ;;  %v17183_v3 = vcombine.high %v6954_v54, %v6962_v43  ;;  %v6978_v59 = vld [vmem:[%s21665_s28 + $0x358] sm:$0xff] }
0x17b8   : > { %v17180_v10 = vcombine.low %v6953_v49, %v6961_v40  ;;  %v6986_v57 = vld [vmem:[%s21665_s28 + $0x398] sm:$0xff]  ;;  %v17198_v61 = vcombine.low %v6970_v28, %v6978_v59 }
0x17b9   : > { %v6994_v46 = vld [vmem:[%s21665_s28 + $0x3d8] sm:$0xff] }
0x17ba   : > { %v7026_v49 = vld [vmem:[%s21665_s28 + $0x4d8] sm:$0xff] }
0x17bc   : > { %10111 = vmatmul.mubr.bf16.vlgmr.msra.gmra.mrb[96].mxu0 %v23344_v1  ;;  %10217 = vmatmul.mubr.bf16.vlgmr.msra.gmra.mrb[96].mxu1 %v23344_v1 }
0x17bd   : > { %10238 = vmatpush1.bf16.msra.mxu0 %v17100_v62  ;;  %10344 = vmatpush1.bf16.msra.mxu1 %v17102_v6  ;;  %v17164_v62 = vcombine.low %v6937_v42, %v6945_v45  ;;  %v17166_v6 = vcombine.low %v6938_v27, %v6946_v60  ;;  %v7009_v42 = vld [vmem:[%s21665_s28 + $0x450] sm:$0xff]  ;;  %v17214_v27 = vcombine.low %v6986_v57, %v6994_v46 }
0x17be   : > { %10120 = vmatprep.mubr.bf16.mxu0 %v23356_v24  ;;  %10226 = vmatprep.mubr.bf16.mxu1 %v23356_v24 }
0x17bf   : > { %10239 = vmatprep.subr.bf16.mxu0 %v17117_v21  ;;  %10345 = vmatprep.subr.bf16.mxu1 %v17119_v35  ;;  %v6969_v21 = vld [vmem:[%s21665_s28 + $0x310] sm:$0xff] }
0x17c0   : > { %v6977_v35 = vld [vmem:[%s21665_s28 + $0x350] sm:$0xff] }
0x17c1   : > { %10240 = vmatpush1.bf16.msra.mxu0 %v17116_v4  ;;  %10346 = vmatpush1.bf16.msra.mxu1 %v17118_v8  ;;  %v17182_v4 = vcombine.low %v6954_v54, %v6962_v43  ;;  %v17197_v8 = vcombine.high %v6969_v21, %v6977_v35  ;;  %v17196_v36 = vcombine.low %v6969_v21, %v6977_v35  ;;  %v7042_v21 = vld [vmem:[%s21665_s28 + $0x558] sm:$0xff] }
0x17c2   : > { %10241 = vmatprep.subr.bf16.mxu0 %v17133_v47  ;;  %10347 = vmatprep.subr.bf16.mxu1 %v17135_v63  ;;  %v17199_v47 = vcombine.high %v6970_v28, %v6978_v59  ;;  %v6985_v63 = vld [vmem:[%s21665_s28 + $0x390] sm:$0xff] }
0x17c3   : > { %v17213_v16 = vcombine.high %v6985_v63, %v6993_v14  ;;  %v17212_v45 = vcombine.low %v6985_v63, %v6993_v14  ;;  %v7058_v63 = vld [vmem:[%s21665_s28 + $0x5d8] sm:$0xff] }
0x17c4   : > { %10121 = vmatmul.mubr.bf16.gmra.mrb[100].mxu0 %v23371_v33  ;;  %10227 = vmatmul.mubr.bf16.gmra.mrb[100].mxu1 %v23371_v33 }
0x17c5   : > { %10242 = vmatpush1.bf16.msra.mxu0 %v17132_v55  ;;  %10348 = vmatpush1.bf16.msra.mxu1 %v17134_v34  ;;  %v17215_v55 = vcombine.high %v6986_v57, %v6994_v46  ;;  %v7001_v34 = vld [vmem:[%s21665_s28 + $0x410] sm:$0xff] }
0x17c6   : > { %10269 = vmatprep.mubr.bf16.mxu0 %v23180_v25  ;;  %10375 = vmatprep.mubr.bf16.mxu1 %v23180_v25  ;;  %v17229_v60 = vcombine.high %v7001_v34, %v7009_v42  ;;  %v17228_v40 = vcombine.low %v7001_v34, %v7009_v42  ;;  %v7074_v34 = vld [vmem:[%s21665_s28 + $0x658] sm:$0xff] }
0x17c7   : > { %10243 = vmatprep.subr.bf16.mxu0 %v17149_v58  ;;  %10349 = vmatprep.subr.bf16.mxu1 %v17151_v13  ;;  %v7002_v58 = vld [vmem:[%s21665_s28 + $0x418] sm:$0xff] }
0x17c8   : > { %v7010_v13 = vld [vmem:[%s21665_s28 + $0x458] sm:$0xff] }
0x17c9   : > { %10244 = vmatpush1.bf16.msra.mxu0 %v17148_v7  ;;  %10350 = vmatpush1.bf16.msra.mxu1 %v17150_v31  ;;  %v17231_v7 = vcombine.high %v7002_v58, %v7010_v13  ;;  %v7017_v31 = vld [vmem:[%s21665_s28 + $0x490] sm:$0xff]  ;;  %v17230_v54 = vcombine.low %v7002_v58, %v7010_v13 }
0x17ca   : > { %10245 = vmatprep.subr.bf16.mxu0 %v17165_v11  ;;  %10351 = vmatprep.subr.bf16.mxu1 %v17167_v32  ;;  %v7025_v11 = vld [vmem:[%s21665_s28 + $0x4d0] sm:$0xff]  ;;  %v7018_v32 = vld [vmem:[%s21665_s28 + $0x498] sm:$0xff] }
0x17cb   : > { %v17245_v43 = vcombine.high %v7017_v31, %v7025_v11  ;;  %v17244_v35 = vcombine.low %v7017_v31, %v7025_v11  ;;  %v17246_v28 = vcombine.low %v7018_v32, %v7026_v49  ;;  %v7090_v31 = vld [vmem:[%s21665_s28 + $0x6d8] sm:$0xff] }
0x17cd   : > { %10246 = vmatpush1.bf16.msra.mxu0 %v17164_v62  ;;  %10352 = vmatpush1.bf16.msra.mxu1 %v17166_v6  ;;  %v17247_v62 = vcombine.high %v7018_v32, %v7026_v49  ;;  %v7033_v6 = vld [vmem:[%s21665_s28 + $0x510] sm:$0xff] }
0x17ce   : > { %10247 = vmatprep.subr.bf16.mxu0 %v17181_v20  ;;  %10353 = vmatprep.subr.bf16.mxu1 %v17183_v3  ;;  %v7041_v20 = vld [vmem:[%s21665_s28 + $0x550] sm:$0xff]  ;;  %v7034_v3 = vld [vmem:[%s21665_s28 + $0x518] sm:$0xff] }
0x17cf   : > { %v17261_v59 = vcombine.high %v7033_v6, %v7041_v20  ;;  %v17260_v14 = vcombine.low %v7033_v6, %v7041_v20  ;;  %v17262_v57 = vcombine.low %v7034_v3, %v7042_v21  ;;  %v7106_v6 = vld [vmem:[%s21665_s28 + $0x758] sm:$0xff] }
0x17d1   : > { %10248 = vmatpush1.bf16.msra.mxu0 %v17180_v10  ;;  %10354 = vmatpush1.bf16.msra.mxu1 %v17182_v4  ;;  %v17263_v10 = vcombine.high %v7034_v3, %v7042_v21  ;;  %v7049_v4 = vld [vmem:[%s21665_s28 + $0x590] sm:$0xff] }
0x17d2   : > { %10249 = vmatprep.subr.bf16.mxu0 %v17197_v8  ;;  %10355 = vmatprep.subr.bf16.mxu1 %v17199_v47  ;;  %v7057_v8 = vld [vmem:[%s21665_s28 + $0x5d0] sm:$0xff]  ;;  %v7050_v47 = vld [vmem:[%s21665_s28 + $0x598] sm:$0xff] }
0x17d3   : > { %v17277_v46 = vcombine.high %v7049_v4, %v7057_v8  ;;  %v17276_v42 = vcombine.low %v7049_v4, %v7057_v8  ;;  %v17278_v58 = vcombine.low %v7050_v47, %v7058_v63  ;;  %v7122_v4 = vld [vmem:[%s21665_s28 + $0x7d8] sm:$0xff] }
0x17d5   : > { %10250 = vmatpush1.bf16.msra.mxu0 %v17196_v36  ;;  %10356 = vmatpush1.bf16.msra.mxu1 %v17198_v61  ;;  %v17279_v36 = vcombine.high %v7050_v47, %v7058_v63  ;;  %v7065_v61 = vld [vmem:[%s21665_s28 + $0x610] sm:$0xff] }
0x17d6   : > { %10251 = vmatprep.subr.bf16.mxu0 %v17213_v16  ;;  %10357 = vmatprep.subr.bf16.mxu1 %v17215_v55  ;;  %v7073_v16 = vld [vmem:[%s21665_s28 + $0x650] sm:$0xff]  ;;  %v7066_v55 = vld [vmem:[%s21665_s28 + $0x618] sm:$0xff] }
0x17d7   : > { %v17293_v13 = vcombine.high %v7065_v61, %v7073_v16  ;;  %v17292_v11 = vcombine.low %v7065_v61, %v7073_v16  ;;  %v17294_v32 = vcombine.low %v7066_v55, %v7074_v34  ;;  %v7138_v61 = vld [vmem:[%s21665_s28 + $0x858] sm:$0xff] }
0x17d9   : > { %10252 = vmatpush1.bf16.msra.mxu0 %v17212_v45  ;;  %10358 = vmatpush1.bf16.msra.mxu1 %v17214_v27  ;;  %v17295_v45 = vcombine.high %v7066_v55, %v7074_v34  ;;  %v7081_v27 = vld [vmem:[%s21665_s28 + $0x690] sm:$0xff] }
0x17da   : > { %10253 = vmatprep.subr.bf16.mxu0 %v17229_v60  ;;  %10359 = vmatprep.subr.bf16.mxu1 %v17231_v7  ;;  %v7089_v60 = vld [vmem:[%s21665_s28 + $0x6d0] sm:$0xff]  ;;  %v7082_v7 = vld [vmem:[%s21665_s28 + $0x698] sm:$0xff] }
0x17db   : > { %v17309_v49 = vcombine.high %v7081_v27, %v7089_v60  ;;  %v17308_v20 = vcombine.low %v7081_v27, %v7089_v60  ;;  %v17310_v3 = vcombine.low %v7082_v7, %v7090_v31  ;;  %v7154_v27 = vld [vmem:[%s21665_s28 + $0x8d8] sm:$0xff] }
0x17dd   : > { %10254 = vmatpush1.bf16.msra.mxu0 %v17228_v40  ;;  %10360 = vmatpush1.bf16.msra.mxu1 %v17230_v54  ;;  %v17311_v40 = vcombine.high %v7082_v7, %v7090_v31  ;;  %v7097_v54 = vld [vmem:[%s21665_s28 + $0x710] sm:$0xff] }
0x17de   : > { %10255 = vmatprep.subr.bf16.mxu0 %v17245_v43  ;;  %10361 = vmatprep.subr.bf16.mxu1 %v17247_v62  ;;  %v7105_v43 = vld [vmem:[%s21665_s28 + $0x750] sm:$0xff]  ;;  %v7098_v62 = vld [vmem:[%s21665_s28 + $0x718] sm:$0xff] }
0x17df   : > { %v17325_v21 = vcombine.high %v7097_v54, %v7105_v43  ;;  %v17324_v8 = vcombine.low %v7097_v54, %v7105_v43  ;;  %v17326_v47 = vcombine.low %v7098_v62, %v7106_v6  ;;  %v7170_v54 = vld [vmem:[%s21665_s28 + $0x958] sm:$0xff] }
0x17e1   : > { %10256 = vmatpush1.bf16.msra.mxu0 %v17244_v35  ;;  %10362 = vmatpush1.bf16.msra.mxu1 %v17246_v28  ;;  %v17327_v35 = vcombine.high %v7098_v62, %v7106_v6  ;;  %v7113_v28 = vld [vmem:[%s21665_s28 + $0x790] sm:$0xff] }
0x17e2   : > { %10257 = vmatprep.subr.bf16.mxu0 %v17261_v59  ;;  %10363 = vmatprep.subr.bf16.mxu1 %v17263_v10  ;;  %v7121_v59 = vld [vmem:[%s21665_s28 + $0x7d0] sm:$0xff]  ;;  %v7114_v10 = vld [vmem:[%s21665_s28 + $0x798] sm:$0xff] }
0x17e3   : > { %v17341_v63 = vcombine.high %v7113_v28, %v7121_v59  ;;  %v17340_v16 = vcombine.low %v7113_v28, %v7121_v59  ;;  %v17342_v55 = vcombine.low %v7114_v10, %v7122_v4  ;;  %v7186_v28 = vld [vmem:[%s21665_s28 + $0x9d8] sm:$0xff] }
0x17e5   : > { %10258 = vmatpush1.bf16.msra.mxu0 %v17260_v14  ;;  %10364 = vmatpush1.bf16.msra.mxu1 %v17262_v57  ;;  %v17343_v14 = vcombine.high %v7114_v10, %v7122_v4  ;;  %v7129_v57 = vld [vmem:[%s21665_s28 + $0x810] sm:$0xff] }
0x17e6   : > { %10259 = vmatprep.subr.bf16.mxu0 %v17277_v46  ;;  %10365 = vmatprep.subr.bf16.mxu1 %v17279_v36  ;;  %v7137_v46 = vld [vmem:[%s21665_s28 + $0x850] sm:$0xff]  ;;  %v7130_v36 = vld [vmem:[%s21665_s28 + $0x818] sm:$0xff] }
0x17e7   : > { %v17357_v34 = vcombine.high %v7129_v57, %v7137_v46  ;;  %v17356_v60 = vcombine.low %v7129_v57, %v7137_v46  ;;  %v17358_v7 = vcombine.low %v7130_v36, %v7138_v61  ;;  %v7202_v57 = vld [vmem:[%s21665_s28 + $0xa58] sm:$0xff] }
0x17e9   : > { %10260 = vmatpush1.bf16.msra.mxu0 %v17276_v42  ;;  %10366 = vmatpush1.bf16.msra.mxu1 %v17278_v58  ;;  %v17359_v42 = vcombine.high %v7130_v36, %v7138_v61  ;;  %v7145_v58 = vld [vmem:[%s21665_s28 + $0x890] sm:$0xff] }
0x17ea   : > { %10261 = vmatprep.subr.bf16.mxu0 %v17293_v13  ;;  %10367 = vmatprep.subr.bf16.mxu1 %v17295_v45  ;;  %v7153_v13 = vld [vmem:[%s21665_s28 + $0x8d0] sm:$0xff]  ;;  %v7146_v45 = vld [vmem:[%s21665_s28 + $0x898] sm:$0xff] }
0x17eb   : > { %v17373_v31 = vcombine.high %v7145_v58, %v7153_v13  ;;  %v17372_v43 = vcombine.low %v7145_v58, %v7153_v13  ;;  %v17374_v62 = vcombine.low %v7146_v45, %v7154_v27  ;;  %v7218_v58 = vld [vmem:[%s21665_s28 + $0xad8] sm:$0xff] }
0x17ed   : > { %10262 = vmatpush1.bf16.msra.mxu0 %v17292_v11  ;;  %10368 = vmatpush1.bf16.msra.mxu1 %v17294_v32  ;;  %v17375_v11 = vcombine.high %v7146_v45, %v7154_v27  ;;  %v7161_v32 = vld [vmem:[%s21665_s28 + $0x910] sm:$0xff] }
0x17ee   : > { %10263 = vmatprep.subr.bf16.mxu0 %v17309_v49  ;;  %10369 = vmatprep.subr.bf16.mxu1 %v17311_v40  ;;  %v7169_v49 = vld [vmem:[%s21665_s28 + $0x950] sm:$0xff]  ;;  %v7162_v40 = vld [vmem:[%s21665_s28 + $0x918] sm:$0xff] }
0x17ef   : > { %v17389_v6 = vcombine.high %v7161_v32, %v7169_v49  ;;  %v17388_v59 = vcombine.low %v7161_v32, %v7169_v49  ;;  %v17390_v10 = vcombine.low %v7162_v40, %v7170_v54  ;;  %v7234_v32 = vld [vmem:[%s21665_s28 + $0xb58] sm:$0xff] }
0x17f1   : > { %10264 = vmatpush1.bf16.msra.mxu0 %v17308_v20  ;;  %10370 = vmatpush1.bf16.msra.mxu1 %v17310_v3  ;;  %v17391_v20 = vcombine.high %v7162_v40, %v7170_v54  ;;  %v7177_v3 = vld [vmem:[%s21665_s28 + $0x990] sm:$0xff] }
0x17f2   : > { %10265 = vmatprep.subr.bf16.mxu0 %v17325_v21  ;;  %10371 = vmatprep.subr.bf16.mxu1 %v17327_v35  ;;  %v7185_v21 = vld [vmem:[%s21665_s28 + $0x9d0] sm:$0xff]  ;;  %v7178_v35 = vld [vmem:[%s21665_s28 + $0x998] sm:$0xff] }
0x17f3   : > { %v17405_v4 = vcombine.high %v7177_v3, %v7185_v21  ;;  %v17404_v46 = vcombine.low %v7177_v3, %v7185_v21  ;;  %v17406_v36 = vcombine.low %v7178_v35, %v7186_v28  ;;  %v7250_v3 = vld [vmem:[%s21665_s28 + $0xbd8] sm:$0xff] }
0x17f5   : > { %10266 = vmatpush1.bf16.msra.mxu0 %v17324_v8  ;;  %10372 = vmatpush1.bf16.msra.mxu1 %v17326_v47  ;;  %v17407_v8 = vcombine.high %v7178_v35, %v7186_v28  ;;  %v7193_v47 = vld [vmem:[%s21665_s28 + $0xa10] sm:$0xff] }
0x17f6   : > { %10267 = vmatprep.subr.bf16.mxu0 %v17341_v63  ;;  %10373 = vmatprep.subr.bf16.mxu1 %v17343_v14  ;;  %v7201_v63 = vld [vmem:[%s21665_s28 + $0xa50] sm:$0xff]  ;;  %v7194_v14 = vld [vmem:[%s21665_s28 + $0xa18] sm:$0xff] }
0x17f7   : > { %v17421_v61 = vcombine.high %v7193_v47, %v7201_v63  ;;  %v17420_v13 = vcombine.low %v7193_v47, %v7201_v63  ;;  %v17422_v45 = vcombine.low %v7194_v14, %v7202_v57  ;;  %v7266_v47 = vld [vmem:[%s21665_s28 + $0xc58] sm:$0xff] }
0x17f9   : > { %10268 = vmatpush1.bf16.msra.mxu0 %v17340_v16  ;;  %10374 = vmatpush1.bf16.msra.mxu1 %v17342_v55  ;;  %v17423_v16 = vcombine.high %v7194_v14, %v7202_v57  ;;  %v7209_v55 = vld [vmem:[%s21665_s28 + $0xa90] sm:$0xff] }
0x17fa   : > { %10290 = vmatprep.subr.bf16.mxu0 %v17357_v34  ;;  %10396 = vmatprep.subr.bf16.mxu1 %v17359_v42  ;;  %v7217_v34 = vld [vmem:[%s21665_s28 + $0xad0] sm:$0xff]  ;;  %v7210_v42 = vld [vmem:[%s21665_s28 + $0xa98] sm:$0xff] }
0x17fb   : > { %v17437_v27 = vcombine.high %v7209_v55, %v7217_v34  ;;  %v17436_v49 = vcombine.low %v7209_v55, %v7217_v34  ;;  %v17438_v40 = vcombine.low %v7210_v42, %v7218_v58  ;;  %v7282_v55 = vld [vmem:[%s21665_s28 + $0xcd8] sm:$0xff] }
0x17fc   : > { %10270 = vmatmul.mubr.bf16.vlgmr.msra.gmra.mrb[104].mxu0 %v23184_v15  ;;  %10376 = vmatmul.mubr.bf16.vlgmr.msra.gmra.mrb[104].mxu1 %v23184_v15 }
0x17fd   : > { %10279 = vmatprep.mubr.bf16.mxu0 %v23307_v50  ;;  %10291 = vmatpush1.bf16.msra.mxu0 %v17356_v60  ;;  %v17439_v60 = vcombine.high %v7210_v42, %v7218_v58 }
0x17fe   : > { %10385 = vmatprep.mubr.bf16.mxu1 %v23307_v50  ;;  %10397 = vmatpush1.bf16.msra.mxu1 %v17358_v7  ;;  %v7225_v7 = vld [vmem:[%s21665_s28 + $0xb10] sm:$0xff] }
0x17ff   : > { %10292 = vmatprep.subr.bf16.mxu0 %v17373_v31  ;;  %10398 = vmatprep.subr.bf16.mxu1 %v17375_v11  ;;  %v7233_v31 = vld [vmem:[%s21665_s28 + $0xb50] sm:$0xff]  ;;  %v7226_v11 = vld [vmem:[%s21665_s28 + $0xb18] sm:$0xff] }
0x1800   : > { %v17453_v54 = vcombine.high %v7225_v7, %v7233_v31  ;;  %v17452_v21 = vcombine.low %v7225_v7, %v7233_v31  ;;  %v17454_v35 = vcombine.low %v7226_v11, %v7234_v32  ;;  %v7298_v7 = vld [vmem:[%s21665_s28 + $0xd58] sm:$0xff] }
0x1801   : > { %10293 = vmatpush1.bf16.msra.mxu0 %v17372_v43  ;;  %v17455_v43 = vcombine.high %v7226_v11, %v7234_v32 }
0x1802   : > { %10399 = vmatpush1.bf16.msra.mxu1 %v17374_v62  ;;  %10294 = vmatprep.subr.bf16.mxu0 %v17389_v6  ;;  %v7241_v62 = vld [vmem:[%s21665_s28 + $0xb90] sm:$0xff] }
0x1803   : > { %10400 = vmatprep.subr.bf16.mxu1 %v17391_v20  ;;  %v7249_v6 = vld [vmem:[%s21665_s28 + $0xbd0] sm:$0xff]  ;;  %v7242_v20 = vld [vmem:[%s21665_s28 + $0xb98] sm:$0xff] }
0x1804   : > { %10280 = vmatmul.mubr.bf16.gmra.mrb[108].mxu0 %v23311_v56  ;;  %10386 = vmatmul.mubr.bf16.gmra.mrb[108].mxu1 %v23311_v56  ;;  %v17469_v28 = vcombine.high %v7241_v62, %v7249_v6  ;;  %v17468_v63 = vcombine.low %v7241_v62, %v7249_v6  ;;  %v17470_v14 = vcombine.low %v7242_v20, %v7250_v3  ;;  %v7314_v62 = vld [vmem:[%s21665_s28 + $0xdd8] sm:$0xff] }
0x1805   : > { %10295 = vmatpush1.bf16.msra.mxu0 %v17388_v59  ;;  %10322 = vmatprep.mubr.bf16.mxu0 %v23320_v19  ;;  %v17471_v59 = vcombine.high %v7242_v20, %v7250_v3 }
0x1806   : > { %10401 = vmatpush1.bf16.msra.mxu1 %v17390_v10  ;;  %10428 = vmatprep.mubr.bf16.mxu1 %v23320_v19  ;;  %v7257_v10 = vld [vmem:[%s21665_s28 + $0xc10] sm:$0xff] }
0x1807   : > { %10296 = vmatprep.subr.bf16.mxu0 %v17405_v4  ;;  %10402 = vmatprep.subr.bf16.mxu1 %v17407_v8  ;;  %v7265_v4 = vld [vmem:[%s21665_s28 + $0xc50] sm:$0xff]  ;;  %v7258_v8 = vld [vmem:[%s21665_s28 + $0xc18] sm:$0xff] }
0x1808   : > { %v17485_v57 = vcombine.high %v7257_v10, %v7265_v4  ;;  %v17484_v34 = vcombine.low %v7257_v10, %v7265_v4  ;;  %v17486_v42 = vcombine.low %v7258_v8, %v7266_v47  ;;  %v7330_v10 = vld [vmem:[%s21665_s28 + $0xe58] sm:$0xff] }
0x1809   : > { %10297 = vmatpush1.bf16.msra.mxu0 %v17404_v46  ;;  %v17487_v46 = vcombine.high %v7258_v8, %v7266_v47 }
0x180a   : > { %10403 = vmatpush1.bf16.msra.mxu1 %v17406_v36  ;;  %10298 = vmatprep.subr.bf16.mxu0 %v17421_v61  ;;  %v7273_v36 = vld [vmem:[%s21665_s28 + $0xc90] sm:$0xff] }
0x180b   : > { %10404 = vmatprep.subr.bf16.mxu1 %v17423_v16  ;;  %v7281_v61 = vld [vmem:[%s21665_s28 + $0xcd0] sm:$0xff]  ;;  %v7274_v16 = vld [vmem:[%s21665_s28 + $0xc98] sm:$0xff] }
0x180c   : > { %v17501_v58 = vcombine.high %v7273_v36, %v7281_v61  ;;  %v17500_v31 = vcombine.low %v7273_v36, %v7281_v61  ;;  %v17502_v11 = vcombine.low %v7274_v16, %v7282_v55  ;;  %v7346_v36 = vld [vmem:[%s21665_s28 + $0xed8] sm:$0xff] }
0x180d   : > { %10299 = vmatpush1.bf16.msra.mxu0 %v17420_v13  ;;  %v17503_v13 = vcombine.high %v7274_v16, %v7282_v55 }
0x180e   : > { %10405 = vmatpush1.bf16.msra.mxu1 %v17422_v45  ;;  %10300 = vmatprep.subr.bf16.mxu0 %v17437_v27  ;;  %v7289_v45 = vld [vmem:[%s21665_s28 + $0xd10] sm:$0xff] }
0x180f   : > { %10406 = vmatprep.subr.bf16.mxu1 %v17439_v60  ;;  %v7297_v27 = vld [vmem:[%s21665_s28 + $0xd50] sm:$0xff]  ;;  %v7290_v60 = vld [vmem:[%s21665_s28 + $0xd18] sm:$0xff] }
0x1810   : > { %v17517_v32 = vcombine.high %v7289_v45, %v7297_v27  ;;  %v17516_v6 = vcombine.low %v7289_v45, %v7297_v27  ;;  %v17518_v20 = vcombine.low %v7290_v60, %v7298_v7  ;;  %v7362_v45 = vld [vmem:[%s21665_s28 + $0xf58] sm:$0xff] }
0x1811   : > { %10301 = vmatpush1.bf16.msra.mxu0 %v17436_v49  ;;  %v17519_v49 = vcombine.high %v7290_v60, %v7298_v7 }
0x1812   : > { %10407 = vmatpush1.bf16.msra.mxu1 %v17438_v40  ;;  %10302 = vmatprep.subr.bf16.mxu0 %v17453_v54  ;;  %v7305_v40 = vld [vmem:[%s21665_s28 + $0xd90] sm:$0xff] }
0x1813   : > { %10408 = vmatprep.subr.bf16.mxu1 %v17455_v43  ;;  %v7313_v54 = vld [vmem:[%s21665_s28 + $0xdd0] sm:$0xff]  ;;  %v7306_v43 = vld [vmem:[%s21665_s28 + $0xd98] sm:$0xff] }
0x1814   : > { %v17533_v3 = vcombine.high %v7305_v40, %v7313_v54  ;;  %v17532_v4 = vcombine.low %v7305_v40, %v7313_v54  ;;  %v17534_v8 = vcombine.low %v7306_v43, %v7314_v62  ;;  %v7378_v40 = vld [vmem:[%s21665_s28 + $0xfd8] sm:$0xff] }
0x1815   : > { %10303 = vmatpush1.bf16.msra.mxu0 %v17452_v21  ;;  %v17535_v21 = vcombine.high %v7306_v43, %v7314_v62 }
0x1816   : > { %10409 = vmatpush1.bf16.msra.mxu1 %v17454_v35  ;;  %10304 = vmatprep.subr.bf16.mxu0 %v17469_v28  ;;  %v7321_v35 = vld [vmem:[%s21665_s28 + $0xe10] sm:$0xff] }
0x1817   : > { %10410 = vmatprep.subr.bf16.mxu1 %v17471_v59  ;;  %v7329_v28 = vld [vmem:[%s21665_s28 + $0xe50] sm:$0xff]  ;;  %v7322_v59 = vld [vmem:[%s21665_s28 + $0xe18] sm:$0xff] }
0x1818   : > { %v17549_v47 = vcombine.high %v7321_v35, %v7329_v28  ;;  %v17548_v61 = vcombine.low %v7321_v35, %v7329_v28  ;;  %v17550_v16 = vcombine.low %v7322_v59, %v7330_v10  ;;  %v6884_v35 = vld [vmem:[%s21665_s28 + $0x68] sm:$0xff] }
0x1819   : > { %10305 = vmatpush1.bf16.msra.mxu0 %v17468_v63  ;;  %v17551_v63 = vcombine.high %v7322_v59, %v7330_v10 }
0x181a   : > { %10411 = vmatpush1.bf16.msra.mxu1 %v17470_v14  ;;  %10306 = vmatprep.subr.bf16.mxu0 %v17485_v57  ;;  %v7337_v14 = vld [vmem:[%s21665_s28 + $0xe90] sm:$0xff] }
0x181b   : > { %10412 = vmatprep.subr.bf16.mxu1 %v17487_v46  ;;  %v7345_v57 = vld [vmem:[%s21665_s28 + $0xed0] sm:$0xff]  ;;  %v7338_v46 = vld [vmem:[%s21665_s28 + $0xe98] sm:$0xff] }
0x181c   : > { %v17565_v55 = vcombine.high %v7337_v14, %v7345_v57  ;;  %v17564_v27 = vcombine.low %v7337_v14, %v7345_v57  ;;  %v17566_v60 = vcombine.low %v7338_v46, %v7346_v36  ;;  %v6900_v14 = vld [vmem:[%s21665_s28 + $0xe8] sm:$0xff] }
0x181d   : > { %10307 = vmatpush1.bf16.msra.mxu0 %v17484_v34  ;;  %v17567_v34 = vcombine.high %v7338_v46, %v7346_v36 }
0x181e   : > { %10413 = vmatpush1.bf16.msra.mxu1 %v17486_v42  ;;  %10308 = vmatprep.subr.bf16.mxu0 %v17501_v58  ;;  %v7353_v42 = vld [vmem:[%s21665_s28 + $0xf10] sm:$0xff] }
0x181f   : > { %10414 = vmatprep.subr.bf16.mxu1 %v17503_v13  ;;  %v7361_v58 = vld [vmem:[%s21665_s28 + $0xf50] sm:$0xff]  ;;  %v7354_v13 = vld [vmem:[%s21665_s28 + $0xf18] sm:$0xff] }
0x1820   : > { %v17581_v7 = vcombine.high %v7353_v42, %v7361_v58  ;;  %v17580_v54 = vcombine.low %v7353_v42, %v7361_v58  ;;  %v17582_v43 = vcombine.low %v7354_v13, %v7362_v45  ;;  %v6916_v42 = vld [vmem:[%s21665_s28 + $0x168] sm:$0xff] }
0x1821   : > { %10309 = vmatpush1.bf16.msra.mxu0 %v17500_v31  ;;  %v17583_v31 = vcombine.high %v7354_v13, %v7362_v45 }
0x1822   : > { %10415 = vmatpush1.bf16.msra.mxu1 %v17502_v11  ;;  %10310 = vmatprep.subr.bf16.mxu0 %v17517_v32  ;;  %v7369_v11 = vld [vmem:[%s21665_s28 + $0xf90] sm:$0xff] }
0x1823   : > { %10416 = vmatprep.subr.bf16.mxu1 %v17519_v49  ;;  %v7377_v32 = vld [vmem:[%s21665_s28 + $0xfd0] sm:$0xff]  ;;  %v7370_v49 = vld [vmem:[%s21665_s28 + $0xf98] sm:$0xff] }
0x1824   : > { %v17597_v62 = vcombine.high %v7369_v11, %v7377_v32  ;;  %v17596_v28 = vcombine.low %v7369_v11, %v7377_v32  ;;  %v17598_v59 = vcombine.low %v7370_v49, %v7378_v40  ;;  %v6932_v11 = vld [vmem:[%s21665_s28 + $0x1e8] sm:$0xff] }
0x1825   : > { %10311 = vmatpush1.bf16.msra.mxu0 %v17516_v6  ;;  %v17599_v6 = vcombine.high %v7370_v49, %v7378_v40 }
0x1826   : > { %10417 = vmatpush1.bf16.msra.mxu1 %v17518_v20  ;;  %10312 = vmatprep.subr.bf16.mxu0 %v17533_v3  ;;  %v6875_v20 = vld [vmem:[%s21665_s28 + $0x20] sm:$0xff] }
0x1827   : > { %10418 = vmatprep.subr.bf16.mxu1 %v17535_v21  ;;  %v6883_v3 = vld [vmem:[%s21665_s28 + $0x60] sm:$0xff]  ;;  %v6876_v21 = vld [vmem:[%s21665_s28 + $0x28] sm:$0xff] }
0x1828   : > { %v17105_v10 = vcombine.high %v6875_v20, %v6883_v3  ;;  %v17104_v57 = vcombine.low %v6875_v20, %v6883_v3  ;;  %v17106_v46 = vcombine.low %v6876_v21, %v6884_v35  ;;  %v6948_v20 = vld [vmem:[%s21665_s28 + $0x268] sm:$0xff] }
0x1829   : > { %10313 = vmatpush1.bf16.msra.mxu0 %v17532_v4  ;;  %v17107_v4 = vcombine.high %v6876_v21, %v6884_v35 }
0x182a   : > { %10419 = vmatpush1.bf16.msra.mxu1 %v17534_v8  ;;  %10314 = vmatprep.subr.bf16.mxu0 %v17549_v47  ;;  %v6891_v8 = vld [vmem:[%s21665_s28 + $0xa0] sm:$0xff] }
0x182b   : > { %10420 = vmatprep.subr.bf16.mxu1 %v17551_v63  ;;  %v6899_v47 = vld [vmem:[%s21665_s28 + $0xe0] sm:$0xff]  ;;  %v6892_v63 = vld [vmem:[%s21665_s28 + $0xa8] sm:$0xff] }
0x182c   : > { %v17121_v36 = vcombine.high %v6891_v8, %v6899_v47  ;;  %v17120_v58 = vcombine.low %v6891_v8, %v6899_v47  ;;  %v17122_v13 = vcombine.low %v6892_v63, %v6900_v14  ;;  %v6964_v8 = vld [vmem:[%s21665_s28 + $0x2e8] sm:$0xff] }
0x182d   : > { %10315 = vmatpush1.bf16.msra.mxu0 %v17548_v61  ;;  %v17123_v61 = vcombine.high %v6892_v63, %v6900_v14 }
0x182e   : > { %10421 = vmatpush1.bf16.msra.mxu1 %v17550_v16  ;;  %10316 = vmatprep.subr.bf16.mxu0 %v17565_v55  ;;  %v6907_v16 = vld [vmem:[%s21665_s28 + $0x120] sm:$0xff] }
0x182f   : > { %10422 = vmatprep.subr.bf16.mxu1 %v17567_v34  ;;  %v6915_v55 = vld [vmem:[%s21665_s28 + $0x160] sm:$0xff]  ;;  %v6908_v34 = vld [vmem:[%s21665_s28 + $0x128] sm:$0xff] }
0x1830   : > { %v17137_v45 = vcombine.high %v6907_v16, %v6915_v55  ;;  %v17136_v32 = vcombine.low %v6907_v16, %v6915_v55  ;;  %v17138_v49 = vcombine.low %v6908_v34, %v6916_v42  ;;  %v6980_v16 = vld [vmem:[%s21665_s28 + $0x368] sm:$0xff] }
0x1831   : > { %10317 = vmatpush1.bf16.msra.mxu0 %v17564_v27  ;;  %v17139_v27 = vcombine.high %v6908_v34, %v6916_v42 }
0x1832   : > { %10423 = vmatpush1.bf16.msra.mxu1 %v17566_v60  ;;  %10318 = vmatprep.subr.bf16.mxu0 %v17581_v7  ;;  %v6923_v60 = vld [vmem:[%s21665_s28 + $0x1a0] sm:$0xff] }
0x1833   : > { %10424 = vmatprep.subr.bf16.mxu1 %v17583_v31  ;;  %v6931_v7 = vld [vmem:[%s21665_s28 + $0x1e0] sm:$0xff]  ;;  %v6924_v31 = vld [vmem:[%s21665_s28 + $0x1a8] sm:$0xff] }
0x1834   : > { %v17153_v40 = vcombine.high %v6923_v60, %v6931_v7  ;;  %v17152_v3 = vcombine.low %v6923_v60, %v6931_v7  ;;  %v17154_v21 = vcombine.low %v6924_v31, %v6932_v11  ;;  %v6996_v60 = vld [vmem:[%s21665_s28 + $0x3e8] sm:$0xff] }
0x1835   : > { %10319 = vmatpush1.bf16.msra.mxu0 %v17580_v54  ;;  %v17155_v54 = vcombine.high %v6924_v31, %v6932_v11 }
0x1836   : > { %10425 = vmatpush1.bf16.msra.mxu1 %v17582_v43  ;;  %10320 = vmatprep.subr.bf16.mxu0 %v17597_v62  ;;  %v6939_v43 = vld [vmem:[%s21665_s28 + $0x220] sm:$0xff] }
0x1837   : > { %10426 = vmatprep.subr.bf16.mxu1 %v17599_v6  ;;  %v6947_v62 = vld [vmem:[%s21665_s28 + $0x260] sm:$0xff]  ;;  %v6940_v6 = vld [vmem:[%s21665_s28 + $0x228] sm:$0xff] }
0x1838   : > { %v17169_v35 = vcombine.high %v6939_v43, %v6947_v62  ;;  %v17168_v47 = vcombine.low %v6939_v43, %v6947_v62  ;;  %v17170_v63 = vcombine.low %v6940_v6, %v6948_v20  ;;  %v7012_v43 = vld [vmem:[%s21665_s28 + $0x468] sm:$0xff] }
0x1839   : > { %10321 = vmatpush1.bf16.msra.mxu0 %v17596_v28  ;;  %v17171_v28 = vcombine.high %v6940_v6, %v6948_v20 }
0x183a   : > { %10427 = vmatpush1.bf16.msra.mxu1 %v17598_v59  ;;  %10449 = vmatprep.subr.bf16.mxu0 %v17105_v10  ;;  %v6955_v59 = vld [vmem:[%s21665_s28 + $0x2a0] sm:$0xff] }
0x183b   : > { %10555 = vmatprep.subr.bf16.mxu1 %v17107_v4  ;;  %v6963_v10 = vld [vmem:[%s21665_s28 + $0x2e0] sm:$0xff]  ;;  %v6956_v4 = vld [vmem:[%s21665_s28 + $0x2a8] sm:$0xff] }
0x183c   : > { %10323 = vmatmul.mubr.bf16.vlgmr.msra.gmra.mrb[104].mxu0 %v23344_v1  ;;  %v17185_v14 = vcombine.high %v6955_v59, %v6963_v10  ;;  %v17184_v55 = vcombine.low %v6955_v59, %v6963_v10  ;;  %v17186_v34 = vcombine.low %v6956_v4, %v6964_v8  ;;  %v7028_v59 = vld [vmem:[%s21665_s28 + $0x4e8] sm:$0xff] }
0x183d   : > { %10429 = vmatmul.mubr.bf16.vlgmr.msra.gmra.mrb[104].mxu1 %v23344_v1  ;;  %10332 = vmatprep.mubr.bf16.mxu0 %v23356_v24 }
0x183e   : > { %10438 = vmatprep.mubr.bf16.mxu1 %v23356_v24  ;;  %10450 = vmatpush1.bf16.msra.mxu0 %v17104_v57  ;;  %v17187_v57 = vcombine.high %v6956_v4, %v6964_v8 }
0x183f   : > { %10556 = vmatpush1.bf16.msra.mxu1 %v17106_v46  ;;  %10451 = vmatprep.subr.bf16.mxu0 %v17121_v36  ;;  %v6971_v46 = vld [vmem:[%s21665_s28 + $0x320] sm:$0xff] }
0x1840   : > { %10557 = vmatprep.subr.bf16.mxu1 %v17123_v61  ;;  %v6979_v36 = vld [vmem:[%s21665_s28 + $0x360] sm:$0xff]  ;;  %v6972_v61 = vld [vmem:[%s21665_s28 + $0x328] sm:$0xff] }
0x1841   : > { %v17201_v42 = vcombine.high %v6971_v46, %v6979_v36  ;;  %v17200_v7 = vcombine.low %v6971_v46, %v6979_v36  ;;  %v17202_v31 = vcombine.low %v6972_v61, %v6980_v16  ;;  %v7044_v46 = vld [vmem:[%s21665_s28 + $0x568] sm:$0xff] }
0x1842   : > { %10452 = vmatpush1.bf16.msra.mxu0 %v17120_v58  ;;  %v17203_v58 = vcombine.high %v6972_v61, %v6980_v16 }
0x1843   : > { %10558 = vmatpush1.bf16.msra.mxu1 %v17122_v13  ;;  %10453 = vmatprep.subr.bf16.mxu0 %v17137_v45  ;;  %v6987_v13 = vld [vmem:[%s21665_s28 + $0x3a0] sm:$0xff] }
0x1844   : > { %10333 = vmatmul.mubr.bf16.gmra.mrb[108].mxu0 %v23371_v33  ;;  %10559 = vmatprep.subr.bf16.mxu1 %v17139_v27  ;;  %v6995_v45 = vld [vmem:[%s21665_s28 + $0x3e0] sm:$0xff]  ;;  %v6988_v27 = vld [vmem:[%s21665_s28 + $0x3a8] sm:$0xff] }
0x1845   : > { %10439 = vmatmul.mubr.bf16.gmra.mrb[108].mxu1 %v23371_v33  ;;  %10481 = vmatprep.mubr.bf16.mxu0 %v23180_v25  ;;  %v17217_v11 = vcombine.high %v6987_v13, %v6995_v45  ;;  %v17216_v62 = vcombine.low %v6987_v13, %v6995_v45  ;;  %v17218_v6 = vcombine.low %v6988_v27, %v6996_v60  ;;  %v7060_v13 = vld [vmem:[%s21665_s28 + $0x5e8] sm:$0xff] }
0x1846   : > { %10454 = vmatpush1.bf16.msra.mxu0 %v17136_v32  ;;  %10587 = vmatprep.mubr.bf16.mxu1 %v23180_v25  ;;  %v17219_v32 = vcombine.high %v6988_v27, %v6996_v60 }
0x1847   : > { %10560 = vmatpush1.bf16.msra.mxu1 %v17138_v49  ;;  %10455 = vmatprep.subr.bf16.mxu0 %v17153_v40  ;;  %v7003_v49 = vld [vmem:[%s21665_s28 + $0x420] sm:$0xff] }
0x1848   : > { %10561 = vmatprep.subr.bf16.mxu1 %v17155_v54  ;;  %v7011_v40 = vld [vmem:[%s21665_s28 + $0x460] sm:$0xff]  ;;  %v7004_v54 = vld [vmem:[%s21665_s28 + $0x428] sm:$0xff] }
0x1849   : > { %v17233_v20 = vcombine.high %v7003_v49, %v7011_v40  ;;  %v17232_v10 = vcombine.low %v7003_v49, %v7011_v40  ;;  %v17234_v4 = vcombine.low %v7004_v54, %v7012_v43  ;;  %v7076_v49 = vld [vmem:[%s21665_s28 + $0x668] sm:$0xff] }
0x184a   : > { %10456 = vmatpush1.bf16.msra.mxu0 %v17152_v3  ;;  %v17235_v3 = vcombine.high %v7004_v54, %v7012_v43 }
0x184b   : > { %10562 = vmatpush1.bf16.msra.mxu1 %v17154_v21  ;;  %10457 = vmatprep.subr.bf16.mxu0 %v17169_v35  ;;  %v7019_v21 = vld [vmem:[%s21665_s28 + $0x4a0] sm:$0xff] }
0x184c   : > { %10563 = vmatprep.subr.bf16.mxu1 %v17171_v28  ;;  %v7027_v35 = vld [vmem:[%s21665_s28 + $0x4e0] sm:$0xff]  ;;  %v7020_v28 = vld [vmem:[%s21665_s28 + $0x4a8] sm:$0xff] }
0x184d   : > { %v17249_v8 = vcombine.high %v7019_v21, %v7027_v35  ;;  %v17248_v36 = vcombine.low %v7019_v21, %v7027_v35  ;;  %v17250_v61 = vcombine.low %v7020_v28, %v7028_v59  ;;  %v7092_v21 = vld [vmem:[%s21665_s28 + $0x6e8] sm:$0xff] }
0x184e   : > { %10458 = vmatpush1.bf16.msra.mxu0 %v17168_v47  ;;  %v17251_v47 = vcombine.high %v7020_v28, %v7028_v59 }
0x184f   : > { %10564 = vmatpush1.bf16.msra.mxu1 %v17170_v63  ;;  %10459 = vmatprep.subr.bf16.mxu0 %v17185_v14  ;;  %v7035_v63 = vld [vmem:[%s21665_s28 + $0x520] sm:$0xff] }
0x1850   : > { %10565 = vmatprep.subr.bf16.mxu1 %v17187_v57  ;;  %v7043_v14 = vld [vmem:[%s21665_s28 + $0x560] sm:$0xff]  ;;  %v7036_v57 = vld [vmem:[%s21665_s28 + $0x528] sm:$0xff] }
0x1851   : > { %v17265_v16 = vcombine.high %v7035_v63, %v7043_v14  ;;  %v17264_v45 = vcombine.low %v7035_v63, %v7043_v14  ;;  %v17266_v27 = vcombine.low %v7036_v57, %v7044_v46  ;;  %v7108_v63 = vld [vmem:[%s21665_s28 + $0x768] sm:$0xff] }
0x1852   : > { %10460 = vmatpush1.bf16.msra.mxu0 %v17184_v55  ;;  %v17267_v55 = vcombine.high %v7036_v57, %v7044_v46 }
0x1853   : > { %10566 = vmatpush1.bf16.msra.mxu1 %v17186_v34  ;;  %10461 = vmatprep.subr.bf16.mxu0 %v17201_v42  ;;  %v7051_v34 = vld [vmem:[%s21665_s28 + $0x5a0] sm:$0xff] }
0x1854   : > { %10567 = vmatprep.subr.bf16.mxu1 %v17203_v58  ;;  %v7059_v42 = vld [vmem:[%s21665_s28 + $0x5e0] sm:$0xff]  ;;  %v7052_v58 = vld [vmem:[%s21665_s28 + $0x5a8] sm:$0xff] }
0x1855   : > { %v17281_v60 = vcombine.high %v7051_v34, %v7059_v42  ;;  %v17280_v40 = vcombine.low %v7051_v34, %v7059_v42  ;;  %v17282_v54 = vcombine.low %v7052_v58, %v7060_v13  ;;  %v7124_v34 = vld [vmem:[%s21665_s28 + $0x7e8] sm:$0xff] }
0x1856   : > { %10462 = vmatpush1.bf16.msra.mxu0 %v17200_v7  ;;  %v17283_v7 = vcombine.high %v7052_v58, %v7060_v13 }
0x1857   : > { %10568 = vmatpush1.bf16.msra.mxu1 %v17202_v31  ;;  %10463 = vmatprep.subr.bf16.mxu0 %v17217_v11  ;;  %v7067_v31 = vld [vmem:[%s21665_s28 + $0x620] sm:$0xff] }
0x1858   : > { %10569 = vmatprep.subr.bf16.mxu1 %v17219_v32  ;;  %v7075_v11 = vld [vmem:[%s21665_s28 + $0x660] sm:$0xff]  ;;  %v7068_v32 = vld [vmem:[%s21665_s28 + $0x628] sm:$0xff] }
0x1859   : > { %v17297_v43 = vcombine.high %v7067_v31, %v7075_v11  ;;  %v17296_v35 = vcombine.low %v7067_v31, %v7075_v11  ;;  %v17298_v28 = vcombine.low %v7068_v32, %v7076_v49  ;;  %v7140_v31 = vld [vmem:[%s21665_s28 + $0x868] sm:$0xff] }
0x185a   : > { %10464 = vmatpush1.bf16.msra.mxu0 %v17216_v62  ;;  %v17299_v62 = vcombine.high %v7068_v32, %v7076_v49 }
0x185b   : > { %10570 = vmatpush1.bf16.msra.mxu1 %v17218_v6  ;;  %10465 = vmatprep.subr.bf16.mxu0 %v17233_v20  ;;  %v7083_v6 = vld [vmem:[%s21665_s28 + $0x6a0] sm:$0xff] }
0x185c   : > { %10571 = vmatprep.subr.bf16.mxu1 %v17235_v3  ;;  %v7091_v20 = vld [vmem:[%s21665_s28 + $0x6e0] sm:$0xff]  ;;  %v7084_v3 = vld [vmem:[%s21665_s28 + $0x6a8] sm:$0xff] }
0x185d   : > { %v17313_v59 = vcombine.high %v7083_v6, %v7091_v20  ;;  %v17312_v14 = vcombine.low %v7083_v6, %v7091_v20  ;;  %v17314_v57 = vcombine.low %v7084_v3, %v7092_v21  ;;  %v7156_v6 = vld [vmem:[%s21665_s28 + $0x8e8] sm:$0xff] }
0x185e   : > { %10466 = vmatpush1.bf16.msra.mxu0 %v17232_v10  ;;  %v17315_v10 = vcombine.high %v7084_v3, %v7092_v21 }
0x185f   : > { %10572 = vmatpush1.bf16.msra.mxu1 %v17234_v4  ;;  %10467 = vmatprep.subr.bf16.mxu0 %v17249_v8  ;;  %v7099_v4 = vld [vmem:[%s21665_s28 + $0x720] sm:$0xff] }
0x1860   : > { %10573 = vmatprep.subr.bf16.mxu1 %v17251_v47  ;;  %v7107_v8 = vld [vmem:[%s21665_s28 + $0x760] sm:$0xff]  ;;  %v7100_v47 = vld [vmem:[%s21665_s28 + $0x728] sm:$0xff] }
0x1861   : > { %v17329_v46 = vcombine.high %v7099_v4, %v7107_v8  ;;  %v17328_v42 = vcombine.low %v7099_v4, %v7107_v8  ;;  %v17330_v58 = vcombine.low %v7100_v47, %v7108_v63  ;;  %v7172_v4 = vld [vmem:[%s21665_s28 + $0x968] sm:$0xff] }
0x1862   : > { %10468 = vmatpush1.bf16.msra.mxu0 %v17248_v36  ;;  %v17331_v36 = vcombine.high %v7100_v47, %v7108_v63 }
0x1863   : > { %10574 = vmatpush1.bf16.msra.mxu1 %v17250_v61  ;;  %10469 = vmatprep.subr.bf16.mxu0 %v17265_v16  ;;  %v7115_v61 = vld [vmem:[%s21665_s28 + $0x7a0] sm:$0xff] }
0x1864   : > { %10575 = vmatprep.subr.bf16.mxu1 %v17267_v55  ;;  %v7123_v16 = vld [vmem:[%s21665_s28 + $0x7e0] sm:$0xff]  ;;  %v7116_v55 = vld [vmem:[%s21665_s28 + $0x7a8] sm:$0xff] }
0x1865   : > { %v17345_v13 = vcombine.high %v7115_v61, %v7123_v16  ;;  %v17344_v11 = vcombine.low %v7115_v61, %v7123_v16  ;;  %v17346_v32 = vcombine.low %v7116_v55, %v7124_v34  ;;  %v7188_v61 = vld [vmem:[%s21665_s28 + $0x9e8] sm:$0xff] }
0x1866   : > { %10470 = vmatpush1.bf16.msra.mxu0 %v17264_v45  ;;  %v17347_v45 = vcombine.high %v7116_v55, %v7124_v34 }
0x1867   : > { %10576 = vmatpush1.bf16.msra.mxu1 %v17266_v27  ;;  %10471 = vmatprep.subr.bf16.mxu0 %v17281_v60  ;;  %v7131_v27 = vld [vmem:[%s21665_s28 + $0x820] sm:$0xff] }
0x1868   : > { %10577 = vmatprep.subr.bf16.mxu1 %v17283_v7  ;;  %v7139_v60 = vld [vmem:[%s21665_s28 + $0x860] sm:$0xff]  ;;  %v7132_v7 = vld [vmem:[%s21665_s28 + $0x828] sm:$0xff] }
0x1869   : > { %v17361_v49 = vcombine.high %v7131_v27, %v7139_v60  ;;  %v17360_v20 = vcombine.low %v7131_v27, %v7139_v60  ;;  %v17362_v3 = vcombine.low %v7132_v7, %v7140_v31  ;;  %v16549_v27 = vld [vmem:[%s21673_s8 + $0x6] ss:$8 sm:$0xf0] }
0x186a   : > { %10472 = vmatpush1.bf16.msra.mxu0 %v17280_v40  ;;  %v17363_v40 = vcombine.high %v7132_v7, %v7140_v31  ;;  %v7196_v60 = vld [vmem:[%s21665_s28 + $0xa28] sm:$0xff] }
0x186b   : > { %10578 = vmatpush1.bf16.msra.mxu1 %v17282_v54  ;;  %10473 = vmatprep.subr.bf16.mxu0 %v17297_v43  ;;  %v7147_v54 = vld [vmem:[%s21665_s28 + $0x8a0] sm:$0xff]  ;;  %v7204_v7 = vld [vmem:[%s21665_s28 + $0xa68] sm:$0xff] }
0x186c   : > { %10579 = vmatprep.subr.bf16.mxu1 %v17299_v62  ;;  %v7155_v43 = vld [vmem:[%s21665_s28 + $0x8e0] sm:$0xff]  ;;  %v7148_v62 = vld [vmem:[%s21665_s28 + $0x8a8] sm:$0xff] }
0x186d   : > { %v17377_v21 = vcombine.high %v7147_v54, %v7155_v43  ;;  %v17376_v8 = vcombine.low %v7147_v54, %v7155_v43  ;;  %v17378_v47 = vcombine.low %v7148_v62, %v7156_v6  ;;  %v7211_v54 = vld [vmem:[%s21665_s28 + $0xaa0] sm:$0xff] }
0x186e   : > { %10474 = vmatpush1.bf16.msra.mxu0 %v17296_v35  ;;  %v17379_v35 = vcombine.high %v7148_v62, %v7156_v6  ;;  %v7219_v43 = vld [vmem:[%s21665_s28 + $0xae0] sm:$0xff]  ;;  %v7212_v62 = vld [vmem:[%s21665_s28 + $0xaa8] sm:$0xff] }
0x186f   : > { %10580 = vmatpush1.bf16.msra.mxu1 %v17298_v28  ;;  %10475 = vmatprep.subr.bf16.mxu0 %v17313_v59  ;;  %v7163_v28 = vld [vmem:[%s21665_s28 + $0x920] sm:$0xff]  ;;  %v7220_v6 = vld [vmem:[%s21665_s28 + $0xae8] sm:$0xff] }
0x1870   : > { %10581 = vmatprep.subr.bf16.mxu1 %v17315_v10  ;;  %v7171_v59 = vld [vmem:[%s21665_s28 + $0x960] sm:$0xff]  ;;  %v7164_v10 = vld [vmem:[%s21665_s28 + $0x928] sm:$0xff] }
0x1871   : > { %v17393_v63 = vcombine.high %v7163_v28, %v7171_v59  ;;  %v17392_v16 = vcombine.low %v7163_v28, %v7171_v59  ;;  %v17394_v55 = vcombine.low %v7164_v10, %v7172_v4  ;;  %v17441_v28 = vcombine.high %v7211_v54, %v7219_v43 }
0x1872   : > { %10476 = vmatpush1.bf16.msra.mxu0 %v17312_v14  ;;  %v17395_v14 = vcombine.high %v7164_v10, %v7172_v4  ;;  %v17443_v59 = vcombine.high %v7212_v62, %v7220_v6 }
0x1873   : > { %10582 = vmatpush1.bf16.msra.mxu1 %v17314_v57  ;;  %10477 = vmatprep.subr.bf16.mxu0 %v17329_v46  ;;  %v7179_v57 = vld [vmem:[%s21665_s28 + $0x9a0] sm:$0xff] }
0x1874   : > { %10583 = vmatprep.subr.bf16.mxu1 %v17331_v36  ;;  %v7187_v46 = vld [vmem:[%s21665_s28 + $0x9e0] sm:$0xff]  ;;  %v7180_v36 = vld [vmem:[%s21665_s28 + $0x9a8] sm:$0xff] }
0x1875   : > { %v17409_v34 = vcombine.high %v7179_v57, %v7187_v46  ;;  %v17408_v31 = vcombine.low %v7179_v57, %v7187_v46 }
0x1876   : > { %10478 = vmatpush1.bf16.msra.mxu0 %v17328_v42  ;;  %v7195_v42 = vld [vmem:[%s21665_s28 + $0xa20] sm:$0xff] }
0x1877   : > { %10584 = vmatpush1.bf16.msra.mxu1 %v17330_v58  ;;  %10479 = vmatprep.subr.bf16.mxu0 %v17345_v13  ;;  %v7203_v58 = vld [vmem:[%s21665_s28 + $0xa60] sm:$0xff]  ;;  %v17411_v13 = vcombine.high %v7180_v36, %v7188_v61 }
0x1878   : > { %10585 = vmatprep.subr.bf16.mxu1 %v17347_v45  ;;  %v16548_v45 = vld [vmem:[%s21673_s8 + $0x6] ss:$8 sm:$0xf] }
0x187a   : > { %10480 = vmatpush1.bf16.msra.mxu0 %v17344_v11  ;;  %v17410_v11 = vcombine.low %v7180_v36, %v7188_v61  ;;  %v17440_v36 = vcombine.low %v7211_v54, %v7219_v43  ;;  %v17442_v61 = vcombine.low %v7212_v62, %v7220_v6 }
0x187b   : > { %10586 = vmatpush1.bf16.msra.mxu1 %v17346_v32  ;;  %10502 = vmatprep.subr.bf16.mxu0 %v17361_v49  ;;  %v17425_v32 = vcombine.high %v7195_v42, %v7203_v58  ;;  %v23599_v49 = vor.u32 %v16549_v27, %v16548_v45  ;;  %v23631_v45 = vld [vmem:[%s21665_s28 + $0xbe0] sm:$0xff]  ;;  %v23634_v27 = vld [vmem:[%s21665_s28 + $0xba8] sm:$0xff] }
0x187c   : > { %10608 = vmatprep.subr.bf16.mxu1 %v17363_v40  ;;  %v17427_v40 = vcombine.high %v7196_v60, %v7204_v7 }
0x187d   : > { %10482 = vmatmul.mubr.bf16.vlgmr.msra.gmra.mrb[112].mxu0 %v23184_v15  ;;  %v23615_v10 = vrot.slane %v23599_v49, %v22884_v52  ;;  %v23619_v4 = vrot.slane %v23599_v49, %v22892_v23 }
0x187e   : > { %10588 = vmatmul.mubr.bf16.vlgmr.msra.gmra.mrb[112].mxu1 %v23184_v15  ;;  %10491 = vmatprep.mubr.bf16.mxu0 %v23307_v50 }
0x187f   : > { %10503 = vmatpush1.bf16.msra.mxu0 %v17360_v20  ;;  %10597 = vmatprep.mubr.bf16.mxu1 %v23307_v50  ;;  %v17424_v20 = vcombine.low %v7195_v42, %v7203_v58 }
0x1880   : > { %10609 = vmatpush1.bf16.msra.mxu1 %v17362_v3  ;;  %10504 = vmatprep.subr.bf16.mxu0 %v17377_v21  ;;  %v17426_v3 = vcombine.low %v7196_v60, %v7204_v7  ;;  %v23607_v21 = vrot.slane %v23599_v49, %v22880_v53  ;;  %v23637_v60 = vld [vmem:[%s21665_s28 + $0xbe8] sm:$0xff] }
0x1881   : > { %10610 = vmatprep.subr.bf16.mxu1 %v17379_v35  ;;  %v23611_v35 = vrot.slane %v23599_v49, %v22887_v5 }
0x1883   : > { %10505 = vmatpush1.bf16.msra.mxu0 %v17376_v8  ;;  %v7227_v8 = vld [vmem:[%s21665_s28 + $0xb20] sm:$0xff] }
0x1884   : > { %10611 = vmatpush1.bf16.msra.mxu1 %v17378_v47  ;;  %10506 = vmatprep.subr.bf16.mxu0 %v17393_v63  ;;  %v7235_v47 = vld [vmem:[%s21665_s28 + $0xb60] sm:$0xff]  ;;  %v7228_v63 = vld [vmem:[%s21665_s28 + $0xb28] sm:$0xff] }
0x1885   : > { %10492 = vmatmul.mubr.bf16.gmra.mrb[116].mxu0 %v23311_v56  ;;  %10612 = vmatprep.subr.bf16.mxu1 %v17395_v14  ;;  %v7236_v14 = vld [vmem:[%s21665_s28 + $0xb68] sm:$0xff] }
0x1886   : > { %10598 = vmatmul.mubr.bf16.gmra.mrb[116].mxu1 %v23311_v56  ;;  %10534 = vmatprep.mubr.bf16.mxu0 %v23320_v19 }
0x1887   : > { %10507 = vmatpush1.bf16.msra.mxu0 %v17392_v16  ;;  %10640 = vmatprep.mubr.bf16.mxu1 %v23320_v19  ;;  %v23626_v16 = vld [vmem:[%s21665_s28 + $0xba0] sm:$0xff] }
0x1888   : > { %10613 = vmatpush1.bf16.msra.mxu1 %v17394_v55  ;;  %10508 = vmatprep.subr.bf16.mxu0 %v17409_v34 }
0x1889   : > { %10614 = vmatprep.subr.bf16.mxu1 %v17411_v13  ;;  %v17457_v13 = vcombine.high %v7227_v8, %v7235_v47 }
0x188b   : > { %10509 = vmatpush1.bf16.msra.mxu0 %v17408_v31 }
0x188c   : > { %10615 = vmatpush1.bf16.msra.mxu1 %v17410_v11  ;;  %10510 = vmatprep.subr.bf16.mxu0 %v17425_v32 }
0x188d   : > { %10616 = vmatprep.subr.bf16.mxu1 %v17427_v40  ;;  %v17459_v40 = vcombine.high %v7228_v63, %v7236_v14 }
0x188f   : > { %10511 = vmatpush1.bf16.msra.mxu0 %v17424_v20  ;;  %v10112_v57 = vpop.f32.mrb[96].mxu0  ;;  %v10218_v46 = vpop.f32.mrb[96].mxu1  ;;  %v17456_v20 = vcombine.low %v7227_v8, %v7235_v47 }
0x1890   : > { %10617 = vmatpush1.bf16.msra.mxu1 %v17426_v3  ;;  %v18529_v55 = vadd.f32 %v10112_v57, %v23607_v21  ;;  %v18537_v34 = vadd.f32 %v10218_v46, %v23611_v35  ;;  %10512 = vmatprep.subr.bf16.mxu0 %v17441_v28  ;;  %v10114_v42 = vpop.f32.mrb[97].mxu0  ;;  %v10220_v58 = vpop.f32.mrb[97].mxu1  ;;  %v17458_v3 = vcombine.low %v7228_v63, %v7236_v14 }
0x1891   : > { %10618 = vmatprep.subr.bf16.mxu1 %v17443_v59  ;;  %v18530_v7 = vadd.f32 %v10114_v42, %v23615_v10  ;;  %v18538_v31 = vadd.f32 %v10220_v58, %v23619_v4  ;;  %v10116_v11 = vpop.f32.mrb[98].mxu0  ;;  %v10222_v32 = vpop.f32.mrb[98].mxu1  ;;  %v17473_v57 = vcombine.high %v23626_v16, %v23631_v45  ;;  %v17475_v46 = vcombine.high %v23634_v27, %v23637_v60 }
0x1892   : > { %v18531_v54 = vadd.f32 %v10116_v11, %v23607_v21  ;;  %v18539_v43 = vadd.f32 %v10222_v32, %v23611_v35  ;;  %v10118_v62 = vpop.f32.mrb[99].mxu0  ;;  %v10224_v6 = vpop.f32.mrb[99].mxu1  ;;  %v10873_v42 = vmax.f32 %v18529_v55, 0.0  ;;  %v10875_v58 = vmax.f32 %v18537_v34, 0.0  ;;  %v7259_v32 = vld [vmem:[%s21665_s28 + $0xc20] sm:$0xff]  ;;  %v7268_v55 = vld [vmem:[%s21665_s28 + $0xc68] sm:$0xff] }
0x1893   : > { %10513 = vmatpush1.bf16.msra.mxu0 %v17440_v36  ;;  %v18532_v28 = vadd.f32 %v10118_v62, %v23615_v10  ;;  %v18540_v59 = vadd.f32 %v10224_v6, %v23619_v4  ;;  %v10874_v63 = vmax.f32 %v18530_v7, 0.0  ;;  %v10876_v14 = vmax.f32 %v18538_v31, 0.0  ;;  %v7267_v62 = vld [vmem:[%s21665_s28 + $0xc60] sm:$0xff] }
0x1894   : > { %10619 = vmatpush1.bf16.msra.mxu1 %v17442_v61  ;;  %v10889_v8 = vmax.f32 %v18531_v54, 0.0  ;;  %v10891_v47 = vmax.f32 %v18539_v43, 0.0  ;;  %10514 = vmatprep.subr.bf16.mxu0 %v17457_v13  ;;  %v17472_v31 = vcombine.low %v23626_v16, %v23631_v45  ;;  %v7275_v54 = vld [vmem:[%s21665_s28 + $0xca0] sm:$0xff] }
0x1895   : > { %v10890_v36 = vmax.f32 %v18532_v28, 0.0  ;;  %v10892_v11 = vmax.f32 %v18540_v59, 0.0  ;;  %10620 = vmatprep.subr.bf16.mxu1 %v17459_v40  ;;  %v17474_v40 = vcombine.low %v23634_v27, %v23637_v60  ;;  %v17491_v60 = vcombine.high %v7260_v51, %v7268_v55 }
0x1896   : > { %v23651_v6 = vpack.c.bf16 %v10889_v8, %v10873_v42  ;;  %v23653_v12 = vpack.c.bf16 %v10891_v47, %v10875_v58  ;;  %v17489_v58 = vcombine.high %v7259_v32, %v7267_v62  ;;  %v7283_v8 = vld [vmem:[%s21665_s28 + $0xce0] sm:$0xff]  ;;  %v7284_v47 = vld [vmem:[%s21665_s28 + $0xce8] sm:$0xff] }
0x1897   : > { %v23657_v34 = vpack.c.bf16 %v10890_v36, %v10874_v63  ;;  %v23659_v61 = vpack.c.bf16 %v10892_v11, %v10876_v14  ;;  %10515 = vmatpush1.bf16.msra.mxu0 %v17456_v20  ;;  %v10122_v13 = vpop.f32.mrb[100].mxu0  ;;  %v10228_v7 = vpop.f32.mrb[100].mxu1  ;;  %v7276_v20 = vld [vmem:[%s21665_s28 + $0xca8] sm:$0xff]  ;;  %v17488_v11 = vcombine.low %v7259_v32, %v7267_v62 }
0x1898   : > { %10621 = vmatpush1.bf16.msra.mxu1 %v17458_v3  ;;  %v18533_v43 = vadd.f32 %v10122_v13, %v23607_v21  ;;  %v18541_v28 = vadd.f32 %v10228_v7, %v23611_v35  ;;  %10516 = vmatprep.subr.bf16.mxu0 %v17473_v57  ;;  %v10124_v59 = vpop.f32.mrb[101].mxu0  ;;  %v10230_v42 = vpop.f32.mrb[101].mxu1  ;;  %v17490_v13 = vcombine.low %v7260_v51, %v7268_v55  ;;  %v7291_v55 = vld [vmem:[%s21665_s28 + $0xd20] sm:$0xff] }
0x1899   : > { %10622 = vmatprep.subr.bf16.mxu1 %v17475_v46  ;;  %v18534_v63 = vadd.f32 %v10124_v59, %v23615_v10  ;;  %v18542_v16 = vadd.f32 %v10230_v42, %v23619_v4  ;;  %v10126_v45 = vpop.f32.mrb[102].mxu0  ;;  %v10232_v27 = vpop.f32.mrb[102].mxu1  ;;  %v17505_v59 = vcombine.high %v7275_v54, %v7283_v8  ;;  %v17507_v42 = vcombine.high %v7276_v20, %v7284_v47 }
0x189a   : > { %v18535_v3 = vadd.f32 %v10126_v45, %v23607_v21  ;;  %v18543_v14 = vadd.f32 %v10232_v27, %v23611_v35  ;;  %v10128_v36 = vpop.f32.mrb[103].mxu0  ;;  %v10234_v57 = vpop.f32.mrb[103].mxu1  ;;  %v10905_v39 = vmax.f32 %v18533_v43, 0.0  ;;  %v10907_v30 = vmax.f32 %v18541_v28, 0.0  ;;  %v7292_v43 = vld [vmem:[%s21665_s28 + $0xd28] sm:$0xff] }
0x189b   : > { %10517 = vmatpush1.bf16.msra.mxu0 %v17472_v31  ;;  %v18536_v7 = vadd.f32 %v10128_v36, %v23615_v10  ;;  %v18544_v46 = vadd.f32 %v10234_v57, %v23619_v4  ;;  %v10906_v45 = vmax.f32 %v18534_v63, 0.0  ;;  %v10908_v32 = vmax.f32 %v18542_v16, 0.0  ;;  %v7299_v10 = vld [vmem:[%s21665_s28 + $0xd60] sm:$0xff] }
0x189c   : > { %10623 = vmatpush1.bf16.msra.mxu1 %v17474_v40  ;;  %v10921_v21 = vmax.f32 %v18535_v3, 0.0  ;;  %v10923_v35 = vmax.f32 %v18543_v14, 0.0  ;;  %10518 = vmatprep.subr.bf16.mxu0 %v17489_v58  ;;  %v7300_v40 = vld [vmem:[%s21665_s28 + $0xd68] sm:$0xff]  ;;  %v17504_v63 = vcombine.low %v7275_v54, %v7283_v8  ;;  %v17506_v16 = vcombine.low %v7276_v20, %v7284_v47  ;;  %v7323_v20 = vld [vmem:[%s21665_s28 + $0xe20] sm:$0xff] }
0x189d   : > { %v10922_v51 = vmax.f32 %v18536_v7, 0.0  ;;  %v10924_v62 = vmax.f32 %v18544_v46, 0.0  ;;  %10624 = vmatprep.subr.bf16.mxu1 %v17491_v60  ;;  %v17521_v27 = vcombine.high %v7291_v55, %v7299_v10  ;;  %v7315_v60 = vld [vmem:[%s21665_s28 + $0xde0] sm:$0xff]  ;;  %v7308_v3 = vld [vmem:[%s21665_s28 + $0xda8] sm:$0xff]  ;;  %v17520_v36 = vcombine.low %v7291_v55, %v7299_v10 }
0x189e   : > { %v23679_v4 = vpack.c.bf16 %v10921_v21, %v10905_v39  ;;  %v23681_v31 = vpack.c.bf16 %v10923_v35, %v10907_v30  ;;  %v17523_v39 = vcombine.high %v7292_v43, %v7300_v40  ;;  %v7307_v30 = vld [vmem:[%s21665_s28 + $0xda0] sm:$0xff]  ;;  %v7316_v14 = vld [vmem:[%s21665_s28 + $0xde8] sm:$0xff]  ;;  %v17522_v57 = vcombine.low %v7292_v43, %v7300_v40 }
0x189f   : > { %v23685_v28 = vpack.c.bf16 %v10922_v51, %v10906_v45  ;;  %v23687_v58 = vpack.c.bf16 %v10924_v62, %v10908_v32  ;;  %10519 = vmatpush1.bf16.msra.mxu0 %v17488_v11  ;;  %v17537_v54 = vcombine.high %v7307_v30, %v7315_v60  ;;  %v17539_v8 = vcombine.high %v7308_v3, %v7316_v14  ;;  %v7331_v47 = vld [vmem:[%s21665_s28 + $0xe60] sm:$0xff]  ;;  %v7324_v11 = vld [vmem:[%s21665_s28 + $0xe28] sm:$0xff] }
0x18a0   : > { %10625 = vmatpush1.bf16.msra.mxu1 %v17490_v13  ;;  %10520 = vmatprep.subr.bf16.mxu0 %v17505_v59  ;;  %v7332_v13 = vld [vmem:[%s21665_s28 + $0xe68] sm:$0xff]  ;;  %v17536_v7 = vcombine.low %v7307_v30, %v7315_v60  ;;  %v17538_v46 = vcombine.low %v7308_v3, %v7316_v14  ;;  %v17553_v59 = vcombine.high %v7323_v20, %v7331_v47  ;;  %v7339_v21 = vld [vmem:[%s21665_s28 + $0xea0] sm:$0xff] }
0x18a1   : > { %10626 = vmatprep.subr.bf16.mxu1 %v17507_v42  ;;  %v17555_v42 = vcombine.high %v7324_v11, %v7332_v13  ;;  %v7347_v35 = vld [vmem:[%s21665_s28 + $0xee0] sm:$0xff]  ;;  %v7340_v45 = vld [vmem:[%s21665_s28 + $0xea8] sm:$0xff]  ;;  %v17552_v51 = vcombine.low %v7323_v20, %v7331_v47  ;;  %v17554_v62 = vcombine.low %v7324_v11, %v7332_v13  ;;  %v6877_v11 = vld [vmem:[%s21665_s28 + $0x30] sm:$0xff] }
0x18a2   : > { %v7348_v32 = vld [vmem:[%s21665_s28 + $0xee8] sm:$0xff]  ;;  %v17569_v55 = vcombine.high %v7339_v21, %v7347_v35  ;;  %v7355_v43 = vld [vmem:[%s21665_s28 + $0xf20] sm:$0xff]  ;;  %v6885_v13 = vld [vmem:[%s21665_s28 + $0x70] sm:$0xff] }
0x18a3   : > { %10521 = vmatpush1.bf16.msra.mxu0 %v17504_v63  ;;  %v17571_v10 = vcombine.high %v7340_v45, %v7348_v32  ;;  %v7363_v40 = vld [vmem:[%s21665_s28 + $0xf60] sm:$0xff]  ;;  %v7356_v63 = vld [vmem:[%s21665_s28 + $0xf28] sm:$0xff] }
0x18a4   : > { %10627 = vmatpush1.bf16.msra.mxu1 %v17506_v16  ;;  %10522 = vmatprep.subr.bf16.mxu0 %v17521_v27  ;;  %v7364_v16 = vld [vmem:[%s21665_s28 + $0xf68] sm:$0xff]  ;;  %v17568_v27 = vcombine.low %v7339_v21, %v7347_v35  ;;  %v17585_v30 = vcombine.high %v7355_v43, %v7363_v40  ;;  %v7371_v3 = vld [vmem:[%s21665_s28 + $0xfa0] sm:$0xff]  ;;  %v17109_v21 = vcombine.high %v6877_v11, %v6885_v13 }
0x18a5   : > { %10628 = vmatprep.subr.bf16.mxu1 %v17523_v39  ;;  %v17570_v39 = vcombine.low %v7340_v45, %v7348_v32  ;;  %v17587_v60 = vcombine.high %v7356_v63, %v7364_v16  ;;  %v7379_v14 = vld [vmem:[%s21665_s28 + $0xfe0] sm:$0xff]  ;;  %v6893_v45 = vld [vmem:[%s21665_s28 + $0xb0] sm:$0xff] }
0x18a6   : > { %v17601_v20 = vcombine.high %v7371_v3, %v7379_v14  ;;  %v6901_v32 = vld [vmem:[%s21665_s28 + $0xf0] sm:$0xff] }
0x18a7   : > { %10523 = vmatpush1.bf16.msra.mxu0 %v17520_v36  ;;  %v7372_v36 = vld [vmem:[%s21665_s28 + $0xfa8] sm:$0xff] }
0x18a8   : > { %10629 = vmatpush1.bf16.msra.mxu1 %v17522_v57  ;;  %10524 = vmatprep.subr.bf16.mxu0 %v17537_v54  ;;  %v7380_v57 = vld [vmem:[%s21665_s28 + $0xfe8] sm:$0xff]  ;;  %v17584_v54 = vcombine.low %v7355_v43, %v7363_v40  ;;  %v17125_v43 = vcombine.high %v6893_v45, %v6901_v32 }
0x18a9   : > { %10630 = vmatprep.subr.bf16.mxu1 %v17539_v8  ;;  %v17586_v8 = vcombine.low %v7356_v63, %v7364_v16  ;;  %v17603_v47 = vcombine.high %v7372_v36, %v7380_v57  ;;  %v6909_v63 = vld [vmem:[%s21665_s28 + $0x130] sm:$0xff] }
0x18aa   : > { %v6917_v16 = vld [vmem:[%s21665_s28 + $0x170] sm:$0xff] }
0x18ab   : > { %10525 = vmatpush1.bf16.msra.mxu0 %v17536_v7  ;;  %v6878_v7 = vld [vmem:[%s21665_s28 + $0x38] sm:$0xff] }
0x18ac   : > { %10631 = vmatpush1.bf16.msra.mxu1 %v17538_v46  ;;  %10526 = vmatprep.subr.bf16.mxu0 %v17553_v59  ;;  %v6886_v46 = vld [vmem:[%s21665_s28 + $0x78] sm:$0xff]  ;;  %v17600_v59 = vcombine.low %v7371_v3, %v7379_v14  ;;  %v17141_v3 = vcombine.high %v6909_v63, %v6917_v16 }
0x18ad   : > { %10632 = vmatprep.subr.bf16.mxu1 %v17555_v42  ;;  %v17602_v42 = vcombine.low %v7372_v36, %v7380_v57  ;;  %v17111_v35 = vcombine.high %v6878_v7, %v6886_v46  ;;  %v6925_v36 = vld [vmem:[%s21665_s28 + $0x1b0] sm:$0xff] }
0x18ae   : > { %v6933_v57 = vld [vmem:[%s21665_s28 + $0x1f0] sm:$0xff] }
0x18af   : > { %10527 = vmatpush1.bf16.msra.mxu0 %v17552_v51  ;;  %v6894_v51 = vld [vmem:[%s21665_s28 + $0xb8] sm:$0xff] }
0x18b0   : > { %10633 = vmatpush1.bf16.msra.mxu1 %v17554_v62  ;;  %10528 = vmatprep.subr.bf16.mxu0 %v17569_v55  ;;  %v6902_v62 = vld [vmem:[%s21665_s28 + $0xf8] sm:$0xff]  ;;  %v17108_v55 = vcombine.low %v6877_v11, %v6885_v13  ;;  %v17157_v11 = vcombine.high %v6925_v36, %v6933_v57 }
0x18b1   : > { %10634 = vmatprep.subr.bf16.mxu1 %v17571_v10  ;;  %v17110_v10 = vcombine.low %v6878_v7, %v6886_v46  ;;  %v17127_v40 = vcombine.high %v6894_v51, %v6902_v62  ;;  %v6941_v7 = vld [vmem:[%s21665_s28 + $0x230] sm:$0xff] }
0x18b2   : > { %v6949_v46 = vld [vmem:[%s21665_s28 + $0x270] sm:$0xff] }
0x18b3   : > { %10529 = vmatpush1.bf16.msra.mxu0 %v17568_v27  ;;  %v6910_v27 = vld [vmem:[%s21665_s28 + $0x138] sm:$0xff] }
0x18b4   : > { %10635 = vmatpush1.bf16.msra.mxu1 %v17570_v39  ;;  %10530 = vmatprep.subr.bf16.mxu0 %v17585_v30  ;;  %v6918_v39 = vld [vmem:[%s21665_s28 + $0x178] sm:$0xff]  ;;  %v17124_v30 = vcombine.low %v6893_v45, %v6901_v32  ;;  %v17173_v45 = vcombine.high %v6941_v7, %v6949_v46 }
0x18b5   : > { %10636 = vmatprep.subr.bf16.mxu1 %v17587_v60  ;;  %v17126_v60 = vcombine.low %v6894_v51, %v6902_v62  ;;  %v17143_v14 = vcombine.high %v6910_v27, %v6918_v39  ;;  %v6957_v51 = vld [vmem:[%s21665_s28 + $0x2b0] sm:$0xff] }
0x18b6   : > { %v6965_v62 = vld [vmem:[%s21665_s28 + $0x2f0] sm:$0xff] }
0x18b7   : > { %10531 = vmatpush1.bf16.msra.mxu0 %v17584_v54  ;;  %v6926_v54 = vld [vmem:[%s21665_s28 + $0x1b8] sm:$0xff] }
0x18b8   : > { %10637 = vmatpush1.bf16.msra.mxu1 %v17586_v8  ;;  %10532 = vmatprep.subr.bf16.mxu0 %v17601_v20  ;;  %v6934_v8 = vld [vmem:[%s21665_s28 + $0x1f8] sm:$0xff]  ;;  %v17140_v20 = vcombine.low %v6909_v63, %v6917_v16  ;;  %v6973_v16 = vld [vmem:[%s21665_s28 + $0x330] sm:$0xff] }
0x18b9   : > { %10638 = vmatprep.subr.bf16.mxu1 %v17603_v47  ;;  %v17142_v47 = vcombine.low %v6910_v27, %v6918_v39  ;;  %v17159_v13 = vcombine.high %v6926_v54, %v6934_v8  ;;  %v6981_v27 = vld [vmem:[%s21665_s28 + $0x370] sm:$0xff]  ;;  %v6974_v39 = vld [vmem:[%s21665_s28 + $0x338] sm:$0xff] }
0x18bb   : > { %10533 = vmatpush1.bf16.msra.mxu0 %v17600_v59  ;;  %v6942_v59 = vld [vmem:[%s21665_s28 + $0x238] sm:$0xff] }
0x18bc   : > { %10639 = vmatpush1.bf16.msra.mxu1 %v17602_v42  ;;  %10661 = vmatprep.subr.bf16.mxu0 %v17109_v21  ;;  %v6950_v42 = vld [vmem:[%s21665_s28 + $0x278] sm:$0xff]  ;;  %v17156_v21 = vcombine.low %v6925_v36, %v6933_v57  ;;  %v6989_v57 = vld [vmem:[%s21665_s28 + $0x3b0] sm:$0xff] }
0x18bd   : > { %10767 = vmatprep.subr.bf16.mxu1 %v17111_v35  ;;  %v17158_v35 = vcombine.low %v6926_v54, %v6934_v8  ;;  %v17175_v32 = vcombine.high %v6942_v59, %v6950_v42  ;;  %v6997_v54 = vld [vmem:[%s21665_s28 + $0x3f0] sm:$0xff]  ;;  %v6990_v8 = vld [vmem:[%s21665_s28 + $0x3b8] sm:$0xff] }
0x18be   : > { %10535 = vmatmul.mubr.bf16.vlgmr.msra.gmra.mrb[112].mxu0 %v23344_v1 }
0x18bf   : > { %10641 = vmatmul.mubr.bf16.vlgmr.msra.gmra.mrb[112].mxu1 %v23344_v1  ;;  %10544 = vmatprep.mubr.bf16.mxu0 %v23356_v24 }
0x18c0   : > { %10650 = vmatprep.mubr.bf16.mxu1 %v23356_v24  ;;  %10662 = vmatpush1.bf16.msra.mxu0 %v17108_v55  ;;  %v6958_v55 = vld [vmem:[%s21665_s28 + $0x2b8] sm:$0xff] }
0x18c1   : > { %10768 = vmatpush1.bf16.msra.mxu1 %v17110_v10  ;;  %10663 = vmatprep.subr.bf16.mxu0 %v17125_v43  ;;  %v6966_v10 = vld [vmem:[%s21665_s28 + $0x2f8] sm:$0xff]  ;;  %v17172_v43 = vcombine.low %v6941_v7, %v6949_v46  ;;  %v7005_v46 = vld [vmem:[%s21665_s28 + $0x430] sm:$0xff] }
0x18c2   : > { %10769 = vmatprep.subr.bf16.mxu1 %v17127_v40  ;;  %v17189_v40 = vcombine.high %v6957_v51, %v6965_v62  ;;  %v17191_v63 = vcombine.high %v6958_v55, %v6966_v10 }
0x18c4   : > { %10664 = vmatpush1.bf16.msra.mxu0 %v17124_v30  ;;  %v6982_v30 = vld [vmem:[%s21665_s28 + $0x378] sm:$0xff] }
0x18c5   : > { %10770 = vmatpush1.bf16.msra.mxu1 %v17126_v60  ;;  %10665 = vmatprep.subr.bf16.mxu0 %v17141_v3  ;;  %v17188_v60 = vcombine.low %v6957_v51, %v6965_v62  ;;  %v17190_v3 = vcombine.low %v6958_v55, %v6966_v10  ;;  %v17207_v36 = vcombine.high %v6974_v39, %v6982_v30  ;;  %v7021_v62 = vld [vmem:[%s21665_s28 + $0x4b0] sm:$0xff]  ;;  %v7022_v10 = vld [vmem:[%s21665_s28 + $0x4b8] sm:$0xff] }
0x18c6   : > { %10545 = vmatmul.mubr.bf16.gmra.mrb[116].mxu0 %v23371_v33  ;;  %10771 = vmatprep.subr.bf16.mxu1 %v17143_v14  ;;  %v17205_v14 = vcombine.high %v6973_v16, %v6981_v27  ;;  %v7029_v55 = vld [vmem:[%s21665_s28 + $0x4f0] sm:$0xff] }
0x18c7   : > { %10651 = vmatmul.mubr.bf16.gmra.mrb[116].mxu1 %v23371_v33  ;;  %10693 = vmatprep.mubr.bf16.mxu0 %v23180_v25 }
0x18c8   : > { %10666 = vmatpush1.bf16.msra.mxu0 %v17140_v20  ;;  %10799 = vmatprep.mubr.bf16.mxu1 %v23180_v25  ;;  %v17174_v25 = vcombine.low %v6942_v59, %v6950_v42  ;;  %v6998_v20 = vld [vmem:[%s21665_s28 + $0x3f8] sm:$0xff]  ;;  %v7013_v59 = vld [vmem:[%s21665_s28 + $0x470] sm:$0xff] }
0x18c9   : > { %10772 = vmatpush1.bf16.msra.mxu1 %v17142_v47  ;;  %10667 = vmatprep.subr.bf16.mxu0 %v17157_v11  ;;  %v17204_v47 = vcombine.low %v6973_v16, %v6981_v27  ;;  %v17206_v11 = vcombine.low %v6974_v39, %v6982_v30  ;;  %v17223_v7 = vcombine.high %v6990_v8, %v6998_v20  ;;  %v7006_v42 = vld [vmem:[%s21665_s28 + $0x438] sm:$0xff]  ;;  %v7037_v27 = vld [vmem:[%s21665_s28 + $0x530] sm:$0xff] }
0x18ca   : > { %10773 = vmatprep.subr.bf16.mxu1 %v17159_v13  ;;  %v17221_v13 = vcombine.high %v6989_v57, %v6997_v54  ;;  %v7045_v39 = vld [vmem:[%s21665_s28 + $0x570] sm:$0xff]  ;;  %v7038_v30 = vld [vmem:[%s21665_s28 + $0x538] sm:$0xff] }
0x18cc   : > { %10668 = vmatpush1.bf16.msra.mxu0 %v17156_v21  ;;  %v7014_v21 = vld [vmem:[%s21665_s28 + $0x478] sm:$0xff] }
0x18cd   : > { %10774 = vmatpush1.bf16.msra.mxu1 %v17158_v35  ;;  %10669 = vmatprep.subr.bf16.mxu0 %v17173_v45  ;;  %v17220_v35 = vcombine.low %v6989_v57, %v6997_v54  ;;  %v17222_v45 = vcombine.low %v6990_v8, %v6998_v20  ;;  %v17239_v51 = vcombine.high %v7006_v42, %v7014_v21  ;;  %v7053_v54 = vld [vmem:[%s21665_s28 + $0x5b0] sm:$0xff]  ;;  %v7054_v20 = vld [vmem:[%s21665_s28 + $0x5b8] sm:$0xff] }
0x18ce   : > { %10775 = vmatprep.subr.bf16.mxu1 %v17175_v32  ;;  %v17237_v32 = vcombine.high %v7005_v46, %v7013_v59  ;;  %v7061_v8 = vld [vmem:[%s21665_s28 + $0x5f0] sm:$0xff] }
0x18d0   : > { %10670 = vmatpush1.bf16.msra.mxu0 %v17172_v43  ;;  %v7030_v43 = vld [vmem:[%s21665_s28 + $0x4f8] sm:$0xff] }
0x18d1   : > { %10776 = vmatpush1.bf16.msra.mxu1 %v17174_v25  ;;  %10671 = vmatprep.subr.bf16.mxu0 %v17189_v40  ;;  %v17236_v25 = vcombine.low %v7005_v46, %v7013_v59  ;;  %v17238_v40 = vcombine.low %v7006_v42, %v7014_v21  ;;  %v17255_v16 = vcombine.high %v7022_v10, %v7030_v43  ;;  %v7069_v59 = vld [vmem:[%s21665_s28 + $0x630] sm:$0xff]  ;;  %v7070_v21 = vld [vmem:[%s21665_s28 + $0x638] sm:$0xff] }
0x18d2   : > { %10777 = vmatprep.subr.bf16.mxu1 %v17191_v63  ;;  %v17253_v63 = vcombine.high %v7021_v62, %v7029_v55  ;;  %v7077_v42 = vld [vmem:[%s21665_s28 + $0x670] sm:$0xff] }
0x18d4   : > { %10672 = vmatpush1.bf16.msra.mxu0 %v17188_v60  ;;  %v7046_v60 = vld [vmem:[%s21665_s28 + $0x578] sm:$0xff] }
0x18d5   : > { %10778 = vmatpush1.bf16.msra.mxu1 %v17190_v3  ;;  %10673 = vmatprep.subr.bf16.mxu0 %v17205_v14  ;;  %v17252_v3 = vcombine.low %v7021_v62, %v7029_v55  ;;  %v17254_v14 = vcombine.low %v7022_v10, %v7030_v43  ;;  %v17271_v57 = vcombine.high %v7038_v30, %v7046_v60  ;;  %v7085_v55 = vld [vmem:[%s21665_s28 + $0x6b0] sm:$0xff]  ;;  %v7086_v43 = vld [vmem:[%s21665_s28 + $0x6b8] sm:$0xff] }
0x18d6   : > { %10779 = vmatprep.subr.bf16.mxu1 %v17207_v36  ;;  %v17269_v36 = vcombine.high %v7037_v27, %v7045_v39  ;;  %v7093_v10 = vld [vmem:[%s21665_s28 + $0x6f0] sm:$0xff] }
0x18d8   : > { %10674 = vmatpush1.bf16.msra.mxu0 %v17204_v47  ;;  %v7062_v47 = vld [vmem:[%s21665_s28 + $0x5f8] sm:$0xff] }
0x18d9   : > { %10780 = vmatpush1.bf16.msra.mxu1 %v17206_v11  ;;  %10675 = vmatprep.subr.bf16.mxu0 %v17221_v13  ;;  %v17268_v11 = vcombine.low %v7037_v27, %v7045_v39  ;;  %v17270_v13 = vcombine.low %v7038_v30, %v7046_v60  ;;  %v17287_v46 = vcombine.high %v7054_v20, %v7062_v47  ;;  %v7101_v39 = vld [vmem:[%s21665_s28 + $0x730] sm:$0xff]  ;;  %v7102_v60 = vld [vmem:[%s21665_s28 + $0x738] sm:$0xff] }
0x18da   : > { %10781 = vmatprep.subr.bf16.mxu1 %v17223_v7  ;;  %v17285_v7 = vcombine.high %v7053_v54, %v7061_v8  ;;  %v7109_v30 = vld [vmem:[%s21665_s28 + $0x770] sm:$0xff] }
0x18dc   : > { %10676 = vmatpush1.bf16.msra.mxu0 %v17220_v35  ;;  %v7078_v35 = vld [vmem:[%s21665_s28 + $0x678] sm:$0xff] }
0x18dd   : > { %10782 = vmatpush1.bf16.msra.mxu1 %v17222_v45  ;;  %10677 = vmatprep.subr.bf16.mxu0 %v17237_v32  ;;  %v17284_v45 = vcombine.low %v7053_v54, %v7061_v8  ;;  %v17286_v32 = vcombine.low %v7054_v20, %v7062_v47  ;;  %v17303_v62 = vcombine.high %v7070_v21, %v7078_v35  ;;  %v7117_v8 = vld [vmem:[%s21665_s28 + $0x7b0] sm:$0xff]  ;;  %v7118_v47 = vld [vmem:[%s21665_s28 + $0x7b8] sm:$0xff] }
0x18de   : > { %10783 = vmatprep.subr.bf16.mxu1 %v17239_v51  ;;  %v17301_v51 = vcombine.high %v7069_v59, %v7077_v42  ;;  %v7125_v20 = vld [vmem:[%s21665_s28 + $0x7f0] sm:$0xff] }
0x18e0   : > { %10678 = vmatpush1.bf16.msra.mxu0 %v17236_v25  ;;  %v7094_v25 = vld [vmem:[%s21665_s28 + $0x6f8] sm:$0xff] }
0x18e1   : > { %10784 = vmatpush1.bf16.msra.mxu1 %v17238_v40  ;;  %10679 = vmatprep.subr.bf16.mxu0 %v17253_v63  ;;  %v17300_v40 = vcombine.low %v7069_v59, %v7077_v42  ;;  %v17302_v63 = vcombine.low %v7070_v21, %v7078_v35  ;;  %v17319_v27 = vcombine.high %v7086_v43, %v7094_v25  ;;  %v7133_v42 = vld [vmem:[%s21665_s28 + $0x830] sm:$0xff]  ;;  %v7134_v35 = vld [vmem:[%s21665_s28 + $0x838] sm:$0xff] }
0x18e2   : > { %10785 = vmatprep.subr.bf16.mxu1 %v17255_v16  ;;  %v17317_v16 = vcombine.high %v7085_v55, %v7093_v10  ;;  %v7141_v21 = vld [vmem:[%s21665_s28 + $0x870] sm:$0xff] }
0x18e4   : > { %10680 = vmatpush1.bf16.msra.mxu0 %v17252_v3  ;;  %v7110_v3 = vld [vmem:[%s21665_s28 + $0x778] sm:$0xff] }
0x18e5   : > { %10786 = vmatpush1.bf16.msra.mxu1 %v17254_v14  ;;  %10681 = vmatprep.subr.bf16.mxu0 %v17269_v36  ;;  %v17316_v14 = vcombine.low %v7085_v55, %v7093_v10  ;;  %v17318_v36 = vcombine.low %v7086_v43, %v7094_v25  ;;  %v17335_v54 = vcombine.high %v7102_v60, %v7110_v3  ;;  %v7149_v10 = vld [vmem:[%s21665_s28 + $0x8b0] sm:$0xff]  ;;  %v7150_v25 = vld [vmem:[%s21665_s28 + $0x8b8] sm:$0xff] }
0x18e6   : > { %10787 = vmatprep.subr.bf16.mxu1 %v17271_v57  ;;  %v17333_v57 = vcombine.high %v7101_v39, %v7109_v30  ;;  %v7157_v43 = vld [vmem:[%s21665_s28 + $0x8f0] sm:$0xff] }
0x18e8   : > { %10682 = vmatpush1.bf16.msra.mxu0 %v17268_v11  ;;  %v7126_v11 = vld [vmem:[%s21665_s28 + $0x7f8] sm:$0xff] }
0x18e9   : > { %10788 = vmatpush1.bf16.msra.mxu1 %v17270_v13  ;;  %10683 = vmatprep.subr.bf16.mxu0 %v17285_v7  ;;  %v17332_v13 = vcombine.low %v7101_v39, %v7109_v30  ;;  %v17334_v7 = vcombine.low %v7102_v60, %v7110_v3  ;;  %v17351_v59 = vcombine.high %v7118_v47, %v7126_v11  ;;  %v7165_v30 = vld [vmem:[%s21665_s28 + $0x930] sm:$0xff]  ;;  %v7166_v3 = vld [vmem:[%s21665_s28 + $0x938] sm:$0xff] }
0x18ea   : > { %10789 = vmatprep.subr.bf16.mxu1 %v17287_v46  ;;  %v17349_v46 = vcombine.high %v7117_v8, %v7125_v20  ;;  %v7173_v60 = vld [vmem:[%s21665_s28 + $0x970] sm:$0xff] }
0x18ec   : > { %10684 = vmatpush1.bf16.msra.mxu0 %v17284_v45  ;;  %v7142_v45 = vld [vmem:[%s21665_s28 + $0x878] sm:$0xff] }
0x18ed   : > { %10790 = vmatpush1.bf16.msra.mxu1 %v17286_v32  ;;  %10685 = vmatprep.subr.bf16.mxu0 %v17301_v51  ;;  %v17348_v32 = vcombine.low %v7117_v8, %v7125_v20  ;;  %v17350_v51 = vcombine.low %v7118_v47, %v7126_v11  ;;  %v17367_v55 = vcombine.high %v7134_v35, %v7142_v45  ;;  %v7181_v20 = vld [vmem:[%s21665_s28 + $0x9b0] sm:$0xff]  ;;  %v7190_v11 = vld [vmem:[%s21665_s28 + $0x9f8] sm:$0xff] }
0x18ee   : > { %10791 = vmatprep.subr.bf16.mxu1 %v17303_v62  ;;  %v17365_v62 = vcombine.high %v7133_v42, %v7141_v21  ;;  %v7189_v47 = vld [vmem:[%s21665_s28 + $0x9f0] sm:$0xff] }
0x18f0   : > { %10686 = vmatpush1.bf16.msra.mxu0 %v17300_v40  ;;  %v7158_v40 = vld [vmem:[%s21665_s28 + $0x8f8] sm:$0xff] }
0x18f1   : > { %10792 = vmatpush1.bf16.msra.mxu1 %v17302_v63  ;;  %10687 = vmatprep.subr.bf16.mxu0 %v17317_v16  ;;  %v17364_v63 = vcombine.low %v7133_v42, %v7141_v21  ;;  %v17366_v16 = vcombine.low %v7134_v35, %v7142_v45  ;;  %v17383_v39 = vcombine.high %v7150_v25, %v7158_v40  ;;  %v7205_v42 = vld [vmem:[%s21665_s28 + $0xa70] sm:$0xff]  ;;  %v7198_v21 = vld [vmem:[%s21665_s28 + $0xa38] sm:$0xff]  ;;  %v25043_v45 = vsub.s32 4, %v22253_v38 }
0x18f2   : > { %10793 = vmatprep.subr.bf16.mxu1 %v17319_v27  ;;  %v17381_v27 = vcombine.high %v7149_v10, %v7157_v43  ;;  %v7206_v35 = vld [vmem:[%s21665_s28 + $0xa78] sm:$0xff] }
0x18f4   : > { %10688 = vmatpush1.bf16.msra.mxu0 %v17316_v14  ;;  %v7174_v14 = vld [vmem:[%s21665_s28 + $0x978] sm:$0xff] }
0x18f5   : > { %10794 = vmatpush1.bf16.msra.mxu1 %v17318_v36  ;;  %10689 = vmatprep.subr.bf16.mxu0 %v17333_v57  ;;  %v17380_v36 = vcombine.low %v7149_v10, %v7157_v43  ;;  %v17382_v57 = vcombine.low %v7150_v25, %v7158_v40  ;;  %v17399_v8 = vcombine.high %v7166_v3, %v7174_v14  ;;  %v25040_v10 = vsub.s32 7, %v22253_v38  ;;  %v7213_v25 = vld [vmem:[%s21665_s28 + $0xab0] sm:$0xff] }
0x18f6   : > { %10795 = vmatprep.subr.bf16.mxu1 %v17335_v54  ;;  %v17397_v54 = vcombine.high %v7165_v30, %v7173_v60  ;;  %v17431_v43 = vcombine.high %v7198_v21, %v7206_v35  ;;  %v7221_v40 = vld [vmem:[%s21665_s28 + $0xaf0] sm:$0xff] }
0x18f8   : > { %10690 = vmatpush1.bf16.msra.mxu0 %v17332_v13  ;;  %v17396_v13 = vcombine.low %v7165_v30, %v7173_v60  ;;  %v17430_v60 = vcombine.low %v7198_v21, %v7206_v35 }
0x18f9   : > { %10796 = vmatpush1.bf16.msra.mxu1 %v17334_v7  ;;  %10691 = vmatprep.subr.bf16.mxu0 %v17349_v46  ;;  %v17413_v7 = vcombine.high %v7181_v20, %v7189_v47 }
0x18fa   : > { %10797 = vmatprep.subr.bf16.mxu1 %v17351_v59  ;;  %v7197_v59 = vld [vmem:[%s21665_s28 + $0xa30] sm:$0xff] }
0x18fc   : > { %10692 = vmatpush1.bf16.msra.mxu0 %v17348_v32  ;;  %v17412_v32 = vcombine.low %v7181_v20, %v7189_v47 }
0x18fd   : > { %10798 = vmatpush1.bf16.msra.mxu1 %v17350_v51  ;;  %10714 = vmatprep.subr.bf16.mxu0 %v17365_v62  ;;  %v25042_v51 = vsub.s32 6, %v22253_v38  ;;  %v25041_v62 = vsub.s32 5, %v22253_v38 }
0x18fe   : > { %10820 = vmatprep.subr.bf16.mxu1 %v17367_v55  ;;  %v17429_v55 = vcombine.high %v7197_v59, %v7205_v42 }
0x18ff   : > { %10694 = vmatmul.mubr.bf16.vlgmr.msra.gmra.mrb[120].mxu0 %v23184_v15  ;;  %v23830_v30 = vrot.slane %v23599_v49, %v25041_v62 }
0x1900   : > { %10800 = vmatmul.mubr.bf16.vlgmr.msra.gmra.mrb[120].mxu1 %v23184_v15  ;;  %10703 = vmatprep.mubr.bf16.mxu0 %v23307_v50  ;;  %v7182_v15 = vld [vmem:[%s21665_s28 + $0x9b8] sm:$0xff] }
0x1901   : > { %10715 = vmatpush1.bf16.msra.mxu0 %v17364_v63  ;;  %10809 = vmatprep.mubr.bf16.mxu1 %v23307_v50  ;;  %v17398_v50 = vcombine.low %v7166_v3, %v7174_v14  ;;  %v17415_v46 = vcombine.high %v7182_v15, %v7190_v11  ;;  %v7214_v63 = vld [vmem:[%s21665_s28 + $0xab8] sm:$0xff]  ;;  %v23835_v3 = vrot.slane %v23599_v49, %v25040_v10 }
0x1902   : > { %10821 = vmatpush1.bf16.msra.mxu1 %v17366_v16  ;;  %10716 = vmatprep.subr.bf16.mxu0 %v17381_v27  ;;  %v7222_v16 = vld [vmem:[%s21665_s28 + $0xaf8] sm:$0xff]  ;;  %v17428_v27 = vcombine.low %v7197_v59, %v7205_v42  ;;  %v17445_v14 = vcombine.high %v7213_v25, %v7221_v40 }
0x1903   : > { %10822 = vmatprep.subr.bf16.mxu1 %v17383_v39  ;;  %v23825_v39 = vrot.slane %v23599_v49, %v25042_v51  ;;  %v17446_v59 = vcombine.low %v7214_v63, %v7222_v16  ;;  %v7286_v51 = vld [vmem:[%s21665_s28 + $0xcf8] sm:$0xff] }
0x1905   : > { %10717 = vmatpush1.bf16.msra.mxu0 %v17380_v36 }
0x1906   : > { %10823 = vmatpush1.bf16.msra.mxu1 %v17382_v57  ;;  %10718 = vmatprep.subr.bf16.mxu0 %v17397_v54  ;;  %v17447_v57 = vcombine.high %v7214_v63, %v7222_v16  ;;  %v7229_v54 = vld [vmem:[%s21665_s28 + $0xb30] sm:$0xff] }
0x1907   : > { %10704 = vmatmul.mubr.bf16.gmra.mrb[124].mxu0 %v23311_v56  ;;  %10824 = vmatprep.subr.bf16.mxu1 %v17399_v8  ;;  %v7237_v8 = vld [vmem:[%s21665_s28 + $0xb70] sm:$0xff] }
0x1908   : > { %10810 = vmatmul.mubr.bf16.gmra.mrb[124].mxu1 %v23311_v56  ;;  %10746 = vmatprep.mubr.bf16.mxu0 %v23320_v19  ;;  %v17414_v56 = vcombine.low %v7182_v15, %v7190_v11  ;;  %v7230_v11 = vld [vmem:[%s21665_s28 + $0xb38] sm:$0xff]  ;;  %v17460_v63 = vcombine.low %v7229_v54, %v7237_v8 }
0x1909   : > { %10719 = vmatpush1.bf16.msra.mxu0 %v17396_v13  ;;  %10852 = vmatprep.mubr.bf16.mxu1 %v23320_v19  ;;  %v23818_v19 = vrot.slane %v23599_v49, %v25043_v45  ;;  %v7238_v13 = vld [vmem:[%s21665_s28 + $0xb78] sm:$0xff]  ;;  %v17444_v49 = vcombine.low %v7213_v25, %v7221_v40 }
0x190a   : > { %10825 = vmatpush1.bf16.msra.mxu1 %v17398_v50  ;;  %10720 = vmatprep.subr.bf16.mxu0 %v17413_v7  ;;  %v17463_v16 = vcombine.high %v7230_v11, %v7238_v13 }
0x190b   : > { %10826 = vmatprep.subr.bf16.mxu1 %v17415_v46 }
0x190d   : > { %10721 = vmatpush1.bf16.msra.mxu0 %v17412_v32 }
0x190e   : > { %10827 = vmatpush1.bf16.msra.mxu1 %v17414_v56  ;;  %10722 = vmatprep.subr.bf16.mxu0 %v17429_v55  ;;  %v17461_v55 = vcombine.high %v7229_v54, %v7237_v8 }
0x190f   : > { %10828 = vmatprep.subr.bf16.mxu1 %v17431_v43  ;;  %v10324_v36 = vpop.f32.mrb[104].mxu0 }
0x1910   : > { %v18545_v20 = vadd.f32 %v10324_v36, %v23818_v19  ;;  %v10430_v47 = vpop.f32.mrb[104].mxu1  ;;  %v10326_v15 = vpop.f32.mrb[105].mxu0 }
0x1911   : > { %10723 = vmatpush1.bf16.msra.mxu0 %v17428_v27  ;;  %v18553_v50 = vadd.f32 %v10430_v47, %v23825_v39  ;;  %v18546_v7 = vadd.f32 %v10326_v15, %v23830_v30  ;;  %v10432_v46 = vpop.f32.mrb[105].mxu1  ;;  %v10328_v42 = vpop.f32.mrb[106].mxu0  ;;  %v23849_v27 = vld [vmem:[%s21665_s28 + $0xbb0] sm:$0xff]  ;;  %v17462_v15 = vcombine.low %v7230_v11, %v7238_v13 }
0x1912   : > { %10829 = vmatpush1.bf16.msra.mxu1 %v17430_v60  ;;  %v18554_v21 = vadd.f32 %v10432_v46, %v23835_v3  ;;  %10724 = vmatprep.subr.bf16.mxu0 %v17445_v14  ;;  %v18547_v35 = vadd.f32 %v10328_v42, %v23818_v19  ;;  %v10434_v32 = vpop.f32.mrb[106].mxu1  ;;  %v10330_v56 = vpop.f32.mrb[107].mxu0  ;;  %v7253_v60 = vld [vmem:[%s21665_s28 + $0xbf0] sm:$0xff]  ;;  %v10877_v36 = vmax.f32 %v18545_v20, 0.0  ;;  %v7246_v46 = vld [vmem:[%s21665_s28 + $0xbb8] sm:$0xff] }
0x1913   : > { %10830 = vmatprep.subr.bf16.mxu1 %v17447_v57  ;;  %v18555_v43 = vadd.f32 %v10434_v32, %v23825_v39  ;;  %v18548_v25 = vadd.f32 %v10330_v56, %v23830_v30  ;;  %v10436_v40 = vpop.f32.mrb[107].mxu1  ;;  %v7254_v42 = vld [vmem:[%s21665_s28 + $0xbf8] sm:$0xff]  ;;  %v10879_v10 = vmax.f32 %v18553_v50, 0.0  ;;  %v10878_v57 = vmax.f32 %v18546_v7, 0.0 }
0x1914   : > { %v10893_v14 = vmax.f32 %v18547_v35, 0.0  ;;  %v18556_v47 = vadd.f32 %v10436_v40, %v23835_v3  ;;  %v10880_v62 = vmax.f32 %v18554_v21, 0.0  ;;  %v17477_v20 = vcombine.high %v23849_v27, %v7253_v60  ;;  %v7261_v35 = vld [vmem:[%s21665_s28 + $0xc30] sm:$0xff]  ;;  %v7262_v40 = vld [vmem:[%s21665_s28 + $0xc38] sm:$0xff] }
0x1915   : > { %v10895_v32 = vmax.f32 %v18555_v43, 0.0  ;;  %10725 = vmatpush1.bf16.msra.mxu0 %v17444_v49  ;;  %v10894_v56 = vmax.f32 %v18548_v25, 0.0  ;;  %v17479_v7 = vcombine.high %v7246_v46, %v7254_v42  ;;  %v7269_v49 = vld [vmem:[%s21665_s28 + $0xc70] sm:$0xff] }
0x1916   : > { %v23855_v54 = vpack.c.bf16 %v10893_v14, %v10877_v36  ;;  %10831 = vmatpush1.bf16.msra.mxu1 %v17446_v59  ;;  %v10896_v8 = vmax.f32 %v18556_v47, 0.0  ;;  %10726 = vmatprep.subr.bf16.mxu0 %v17461_v55  ;;  %v7270_v36 = vld [vmem:[%s21665_s28 + $0xc78] sm:$0xff]  ;;  %v17478_v47 = vcombine.low %v7246_v46, %v7254_v42  ;;  %v17492_v46 = vcombine.low %v7261_v35, %v7269_v49 }
0x1917   : > { %v23858_v11 = vpack.c.bf16 %v10895_v32, %v10879_v10  ;;  %v23860_v13 = vpack.c.bf16 %v10894_v56, %v10878_v57  ;;  %10832 = vmatprep.subr.bf16.mxu1 %v17463_v16  ;;  %v10334_v50 = vpop.f32.mrb[108].mxu0  ;;  %v17476_v16 = vcombine.low %v23849_v27, %v7253_v60  ;;  %v17495_v42 = vcombine.high %v7262_v40, %v7270_v36 }
0x1918   : > { %v23864_v43 = vpack.c.bf16 %v10896_v8, %v10880_v62  ;;  %v18549_v21 = vadd.f32 %v10334_v50, %v23818_v19  ;;  %v10440_v25 = vpop.f32.mrb[108].mxu1  ;;  %v10336_v59 = vpop.f32.mrb[109].mxu0  ;;  %v17493_v8 = vcombine.high %v7261_v35, %v7269_v49 }
0x1919   : > { %10727 = vmatpush1.bf16.msra.mxu0 %v17460_v63  ;;  %v18557_v55 = vadd.f32 %v10440_v25, %v23825_v39  ;;  %v18550_v10 = vadd.f32 %v10336_v59, %v23830_v30  ;;  %v10442_v14 = vpop.f32.mrb[109].mxu1  ;;  %v10338_v57 = vpop.f32.mrb[110].mxu0  ;;  %v7277_v25 = vld [vmem:[%s21665_s28 + $0xcb0] sm:$0xff] }
0x191a   : > { %10833 = vmatpush1.bf16.msra.mxu1 %v17462_v15  ;;  %v18558_v62 = vadd.f32 %v10442_v14, %v23835_v3  ;;  %10728 = vmatprep.subr.bf16.mxu0 %v17477_v20  ;;  %v18551_v32 = vadd.f32 %v10338_v57, %v23818_v19  ;;  %v10444_v56 = vpop.f32.mrb[110].mxu1  ;;  %v10340_v63 = vpop.f32.mrb[111].mxu0  ;;  %v7285_v15 = vld [vmem:[%s21665_s28 + $0xcf0] sm:$0xff]  ;;  %v10909_v59 = vmax.f32 %v18549_v21, 0.0  ;;  %v17494_v19 = vcombine.low %v7262_v40, %v7270_v36  ;;  %v7278_v57 = vld [vmem:[%s21665_s28 + $0xcb8] sm:$0xff] }
0x191b   : > { %10834 = vmatprep.subr.bf16.mxu1 %v17479_v7  ;;  %v18559_v50 = vadd.f32 %v10444_v56, %v23825_v39  ;;  %v18552_v27 = vadd.f32 %v10340_v63, %v23830_v30  ;;  %v10446_v60 = vpop.f32.mrb[111].mxu1  ;;  %v10911_v45 = vmax.f32 %v18557_v55, 0.0  ;;  %v10910_v7 = vmax.f32 %v18550_v10, 0.0  ;;  %v7293_v55 = vld [vmem:[%s21665_s28 + $0xd30] sm:$0xff] }
0x191c   : > { %v10925_v14 = vmax.f32 %v18551_v32, 0.0  ;;  %v18560_v20 = vadd.f32 %v10446_v60, %v23835_v3  ;;  %v10912_v30 = vmax.f32 %v18558_v62, 0.0  ;;  %v17509_v21 = vcombine.high %v7277_v25, %v7285_v15  ;;  %v7301_v10 = vld [vmem:[%s21665_s28 + $0xd70] sm:$0xff]  ;;  %v7294_v62 = vld [vmem:[%s21665_s28 + $0xd38] sm:$0xff] }
0x191d   : > { %v10927_v26 = vmax.f32 %v18559_v50, 0.0  ;;  %10729 = vmatpush1.bf16.msra.mxu0 %v17476_v16  ;;  %v10926_v39 = vmax.f32 %v18552_v27, 0.0  ;;  %v17511_v36 = vcombine.high %v7278_v57, %v7286_v51  ;;  %v7302_v32 = vld [vmem:[%s21665_s28 + $0xd78] sm:$0xff]  ;;  %v7309_v63 = vld [vmem:[%s21665_s28 + $0xdb0] sm:$0xff]  ;;  %v17524_v60 = vcombine.low %v7293_v55, %v7301_v10 }
0x191e   : > { %v23881_v35 = vpack.c.bf16 %v10925_v14, %v10909_v59  ;;  %10835 = vmatpush1.bf16.msra.mxu1 %v17478_v47  ;;  %v10928_v49 = vmax.f32 %v18560_v20, 0.0  ;;  %10730 = vmatprep.subr.bf16.mxu0 %v17493_v8  ;;  %v17508_v47 = vcombine.low %v7277_v25, %v7285_v15  ;;  %v17527_v56 = vcombine.high %v7294_v62, %v7302_v32  ;;  %v7317_v8 = vld [vmem:[%s21665_s28 + $0xdf0] sm:$0xff]  ;;  %v7310_v50 = vld [vmem:[%s21665_s28 + $0xdb8] sm:$0xff] }
0x191f   : > { %v23883_v3 = vpack.c.bf16 %v10927_v26, %v10911_v45  ;;  %v23885_v40 = vpack.c.bf16 %v10926_v39, %v10910_v7  ;;  %10836 = vmatprep.subr.bf16.mxu1 %v17495_v42  ;;  %v17510_v26 = vcombine.low %v7278_v57, %v7286_v51  ;;  %v17525_v45 = vcombine.high %v7293_v55, %v7301_v10  ;;  %v7318_v27 = vld [vmem:[%s21665_s28 + $0xdf8] sm:$0xff]  ;;  %v7325_v25 = vld [vmem:[%s21665_s28 + $0xe30] sm:$0xff] }
0x1920   : > { %v23889_v16 = vpack.c.bf16 %v10928_v49, %v10912_v30  ;;  %v17541_v42 = vcombine.high %v7309_v63, %v7317_v8  ;;  %v17543_v51 = vcombine.high %v7310_v50, %v7318_v27  ;;  %v7333_v15 = vld [vmem:[%s21665_s28 + $0xe70] sm:$0xff]  ;;  %v7326_v59 = vld [vmem:[%s21665_s28 + $0xe38] sm:$0xff]  ;;  %v17540_v20 = vcombine.low %v7309_v63, %v7317_v8 }
0x1921   : > { %10731 = vmatpush1.bf16.msra.mxu0 %v17492_v46  ;;  %v17526_v46 = vcombine.low %v7294_v62, %v7302_v32  ;;  %v7334_v14 = vld [vmem:[%s21665_s28 + $0xe78] sm:$0xff]  ;;  %v17557_v57 = vcombine.high %v7325_v25, %v7333_v15  ;;  %v7341_v39 = vld [vmem:[%s21665_s28 + $0xeb0] sm:$0xff] }
0x1922   : > { %10837 = vmatpush1.bf16.msra.mxu1 %v17494_v19  ;;  %10732 = vmatprep.subr.bf16.mxu0 %v17509_v21  ;;  %v17542_v19 = vcombine.low %v7310_v50, %v7318_v27  ;;  %v17559_v7 = vcombine.high %v7326_v59, %v7334_v14  ;;  %v7349_v30 = vld [vmem:[%s21665_s28 + $0xef0] sm:$0xff]  ;;  %v7342_v49 = vld [vmem:[%s21665_s28 + $0xeb8] sm:$0xff]  ;;  %v17558_v55 = vcombine.low %v7326_v59, %v7334_v14 }
0x1923   : > { %10838 = vmatprep.subr.bf16.mxu1 %v17511_v36  ;;  %v7350_v21 = vld [vmem:[%s21665_s28 + $0xef8] sm:$0xff]  ;;  %v17556_v36 = vcombine.low %v7325_v25, %v7333_v15  ;;  %v17573_v10 = vcombine.high %v7341_v39, %v7349_v30  ;;  %v7357_v32 = vld [vmem:[%s21665_s28 + $0xf30] sm:$0xff] }
0x1924   : > { %v17575_v62 = vcombine.high %v7342_v49, %v7350_v21  ;;  %v17574_v63 = vcombine.low %v7342_v49, %v7350_v21  ;;  %v7373_v27 = vld [vmem:[%s21665_s28 + $0xfb0] sm:$0xff]  ;;  %v19781_v49 = vld [vmem:[%s21667_s14 + $0x2c] ss:$16 sps:$4 sm:$0xff]  }
0x1925   : > { %10733 = vmatpush1.bf16.msra.mxu0 %v17508_v47  ;;  %v7365_v47 = vld [vmem:[%s21665_s28 + $0xf70] sm:$0xff] }
0x1926   : > { %10839 = vmatpush1.bf16.msra.mxu1 %v17510_v26  ;;  %10734 = vmatprep.subr.bf16.mxu0 %v17525_v45  ;;  %v7358_v26 = vld [vmem:[%s21665_s28 + $0xf38] sm:$0xff]  ;;  %v17589_v8 = vcombine.high %v7357_v32, %v7365_v47  ;;  %v19776_v21 = vld [vmem:[%s21667_s14 + $0x20] ss:$16 sps:$4 sm:$0xff]  }
0x1927   : > { %10840 = vmatprep.subr.bf16.mxu1 %v17527_v56  ;;  %v7366_v45 = vld [vmem:[%s21665_s28 + $0xf78] sm:$0xff]  ;;  %v17572_v56 = vcombine.low %v7341_v39, %v7349_v30  ;;  %v19778_v30 = vld [vmem:[%s21667_s14 + $0x24] ss:$16 sps:$4 sm:$0xff]  }
0x1928   : > { %v17591_v50 = vcombine.high %v7358_v26, %v7366_v45  ;;  %v17590_v25 = vcombine.low %v7358_v26, %v7366_v45  ;;  %v19773_v39 = vld [vmem:[%s21667_s14 + $0x8] ss:$16 sps:$4 sm:$0xff]   ;;  %v19796_v45 = vld [vmem:[%s21667_s14 + $0x84] ss:$16 sps:$4 sm:$0xff]  }
0x1929   : > { %10735 = vmatpush1.bf16.msra.mxu0 %v17524_v60  ;;  %v7381_v60 = vld [vmem:[%s21665_s28 + $0xff0] sm:$0xff]  ;;  %v19791_v26 = vld [vmem:[%s21667_s14 + $0x68] ss:$16 sps:$4 sm:$0xff]  }
0x192a   : > { %10841 = vmatpush1.bf16.msra.mxu1 %v17526_v46  ;;  %10736 = vmatprep.subr.bf16.mxu0 %v17541_v42  ;;  %v7374_v46 = vld [vmem:[%s21665_s28 + $0xfb8] sm:$0xff]  ;;  %v17605_v15 = vcombine.high %v7373_v27, %v7381_v60  ;;  %v17604_v14 = vcombine.low %v7373_v27, %v7381_v60  ;;  %v19808_v60 = vld [vmem:[%s21667_s14 + $0xc4] ss:$16 sps:$4 sm:$0xff]  }
0x192b   : > { %10842 = vmatprep.subr.bf16.mxu1 %v17543_v51  ;;  %v7382_v42 = vld [vmem:[%s21665_s28 + $0xff8] sm:$0xff]  ;;  %v17588_v51 = vcombine.low %v7357_v32, %v7365_v47  ;;  %v19790_v32 = vld [vmem:[%s21667_s14 + $0x64] ss:$16 sps:$4 sm:$0xff]   ;;  %v19788_v47 = vld [vmem:[%s21667_s14 + $0x60] ss:$16 sps:$4 sm:$0xff]  }
0x192c   : > { %v17607_v59 = vcombine.high %v7374_v46, %v7382_v42  ;;  %v19803_v27 = vld [vmem:[%s21667_s14 + $0xa8] ss:$16 sps:$4 sm:$0xff]  }
0x192d   : > { %10737 = vmatpush1.bf16.msra.mxu0 %v17540_v20  ;;  %v17606_v20 = vcombine.low %v7374_v46, %v7382_v42  ;;  %v19811_v46 = vld [vmem:[%s21667_s14 + $0xcc] ss:$16 sps:$4 sm:$0xff]   ;;  %v19806_v42 = vld [vmem:[%s21667_s14 + $0xc0] ss:$16 sps:$4 sm:$0xff]  }
0x192e   : > { %10843 = vmatpush1.bf16.msra.mxu1 %v17542_v19  ;;  %10738 = vmatprep.subr.bf16.mxu0 %v17557_v57  ;;  %v19772_v19 = vld [vmem:[%s21667_s14 + $0x4] ss:$16 sps:$4 sm:$0xff]   ;;  %v19775_v57 = vld [vmem:[%s21667_s14 + $0xc] ss:$16 sps:$4 sm:$0xff]  }
0x192f   : > { %10844 = vmatprep.subr.bf16.mxu1 %v17559_v7  ;;  %v19770_v7 = vld [vmem:[%s21667_s14] ss:$16 sps:$4 sm:$0xff]  }
0x1931   : > { %10739 = vmatpush1.bf16.msra.mxu0 %v17556_v36  ;;  %v19779_v36 = vld [vmem:[%s21667_s14 + $0x28] ss:$16 sps:$4 sm:$0xff]  }
0x1932   : > { %10845 = vmatpush1.bf16.msra.mxu1 %v17558_v55  ;;  %10740 = vmatprep.subr.bf16.mxu0 %v17573_v10  ;;  %v19784_v55 = vld [vmem:[%s21667_s14 + $0x44] ss:$16 sps:$4 sm:$0xff]   ;;  %v19787_v10 = vld [vmem:[%s21667_s14 + $0x4c] ss:$16 sps:$4 sm:$0xff]  }
0x1933   : > { %10846 = vmatprep.subr.bf16.mxu1 %v17575_v62  ;;  %v19782_v62 = vld [vmem:[%s21667_s14 + $0x40] ss:$16 sps:$4 sm:$0xff]  }
0x1935   : > { %10741 = vmatpush1.bf16.msra.mxu0 %v17572_v56  ;;  %v19799_v56 = vld [vmem:[%s21667_s14 + $0x8c] ss:$16 sps:$4 sm:$0xff]  }
0x1936   : > { %10847 = vmatpush1.bf16.msra.mxu1 %v17574_v63  ;;  %10742 = vmatprep.subr.bf16.mxu0 %v17589_v8  ;;  %v19797_v63 = vld [vmem:[%s21667_s14 + $0x88] ss:$16 sps:$4 sm:$0xff]   ;;  %v19802_v8 = vld [vmem:[%s21667_s14 + $0xa4] ss:$16 sps:$4 sm:$0xff]  }
0x1937   : > { %10848 = vmatprep.subr.bf16.mxu1 %v17591_v50  ;;  %v19800_v50 = vld [vmem:[%s21667_s14 + $0xa0] ss:$16 sps:$4 sm:$0xff]  }
0x1939   : > { %10743 = vmatpush1.bf16.msra.mxu0 %v17588_v51  ;;  %v19809_v51 = vld [vmem:[%s21667_s14 + $0xc8] ss:$16 sps:$4 sm:$0xff]  }
0x193a   : > { %10849 = vmatpush1.bf16.msra.mxu1 %v17590_v25  ;;  %10744 = vmatprep.subr.bf16.mxu0 %v17605_v15  ;;  %v19814_v25 = vld [vmem:[%s21667_s14 + $0xe4] ss:$16 sps:$4 sm:$0xff]   ;;  %v19817_v15 = vld [vmem:[%s21667_s14 + $0xec] ss:$16 sps:$4 sm:$0xff]  }
0x193b   : > { %10850 = vmatprep.subr.bf16.mxu1 %v17607_v59  ;;  %v19812_v59 = vld [vmem:[%s21667_s14 + $0xe0] ss:$16 sps:$4 sm:$0xff]  }
0x193d   : > { %10745 = vmatpush1.bf16.msra.mxu0 %v17604_v14  ;;  %v19815_v14 = vld [vmem:[%s21667_s14 + $0xe8] ss:$16 sps:$4 sm:$0xff]  }
0x193e   : > { %10851 = vmatpush1.bf16.msra.mxu1 %v17606_v20  ;;  %14062 = vmatprep.subr.bf16.mxu0 %v19772_v19  ;;  %v19820_v20 = vld [vmem:[%s21667_s14 + $0x104] ss:$16 sps:$4 sm:$0xff]   ;;  %v19823_v19 = vld [vmem:[%s21667_s14 + $0x10c] ss:$16 sps:$4 sm:$0xff]  }
0x193f   : > { %14486 = vmatprep.subr.bf16.mxu1 %v19775_v57  ;;  %v19818_v57 = vld [vmem:[%s21667_s14 + $0x100] ss:$16 sps:$4 sm:$0xff]  }
0x1940   : > { %10747 = vmatmul.mubr.bf16.vlgmr.msra.gmra.mrb[120].mxu0 %v23344_v1 }
0x1941   : > { %10853 = vmatmul.mubr.bf16.vlgmr.msra.gmra.mrb[120].mxu1 %v23344_v1  ;;  %10756 = vmatprep.mubr.bf16.mxu0 %v23356_v24  ;;  %v19785_v1 = vld [vmem:[%s21667_s14 + $0x48] ss:$16 sps:$4 sm:$0xff]  }
0x1942   : > { %10862 = vmatprep.mubr.bf16.mxu1 %v23356_v24  ;;  %14063 = vmatpush1.bf16.msra.mxu0 %v19770_v7  ;;  %v19793_v24 = vld [vmem:[%s21667_s14 + $0x6c] ss:$16 sps:$4 sm:$0xff]   ;;  %v19821_v7 = vld [vmem:[%s21667_s14 + $0x108] ss:$16 sps:$4 sm:$0xff]  }
0x1943   : > { %14487 = vmatpush1.bf16.msra.mxu1 %v19773_v39  ;;  %14064 = vmatprep.subr.bf16.mxu0 %v19778_v30  ;;  %v19826_v39 = vld [vmem:[%s21667_s14 + $0x124] ss:$16 sps:$4 sm:$0xff]   ;;  %v19829_v30 = vld [vmem:[%s21667_s14 + $0x12c] ss:$16 sps:$4 sm:$0xff]  }
0x1944   : > { %14488 = vmatprep.subr.bf16.mxu1 %v19781_v49  ;;  %v19824_v49 = vld [vmem:[%s21667_s14 + $0x120] ss:$16 sps:$4 sm:$0xff]  }
0x1946   : > { %14065 = vmatpush1.bf16.msra.mxu0 %v19776_v21  ;;  %v19827_v21 = vld [vmem:[%s21667_s14 + $0x128] ss:$16 sps:$4 sm:$0xff]  }
0x1947   : > { %14489 = vmatpush1.bf16.msra.mxu1 %v19779_v36  ;;  %14066 = vmatprep.subr.bf16.mxu0 %v19784_v55  ;;  %v19832_v36 = vld [vmem:[%s21667_s14 + $0x144] ss:$16 sps:$4 sm:$0xff]   ;;  %v19835_v55 = vld [vmem:[%s21667_s14 + $0x14c] ss:$16 sps:$4 sm:$0xff]  }
0x1948   : > { %10757 = vmatmul.mubr.bf16.gmra.mrb[124].mxu0 %v23371_v33  ;;  %14490 = vmatprep.subr.bf16.mxu1 %v19787_v10  ;;  %v19830_v10 = vld [vmem:[%s21667_s14 + $0x140] ss:$16 sps:$4 sm:$0xff]  }
0x1949   : > { %10863 = vmatmul.mubr.bf16.gmra.mrb[124].mxu1 %v23371_v33  ;;  %14094 = vmatprep.mubr.bf16.mxu0 %v23657_v34  ;;  %v19794_v33 = vld [vmem:[%s21667_s14 + $0x80] ss:$16 sps:$4 sm:$0xff]  }
0x194a   : > { %14067 = vmatpush1.bf16.msra.mxu0 %v19782_v62  ;;  %14518 = vmatprep.mubr.bf16.mxu1 %v23657_v34  ;;  %v19805_v34 = vld [vmem:[%s21667_s14 + $0xac] ss:$16 sps:$4 sm:$0xff]   ;;  %v19833_v62 = vld [vmem:[%s21667_s14 + $0x148] ss:$16 sps:$4 sm:$0xff]  }
0x194b   : > { %14491 = vmatpush1.bf16.msra.mxu1 %v19785_v1  ;;  %14068 = vmatprep.subr.bf16.mxu0 %v19790_v32  ;;  %v19838_v1 = vld [vmem:[%s21667_s14 + $0x164] ss:$16 sps:$4 sm:$0xff]   ;;  %v19841_v32 = vld [vmem:[%s21667_s14 + $0x16c] ss:$16 sps:$4 sm:$0xff]  }
0x194c   : > { %14492 = vmatprep.subr.bf16.mxu1 %v19793_v24  ;;  %v19836_v24 = vld [vmem:[%s21667_s14 + $0x160] ss:$16 sps:$4 sm:$0xff]  }
0x194e   : > { %14069 = vmatpush1.bf16.msra.mxu0 %v19788_v47  ;;  %v19839_v47 = vld [vmem:[%s21667_s14 + $0x168] ss:$16 sps:$4 sm:$0xff]  }
0x194f   : > { %14493 = vmatpush1.bf16.msra.mxu1 %v19791_v26  ;;  %14070 = vmatprep.subr.bf16.mxu0 %v19796_v45  ;;  %v19844_v26 = vld [vmem:[%s21667_s14 + $0x184] ss:$16 sps:$4 sm:$0xff]   ;;  %v19847_v45 = vld [vmem:[%s21667_s14 + $0x18c] ss:$16 sps:$4 sm:$0xff]  }
0x1950   : > { %14494 = vmatprep.subr.bf16.mxu1 %v19799_v56  ;;  %v19842_v56 = vld [vmem:[%s21667_s14 + $0x180] ss:$16 sps:$4 sm:$0xff]  }
0x1952   : > { %14071 = vmatpush1.bf16.msra.mxu0 %v19794_v33  ;;  %v19845_v33 = vld [vmem:[%s21667_s14 + $0x188] ss:$16 sps:$4 sm:$0xff]  }
0x1953   : > { %14495 = vmatpush1.bf16.msra.mxu1 %v19797_v63  ;;  %14072 = vmatprep.subr.bf16.mxu0 %v19802_v8  ;;  %v19850_v63 = vld [vmem:[%s21667_s14 + $0x1a4] ss:$16 sps:$4 sm:$0xff]   ;;  %v19853_v8 = vld [vmem:[%s21667_s14 + $0x1ac] ss:$16 sps:$4 sm:$0xff]  }
0x1954   : > { %14496 = vmatprep.subr.bf16.mxu1 %v19805_v34  ;;  %v19848_v34 = vld [vmem:[%s21667_s14 + $0x1a0] ss:$16 sps:$4 sm:$0xff]  }
0x1956   : > { %14073 = vmatpush1.bf16.msra.mxu0 %v19800_v50  ;;  %v19851_v50 = vld [vmem:[%s21667_s14 + $0x1a8] ss:$16 sps:$4 sm:$0xff]  }
0x1957   : > { %14497 = vmatpush1.bf16.msra.mxu1 %v19803_v27  ;;  %14074 = vmatprep.subr.bf16.mxu0 %v19808_v60  ;;  %v19856_v27 = vld [vmem:[%s21667_s14 + $0x1c4] ss:$16 sps:$4 sm:$0xff]   ;;  %v19859_v60 = vld [vmem:[%s21667_s14 + $0x1cc] ss:$16 sps:$4 sm:$0xff]  }
0x1958   : > { %14498 = vmatprep.subr.bf16.mxu1 %v19811_v46  ;;  %v19854_v46 = vld [vmem:[%s21667_s14 + $0x1c0] ss:$16 sps:$4 sm:$0xff]  }
0x195a   : > { %14075 = vmatpush1.bf16.msra.mxu0 %v19806_v42  ;;  %v19857_v42 = vld [vmem:[%s21667_s14 + $0x1c8] ss:$16 sps:$4 sm:$0xff]  }
0x195b   : > { %14499 = vmatpush1.bf16.msra.mxu1 %v19809_v51  ;;  %14076 = vmatprep.subr.bf16.mxu0 %v19814_v25  ;;  %v19862_v51 = vld [vmem:[%s21667_s14 + $0x1e4] ss:$16 sps:$4 sm:$0xff]   ;;  %v19865_v25 = vld [vmem:[%s21667_s14 + $0x1ec] ss:$16 sps:$4 sm:$0xff]  }
0x195c   : > { %14500 = vmatprep.subr.bf16.mxu1 %v19817_v15  ;;  %v19860_v15 = vld [vmem:[%s21667_s14 + $0x1e0] ss:$16 sps:$4 sm:$0xff]  }
0x195e   : > { %14077 = vmatpush1.bf16.msra.mxu0 %v19812_v59  ;;  %v19863_v59 = vld [vmem:[%s21667_s14 + $0x1e8] ss:$16 sps:$4 sm:$0xff]  }
0x195f   : > { %14501 = vmatpush1.bf16.msra.mxu1 %v19815_v14  ;;  %14078 = vmatprep.subr.bf16.mxu0 %v19820_v20  ;;  %v19868_v14 = vld [vmem:[%s21667_s14 + $0x204] ss:$16 sps:$4 sm:$0xff]   ;;  %v19871_v20 = vld [vmem:[%s21667_s14 + $0x20c] ss:$16 sps:$4 sm:$0xff]  }
0x1960   : > { %14502 = vmatprep.subr.bf16.mxu1 %v19823_v19  ;;  %v19866_v19 = vld [vmem:[%s21667_s14 + $0x200] ss:$16 sps:$4 sm:$0xff]  }
0x1962   : > { %14079 = vmatpush1.bf16.msra.mxu0 %v19818_v57  ;;  %v19869_v57 = vld [vmem:[%s21667_s14 + $0x208] ss:$16 sps:$4 sm:$0xff]  }
0x1963   : > { %14503 = vmatpush1.bf16.msra.mxu1 %v19821_v7  ;;  %14080 = vmatprep.subr.bf16.mxu0 %v19826_v39  ;;  %v19874_v7 = vld [vmem:[%s21667_s14 + $0x224] ss:$16 sps:$4 sm:$0xff]   ;;  %v19877_v39 = vld [vmem:[%s21667_s14 + $0x22c] ss:$16 sps:$4 sm:$0xff]  }
0x1964   : > { %14504 = vmatprep.subr.bf16.mxu1 %v19829_v30  ;;  %v19872_v30 = vld [vmem:[%s21667_s14 + $0x220] ss:$16 sps:$4 sm:$0xff]  }
0x1966   : > { %14081 = vmatpush1.bf16.msra.mxu0 %v19824_v49  ;;  %v19875_v49 = vld [vmem:[%s21667_s14 + $0x228] ss:$16 sps:$4 sm:$0xff]  }
0x1967   : > { %14505 = vmatpush1.bf16.msra.mxu1 %v19827_v21  ;;  %14082 = vmatprep.subr.bf16.mxu0 %v19832_v36  ;;  %v19880_v21 = vld [vmem:[%s21667_s14 + $0x244] ss:$16 sps:$4 sm:$0xff]   ;;  %v19883_v36 = vld [vmem:[%s21667_s14 + $0x24c] ss:$16 sps:$4 sm:$0xff]  }
0x1968   : > { %14506 = vmatprep.subr.bf16.mxu1 %v19835_v55  ;;  %v19878_v55 = vld [vmem:[%s21667_s14 + $0x240] ss:$16 sps:$4 sm:$0xff]  }
0x196a   : > { %14083 = vmatpush1.bf16.msra.mxu0 %v19830_v10  ;;  %v16550_v10 = vld [vmem:[%s21673_s8 + $0x46] ss:$8 sm:$0xf] }
0x196b   : > { %14507 = vmatpush1.bf16.msra.mxu1 %v19833_v62  ;;  %14084 = vmatprep.subr.bf16.mxu0 %v19838_v1  ;;  %v19881_v62 = vld [vmem:[%s21667_s14 + $0x248] ss:$16 sps:$4 sm:$0xff]   ;;  %v19889_v1 = vld [vmem:[%s21667_s14 + $0x26c] ss:$16 sps:$4 sm:$0xff]  }
0x196c   : > { %14508 = vmatprep.subr.bf16.mxu1 %v19841_v32 }
0x196e   : > { %14085 = vmatpush1.bf16.msra.mxu0 %v19836_v24  ;;  %v19884_v24 = vld [vmem:[%s21667_s14 + $0x260] ss:$16 sps:$4 sm:$0xff]  }
0x196f   : > { %14509 = vmatpush1.bf16.msra.mxu1 %v19839_v47  ;;  %14086 = vmatprep.subr.bf16.mxu0 %v19844_v26  ;;  %v19887_v47 = vld [vmem:[%s21667_s14 + $0x268] ss:$16 sps:$4 sm:$0xff]   ;;  %v19892_v26 = vld [vmem:[%s21667_s14 + $0x284] ss:$16 sps:$4 sm:$0xff]  }
0x1970   : > { %14510 = vmatprep.subr.bf16.mxu1 %v19847_v45  ;;  %v19895_v45 = vld [vmem:[%s21667_s14 + $0x28c] ss:$16 sps:$4 sm:$0xff]  }
0x1972   : > { %14087 = vmatpush1.bf16.msra.mxu0 %v19842_v56  ;;  %v19890_v56 = vld [vmem:[%s21667_s14 + $0x280] ss:$16 sps:$4 sm:$0xff]  }
0x1973   : > { %14511 = vmatpush1.bf16.msra.mxu1 %v19845_v33  ;;  %14088 = vmatprep.subr.bf16.mxu0 %v19850_v63  ;;  %v19893_v63 = vld [vmem:[%s21667_s14 + $0x288] ss:$16 sps:$4 sm:$0xff]  }
0x1974   : > { %14512 = vmatprep.subr.bf16.mxu1 %v19853_v8 }
0x1976   : > { %14089 = vmatpush1.bf16.msra.mxu0 %v19848_v34  ;;  %v19898_v34 = vld [vmem:[%s21667_s14 + $0x2a4] ss:$16 sps:$4 sm:$0xff]  }
0x1977   : > { %14513 = vmatpush1.bf16.msra.mxu1 %v19851_v50  ;;  %14090 = vmatprep.subr.bf16.mxu0 %v19856_v27  ;;  %v19901_v27 = vld [vmem:[%s21667_s14 + $0x2ac] ss:$16 sps:$4 sm:$0xff]  }
0x1978   : > { %14514 = vmatprep.subr.bf16.mxu1 %v19859_v60 }
0x197a   : > { %14091 = vmatpush1.bf16.msra.mxu0 %v19854_v46 }
0x197b   : > { %14515 = vmatpush1.bf16.msra.mxu1 %v19857_v42  ;;  %14092 = vmatprep.subr.bf16.mxu0 %v19862_v51 }
0x197c   : > { %14516 = vmatprep.subr.bf16.mxu1 %v19865_v25 }
0x197e   : > { %14093 = vmatpush1.bf16.msra.mxu0 %v19860_v15 }
0x197f   : > { %14517 = vmatpush1.bf16.msra.mxu1 %v19863_v59  ;;  %14115 = vmatprep.subr.bf16.mxu0 %v19868_v14  ;;  %v19896_v59 = vld [vmem:[%s21667_s14 + $0x2a0] ss:$16 sps:$4 sm:$0xff]  }
0x1980   : > { %14539 = vmatprep.subr.bf16.mxu1 %v19871_v20 }
0x1981   : > { %14095 = vmatmul.mubr.bf16.vlgmr.msra.gmra.mrb[128].mxu0 %v23651_v6 }
0x1982   : > { %14519 = vmatmul.mubr.bf16.vlgmr.msra.gmra.mrb[128].mxu1 %v23651_v6  ;;  %14104 = vmatprep.mubr.bf16.mxu0 %v23685_v28  ;;  %v16551_v6 = vld [vmem:[%s21673_s8 + $0x46] ss:$8 sm:$0xf0] }
0x1983   : > { %14116 = vmatpush1.bf16.msra.mxu0 %v19866_v19  ;;  %14528 = vmatprep.mubr.bf16.mxu1 %v23685_v28  ;;  %v19886_v28 = vld [vmem:[%s21667_s14 + $0x264] ss:$16 sps:$4 sm:$0xff]   ;;  %v24008_v32 = vor.u32 %v16551_v6, %v16550_v10  ;;  %v19899_v19 = vld [vmem:[%s21667_s14 + $0x2a8] ss:$16 sps:$4 sm:$0xff]  }
0x1984   : > { %14540 = vmatpush1.bf16.msra.mxu1 %v19869_v57  ;;  %14117 = vmatprep.subr.bf16.mxu0 %v19874_v7 }
0x1985   : > { %14541 = vmatprep.subr.bf16.mxu1 %v19877_v39  ;;  %v24022_v33 = vrot.slane %v24008_v32, %v22887_v5  ;;  %v24031_v8 = vrot.slane %v24008_v32, %v22892_v23 }
0x1987   : > { %14118 = vmatpush1.bf16.msra.mxu0 %v19872_v30  ;;  %v19904_v30 = vld [vmem:[%s21667_s14 + $0x2c4] ss:$16 sps:$4 sm:$0xff]  }
0x1988   : > { %14542 = vmatpush1.bf16.msra.mxu1 %v19875_v49  ;;  %14119 = vmatprep.subr.bf16.mxu0 %v19880_v21 }
0x1989   : > { %14105 = vmatmul.mubr.bf16.gmra.mrb[132].mxu0 %v23679_v4  ;;  %14543 = vmatprep.subr.bf16.mxu1 %v19883_v36 }
0x198a   : > { %14529 = vmatmul.mubr.bf16.gmra.mrb[132].mxu1 %v23679_v4  ;;  %14147 = vmatprep.mubr.bf16.mxu0 %v23659_v61  ;;  %v24017_v4 = vrot.slane %v24008_v32, %v22880_v53 }
0x198b   : > { %14120 = vmatpush1.bf16.msra.mxu0 %v19878_v55  ;;  %14571 = vmatprep.mubr.bf16.mxu1 %v23659_v61  ;;  %v24026_v61 = vrot.slane %v24008_v32, %v22884_v52  ;;  %v19907_v55 = vld [vmem:[%s21667_s14 + $0x2cc] ss:$16 sps:$4 sm:$0xff]  }
0x198c   : > { %14544 = vmatpush1.bf16.msra.mxu1 %v19881_v62  ;;  %14121 = vmatprep.subr.bf16.mxu0 %v19886_v28 }
0x198d   : > { %14545 = vmatprep.subr.bf16.mxu1 %v19889_v1 }
0x198f   : > { %14122 = vmatpush1.bf16.msra.mxu0 %v19884_v24 }
0x1990   : > { %14546 = vmatpush1.bf16.msra.mxu1 %v19887_v47  ;;  %14123 = vmatprep.subr.bf16.mxu0 %v19892_v26  ;;  %v19902_v26 = vld [vmem:[%s21667_s14 + $0x2c0] ss:$16 sps:$4 sm:$0xff]  }
0x1991   : > { %14547 = vmatprep.subr.bf16.mxu1 %v19895_v45  ;;  %v10536_v50 = vpop.f32.mrb[112].mxu0 }
0x1992   : > { %v18561_v60 = vadd.f32 %v10536_v50, %v24017_v4  ;;  %v10642_v46 = vpop.f32.mrb[112].mxu1  ;;  %v10538_v42 = vpop.f32.mrb[113].mxu0  ;;  %v19910_v50 = vld [vmem:[%s21667_s14 + $0x2e4] ss:$16 sps:$4 sm:$0xff]  }
0x1993   : > { %14124 = vmatpush1.bf16.msra.mxu0 %v19890_v56  ;;  %v18569_v51 = vadd.f32 %v10642_v46, %v24022_v33  ;;  %v18562_v25 = vadd.f32 %v10538_v42, %v24026_v61  ;;  %v10644_v15 = vpop.f32.mrb[113].mxu1  ;;  %v10540_v14 = vpop.f32.mrb[114].mxu0  ;;  %v19913_v42 = vld [vmem:[%s21667_s14 + $0x2ec] ss:$16 sps:$4 sm:$0xff]  }
0x1994   : > { %14548 = vmatpush1.bf16.msra.mxu1 %v19893_v63  ;;  %v18570_v20 = vadd.f32 %v10644_v15, %v24031_v8  ;;  %14125 = vmatprep.subr.bf16.mxu0 %v19898_v34  ;;  %v18563_v57 = vadd.f32 %v10540_v14, %v24017_v4  ;;  %v10646_v7 = vpop.f32.mrb[114].mxu1  ;;  %v10542_v39 = vpop.f32.mrb[115].mxu0  ;;  %v10881_v10 = vmax.f32 %v18561_v60, 0.0  ;;  %v19905_v34 = vld [vmem:[%s21667_s14 + $0x2c8] ss:$16 sps:$4 sm:$0xff]  }
0x1995   : > { %14549 = vmatprep.subr.bf16.mxu1 %v19901_v27  ;;  %v18571_v49 = vadd.f32 %v10646_v7, %v24022_v33  ;;  %v18564_v21 = vadd.f32 %v10542_v39, %v24026_v61  ;;  %v10648_v36 = vpop.f32.mrb[115].mxu1  ;;  %v10883_v28 = vmax.f32 %v18569_v51, 0.0  ;;  %v10882_v1 = vmax.f32 %v18562_v25, 0.0 }
0x1996   : > { %v10897_v6 = vmax.f32 %v18563_v57, 0.0  ;;  %v18572_v62 = vadd.f32 %v10648_v36, %v24031_v8  ;;  %v10884_v45 = vmax.f32 %v18570_v20, 0.0  ;;  %v19908_v57 = vld [vmem:[%s21667_s14 + $0x2e0] ss:$16 sps:$4 sm:$0xff]  }
0x1997   : > { %v10899_v24 = vmax.f32 %v18571_v49, 0.0  ;;  %14126 = vmatpush1.bf16.msra.mxu0 %v19896_v59  ;;  %v10898_v47 = vmax.f32 %v18564_v21, 0.0 }
0x1998   : > { %v24048_v56 = vpack.c.bf16 %v10897_v6, %v10881_v10  ;;  %14550 = vmatpush1.bf16.msra.mxu1 %v19899_v19  ;;  %v10900_v63 = vmax.f32 %v18572_v62, 0.0  ;;  %14127 = vmatprep.subr.bf16.mxu0 %v19904_v30  ;;  %v19911_v30 = vld [vmem:[%s21667_s14 + $0x2e8] ss:$16 sps:$4 sm:$0xff]  }
0x1999   : > { %v24052_v27 = vpack.c.bf16 %v10899_v24, %v10883_v28  ;;  %v24054_v60 = vpack.c.bf16 %v10898_v47, %v10882_v1  ;;  %14551 = vmatprep.subr.bf16.mxu1 %v19907_v55  ;;  %v10546_v46 = vpop.f32.mrb[116].mxu0  ;;  %v19916_v55 = vld [vmem:[%s21667_s14 + $0x304] ss:$16 sps:$4 sm:$0xff]   ;;  %v19919_v28 = vld [vmem:[%s21667_s14 + $0x30c] ss:$16 sps:$4 sm:$0xff]  }
0x199a   : > { %v24057_v51 = vpack.c.bf16 %v10900_v63, %v10884_v45  ;;  %v18565_v25 = vadd.f32 %v10546_v46, %v24017_v4  ;;  %v10652_v15 = vpop.f32.mrb[116].mxu1  ;;  %v10548_v59 = vpop.f32.mrb[117].mxu0  ;;  %v19917_v46 = vld [vmem:[%s21667_s14 + $0x308] ss:$16 sps:$4 sm:$0xff]  }
0x199b   : > { %14128 = vmatpush1.bf16.msra.mxu0 %v19902_v26  ;;  %v18573_v14 = vadd.f32 %v10652_v15, %v24022_v33  ;;  %v18566_v20 = vadd.f32 %v10548_v59, %v24026_v61  ;;  %v10654_v19 = vpop.f32.mrb[117].mxu1  ;;  %v10550_v7 = vpop.f32.mrb[118].mxu0  ;;  %v19925_v15 = vld [vmem:[%s21667_s14 + $0x32c] ss:$16 sps:$4 sm:$0xff]  }
0x199c   : > { %14552 = vmatpush1.bf16.msra.mxu1 %v19905_v34  ;;  %v18574_v39 = vadd.f32 %v10654_v19, %v24031_v8  ;;  %14129 = vmatprep.subr.bf16.mxu0 %v19910_v50  ;;  %v18567_v49 = vadd.f32 %v10550_v7, %v24017_v4  ;;  %v10656_v21 = vpop.f32.mrb[118].mxu1  ;;  %v10552_v36 = vpop.f32.mrb[119].mxu0  ;;  %v10913_v1 = vmax.f32 %v18565_v25, 0.0  ;;  %v19914_v34 = vld [vmem:[%s21667_s14 + $0x300] ss:$16 sps:$4 sm:$0xff]  }
0x199d   : > { %14553 = vmatprep.subr.bf16.mxu1 %v19913_v42  ;;  %v18575_v10 = vadd.f32 %v10656_v21, %v24022_v33  ;;  %v18568_v6 = vadd.f32 %v10552_v36, %v24026_v61  ;;  %v10658_v62 = vpop.f32.mrb[119].mxu1  ;;  %v10915_v26 = vmax.f32 %v18573_v14, 0.0  ;;  %v10914_v4 = vmax.f32 %v18566_v20, 0.0  ;;  %v19920_v14 = vld [vmem:[%s21667_s14 + $0x320] ss:$16 sps:$4 sm:$0xff]  }
0x199e   : > { %v10929_v24 = vmax.f32 %v18567_v49, 0.0  ;;  %v18576_v47 = vadd.f32 %v10658_v62, %v24031_v8  ;;  %v10916_v50 = vmax.f32 %v18574_v39, 0.0  ;;  %v19922_v8 = vld [vmem:[%s21667_s14 + $0x324] ss:$16 sps:$4 sm:$0xff]   ;;  %v19923_v20 = vld [vmem:[%s21667_s14 + $0x328] ss:$16 sps:$4 sm:$0xff]  }
0x199f   : > { %v10931_v45 = vmax.f32 %v18575_v10, 0.0  ;;  %14130 = vmatpush1.bf16.msra.mxu0 %v19908_v57  ;;  %v10930_v63 = vmax.f32 %v18568_v6, 0.0  ;;  %v19928_v19 = vld [vmem:[%s21667_s14 + $0x344] ss:$16 sps:$4 sm:$0xff]   ;;  %v19931_v57 = vld [vmem:[%s21667_s14 + $0x34c] ss:$16 sps:$4 sm:$0xff]  }
0x19a0   : > { %v24072_v33 = vpack.c.bf16 %v10929_v24, %v10913_v1  ;;  %14554 = vmatpush1.bf16.msra.mxu1 %v19911_v30  ;;  %v10932_v61 = vmax.f32 %v18576_v47, 0.0  ;;  %14131 = vmatprep.subr.bf16.mxu0 %v19916_v55  ;;  %v19926_v7 = vld [vmem:[%s21667_s14 + $0x340] ss:$16 sps:$4 sm:$0xff]   ;;  %v19929_v39 = vld [vmem:[%s21667_s14 + $0x348] ss:$16 sps:$4 sm:$0xff]  }
0x19a1   : > { %v24076_v42 = vpack.c.bf16 %v10931_v45, %v10915_v26  ;;  %v24078_v25 = vpack.c.bf16 %v10930_v63, %v10914_v4  ;;  %14555 = vmatprep.subr.bf16.mxu1 %v19919_v28  ;;  %v19934_v30 = vld [vmem:[%s21667_s14 + $0x364] ss:$16 sps:$4 sm:$0xff]   ;;  %v19937_v49 = vld [vmem:[%s21667_s14 + $0x36c] ss:$16 sps:$4 sm:$0xff]   ;;  %v19932_v21 = vld [vmem:[%s21667_s14 + $0x360] ss:$16 sps:$4 sm:$0xff]  }
0x19a2   : > { %v24081_v59 = vpack.c.bf16 %v10932_v61, %v10916_v50  ;;  %v19935_v36 = vld [vmem:[%s21667_s14 + $0x368] ss:$16 sps:$4 sm:$0xff]   ;;  %v19940_v55 = vld [vmem:[%s21667_s14 + $0x384] ss:$16 sps:$4 sm:$0xff]   ;;  %v19943_v10 = vld [vmem:[%s21667_s14 + $0x38c] ss:$16 sps:$4 sm:$0xff]  }
0x19a3   : > { %14132 = vmatpush1.bf16.msra.mxu0 %v19914_v34  ;;  %v19938_v6 = vld [vmem:[%s21667_s14 + $0x380] ss:$16 sps:$4 sm:$0xff]   ;;  %v19941_v62 = vld [vmem:[%s21667_s14 + $0x388] ss:$16 sps:$4 sm:$0xff]   ;;  %v19946_v28 = vld [vmem:[%s21667_s14 + $0x3a4] ss:$16 sps:$4 sm:$0xff]  }
0x19a4   : > { %14556 = vmatpush1.bf16.msra.mxu1 %v19917_v46  ;;  %14133 = vmatprep.subr.bf16.mxu0 %v19922_v8  ;;  %v19949_v1 = vld [vmem:[%s21667_s14 + $0x3ac] ss:$16 sps:$4 sm:$0xff]   ;;  %v19944_v24 = vld [vmem:[%s21667_s14 + $0x3a0] ss:$16 sps:$4 sm:$0xff]   ;;  %v19947_v47 = vld [vmem:[%s21667_s14 + $0x3a8] ss:$16 sps:$4 sm:$0xff]  }
0x19a5   : > { %14557 = vmatprep.subr.bf16.mxu1 %v19925_v15  ;;  %v19952_v26 = vld [vmem:[%s21667_s14 + $0x3c4] ss:$16 sps:$4 sm:$0xff]   ;;  %v19955_v4 = vld [vmem:[%s21667_s14 + $0x3cc] ss:$16 sps:$4 sm:$0xff]   ;;  %v19950_v45 = vld [vmem:[%s21667_s14 + $0x3c0] ss:$16 sps:$4 sm:$0xff]  }
0x19a6   : > { %v19953_v63 = vld [vmem:[%s21667_s14 + $0x3c8] ss:$16 sps:$4 sm:$0xff]   ;;  %v19958_v34 = vld [vmem:[%s21667_s14 + $0x3e4] ss:$16 sps:$4 sm:$0xff]   ;;  %v19961_v50 = vld [vmem:[%s21667_s14 + $0x3ec] ss:$16 sps:$4 sm:$0xff]  }
0x19a7   : > { %14134 = vmatpush1.bf16.msra.mxu0 %v19920_v14  ;;  %v19956_v61 = vld [vmem:[%s21667_s14 + $0x3e0] ss:$16 sps:$4 sm:$0xff]   ;;  %v19959_v46 = vld [vmem:[%s21667_s14 + $0x3e8] ss:$16 sps:$4 sm:$0xff]   ;;  %v19964_v8 = vld [vmem:[%s21667_s14 + $0x404] ss:$16 sps:$4 sm:$0xff]  }
0x19a8   : > { %14558 = vmatpush1.bf16.msra.mxu1 %v19923_v20  ;;  %14135 = vmatprep.subr.bf16.mxu0 %v19928_v19  ;;  %v19967_v15 = vld [vmem:[%s21667_s14 + $0x40c] ss:$16 sps:$4 sm:$0xff]   ;;  %v19962_v14 = vld [vmem:[%s21667_s14 + $0x400] ss:$16 sps:$4 sm:$0xff]   ;;  %v19965_v20 = vld [vmem:[%s21667_s14 + $0x408] ss:$16 sps:$4 sm:$0xff]  }
0x19a9   : > { %14559 = vmatprep.subr.bf16.mxu1 %v19931_v57  ;;  %v19970_v19 = vld [vmem:[%s21667_s14 + $0x424] ss:$16 sps:$4 sm:$0xff]   ;;  %v19973_v57 = vld [vmem:[%s21667_s14 + $0x42c] ss:$16 sps:$4 sm:$0xff]  }
0x19ab   : > { %14136 = vmatpush1.bf16.msra.mxu0 %v19926_v7  ;;  %v19968_v7 = vld [vmem:[%s21667_s14 + $0x420] ss:$16 sps:$4 sm:$0xff]  }
0x19ac   : > { %14560 = vmatpush1.bf16.msra.mxu1 %v19929_v39  ;;  %14137 = vmatprep.subr.bf16.mxu0 %v19934_v30  ;;  %v19971_v39 = vld [vmem:[%s21667_s14 + $0x428] ss:$16 sps:$4 sm:$0xff]   ;;  %v19976_v30 = vld [vmem:[%s21667_s14 + $0x444] ss:$16 sps:$4 sm:$0xff]  }
0x19ad   : > { %14561 = vmatprep.subr.bf16.mxu1 %v19937_v49  ;;  %v19979_v49 = vld [vmem:[%s21667_s14 + $0x44c] ss:$16 sps:$4 sm:$0xff]  }
0x19af   : > { %14138 = vmatpush1.bf16.msra.mxu0 %v19932_v21  ;;  %v19974_v21 = vld [vmem:[%s21667_s14 + $0x440] ss:$16 sps:$4 sm:$0xff]  }
0x19b0   : > { %14562 = vmatpush1.bf16.msra.mxu1 %v19935_v36  ;;  %14139 = vmatprep.subr.bf16.mxu0 %v19940_v55  ;;  %v19982_v36 = vld [vmem:[%s21667_s14 + $0x464] ss:$16 sps:$4 sm:$0xff]   ;;  %v19980_v55 = vld [vmem:[%s21667_s14 + $0x460] ss:$16 sps:$4 sm:$0xff]  }
0x19b1   : > { %14563 = vmatprep.subr.bf16.mxu1 %v19943_v10  ;;  %v19983_v10 = vld [vmem:[%s21667_s14 + $0x468] ss:$16 sps:$4 sm:$0xff]  }
0x19b3   : > { %14140 = vmatpush1.bf16.msra.mxu0 %v19938_v6  ;;  %v19988_v6 = vld [vmem:[%s21667_s14 + $0x484] ss:$16 sps:$4 sm:$0xff]  }
0x19b4   : > { %14564 = vmatpush1.bf16.msra.mxu1 %v19941_v62  ;;  %14141 = vmatprep.subr.bf16.mxu0 %v19946_v28  ;;  %v19991_v62 = vld [vmem:[%s21667_s14 + $0x48c] ss:$16 sps:$4 sm:$0xff]   ;;  %v19989_v28 = vld [vmem:[%s21667_s14 + $0x488] ss:$16 sps:$4 sm:$0xff]  }
0x19b5   : > { %14565 = vmatprep.subr.bf16.mxu1 %v19949_v1  ;;  %v19994_v1 = vld [vmem:[%s21667_s14 + $0x4a4] ss:$16 sps:$4 sm:$0xff]  }
0x19b7   : > { %14142 = vmatpush1.bf16.msra.mxu0 %v19944_v24  ;;  %v19992_v24 = vld [vmem:[%s21667_s14 + $0x4a0] ss:$16 sps:$4 sm:$0xff]  }
0x19b8   : > { %14566 = vmatpush1.bf16.msra.mxu1 %v19947_v47  ;;  %14143 = vmatprep.subr.bf16.mxu0 %v19952_v26  ;;  %v19995_v47 = vld [vmem:[%s21667_s14 + $0x4a8] ss:$16 sps:$4 sm:$0xff]   ;;  %v20000_v26 = vld [vmem:[%s21667_s14 + $0x4c4] ss:$16 sps:$4 sm:$0xff]  }
0x19b9   : > { %14567 = vmatprep.subr.bf16.mxu1 %v19955_v4  ;;  %v20003_v4 = vld [vmem:[%s21667_s14 + $0x4cc] ss:$16 sps:$4 sm:$0xff]  }
0x19bb   : > { %14144 = vmatpush1.bf16.msra.mxu0 %v19950_v45  ;;  %v19998_v45 = vld [vmem:[%s21667_s14 + $0x4c0] ss:$16 sps:$4 sm:$0xff]  }
0x19bc   : > { %14568 = vmatpush1.bf16.msra.mxu1 %v19953_v63  ;;  %14145 = vmatprep.subr.bf16.mxu0 %v19958_v34  ;;  %v20001_v63 = vld [vmem:[%s21667_s14 + $0x4c8] ss:$16 sps:$4 sm:$0xff]   ;;  %v20006_v34 = vld [vmem:[%s21667_s14 + $0x4e4] ss:$16 sps:$4 sm:$0xff]  }
0x19bd   : > { %14569 = vmatprep.subr.bf16.mxu1 %v19961_v50  ;;  %v20009_v50 = vld [vmem:[%s21667_s14 + $0x4ec] ss:$16 sps:$4 sm:$0xff]  }
0x19bf   : > { %14146 = vmatpush1.bf16.msra.mxu0 %v19956_v61  ;;  %v20004_v61 = vld [vmem:[%s21667_s14 + $0x4e0] ss:$16 sps:$4 sm:$0xff]  }
0x19c0   : > { %14570 = vmatpush1.bf16.msra.mxu1 %v19959_v46  ;;  %14168 = vmatprep.subr.bf16.mxu0 %v19964_v8  ;;  %v20007_v46 = vld [vmem:[%s21667_s14 + $0x4e8] ss:$16 sps:$4 sm:$0xff]   ;;  %v20012_v8 = vld [vmem:[%s21667_s14 + $0x504] ss:$16 sps:$4 sm:$0xff]  }
0x19c1   : > { %14592 = vmatprep.subr.bf16.mxu1 %v19967_v15  ;;  %v20015_v15 = vld [vmem:[%s21667_s14 + $0x50c] ss:$16 sps:$4 sm:$0xff]  }
0x19c2   : > { %14148 = vmatmul.mubr.bf16.vlgmr.msra.gmra.mrb[128].mxu0 %v23653_v12 }
0x19c3   : > { %14572 = vmatmul.mubr.bf16.vlgmr.msra.gmra.mrb[128].mxu1 %v23653_v12  ;;  %14157 = vmatprep.mubr.bf16.mxu0 %v23687_v58  ;;  %v19977_v12 = vld [vmem:[%s21667_s14 + $0x448] ss:$16 sps:$4 sm:$0xff]  }
0x19c4   : > { %14169 = vmatpush1.bf16.msra.mxu0 %v19962_v14  ;;  %14581 = vmatprep.mubr.bf16.mxu1 %v23687_v58  ;;  %v19985_v58 = vld [vmem:[%s21667_s14 + $0x46c] ss:$16 sps:$4 sm:$0xff]   ;;  %v20010_v14 = vld [vmem:[%s21667_s14 + $0x500] ss:$16 sps:$4 sm:$0xff]  }
0x19c5   : > { %14593 = vmatpush1.bf16.msra.mxu1 %v19965_v20  ;;  %14170 = vmatprep.subr.bf16.mxu0 %v19970_v19  ;;  %v20013_v20 = vld [vmem:[%s21667_s14 + $0x508] ss:$16 sps:$4 sm:$0xff]   ;;  %v20018_v19 = vld [vmem:[%s21667_s14 + $0x524] ss:$16 sps:$4 sm:$0xff]  }
0x19c6   : > { %14594 = vmatprep.subr.bf16.mxu1 %v19973_v57  ;;  %v20021_v57 = vld [vmem:[%s21667_s14 + $0x52c] ss:$16 sps:$4 sm:$0xff]  }
0x19c8   : > { %14171 = vmatpush1.bf16.msra.mxu0 %v19968_v7  ;;  %v20016_v7 = vld [vmem:[%s21667_s14 + $0x520] ss:$16 sps:$4 sm:$0xff]  }
0x19c9   : > { %14595 = vmatpush1.bf16.msra.mxu1 %v19971_v39  ;;  %14172 = vmatprep.subr.bf16.mxu0 %v19976_v30  ;;  %v20019_v39 = vld [vmem:[%s21667_s14 + $0x528] ss:$16 sps:$4 sm:$0xff]   ;;  %v20024_v30 = vld [vmem:[%s21667_s14 + $0x544] ss:$16 sps:$4 sm:$0xff]  }
0x19ca   : > { %14158 = vmatmul.mubr.bf16.gmra.mrb[132].mxu0 %v23681_v31  ;;  %14596 = vmatprep.subr.bf16.mxu1 %v19979_v49  ;;  %v20027_v49 = vld [vmem:[%s21667_s14 + $0x54c] ss:$16 sps:$4 sm:$0xff]  }
0x19cb   : > { %14582 = vmatmul.mubr.bf16.gmra.mrb[132].mxu1 %v23681_v31  ;;  %14200 = vmatprep.mubr.bf16.mxu0 %v23860_v13  ;;  %v19986_v31 = vld [vmem:[%s21667_s14 + $0x480] ss:$16 sps:$4 sm:$0xff]  }
0x19cc   : > { %14173 = vmatpush1.bf16.msra.mxu0 %v19974_v21  ;;  %14624 = vmatprep.mubr.bf16.mxu1 %v23860_v13  ;;  %v19997_v13 = vld [vmem:[%s21667_s14 + $0x4ac] ss:$16 sps:$4 sm:$0xff]   ;;  %v20022_v21 = vld [vmem:[%s21667_s14 + $0x540] ss:$16 sps:$4 sm:$0xff]  }
0x19cd   : > { %14597 = vmatpush1.bf16.msra.mxu1 %v19977_v12  ;;  %14174 = vmatprep.subr.bf16.mxu0 %v19982_v36  ;;  %v20025_v12 = vld [vmem:[%s21667_s14 + $0x548] ss:$16 sps:$4 sm:$0xff]   ;;  %v20030_v36 = vld [vmem:[%s21667_s14 + $0x564] ss:$16 sps:$4 sm:$0xff]  }
0x19ce   : > { %14598 = vmatprep.subr.bf16.mxu1 %v19985_v58  ;;  %v20033_v58 = vld [vmem:[%s21667_s14 + $0x56c] ss:$16 sps:$4 sm:$0xff]  }
0x19d0   : > { %14175 = vmatpush1.bf16.msra.mxu0 %v19980_v55  ;;  %v20028_v55 = vld [vmem:[%s21667_s14 + $0x560] ss:$16 sps:$4 sm:$0xff]  }
0x19d1   : > { %14599 = vmatpush1.bf16.msra.mxu1 %v19983_v10  ;;  %14176 = vmatprep.subr.bf16.mxu0 %v19988_v6  ;;  %v20031_v10 = vld [vmem:[%s21667_s14 + $0x568] ss:$16 sps:$4 sm:$0xff]   ;;  %v20036_v6 = vld [vmem:[%s21667_s14 + $0x584] ss:$16 sps:$4 sm:$0xff]  }
0x19d2   : > { %14600 = vmatprep.subr.bf16.mxu1 %v19991_v62  ;;  %v20039_v62 = vld [vmem:[%s21667_s14 + $0x58c] ss:$16 sps:$4 sm:$0xff]  }
0x19d4   : > { %14177 = vmatpush1.bf16.msra.mxu0 %v19986_v31  ;;  %v20034_v31 = vld [vmem:[%s21667_s14 + $0x580] ss:$16 sps:$4 sm:$0xff]  }
0x19d5   : > { %14601 = vmatpush1.bf16.msra.mxu1 %v19989_v28  ;;  %14178 = vmatprep.subr.bf16.mxu0 %v19994_v1  ;;  %v20037_v28 = vld [vmem:[%s21667_s14 + $0x588] ss:$16 sps:$4 sm:$0xff]   ;;  %v20042_v1 = vld [vmem:[%s21667_s14 + $0x5a4] ss:$16 sps:$4 sm:$0xff]  }
0x19d6   : > { %14602 = vmatprep.subr.bf16.mxu1 %v19997_v13  ;;  %v20045_v13 = vld [vmem:[%s21667_s14 + $0x5ac] ss:$16 sps:$4 sm:$0xff]  }
0x19d8   : > { %14179 = vmatpush1.bf16.msra.mxu0 %v19992_v24  ;;  %v20040_v24 = vld [vmem:[%s21667_s14 + $0x5a0] ss:$16 sps:$4 sm:$0xff]  }
0x19d9   : > { %14603 = vmatpush1.bf16.msra.mxu1 %v19995_v47  ;;  %14180 = vmatprep.subr.bf16.mxu0 %v20000_v26  ;;  %v20043_v47 = vld [vmem:[%s21667_s14 + $0x5a8] ss:$16 sps:$4 sm:$0xff]   ;;  %v20048_v26 = vld [vmem:[%s21667_s14 + $0x5c4] ss:$16 sps:$4 sm:$0xff]  }
0x19da   : > { %14604 = vmatprep.subr.bf16.mxu1 %v20003_v4  ;;  %v20051_v4 = vld [vmem:[%s21667_s14 + $0x5cc] ss:$16 sps:$4 sm:$0xff]  }
0x19dc   : > { %14181 = vmatpush1.bf16.msra.mxu0 %v19998_v45  ;;  %v20046_v45 = vld [vmem:[%s21667_s14 + $0x5c0] ss:$16 sps:$4 sm:$0xff]  }
0x19dd   : > { %14605 = vmatpush1.bf16.msra.mxu1 %v20001_v63  ;;  %14182 = vmatprep.subr.bf16.mxu0 %v20006_v34  ;;  %v20049_v63 = vld [vmem:[%s21667_s14 + $0x5c8] ss:$16 sps:$4 sm:$0xff]   ;;  %v20054_v34 = vld [vmem:[%s21667_s14 + $0x5e4] ss:$16 sps:$4 sm:$0xff]  }
0x19de   : > { %14606 = vmatprep.subr.bf16.mxu1 %v20009_v50  ;;  %v20057_v50 = vld [vmem:[%s21667_s14 + $0x5ec] ss:$16 sps:$4 sm:$0xff]  }
0x19e0   : > { %14183 = vmatpush1.bf16.msra.mxu0 %v20004_v61  ;;  %v20052_v61 = vld [vmem:[%s21667_s14 + $0x5e0] ss:$16 sps:$4 sm:$0xff]  }
0x19e1   : > { %14607 = vmatpush1.bf16.msra.mxu1 %v20007_v46  ;;  %14184 = vmatprep.subr.bf16.mxu0 %v20012_v8  ;;  %v20055_v46 = vld [vmem:[%s21667_s14 + $0x5e8] ss:$16 sps:$4 sm:$0xff]   ;;  %v20060_v8 = vld [vmem:[%s21667_s14 + $0x604] ss:$16 sps:$4 sm:$0xff]  }
0x19e2   : > { %14608 = vmatprep.subr.bf16.mxu1 %v20015_v15  ;;  %v20063_v15 = vld [vmem:[%s21667_s14 + $0x60c] ss:$16 sps:$4 sm:$0xff]  }
0x19e4   : > { %14185 = vmatpush1.bf16.msra.mxu0 %v20010_v14  ;;  %v20058_v14 = vld [vmem:[%s21667_s14 + $0x600] ss:$16 sps:$4 sm:$0xff]  }
0x19e5   : > { %14609 = vmatpush1.bf16.msra.mxu1 %v20013_v20  ;;  %14186 = vmatprep.subr.bf16.mxu0 %v20018_v19  ;;  %v20061_v20 = vld [vmem:[%s21667_s14 + $0x608] ss:$16 sps:$4 sm:$0xff]   ;;  %v20066_v19 = vld [vmem:[%s21667_s14 + $0x624] ss:$16 sps:$4 sm:$0xff]  }
0x19e6   : > { %14610 = vmatprep.subr.bf16.mxu1 %v20021_v57  ;;  %v20069_v57 = vld [vmem:[%s21667_s14 + $0x62c] ss:$16 sps:$4 sm:$0xff]  }
0x19e8   : > { %14187 = vmatpush1.bf16.msra.mxu0 %v20016_v7  ;;  %v20064_v7 = vld [vmem:[%s21667_s14 + $0x620] ss:$16 sps:$4 sm:$0xff]  }
0x19e9   : > { %14611 = vmatpush1.bf16.msra.mxu1 %v20019_v39  ;;  %14188 = vmatprep.subr.bf16.mxu0 %v20024_v30  ;;  %v20067_v39 = vld [vmem:[%s21667_s14 + $0x628] ss:$16 sps:$4 sm:$0xff]   ;;  %v20072_v30 = vld [vmem:[%s21667_s14 + $0x644] ss:$16 sps:$4 sm:$0xff]  }
0x19ea   : > { %14612 = vmatprep.subr.bf16.mxu1 %v20027_v49  ;;  %v20075_v49 = vld [vmem:[%s21667_s14 + $0x64c] ss:$16 sps:$4 sm:$0xff]  }
0x19ec   : > { %14189 = vmatpush1.bf16.msra.mxu0 %v20022_v21  ;;  %v20070_v21 = vld [vmem:[%s21667_s14 + $0x640] ss:$16 sps:$4 sm:$0xff]  }
0x19ed   : > { %14613 = vmatpush1.bf16.msra.mxu1 %v20025_v12  ;;  %14190 = vmatprep.subr.bf16.mxu0 %v20030_v36  ;;  %v20078_v12 = vld [vmem:[%s21667_s14 + $0x664] ss:$16 sps:$4 sm:$0xff]   ;;  %v20076_v36 = vld [vmem:[%s21667_s14 + $0x660] ss:$16 sps:$4 sm:$0xff]  }
0x19ee   : > { %14614 = vmatprep.subr.bf16.mxu1 %v20033_v58  ;;  %v20079_v58 = vld [vmem:[%s21667_s14 + $0x668] ss:$16 sps:$4 sm:$0xff]  }
0x19f0   : > { %14191 = vmatpush1.bf16.msra.mxu0 %v20028_v55  ;;  %v20084_v55 = vld [vmem:[%s21667_s14 + $0x684] ss:$16 sps:$4 sm:$0xff]  }
0x19f1   : > { %14615 = vmatpush1.bf16.msra.mxu1 %v20031_v10  ;;  %14192 = vmatprep.subr.bf16.mxu0 %v20036_v6  ;;  %v20087_v10 = vld [vmem:[%s21667_s14 + $0x68c] ss:$16 sps:$4 sm:$0xff]   ;;  %v25095_v6 = vsub.s32 4, %v22253_v38 }
0x19f2   : > { %14616 = vmatprep.subr.bf16.mxu1 %v20039_v62 }
0x19f3   : > { %v24210_v62 = vrot.slane %v24008_v32, %v25095_v6  ;;  %v20094_v6 = vld [vmem:[%s21667_s14 + $0x6c0] ss:$16 sps:$4 sm:$0xff]  }
0x19f4   : > { %14193 = vmatpush1.bf16.msra.mxu0 %v20034_v31  ;;  %v25096_v31 = vsub.s32 6, %v22253_v38 }
0x19f5   : > { %14617 = vmatpush1.bf16.msra.mxu1 %v20037_v28  ;;  %14194 = vmatprep.subr.bf16.mxu0 %v20042_v1  ;;  %v25097_v28 = vsub.s32 5, %v22253_v38 }
0x19f6   : > { %14618 = vmatprep.subr.bf16.mxu1 %v20045_v13  ;;  %v20085_v13 = vld [vmem:[%s21667_s14 + $0x688] ss:$16 sps:$4 sm:$0xff]  }
0x19f7   : > { %v24221_v1 = vrot.slane %v24008_v32, %v25097_v28 }
0x19f8   : > { %14195 = vmatpush1.bf16.msra.mxu0 %v20040_v24  ;;  %v25098_v24 = vsub.s32 7, %v22253_v38 }
0x19f9   : > { %14619 = vmatpush1.bf16.msra.mxu1 %v20043_v47  ;;  %14196 = vmatprep.subr.bf16.mxu0 %v20048_v26  ;;  %v20090_v26 = vld [vmem:[%s21667_s14 + $0x6a4] ss:$16 sps:$4 sm:$0xff]  }
0x19fa   : > { %14620 = vmatprep.subr.bf16.mxu1 %v20051_v4  ;;  %v24227_v47 = vrot.slane %v24008_v32, %v25098_v24  ;;  %v20102_v24 = vld [vmem:[%s21667_s14 + $0x6e4] ss:$16 sps:$4 sm:$0xff]  }
0x19fc   : > { %14197 = vmatpush1.bf16.msra.mxu0 %v20046_v45  ;;  %v20093_v45 = vld [vmem:[%s21667_s14 + $0x6ac] ss:$16 sps:$4 sm:$0xff]  }
0x19fd   : > { %14621 = vmatpush1.bf16.msra.mxu1 %v20049_v63  ;;  %14198 = vmatprep.subr.bf16.mxu0 %v20054_v34 }
0x19fe   : > { %14622 = vmatprep.subr.bf16.mxu1 %v20057_v50 }
0x1a00   : > { %14199 = vmatpush1.bf16.msra.mxu0 %v20052_v61 }
0x1a01   : > { %14623 = vmatpush1.bf16.msra.mxu1 %v20055_v46  ;;  %14221 = vmatprep.subr.bf16.mxu0 %v20060_v8  ;;  %v20088_v8 = vld [vmem:[%s21667_s14 + $0x6a0] ss:$16 sps:$4 sm:$0xff]  }
0x1a02   : > { %14645 = vmatprep.subr.bf16.mxu1 %v20063_v15 }
0x1a03   : > { %14201 = vmatmul.mubr.bf16.vlgmr.msra.gmra.mrb[128].mxu0 %v23855_v54 }
0x1a04   : > { %14625 = vmatmul.mubr.bf16.vlgmr.msra.gmra.mrb[128].mxu1 %v23855_v54  ;;  %14210 = vmatprep.mubr.bf16.mxu0 %v23885_v40  ;;  %v20073_v54 = vld [vmem:[%s21667_s14 + $0x648] ss:$16 sps:$4 sm:$0xff]  }
0x1a05   : > { %14222 = vmatpush1.bf16.msra.mxu0 %v20058_v14  ;;  %14634 = vmatprep.mubr.bf16.mxu1 %v23885_v40  ;;  %v20081_v40 = vld [vmem:[%s21667_s14 + $0x66c] ss:$16 sps:$4 sm:$0xff]   ;;  %v20091_v14 = vld [vmem:[%s21667_s14 + $0x6a8] ss:$16 sps:$4 sm:$0xff]  }
0x1a06   : > { %14646 = vmatpush1.bf16.msra.mxu1 %v20061_v20  ;;  %14223 = vmatprep.subr.bf16.mxu0 %v20066_v19 }
0x1a07   : > { %14647 = vmatprep.subr.bf16.mxu1 %v20069_v57 }
0x1a09   : > { %14224 = vmatpush1.bf16.msra.mxu0 %v20064_v7  ;;  %v20096_v7 = vld [vmem:[%s21667_s14 + $0x6c4] ss:$16 sps:$4 sm:$0xff]  }
0x1a0a   : > { %14648 = vmatpush1.bf16.msra.mxu1 %v20067_v39  ;;  %14225 = vmatprep.subr.bf16.mxu0 %v20072_v30 }
0x1a0b   : > { %14211 = vmatmul.mubr.bf16.gmra.mrb[132].mxu0 %v23881_v35  ;;  %14649 = vmatprep.subr.bf16.mxu1 %v20075_v49 }
0x1a0c   : > { %14635 = vmatmul.mubr.bf16.gmra.mrb[132].mxu1 %v23881_v35  ;;  %14253 = vmatprep.mubr.bf16.mxu0 %v23864_v43  ;;  %v20082_v35 = vld [vmem:[%s21667_s14 + $0x680] ss:$16 sps:$4 sm:$0xff]  }
0x1a0d   : > { %14226 = vmatpush1.bf16.msra.mxu0 %v20070_v21  ;;  %14677 = vmatprep.mubr.bf16.mxu1 %v23864_v43  ;;  %v24216_v43 = vrot.slane %v24008_v32, %v25096_v31  ;;  %v20099_v21 = vld [vmem:[%s21667_s14 + $0x6cc] ss:$16 sps:$4 sm:$0xff]  }
0x1a0e   : > { %14650 = vmatpush1.bf16.msra.mxu1 %v20073_v54  ;;  %14227 = vmatprep.subr.bf16.mxu0 %v20078_v12 }
0x1a0f   : > { %14651 = vmatprep.subr.bf16.mxu1 %v20081_v40 }
0x1a11   : > { %14228 = vmatpush1.bf16.msra.mxu0 %v20076_v36 }
0x1a12   : > { %14652 = vmatpush1.bf16.msra.mxu1 %v20079_v58  ;;  %14229 = vmatprep.subr.bf16.mxu0 %v20084_v55 }
0x1a13   : > { %14653 = vmatprep.subr.bf16.mxu1 %v20087_v10  ;;  %v10748_v4 = vpop.f32.mrb[120].mxu0 }
0x1a14   : > { %v18577_v63 = vadd.f32 %v10748_v4, %v24210_v62  ;;  %v10854_v34 = vpop.f32.mrb[120].mxu1  ;;  %v10750_v50 = vpop.f32.mrb[121].mxu0 }
0x1a15   : > { %14230 = vmatpush1.bf16.msra.mxu0 %v20082_v35  ;;  %v18585_v61 = vadd.f32 %v10854_v34, %v24216_v43  ;;  %v18578_v46 = vadd.f32 %v10750_v50, %v24221_v1  ;;  %v10856_v38 = vpop.f32.mrb[121].mxu1  ;;  %v10752_v32 = vpop.f32.mrb[122].mxu0 }
0x1a16   : > { %14654 = vmatpush1.bf16.msra.mxu1 %v20085_v13  ;;  %v18586_v15 = vadd.f32 %v10856_v38, %v24227_v47  ;;  %14231 = vmatprep.subr.bf16.mxu0 %v20090_v26  ;;  %v18579_v20 = vadd.f32 %v10752_v32, %v24210_v62  ;;  %v10858_v19 = vpop.f32.mrb[122].mxu1  ;;  %v10754_v57 = vpop.f32.mrb[123].mxu0  ;;  %v10885_v54 = vmax.f32 %v18577_v63, 0.0  ;;  %v20097_v13 = vld [vmem:[%s21667_s14 + $0x6c8] ss:$16 sps:$4 sm:$0xff]  }
0x1a17   : > { %14655 = vmatprep.subr.bf16.mxu1 %v20093_v45  ;;  %v18587_v39 = vadd.f32 %v10858_v19, %v24216_v43  ;;  %v18580_v30 = vadd.f32 %v10754_v57, %v24221_v1  ;;  %v10860_v49 = vpop.f32.mrb[123].mxu1  ;;  %v10887_v36 = vmax.f32 %v18585_v61, 0.0  ;;  %v10886_v58 = vmax.f32 %v18578_v46, 0.0  ;;  %v20105_v63 = vld [vmem:[%s21667_s14 + $0x6ec] ss:$16 sps:$4 sm:$0xff]  }
0x1a18   : > { %v10901_v12 = vmax.f32 %v18579_v20, 0.0  ;;  %v18588_v40 = vadd.f32 %v10860_v49, %v24227_v47  ;;  %v10888_v35 = vmax.f32 %v18586_v15, 0.0  ;;  %v20100_v15 = vld [vmem:[%s21667_s14 + $0x6e0] ss:$16 sps:$4 sm:$0xff]   ;;  %v20103_v19 = vld [vmem:[%s21667_s14 + $0x6e8] ss:$16 sps:$4 sm:$0xff]  }
0x1a19   : > { %v10903_v55 = vmax.f32 %v18587_v39, 0.0  ;;  %14232 = vmatpush1.bf16.msra.mxu0 %v20088_v8  ;;  %v10902_v10 = vmax.f32 %v18580_v30, 0.0  ;;  %v20108_v30 = vld [vmem:[%s21667_s14 + $0x704] ss:$16 sps:$4 sm:$0xff]  }
0x1a1a   : > { %v24244_v31 = vpack.c.bf16 %v10901_v12, %v10885_v54  ;;  %14656 = vmatpush1.bf16.msra.mxu1 %v20091_v14  ;;  %v10904_v28 = vmax.f32 %v18588_v40, 0.0  ;;  %14233 = vmatprep.subr.bf16.mxu0 %v20096_v7  ;;  %v20111_v12 = vld [vmem:[%s21667_s14 + $0x70c] ss:$16 sps:$4 sm:$0xff]  }
0x1a1b   : > { %v24248_v26 = vpack.c.bf16 %v10903_v55, %v10887_v36  ;;  %v24250_v4 = vpack.c.bf16 %v10902_v10, %v10886_v58  ;;  %14657 = vmatprep.subr.bf16.mxu1 %v20099_v21  ;;  %v10758_v45 = vpop.f32.mrb[124].mxu0 }
0x1a1c   : > { %v24253_v34 = vpack.c.bf16 %v10904_v28, %v10888_v35  ;;  %v18581_v50 = vadd.f32 %v10758_v45, %v24210_v62  ;;  %v10864_v61 = vpop.f32.mrb[124].mxu1  ;;  %v10760_v46 = vpop.f32.mrb[125].mxu0  ;;  %v20106_v35 = vld [vmem:[%s21667_s14 + $0x700] ss:$16 sps:$4 sm:$0xff]  }
0x1a1d   : > { %14234 = vmatpush1.bf16.msra.mxu0 %v20094_v6  ;;  %v18589_v38 = vadd.f32 %v10864_v61, %v24216_v43  ;;  %v18582_v8 = vadd.f32 %v10760_v46, %v24221_v1  ;;  %v10866_v32 = vpop.f32.mrb[125].mxu1  ;;  %v10762_v14 = vpop.f32.mrb[126].mxu0  ;;  %v20112_v61 = vld [vmem:[%s21667_s14 + $0x720] ss:$16 sps:$4 sm:$0xff]   ;;  %v20115_v46 = vld [vmem:[%s21667_s14 + $0x728] ss:$16 sps:$4 sm:$0xff]  }
0x1a1e   : > { %14658 = vmatpush1.bf16.msra.mxu1 %v20097_v13  ;;  %v18590_v20 = vadd.f32 %v10866_v32, %v24227_v47  ;;  %14235 = vmatprep.subr.bf16.mxu0 %v20102_v24  ;;  %v18583_v57 = vadd.f32 %v10762_v14, %v24210_v62  ;;  %v10868_v7 = vpop.f32.mrb[126].mxu1  ;;  %v10764_v39 = vpop.f32.mrb[127].mxu0  ;;  %v10917_v40 = vmax.f32 %v18581_v50, 0.0  ;;  %v20109_v13 = vld [vmem:[%s21667_s14 + $0x708] ss:$16 sps:$4 sm:$0xff]  }
0x1a1f   : > { %14659 = vmatprep.subr.bf16.mxu1 %v20105_v63  ;;  %v18591_v49 = vadd.f32 %v10868_v7, %v24216_v43  ;;  %v18584_v21 = vadd.f32 %v10764_v39, %v24221_v1  ;;  %v10870_v54 = vpop.f32.mrb[127].mxu1  ;;  %v10919_v55 = vmax.f32 %v18589_v38, 0.0  ;;  %v10918_v62 = vmax.f32 %v18582_v8, 0.0  ;;  %v20117_v63 = vld [vmem:[%s21667_s14 + $0x72c] ss:$16 sps:$4 sm:$0xff]  }
0x1a20   : > { %v10933_v36 = vmax.f32 %v18583_v57, 0.0  ;;  %v18592_v58 = vadd.f32 %v10870_v54, %v24227_v47  ;;  %v10920_v28 = vmax.f32 %v18590_v20, 0.0  ;;  %v20114_v47 = vld [vmem:[%s21667_s14 + $0x724] ss:$16 sps:$4 sm:$0xff]   ;;  %v20123_v8 = vld [vmem:[%s21667_s14 + $0x74c] ss:$16 sps:$4 sm:$0xff]  }
0x1a21   : > { %v10935_v10 = vmax.f32 %v18591_v49, 0.0  ;;  %14236 = vmatpush1.bf16.msra.mxu0 %v20100_v15  ;;  %v10934_v6 = vmax.f32 %v18584_v21, 0.0  ;;  %v20120_v38 = vld [vmem:[%s21667_s14 + $0x744] ss:$16 sps:$4 sm:$0xff]   ;;  %v20118_v32 = vld [vmem:[%s21667_s14 + $0x740] ss:$16 sps:$4 sm:$0xff]  }
0x1a22   : > { %v24268_v43 = vpack.c.bf16 %v10933_v36, %v10917_v40  ;;  %14660 = vmatpush1.bf16.msra.mxu1 %v20103_v19  ;;  %v10936_v1 = vmax.f32 %v18592_v58, 0.0  ;;  %14237 = vmatprep.subr.bf16.mxu0 %v20108_v30  ;;  %v20121_v15 = vld [vmem:[%s21667_s14 + $0x748] ss:$16 sps:$4 sm:$0xff]   ;;  %v20126_v14 = vld [vmem:[%s21667_s14 + $0x764] ss:$16 sps:$4 sm:$0xff]  }
0x1a23   : > { %v24272_v24 = vpack.c.bf16 %v10935_v10, %v10919_v55  ;;  %v24274_v45 = vpack.c.bf16 %v10934_v6, %v10918_v62  ;;  %14661 = vmatprep.subr.bf16.mxu1 %v20111_v12  ;;  %v20129_v20 = vld [vmem:[%s21667_s14 + $0x76c] ss:$16 sps:$4 sm:$0xff]   ;;  %v20124_v19 = vld [vmem:[%s21667_s14 + $0x760] ss:$16 sps:$4 sm:$0xff]   ;;  %v20127_v57 = vld [vmem:[%s21667_s14 + $0x768] ss:$16 sps:$4 sm:$0xff]  }
0x1a24   : > { %v24277_v50 = vpack.c.bf16 %v10936_v1, %v10920_v28  ;;  %v20132_v7 = vld [vmem:[%s21667_s14 + $0x784] ss:$16 sps:$4 sm:$0xff]   ;;  %v20135_v39 = vld [vmem:[%s21667_s14 + $0x78c] ss:$16 sps:$4 sm:$0xff]   ;;  %v20130_v30 = vld [vmem:[%s21667_s14 + $0x780] ss:$16 sps:$4 sm:$0xff]  }
0x1a25   : > { %14238 = vmatpush1.bf16.msra.mxu0 %v20106_v35  ;;  %v20133_v49 = vld [vmem:[%s21667_s14 + $0x788] ss:$16 sps:$4 sm:$0xff]   ;;  %v20138_v21 = vld [vmem:[%s21667_s14 + $0x7a4] ss:$16 sps:$4 sm:$0xff]   ;;  %v20141_v54 = vld [vmem:[%s21667_s14 + $0x7ac] ss:$16 sps:$4 sm:$0xff]  }
0x1a26   : > { %14662 = vmatpush1.bf16.msra.mxu1 %v20109_v13  ;;  %14239 = vmatprep.subr.bf16.mxu0 %v20114_v47  ;;  %v20136_v12 = vld [vmem:[%s21667_s14 + $0x7a0] ss:$16 sps:$4 sm:$0xff]   ;;  %v20139_v40 = vld [vmem:[%s21667_s14 + $0x7a8] ss:$16 sps:$4 sm:$0xff]   ;;  %v20144_v36 = vld [vmem:[%s21667_s14 + $0x7c4] ss:$16 sps:$4 sm:$0xff]  }
0x1a27   : > { %14663 = vmatprep.subr.bf16.mxu1 %v20117_v63  ;;  %v20147_v58 = vld [vmem:[%s21667_s14 + $0x7cc] ss:$16 sps:$4 sm:$0xff]   ;;  %v20142_v55 = vld [vmem:[%s21667_s14 + $0x7c0] ss:$16 sps:$4 sm:$0xff]   ;;  %v20145_v62 = vld [vmem:[%s21667_s14 + $0x7c8] ss:$16 sps:$4 sm:$0xff]  }
0x1a28   : > { %v20150_v10 = vld [vmem:[%s21667_s14 + $0x7e4] ss:$16 sps:$4 sm:$0xff]   ;;  %v20153_v6 = vld [vmem:[%s21667_s14 + $0x7ec] ss:$16 sps:$4 sm:$0xff]   ;;  %v20148_v35 = vld [vmem:[%s21667_s14 + $0x7e0] ss:$16 sps:$4 sm:$0xff]  }
0x1a29   : > { %14240 = vmatpush1.bf16.msra.mxu0 %v20112_v61  ;;  %v20151_v28 = vld [vmem:[%s21667_s14 + $0x7e8] ss:$16 sps:$4 sm:$0xff]   ;;  %v20156_v1 = vld [vmem:[%s21667_s14 + $0x804] ss:$16 sps:$4 sm:$0xff]   ;;  %v20159_v13 = vld [vmem:[%s21667_s14 + $0x80c] ss:$16 sps:$4 sm:$0xff]  }
0x1a2a   : > { %14664 = vmatpush1.bf16.msra.mxu1 %v20115_v46  ;;  %14241 = vmatprep.subr.bf16.mxu0 %v20120_v38  ;;  %v20154_v47 = vld [vmem:[%s21667_s14 + $0x800] ss:$16 sps:$4 sm:$0xff]   ;;  %v20157_v63 = vld [vmem:[%s21667_s14 + $0x808] ss:$16 sps:$4 sm:$0xff]   ;;  %v20162_v61 = vld [vmem:[%s21667_s14 + $0x824] ss:$16 sps:$4 sm:$0xff]  }
0x1a2b   : > { %14665 = vmatprep.subr.bf16.mxu1 %v20123_v8  ;;  %v20165_v46 = vld [vmem:[%s21667_s14 + $0x82c] ss:$16 sps:$4 sm:$0xff]   ;;  %v20160_v38 = vld [vmem:[%s21667_s14 + $0x820] ss:$16 sps:$4 sm:$0xff]   ;;  %v20163_v8 = vld [vmem:[%s21667_s14 + $0x828] ss:$16 sps:$4 sm:$0xff]  }
0x1a2d   : > { %14242 = vmatpush1.bf16.msra.mxu0 %v20118_v32  ;;  %v20168_v32 = vld [vmem:[%s21667_s14 + $0x844] ss:$16 sps:$4 sm:$0xff]  }
0x1a2e   : > { %14666 = vmatpush1.bf16.msra.mxu1 %v20121_v15  ;;  %14243 = vmatprep.subr.bf16.mxu0 %v20126_v14  ;;  %v20171_v15 = vld [vmem:[%s21667_s14 + $0x84c] ss:$16 sps:$4 sm:$0xff]   ;;  %v20166_v14 = vld [vmem:[%s21667_s14 + $0x840] ss:$16 sps:$4 sm:$0xff]  }
0x1a2f   : > { %14667 = vmatprep.subr.bf16.mxu1 %v20129_v20  ;;  %v20174_v20 = vld [vmem:[%s21667_s14 + $0x864] ss:$16 sps:$4 sm:$0xff]  }
0x1a31   : > { %14244 = vmatpush1.bf16.msra.mxu0 %v20124_v19  ;;  %v20172_v19 = vld [vmem:[%s21667_s14 + $0x860] ss:$16 sps:$4 sm:$0xff]  }
0x1a32   : > { %14668 = vmatpush1.bf16.msra.mxu1 %v20127_v57  ;;  %14245 = vmatprep.subr.bf16.mxu0 %v20132_v7  ;;  %v20175_v57 = vld [vmem:[%s21667_s14 + $0x868] ss:$16 sps:$4 sm:$0xff]   ;;  %v20180_v7 = vld [vmem:[%s21667_s14 + $0x884] ss:$16 sps:$4 sm:$0xff]  }
0x1a33   : > { %14669 = vmatprep.subr.bf16.mxu1 %v20135_v39  ;;  %v20183_v39 = vld [vmem:[%s21667_s14 + $0x88c] ss:$16 sps:$4 sm:$0xff]  }
0x1a35   : > { %14246 = vmatpush1.bf16.msra.mxu0 %v20130_v30  ;;  %v20181_v30 = vld [vmem:[%s21667_s14 + $0x888] ss:$16 sps:$4 sm:$0xff]  }
0x1a36   : > { %14670 = vmatpush1.bf16.msra.mxu1 %v20133_v49  ;;  %14247 = vmatprep.subr.bf16.mxu0 %v20138_v21  ;;  %v20186_v49 = vld [vmem:[%s21667_s14 + $0x8a4] ss:$16 sps:$4 sm:$0xff]   ;;  %v20184_v21 = vld [vmem:[%s21667_s14 + $0x8a0] ss:$16 sps:$4 sm:$0xff]  }
0x1a37   : > { %14671 = vmatprep.subr.bf16.mxu1 %v20141_v54  ;;  %v20187_v54 = vld [vmem:[%s21667_s14 + $0x8a8] ss:$16 sps:$4 sm:$0xff]  }
0x1a39   : > { %14248 = vmatpush1.bf16.msra.mxu0 %v20136_v12  ;;  %v20192_v12 = vld [vmem:[%s21667_s14 + $0x8c4] ss:$16 sps:$4 sm:$0xff]  }
0x1a3a   : > { %14672 = vmatpush1.bf16.msra.mxu1 %v20139_v40  ;;  %14249 = vmatprep.subr.bf16.mxu0 %v20144_v36  ;;  %v20195_v40 = vld [vmem:[%s21667_s14 + $0x8cc] ss:$16 sps:$4 sm:$0xff]   ;;  %v20190_v36 = vld [vmem:[%s21667_s14 + $0x8c0] ss:$16 sps:$4 sm:$0xff]  }
0x1a3b   : > { %14673 = vmatprep.subr.bf16.mxu1 %v20147_v58  ;;  %v20193_v58 = vld [vmem:[%s21667_s14 + $0x8c8] ss:$16 sps:$4 sm:$0xff]  }
0x1a3d   : > { %14250 = vmatpush1.bf16.msra.mxu0 %v20142_v55  ;;  %v20198_v55 = vld [vmem:[%s21667_s14 + $0x8e4] ss:$16 sps:$4 sm:$0xff]  }
0x1a3e   : > { %14674 = vmatpush1.bf16.msra.mxu1 %v20145_v62  ;;  %14251 = vmatprep.subr.bf16.mxu0 %v20150_v10  ;;  %v20201_v62 = vld [vmem:[%s21667_s14 + $0x8ec] ss:$16 sps:$4 sm:$0xff]   ;;  %v20196_v10 = vld [vmem:[%s21667_s14 + $0x8e0] ss:$16 sps:$4 sm:$0xff]  }
0x1a3f   : > { %14675 = vmatprep.subr.bf16.mxu1 %v20153_v6  ;;  %v20199_v6 = vld [vmem:[%s21667_s14 + $0x8e8] ss:$16 sps:$4 sm:$0xff]  }
0x1a41   : > { %14252 = vmatpush1.bf16.msra.mxu0 %v20148_v35  ;;  %v20204_v35 = vld [vmem:[%s21667_s14 + $0x904] ss:$16 sps:$4 sm:$0xff]  }
0x1a42   : > { %14676 = vmatpush1.bf16.msra.mxu1 %v20151_v28  ;;  %14274 = vmatprep.subr.bf16.mxu0 %v20156_v1  ;;  %v20207_v28 = vld [vmem:[%s21667_s14 + $0x90c] ss:$16 sps:$4 sm:$0xff]   ;;  %v20202_v1 = vld [vmem:[%s21667_s14 + $0x900] ss:$16 sps:$4 sm:$0xff]  }
0x1a43   : > { %14698 = vmatprep.subr.bf16.mxu1 %v20159_v13  ;;  %v20205_v13 = vld [vmem:[%s21667_s14 + $0x908] ss:$16 sps:$4 sm:$0xff]  }
0x1a44   : > { %14254 = vmatmul.mubr.bf16.vlgmr.msra.gmra.mrb[128].mxu0 %v23858_v11 }
0x1a45   : > { %14678 = vmatmul.mubr.bf16.vlgmr.msra.gmra.mrb[128].mxu1 %v23858_v11  ;;  %14263 = vmatprep.mubr.bf16.mxu0 %v23889_v16  ;;  %v20169_v11 = vld [vmem:[%s21667_s14 + $0x848] ss:$16 sps:$4 sm:$0xff]  }
0x1a46   : > { %14275 = vmatpush1.bf16.msra.mxu0 %v20154_v47  ;;  %14687 = vmatprep.mubr.bf16.mxu1 %v23889_v16  ;;  %v20177_v16 = vld [vmem:[%s21667_s14 + $0x86c] ss:$16 sps:$4 sm:$0xff]   ;;  %v20210_v47 = vld [vmem:[%s21667_s14 + $0x924] ss:$16 sps:$4 sm:$0xff]  }
0x1a47   : > { %14699 = vmatpush1.bf16.msra.mxu1 %v20157_v63  ;;  %14276 = vmatprep.subr.bf16.mxu0 %v20162_v61  ;;  %v20213_v63 = vld [vmem:[%s21667_s14 + $0x92c] ss:$16 sps:$4 sm:$0xff]   ;;  %v20208_v61 = vld [vmem:[%s21667_s14 + $0x920] ss:$16 sps:$4 sm:$0xff]  }
0x1a48   : > { %14700 = vmatprep.subr.bf16.mxu1 %v20165_v46  ;;  %v20211_v46 = vld [vmem:[%s21667_s14 + $0x928] ss:$16 sps:$4 sm:$0xff]  }
0x1a4a   : > { %14277 = vmatpush1.bf16.msra.mxu0 %v20160_v38  ;;  %v20216_v38 = vld [vmem:[%s21667_s14 + $0x944] ss:$16 sps:$4 sm:$0xff]  }
0x1a4b   : > { %14701 = vmatpush1.bf16.msra.mxu1 %v20163_v8  ;;  %14278 = vmatprep.subr.bf16.mxu0 %v20168_v32  ;;  %v20219_v8 = vld [vmem:[%s21667_s14 + $0x94c] ss:$16 sps:$4 sm:$0xff]   ;;  %v20214_v32 = vld [vmem:[%s21667_s14 + $0x940] ss:$16 sps:$4 sm:$0xff]  }
0x1a4c   : > { %14264 = vmatmul.mubr.bf16.gmra.mrb[132].mxu0 %v23883_v3  ;;  %14702 = vmatprep.subr.bf16.mxu1 %v20171_v15  ;;  %v20217_v15 = vld [vmem:[%s21667_s14 + $0x948] ss:$16 sps:$4 sm:$0xff]  }
0x1a4d   : > { %14688 = vmatmul.mubr.bf16.gmra.mrb[132].mxu1 %v23883_v3  ;;  %14306 = vmatprep.mubr.bf16.mxu0 %v24054_v60  ;;  %v20178_v3 = vld [vmem:[%s21667_s14 + $0x880] ss:$16 sps:$4 sm:$0xff]  }
0x1a4e   : > { %14279 = vmatpush1.bf16.msra.mxu0 %v20166_v14  ;;  %14730 = vmatprep.mubr.bf16.mxu1 %v24054_v60  ;;  %v20189_v60 = vld [vmem:[%s21667_s14 + $0x8ac] ss:$16 sps:$4 sm:$0xff]   ;;  %v20222_v14 = vld [vmem:[%s21667_s14 + $0x964] ss:$16 sps:$4 sm:$0xff]  }
0x1a4f   : > { %14703 = vmatpush1.bf16.msra.mxu1 %v20169_v11  ;;  %14280 = vmatprep.subr.bf16.mxu0 %v20174_v20  ;;  %v20225_v11 = vld [vmem:[%s21667_s14 + $0x96c] ss:$16 sps:$4 sm:$0xff]   ;;  %v20220_v20 = vld [vmem:[%s21667_s14 + $0x960] ss:$16 sps:$4 sm:$0xff]  }
0x1a50   : > { %14704 = vmatprep.subr.bf16.mxu1 %v20177_v16  ;;  %v20223_v16 = vld [vmem:[%s21667_s14 + $0x968] ss:$16 sps:$4 sm:$0xff]  }
0x1a52   : > { %14281 = vmatpush1.bf16.msra.mxu0 %v20172_v19  ;;  %v20228_v19 = vld [vmem:[%s21667_s14 + $0x984] ss:$16 sps:$4 sm:$0xff]  }
0x1a53   : > { %14705 = vmatpush1.bf16.msra.mxu1 %v20175_v57  ;;  %14282 = vmatprep.subr.bf16.mxu0 %v20180_v7  ;;  %v20231_v57 = vld [vmem:[%s21667_s14 + $0x98c] ss:$16 sps:$4 sm:$0xff]   ;;  %v20226_v7 = vld [vmem:[%s21667_s14 + $0x980] ss:$16 sps:$4 sm:$0xff]  }
0x1a54   : > { %14706 = vmatprep.subr.bf16.mxu1 %v20183_v39  ;;  %v20229_v39 = vld [vmem:[%s21667_s14 + $0x988] ss:$16 sps:$4 sm:$0xff]  }
0x1a56   : > { %14283 = vmatpush1.bf16.msra.mxu0 %v20178_v3  ;;  %v20234_v3 = vld [vmem:[%s21667_s14 + $0x9a4] ss:$16 sps:$4 sm:$0xff]  }
0x1a57   : > { %14707 = vmatpush1.bf16.msra.mxu1 %v20181_v30  ;;  %14284 = vmatprep.subr.bf16.mxu0 %v20186_v49  ;;  %v20237_v30 = vld [vmem:[%s21667_s14 + $0x9ac] ss:$16 sps:$4 sm:$0xff]   ;;  %v20232_v49 = vld [vmem:[%s21667_s14 + $0x9a0] ss:$16 sps:$4 sm:$0xff]  }
0x1a58   : > { %14708 = vmatprep.subr.bf16.mxu1 %v20189_v60  ;;  %v20235_v60 = vld [vmem:[%s21667_s14 + $0x9a8] ss:$16 sps:$4 sm:$0xff]  }
0x1a5a   : > { %14285 = vmatpush1.bf16.msra.mxu0 %v20184_v21  ;;  %v20240_v21 = vld [vmem:[%s21667_s14 + $0x9c4] ss:$16 sps:$4 sm:$0xff]  }
0x1a5b   : > { %14709 = vmatpush1.bf16.msra.mxu1 %v20187_v54  ;;  %14286 = vmatprep.subr.bf16.mxu0 %v20192_v12  ;;  %v20243_v54 = vld [vmem:[%s21667_s14 + $0x9cc] ss:$16 sps:$4 sm:$0xff]   ;;  %v20238_v12 = vld [vmem:[%s21667_s14 + $0x9c0] ss:$16 sps:$4 sm:$0xff]  }
0x1a5c   : > { %14710 = vmatprep.subr.bf16.mxu1 %v20195_v40  ;;  %v20241_v40 = vld [vmem:[%s21667_s14 + $0x9c8] ss:$16 sps:$4 sm:$0xff]  }
0x1a5e   : > { %14287 = vmatpush1.bf16.msra.mxu0 %v20190_v36  ;;  %v20246_v36 = vld [vmem:[%s21667_s14 + $0x9e4] ss:$16 sps:$4 sm:$0xff]  }
0x1a5f   : > { %14711 = vmatpush1.bf16.msra.mxu1 %v20193_v58  ;;  %14288 = vmatprep.subr.bf16.mxu0 %v20198_v55  ;;  %v20249_v58 = vld [vmem:[%s21667_s14 + $0x9ec] ss:$16 sps:$4 sm:$0xff]   ;;  %v20244_v55 = vld [vmem:[%s21667_s14 + $0x9e0] ss:$16 sps:$4 sm:$0xff]  }
0x1a60   : > { %14712 = vmatprep.subr.bf16.mxu1 %v20201_v62  ;;  %v20247_v62 = vld [vmem:[%s21667_s14 + $0x9e8] ss:$16 sps:$4 sm:$0xff]  }
0x1a62   : > { %14289 = vmatpush1.bf16.msra.mxu0 %v20196_v10  ;;  %v20252_v10 = vld [vmem:[%s21667_s14 + $0xa04] ss:$16 sps:$4 sm:$0xff]  }
0x1a63   : > { %14713 = vmatpush1.bf16.msra.mxu1 %v20199_v6  ;;  %14290 = vmatprep.subr.bf16.mxu0 %v20204_v35  ;;  %v20255_v6 = vld [vmem:[%s21667_s14 + $0xa0c] ss:$16 sps:$4 sm:$0xff]   ;;  %v20250_v35 = vld [vmem:[%s21667_s14 + $0xa00] ss:$16 sps:$4 sm:$0xff]  }
0x1a64   : > { %14714 = vmatprep.subr.bf16.mxu1 %v20207_v28  ;;  %v20253_v28 = vld [vmem:[%s21667_s14 + $0xa08] ss:$16 sps:$4 sm:$0xff]  }
0x1a66   : > { %14291 = vmatpush1.bf16.msra.mxu0 %v20202_v1  ;;  %v20258_v1 = vld [vmem:[%s21667_s14 + $0xa24] ss:$16 sps:$4 sm:$0xff]  }
0x1a67   : > { %14715 = vmatpush1.bf16.msra.mxu1 %v20205_v13  ;;  %14292 = vmatprep.subr.bf16.mxu0 %v20210_v47  ;;  %v20261_v13 = vld [vmem:[%s21667_s14 + $0xa2c] ss:$16 sps:$4 sm:$0xff]   ;;  %v20256_v47 = vld [vmem:[%s21667_s14 + $0xa20] ss:$16 sps:$4 sm:$0xff]  }
0x1a68   : > { %14716 = vmatprep.subr.bf16.mxu1 %v20213_v63  ;;  %v20259_v63 = vld [vmem:[%s21667_s14 + $0xa28] ss:$16 sps:$4 sm:$0xff]  }
0x1a6a   : > { %14293 = vmatpush1.bf16.msra.mxu0 %v20208_v61  ;;  %v20264_v61 = vld [vmem:[%s21667_s14 + $0xa44] ss:$16 sps:$4 sm:$0xff]  }
0x1a6b   : > { %14717 = vmatpush1.bf16.msra.mxu1 %v20211_v46  ;;  %14294 = vmatprep.subr.bf16.mxu0 %v20216_v38  ;;  %v20267_v46 = vld [vmem:[%s21667_s14 + $0xa4c] ss:$16 sps:$4 sm:$0xff]   ;;  %v20262_v38 = vld [vmem:[%s21667_s14 + $0xa40] ss:$16 sps:$4 sm:$0xff]  }
0x1a6c   : > { %14718 = vmatprep.subr.bf16.mxu1 %v20219_v8  ;;  %v20270_v8 = vld [vmem:[%s21667_s14 + $0xa64] ss:$16 sps:$4 sm:$0xff]  }
0x1a6e   : > { %14295 = vmatpush1.bf16.msra.mxu0 %v20214_v32  ;;  %v20268_v32 = vld [vmem:[%s21667_s14 + $0xa60] ss:$16 sps:$4 sm:$0xff]  }
0x1a6f   : > { %14719 = vmatpush1.bf16.msra.mxu1 %v20217_v15  ;;  %14296 = vmatprep.subr.bf16.mxu0 %v20222_v14  ;;  %v20271_v15 = vld [vmem:[%s21667_s14 + $0xa68] ss:$16 sps:$4 sm:$0xff]   ;;  %v20276_v14 = vld [vmem:[%s21667_s14 + $0xa84] ss:$16 sps:$4 sm:$0xff]  }
0x1a70   : > { %14720 = vmatprep.subr.bf16.mxu1 %v20225_v11  ;;  %v20279_v11 = vld [vmem:[%s21667_s14 + $0xa8c] ss:$16 sps:$4 sm:$0xff]  }
0x1a72   : > { %14297 = vmatpush1.bf16.msra.mxu0 %v20220_v20  ;;  %v20277_v20 = vld [vmem:[%s21667_s14 + $0xa88] ss:$16 sps:$4 sm:$0xff]  }
0x1a73   : > { %14721 = vmatpush1.bf16.msra.mxu1 %v20223_v16  ;;  %14298 = vmatprep.subr.bf16.mxu0 %v20228_v19  ;;  %v20282_v16 = vld [vmem:[%s21667_s14 + $0xaa4] ss:$16 sps:$4 sm:$0xff]   ;;  %v20280_v19 = vld [vmem:[%s21667_s14 + $0xaa0] ss:$16 sps:$4 sm:$0xff]  }
0x1a74   : > { %14722 = vmatprep.subr.bf16.mxu1 %v20231_v57  ;;  %v20283_v57 = vld [vmem:[%s21667_s14 + $0xaa8] ss:$16 sps:$4 sm:$0xff]  }
0x1a76   : > { %14299 = vmatpush1.bf16.msra.mxu0 %v20226_v7  ;;  %v20288_v7 = vld [vmem:[%s21667_s14 + $0xac4] ss:$16 sps:$4 sm:$0xff]  }
0x1a77   : > { %14723 = vmatpush1.bf16.msra.mxu1 %v20229_v39  ;;  %14300 = vmatprep.subr.bf16.mxu0 %v20234_v3  ;;  %v20291_v39 = vld [vmem:[%s21667_s14 + $0xacc] ss:$16 sps:$4 sm:$0xff]   ;;  %v20286_v3 = vld [vmem:[%s21667_s14 + $0xac0] ss:$16 sps:$4 sm:$0xff]  }
0x1a78   : > { %14724 = vmatprep.subr.bf16.mxu1 %v20237_v30  ;;  %v20289_v30 = vld [vmem:[%s21667_s14 + $0xac8] ss:$16 sps:$4 sm:$0xff]  }
0x1a7a   : > { %14301 = vmatpush1.bf16.msra.mxu0 %v20232_v49  ;;  %v20294_v49 = vld [vmem:[%s21667_s14 + $0xae4] ss:$16 sps:$4 sm:$0xff]  }
0x1a7b   : > { %14725 = vmatpush1.bf16.msra.mxu1 %v20235_v60  ;;  %14302 = vmatprep.subr.bf16.mxu0 %v20240_v21  ;;  %v20297_v60 = vld [vmem:[%s21667_s14 + $0xaec] ss:$16 sps:$4 sm:$0xff]   ;;  %v20292_v21 = vld [vmem:[%s21667_s14 + $0xae0] ss:$16 sps:$4 sm:$0xff]  }
0x1a7c   : > { %14726 = vmatprep.subr.bf16.mxu1 %v20243_v54  ;;  %v20295_v54 = vld [vmem:[%s21667_s14 + $0xae8] ss:$16 sps:$4 sm:$0xff]  }
0x1a7e   : > { %14303 = vmatpush1.bf16.msra.mxu0 %v20238_v12  ;;  %v20300_v12 = vld [vmem:[%s21667_s14 + $0xb04] ss:$16 sps:$4 sm:$0xff]  }
0x1a7f   : > { %14727 = vmatpush1.bf16.msra.mxu1 %v20241_v40  ;;  %14304 = vmatprep.subr.bf16.mxu0 %v20246_v36  ;;  %v20303_v40 = vld [vmem:[%s21667_s14 + $0xb0c] ss:$16 sps:$4 sm:$0xff]   ;;  %v20298_v36 = vld [vmem:[%s21667_s14 + $0xb00] ss:$16 sps:$4 sm:$0xff]  }
0x1a80   : > { %14728 = vmatprep.subr.bf16.mxu1 %v20249_v58  ;;  %v20301_v58 = vld [vmem:[%s21667_s14 + $0xb08] ss:$16 sps:$4 sm:$0xff]  }
0x1a82   : > { %14305 = vmatpush1.bf16.msra.mxu0 %v20244_v55  ;;  %v20306_v55 = vld [vmem:[%s21667_s14 + $0xb24] ss:$16 sps:$4 sm:$0xff]  }
0x1a83   : > { %14729 = vmatpush1.bf16.msra.mxu1 %v20247_v62  ;;  %14327 = vmatprep.subr.bf16.mxu0 %v20252_v10  ;;  %v20309_v62 = vld [vmem:[%s21667_s14 + $0xb2c] ss:$16 sps:$4 sm:$0xff]   ;;  %v20304_v10 = vld [vmem:[%s21667_s14 + $0xb20] ss:$16 sps:$4 sm:$0xff]  }
0x1a84   : > { %14751 = vmatprep.subr.bf16.mxu1 %v20255_v6  ;;  %v20307_v6 = vld [vmem:[%s21667_s14 + $0xb28] ss:$16 sps:$4 sm:$0xff]  }
0x1a85   : > { %14307 = vmatmul.mubr.bf16.vlgmr.msra.gmra.mrb[128].mxu0 %v24048_v56 }
0x1a86   : > { %14731 = vmatmul.mubr.bf16.vlgmr.msra.gmra.mrb[128].mxu1 %v24048_v56  ;;  %14316 = vmatprep.mubr.bf16.mxu0 %v24078_v25  ;;  %v20265_v56 = vld [vmem:[%s21667_s14 + $0xa48] ss:$16 sps:$4 sm:$0xff]  }
0x1a87   : > { %14328 = vmatpush1.bf16.msra.mxu0 %v20250_v35  ;;  %14740 = vmatprep.mubr.bf16.mxu1 %v24078_v25  ;;  %v20273_v25 = vld [vmem:[%s21667_s14 + $0xa6c] ss:$16 sps:$4 sm:$0xff]   ;;  %v20312_v35 = vld [vmem:[%s21667_s14 + $0xb44] ss:$16 sps:$4 sm:$0xff]  }
0x1a88   : > { %14752 = vmatpush1.bf16.msra.mxu1 %v20253_v28  ;;  %14329 = vmatprep.subr.bf16.mxu0 %v20258_v1  ;;  %v20315_v28 = vld [vmem:[%s21667_s14 + $0xb4c] ss:$16 sps:$4 sm:$0xff]   ;;  %v20310_v1 = vld [vmem:[%s21667_s14 + $0xb40] ss:$16 sps:$4 sm:$0xff]  }
0x1a89   : > { %14753 = vmatprep.subr.bf16.mxu1 %v20261_v13  ;;  %v20313_v13 = vld [vmem:[%s21667_s14 + $0xb48] ss:$16 sps:$4 sm:$0xff]  }
0x1a8b   : > { %14330 = vmatpush1.bf16.msra.mxu0 %v20256_v47  ;;  %v20318_v47 = vld [vmem:[%s21667_s14 + $0xb64] ss:$16 sps:$4 sm:$0xff]  }
0x1a8c   : > { %14754 = vmatpush1.bf16.msra.mxu1 %v20259_v63  ;;  %14331 = vmatprep.subr.bf16.mxu0 %v20264_v61  ;;  %v20321_v63 = vld [vmem:[%s21667_s14 + $0xb6c] ss:$16 sps:$4 sm:$0xff]   ;;  %v20316_v61 = vld [vmem:[%s21667_s14 + $0xb60] ss:$16 sps:$4 sm:$0xff]  }
0x1a8d   : > { %14317 = vmatmul.mubr.bf16.gmra.mrb[132].mxu0 %v24072_v33  ;;  %14755 = vmatprep.subr.bf16.mxu1 %v20267_v46  ;;  %v20319_v46 = vld [vmem:[%s21667_s14 + $0xb68] ss:$16 sps:$4 sm:$0xff]  }
0x1a8e   : > { %14741 = vmatmul.mubr.bf16.gmra.mrb[132].mxu1 %v24072_v33  ;;  %14359 = vmatprep.mubr.bf16.mxu0 %v24057_v51  ;;  %v20274_v33 = vld [vmem:[%s21667_s14 + $0xa80] ss:$16 sps:$4 sm:$0xff]  }
0x1a8f   : > { %14332 = vmatpush1.bf16.msra.mxu0 %v20262_v38  ;;  %14783 = vmatprep.mubr.bf16.mxu1 %v24057_v51  ;;  %v20285_v51 = vld [vmem:[%s21667_s14 + $0xaac] ss:$16 sps:$4 sm:$0xff]   ;;  %v20324_v38 = vld [vmem:[%s21667_s14 + $0xb84] ss:$16 sps:$4 sm:$0xff]  }
0x1a90   : > { %14756 = vmatpush1.bf16.msra.mxu1 %v20265_v56  ;;  %14333 = vmatprep.subr.bf16.mxu0 %v20270_v8  ;;  %v20327_v56 = vld [vmem:[%s21667_s14 + $0xb8c] ss:$16 sps:$4 sm:$0xff]   ;;  %v20322_v8 = vld [vmem:[%s21667_s14 + $0xb80] ss:$16 sps:$4 sm:$0xff]  }
0x1a91   : > { %14757 = vmatprep.subr.bf16.mxu1 %v20273_v25  ;;  %v20325_v25 = vld [vmem:[%s21667_s14 + $0xb88] ss:$16 sps:$4 sm:$0xff]  }
0x1a93   : > { %14334 = vmatpush1.bf16.msra.mxu0 %v20268_v32  ;;  %v20330_v32 = vld [vmem:[%s21667_s14 + $0xba4] ss:$16 sps:$4 sm:$0xff]  }
0x1a94   : > { %14758 = vmatpush1.bf16.msra.mxu1 %v20271_v15  ;;  %14335 = vmatprep.subr.bf16.mxu0 %v20276_v14  ;;  %v20333_v15 = vld [vmem:[%s21667_s14 + $0xbac] ss:$16 sps:$4 sm:$0xff]   ;;  %v20328_v14 = vld [vmem:[%s21667_s14 + $0xba0] ss:$16 sps:$4 sm:$0xff]  }
0x1a95   : > { %14759 = vmatprep.subr.bf16.mxu1 %v20279_v11  ;;  %v20331_v11 = vld [vmem:[%s21667_s14 + $0xba8] ss:$16 sps:$4 sm:$0xff]  }
0x1a97   : > { %14336 = vmatpush1.bf16.msra.mxu0 %v20274_v33  ;;  %v20336_v33 = vld [vmem:[%s21667_s14 + $0xbc4] ss:$16 sps:$4 sm:$0xff]  }
0x1a98   : > { %14760 = vmatpush1.bf16.msra.mxu1 %v20277_v20  ;;  %14337 = vmatprep.subr.bf16.mxu0 %v20282_v16  ;;  %v20339_v20 = vld [vmem:[%s21667_s14 + $0xbcc] ss:$16 sps:$4 sm:$0xff]   ;;  %v20334_v16 = vld [vmem:[%s21667_s14 + $0xbc0] ss:$16 sps:$4 sm:$0xff]  }
0x1a99   : > { %14761 = vmatprep.subr.bf16.mxu1 %v20285_v51  ;;  %v20337_v51 = vld [vmem:[%s21667_s14 + $0xbc8] ss:$16 sps:$4 sm:$0xff]  }
0x1a9b   : > { %14338 = vmatpush1.bf16.msra.mxu0 %v20280_v19  ;;  %v20342_v19 = vld [vmem:[%s21667_s14 + $0xbe4] ss:$16 sps:$4 sm:$0xff]  }
0x1a9c   : > { %14762 = vmatpush1.bf16.msra.mxu1 %v20283_v57  ;;  %14339 = vmatprep.subr.bf16.mxu0 %v20288_v7  ;;  %v20345_v57 = vld [vmem:[%s21667_s14 + $0xbec] ss:$16 sps:$4 sm:$0xff]   ;;  %v20340_v7 = vld [vmem:[%s21667_s14 + $0xbe0] ss:$16 sps:$4 sm:$0xff]  }
0x1a9d   : > { %14763 = vmatprep.subr.bf16.mxu1 %v20291_v39  ;;  %v20343_v39 = vld [vmem:[%s21667_s14 + $0xbe8] ss:$16 sps:$4 sm:$0xff]  }
0x1a9f   : > { %14340 = vmatpush1.bf16.msra.mxu0 %v20286_v3  ;;  %v20348_v3 = vld [vmem:[%s21667_s14 + $0xc04] ss:$16 sps:$4 sm:$0xff]  }
0x1aa0   : > { %14764 = vmatpush1.bf16.msra.mxu1 %v20289_v30  ;;  %14341 = vmatprep.subr.bf16.mxu0 %v20294_v49  ;;  %v20351_v30 = vld [vmem:[%s21667_s14 + $0xc0c] ss:$16 sps:$4 sm:$0xff]   ;;  %v20346_v49 = vld [vmem:[%s21667_s14 + $0xc00] ss:$16 sps:$4 sm:$0xff]  }
0x1aa1   : > { %14765 = vmatprep.subr.bf16.mxu1 %v20297_v60  ;;  %v20349_v60 = vld [vmem:[%s21667_s14 + $0xc08] ss:$16 sps:$4 sm:$0xff]  }
0x1aa3   : > { %14342 = vmatpush1.bf16.msra.mxu0 %v20292_v21  ;;  %v20354_v21 = vld [vmem:[%s21667_s14 + $0xc24] ss:$16 sps:$4 sm:$0xff]  }
0x1aa4   : > { %14766 = vmatpush1.bf16.msra.mxu1 %v20295_v54  ;;  %14343 = vmatprep.subr.bf16.mxu0 %v20300_v12  ;;  %v20357_v54 = vld [vmem:[%s21667_s14 + $0xc2c] ss:$16 sps:$4 sm:$0xff]   ;;  %v20352_v12 = vld [vmem:[%s21667_s14 + $0xc20] ss:$16 sps:$4 sm:$0xff]  }
0x1aa5   : > { %14767 = vmatprep.subr.bf16.mxu1 %v20303_v40  ;;  %v20355_v40 = vld [vmem:[%s21667_s14 + $0xc28] ss:$16 sps:$4 sm:$0xff]  }
0x1aa7   : > { %14344 = vmatpush1.bf16.msra.mxu0 %v20298_v36  ;;  %v20360_v36 = vld [vmem:[%s21667_s14 + $0xc44] ss:$16 sps:$4 sm:$0xff]  }
0x1aa8   : > { %14768 = vmatpush1.bf16.msra.mxu1 %v20301_v58  ;;  %14345 = vmatprep.subr.bf16.mxu0 %v20306_v55  ;;  %v20363_v58 = vld [vmem:[%s21667_s14 + $0xc4c] ss:$16 sps:$4 sm:$0xff]   ;;  %v20358_v55 = vld [vmem:[%s21667_s14 + $0xc40] ss:$16 sps:$4 sm:$0xff]  }
0x1aa9   : > { %14769 = vmatprep.subr.bf16.mxu1 %v20309_v62  ;;  %v20366_v62 = vld [vmem:[%s21667_s14 + $0xc64] ss:$16 sps:$4 sm:$0xff]  }
0x1aab   : > { %14346 = vmatpush1.bf16.msra.mxu0 %v20304_v10  ;;  %v20364_v10 = vld [vmem:[%s21667_s14 + $0xc60] ss:$16 sps:$4 sm:$0xff]  }
0x1aac   : > { %14770 = vmatpush1.bf16.msra.mxu1 %v20307_v6  ;;  %14347 = vmatprep.subr.bf16.mxu0 %v20312_v35  ;;  %v20367_v6 = vld [vmem:[%s21667_s14 + $0xc68] ss:$16 sps:$4 sm:$0xff]   ;;  %v20372_v35 = vld [vmem:[%s21667_s14 + $0xc84] ss:$16 sps:$4 sm:$0xff]  }
0x1aad   : > { %14771 = vmatprep.subr.bf16.mxu1 %v20315_v28  ;;  %v20375_v28 = vld [vmem:[%s21667_s14 + $0xc8c] ss:$16 sps:$4 sm:$0xff]  }
0x1aaf   : > { %14348 = vmatpush1.bf16.msra.mxu0 %v20310_v1  ;;  %v20373_v1 = vld [vmem:[%s21667_s14 + $0xc88] ss:$16 sps:$4 sm:$0xff]  }
0x1ab0   : > { %14772 = vmatpush1.bf16.msra.mxu1 %v20313_v13  ;;  %14349 = vmatprep.subr.bf16.mxu0 %v20318_v47  ;;  %v20378_v13 = vld [vmem:[%s21667_s14 + $0xca4] ss:$16 sps:$4 sm:$0xff]   ;;  %v20376_v47 = vld [vmem:[%s21667_s14 + $0xca0] ss:$16 sps:$4 sm:$0xff]  }
0x1ab1   : > { %14773 = vmatprep.subr.bf16.mxu1 %v20321_v63  ;;  %v20379_v63 = vld [vmem:[%s21667_s14 + $0xca8] ss:$16 sps:$4 sm:$0xff]  }
0x1ab3   : > { %14350 = vmatpush1.bf16.msra.mxu0 %v20316_v61  ;;  %v20384_v61 = vld [vmem:[%s21667_s14 + $0xcc4] ss:$16 sps:$4 sm:$0xff]  }
0x1ab4   : > { %14774 = vmatpush1.bf16.msra.mxu1 %v20319_v46  ;;  %14351 = vmatprep.subr.bf16.mxu0 %v20324_v38  ;;  %v20387_v46 = vld [vmem:[%s21667_s14 + $0xccc] ss:$16 sps:$4 sm:$0xff]   ;;  %v20382_v38 = vld [vmem:[%s21667_s14 + $0xcc0] ss:$16 sps:$4 sm:$0xff]  }
0x1ab5   : > { %14775 = vmatprep.subr.bf16.mxu1 %v20327_v56  ;;  %v20385_v56 = vld [vmem:[%s21667_s14 + $0xcc8] ss:$16 sps:$4 sm:$0xff]  }
0x1ab7   : > { %14352 = vmatpush1.bf16.msra.mxu0 %v20322_v8  ;;  %v20390_v8 = vld [vmem:[%s21667_s14 + $0xce4] ss:$16 sps:$4 sm:$0xff]  }
0x1ab8   : > { %14776 = vmatpush1.bf16.msra.mxu1 %v20325_v25  ;;  %14353 = vmatprep.subr.bf16.mxu0 %v20330_v32  ;;  %v20393_v25 = vld [vmem:[%s21667_s14 + $0xcec] ss:$16 sps:$4 sm:$0xff]   ;;  %v20388_v32 = vld [vmem:[%s21667_s14 + $0xce0] ss:$16 sps:$4 sm:$0xff]  }
0x1ab9   : > { %14777 = vmatprep.subr.bf16.mxu1 %v20333_v15  ;;  %v20391_v15 = vld [vmem:[%s21667_s14 + $0xce8] ss:$16 sps:$4 sm:$0xff]  }
0x1abb   : > { %14354 = vmatpush1.bf16.msra.mxu0 %v20328_v14  ;;  %v20396_v14 = vld [vmem:[%s21667_s14 + $0xd04] ss:$16 sps:$4 sm:$0xff]  }
0x1abc   : > { %14778 = vmatpush1.bf16.msra.mxu1 %v20331_v11  ;;  %14355 = vmatprep.subr.bf16.mxu0 %v20336_v33  ;;  %v20399_v11 = vld [vmem:[%s21667_s14 + $0xd0c] ss:$16 sps:$4 sm:$0xff]   ;;  %v20394_v33 = vld [vmem:[%s21667_s14 + $0xd00] ss:$16 sps:$4 sm:$0xff]  }
0x1abd   : > { %14779 = vmatprep.subr.bf16.mxu1 %v20339_v20  ;;  %v20397_v20 = vld [vmem:[%s21667_s14 + $0xd08] ss:$16 sps:$4 sm:$0xff]  }
0x1abf   : > { %14356 = vmatpush1.bf16.msra.mxu0 %v20334_v16  ;;  %v20402_v16 = vld [vmem:[%s21667_s14 + $0xd24] ss:$16 sps:$4 sm:$0xff]  }
0x1ac0   : > { %14780 = vmatpush1.bf16.msra.mxu1 %v20337_v51  ;;  %14357 = vmatprep.subr.bf16.mxu0 %v20342_v19  ;;  %v20405_v51 = vld [vmem:[%s21667_s14 + $0xd2c] ss:$16 sps:$4 sm:$0xff]   ;;  %v20400_v19 = vld [vmem:[%s21667_s14 + $0xd20] ss:$16 sps:$4 sm:$0xff]  }
0x1ac1   : > { %14781 = vmatprep.subr.bf16.mxu1 %v20345_v57  ;;  %v20403_v57 = vld [vmem:[%s21667_s14 + $0xd28] ss:$16 sps:$4 sm:$0xff]  }
0x1ac3   : > { %14358 = vmatpush1.bf16.msra.mxu0 %v20340_v7  ;;  %v20408_v7 = vld [vmem:[%s21667_s14 + $0xd44] ss:$16 sps:$4 sm:$0xff]  }
0x1ac4   : > { %14782 = vmatpush1.bf16.msra.mxu1 %v20343_v39  ;;  %14380 = vmatprep.subr.bf16.mxu0 %v20348_v3  ;;  %v20411_v39 = vld [vmem:[%s21667_s14 + $0xd4c] ss:$16 sps:$4 sm:$0xff]   ;;  %v20406_v3 = vld [vmem:[%s21667_s14 + $0xd40] ss:$16 sps:$4 sm:$0xff]  }
0x1ac5   : > { %14804 = vmatprep.subr.bf16.mxu1 %v20351_v30  ;;  %v20409_v30 = vld [vmem:[%s21667_s14 + $0xd48] ss:$16 sps:$4 sm:$0xff]  }
0x1ac6   : > { %14360 = vmatmul.mubr.bf16.vlgmr.msra.gmra.mrb[128].mxu0 %v24052_v27 }
0x1ac7   : > { %14784 = vmatmul.mubr.bf16.vlgmr.msra.gmra.mrb[128].mxu1 %v24052_v27  ;;  %14369 = vmatprep.mubr.bf16.mxu0 %v24081_v59  ;;  %v20361_v27 = vld [vmem:[%s21667_s14 + $0xc48] ss:$16 sps:$4 sm:$0xff]  }
0x1ac8   : > { %14381 = vmatpush1.bf16.msra.mxu0 %v20346_v49  ;;  %14793 = vmatprep.mubr.bf16.mxu1 %v24081_v59  ;;  %v20369_v59 = vld [vmem:[%s21667_s14 + $0xc6c] ss:$16 sps:$4 sm:$0xff]   ;;  %v20414_v49 = vld [vmem:[%s21667_s14 + $0xd64] ss:$16 sps:$4 sm:$0xff]  }
0x1ac9   : > { %14805 = vmatpush1.bf16.msra.mxu1 %v20349_v60  ;;  %14382 = vmatprep.subr.bf16.mxu0 %v20354_v21  ;;  %v20417_v60 = vld [vmem:[%s21667_s14 + $0xd6c] ss:$16 sps:$4 sm:$0xff]   ;;  %v20412_v21 = vld [vmem:[%s21667_s14 + $0xd60] ss:$16 sps:$4 sm:$0xff]  }
0x1aca   : > { %14806 = vmatprep.subr.bf16.mxu1 %v20357_v54  ;;  %v20415_v54 = vld [vmem:[%s21667_s14 + $0xd68] ss:$16 sps:$4 sm:$0xff]  }
0x1acc   : > { %14383 = vmatpush1.bf16.msra.mxu0 %v20352_v12  ;;  %v20420_v12 = vld [vmem:[%s21667_s14 + $0xd84] ss:$16 sps:$4 sm:$0xff]  }
0x1acd   : > { %14807 = vmatpush1.bf16.msra.mxu1 %v20355_v40  ;;  %14384 = vmatprep.subr.bf16.mxu0 %v20360_v36  ;;  %v20423_v40 = vld [vmem:[%s21667_s14 + $0xd8c] ss:$16 sps:$4 sm:$0xff]   ;;  %v20418_v36 = vld [vmem:[%s21667_s14 + $0xd80] ss:$16 sps:$4 sm:$0xff]  }
0x1ace   : > { %14370 = vmatmul.mubr.bf16.gmra.mrb[132].mxu0 %v24076_v42  ;;  %14808 = vmatprep.subr.bf16.mxu1 %v20363_v58  ;;  %v20421_v58 = vld [vmem:[%s21667_s14 + $0xd88] ss:$16 sps:$4 sm:$0xff]  }
0x1acf   : > { %14794 = vmatmul.mubr.bf16.gmra.mrb[132].mxu1 %v24076_v42  ;;  %14412 = vmatprep.mubr.bf16.mxu0 %v24250_v4  ;;  %v20370_v42 = vld [vmem:[%s21667_s14 + $0xc80] ss:$16 sps:$4 sm:$0xff]  }
0x1ad0   : > { %14385 = vmatpush1.bf16.msra.mxu0 %v20358_v55  ;;  %14836 = vmatprep.mubr.bf16.mxu1 %v24250_v4  ;;  %v20381_v4 = vld [vmem:[%s21667_s14 + $0xcac] ss:$16 sps:$4 sm:$0xff]   ;;  %v20426_v55 = vld [vmem:[%s21667_s14 + $0xda4] ss:$16 sps:$4 sm:$0xff]  }
0x1ad1   : > { %14809 = vmatpush1.bf16.msra.mxu1 %v20361_v27  ;;  %14386 = vmatprep.subr.bf16.mxu0 %v20366_v62  ;;  %v20429_v27 = vld [vmem:[%s21667_s14 + $0xdac] ss:$16 sps:$4 sm:$0xff]   ;;  %v20424_v62 = vld [vmem:[%s21667_s14 + $0xda0] ss:$16 sps:$4 sm:$0xff]  }
0x1ad2   : > { %14810 = vmatprep.subr.bf16.mxu1 %v20369_v59  ;;  %v20427_v59 = vld [vmem:[%s21667_s14 + $0xda8] ss:$16 sps:$4 sm:$0xff]  }
0x1ad4   : > { %14387 = vmatpush1.bf16.msra.mxu0 %v20364_v10  ;;  %v20432_v10 = vld [vmem:[%s21667_s14 + $0xdc4] ss:$16 sps:$4 sm:$0xff]  }
0x1ad5   : > { %14811 = vmatpush1.bf16.msra.mxu1 %v20367_v6  ;;  %14388 = vmatprep.subr.bf16.mxu0 %v20372_v35  ;;  %v20435_v6 = vld [vmem:[%s21667_s14 + $0xdcc] ss:$16 sps:$4 sm:$0xff]   ;;  %v20430_v35 = vld [vmem:[%s21667_s14 + $0xdc0] ss:$16 sps:$4 sm:$0xff]  }
0x1ad6   : > { %14812 = vmatprep.subr.bf16.mxu1 %v20375_v28  ;;  %v20433_v28 = vld [vmem:[%s21667_s14 + $0xdc8] ss:$16 sps:$4 sm:$0xff]  }
0x1ad8   : > { %14389 = vmatpush1.bf16.msra.mxu0 %v20370_v42  ;;  %v20438_v42 = vld [vmem:[%s21667_s14 + $0xde4] ss:$16 sps:$4 sm:$0xff]  }
0x1ad9   : > { %14813 = vmatpush1.bf16.msra.mxu1 %v20373_v1  ;;  %14390 = vmatprep.subr.bf16.mxu0 %v20378_v13  ;;  %v20441_v1 = vld [vmem:[%s21667_s14 + $0xdec] ss:$16 sps:$4 sm:$0xff]   ;;  %v20436_v13 = vld [vmem:[%s21667_s14 + $0xde0] ss:$16 sps:$4 sm:$0xff]  }
0x1ada   : > { %14814 = vmatprep.subr.bf16.mxu1 %v20381_v4  ;;  %v20439_v4 = vld [vmem:[%s21667_s14 + $0xde8] ss:$16 sps:$4 sm:$0xff]  }
0x1adc   : > { %14391 = vmatpush1.bf16.msra.mxu0 %v20376_v47  ;;  %v20444_v47 = vld [vmem:[%s21667_s14 + $0xe04] ss:$16 sps:$4 sm:$0xff]  }
0x1add   : > { %14815 = vmatpush1.bf16.msra.mxu1 %v20379_v63  ;;  %14392 = vmatprep.subr.bf16.mxu0 %v20384_v61  ;;  %v20447_v63 = vld [vmem:[%s21667_s14 + $0xe0c] ss:$16 sps:$4 sm:$0xff]   ;;  %v20442_v61 = vld [vmem:[%s21667_s14 + $0xe00] ss:$16 sps:$4 sm:$0xff]  }
0x1ade   : > { %14816 = vmatprep.subr.bf16.mxu1 %v20387_v46  ;;  %v20445_v46 = vld [vmem:[%s21667_s14 + $0xe08] ss:$16 sps:$4 sm:$0xff]  }
0x1ae0   : > { %14393 = vmatpush1.bf16.msra.mxu0 %v20382_v38  ;;  %v20450_v38 = vld [vmem:[%s21667_s14 + $0xe24] ss:$16 sps:$4 sm:$0xff]  }
0x1ae1   : > { %14817 = vmatpush1.bf16.msra.mxu1 %v20385_v56  ;;  %14394 = vmatprep.subr.bf16.mxu0 %v20390_v8  ;;  %v20453_v56 = vld [vmem:[%s21667_s14 + $0xe2c] ss:$16 sps:$4 sm:$0xff]   ;;  %v20448_v8 = vld [vmem:[%s21667_s14 + $0xe20] ss:$16 sps:$4 sm:$0xff]  }
0x1ae2   : > { %14818 = vmatprep.subr.bf16.mxu1 %v20393_v25  ;;  %v20451_v25 = vld [vmem:[%s21667_s14 + $0xe28] ss:$16 sps:$4 sm:$0xff]  }
0x1ae4   : > { %14395 = vmatpush1.bf16.msra.mxu0 %v20388_v32  ;;  %v20456_v32 = vld [vmem:[%s21667_s14 + $0xe44] ss:$16 sps:$4 sm:$0xff]  }
0x1ae5   : > { %14819 = vmatpush1.bf16.msra.mxu1 %v20391_v15  ;;  %14396 = vmatprep.subr.bf16.mxu0 %v20396_v14  ;;  %v20459_v15 = vld [vmem:[%s21667_s14 + $0xe4c] ss:$16 sps:$4 sm:$0xff]   ;;  %v20454_v14 = vld [vmem:[%s21667_s14 + $0xe40] ss:$16 sps:$4 sm:$0xff]  }
0x1ae6   : > { %14820 = vmatprep.subr.bf16.mxu1 %v20399_v11  ;;  %v20462_v11 = vld [vmem:[%s21667_s14 + $0xe64] ss:$16 sps:$4 sm:$0xff]  }
0x1ae8   : > { %14397 = vmatpush1.bf16.msra.mxu0 %v20394_v33  ;;  %v20460_v33 = vld [vmem:[%s21667_s14 + $0xe60] ss:$16 sps:$4 sm:$0xff]  }
0x1ae9   : > { %14821 = vmatpush1.bf16.msra.mxu1 %v20397_v20  ;;  %14398 = vmatprep.subr.bf16.mxu0 %v20402_v16  ;;  %v20463_v20 = vld [vmem:[%s21667_s14 + $0xe68] ss:$16 sps:$4 sm:$0xff]   ;;  %v20468_v16 = vld [vmem:[%s21667_s14 + $0xe84] ss:$16 sps:$4 sm:$0xff]  }
0x1aea   : > { %14822 = vmatprep.subr.bf16.mxu1 %v20405_v51  ;;  %v20471_v51 = vld [vmem:[%s21667_s14 + $0xe8c] ss:$16 sps:$4 sm:$0xff]  }
0x1aec   : > { %14399 = vmatpush1.bf16.msra.mxu0 %v20400_v19  ;;  %v20469_v19 = vld [vmem:[%s21667_s14 + $0xe88] ss:$16 sps:$4 sm:$0xff]  }
0x1aed   : > { %14823 = vmatpush1.bf16.msra.mxu1 %v20403_v57  ;;  %14400 = vmatprep.subr.bf16.mxu0 %v20408_v7  ;;  %v20474_v57 = vld [vmem:[%s21667_s14 + $0xea4] ss:$16 sps:$4 sm:$0xff]   ;;  %v20472_v7 = vld [vmem:[%s21667_s14 + $0xea0] ss:$16 sps:$4 sm:$0xff]  }
0x1aee   : > { %14824 = vmatprep.subr.bf16.mxu1 %v20411_v39  ;;  %v20475_v39 = vld [vmem:[%s21667_s14 + $0xea8] ss:$16 sps:$4 sm:$0xff]  }
0x1af0   : > { %14401 = vmatpush1.bf16.msra.mxu0 %v20406_v3  ;;  %v20480_v3 = vld [vmem:[%s21667_s14 + $0xec4] ss:$16 sps:$4 sm:$0xff]  }
0x1af1   : > { %14825 = vmatpush1.bf16.msra.mxu1 %v20409_v30  ;;  %14402 = vmatprep.subr.bf16.mxu0 %v20414_v49  ;;  %v20483_v30 = vld [vmem:[%s21667_s14 + $0xecc] ss:$16 sps:$4 sm:$0xff]   ;;  %v20478_v49 = vld [vmem:[%s21667_s14 + $0xec0] ss:$16 sps:$4 sm:$0xff]  }
0x1af2   : > { %14826 = vmatprep.subr.bf16.mxu1 %v20417_v60  ;;  %v20481_v60 = vld [vmem:[%s21667_s14 + $0xec8] ss:$16 sps:$4 sm:$0xff]  }
0x1af4   : > { %14403 = vmatpush1.bf16.msra.mxu0 %v20412_v21  ;;  %v20486_v21 = vld [vmem:[%s21667_s14 + $0xee4] ss:$16 sps:$4 sm:$0xff]  }
0x1af5   : > { %14827 = vmatpush1.bf16.msra.mxu1 %v20415_v54  ;;  %14404 = vmatprep.subr.bf16.mxu0 %v20420_v12  ;;  %v20489_v54 = vld [vmem:[%s21667_s14 + $0xeec] ss:$16 sps:$4 sm:$0xff]   ;;  %v20484_v12 = vld [vmem:[%s21667_s14 + $0xee0] ss:$16 sps:$4 sm:$0xff]  }
0x1af6   : > { %14828 = vmatprep.subr.bf16.mxu1 %v20423_v40  ;;  %v20487_v40 = vld [vmem:[%s21667_s14 + $0xee8] ss:$16 sps:$4 sm:$0xff]  }
0x1af8   : > { %14405 = vmatpush1.bf16.msra.mxu0 %v20418_v36  ;;  %v20492_v36 = vld [vmem:[%s21667_s14 + $0xf04] ss:$16 sps:$4 sm:$0xff]  }
0x1af9   : > { %14829 = vmatpush1.bf16.msra.mxu1 %v20421_v58  ;;  %14406 = vmatprep.subr.bf16.mxu0 %v20426_v55  ;;  %v20495_v58 = vld [vmem:[%s21667_s14 + $0xf0c] ss:$16 sps:$4 sm:$0xff]   ;;  %v20490_v55 = vld [vmem:[%s21667_s14 + $0xf00] ss:$16 sps:$4 sm:$0xff]  }
0x1afa   : > { %14830 = vmatprep.subr.bf16.mxu1 %v20429_v27  ;;  %v20493_v27 = vld [vmem:[%s21667_s14 + $0xf08] ss:$16 sps:$4 sm:$0xff]  }
0x1afc   : > { %14407 = vmatpush1.bf16.msra.mxu0 %v20424_v62  ;;  %v20498_v62 = vld [vmem:[%s21667_s14 + $0xf24] ss:$16 sps:$4 sm:$0xff]  }
0x1afd   : > { %14831 = vmatpush1.bf16.msra.mxu1 %v20427_v59  ;;  %14408 = vmatprep.subr.bf16.mxu0 %v20432_v10  ;;  %v20501_v59 = vld [vmem:[%s21667_s14 + $0xf2c] ss:$16 sps:$4 sm:$0xff]   ;;  %v20496_v10 = vld [vmem:[%s21667_s14 + $0xf20] ss:$16 sps:$4 sm:$0xff]  }
0x1afe   : > { %14832 = vmatprep.subr.bf16.mxu1 %v20435_v6  ;;  %v20499_v6 = vld [vmem:[%s21667_s14 + $0xf28] ss:$16 sps:$4 sm:$0xff]  }
0x1b00   : > { %14409 = vmatpush1.bf16.msra.mxu0 %v20430_v35  ;;  %v20504_v35 = vld [vmem:[%s21667_s14 + $0xf44] ss:$16 sps:$4 sm:$0xff]  }
0x1b01   : > { %14833 = vmatpush1.bf16.msra.mxu1 %v20433_v28  ;;  %14410 = vmatprep.subr.bf16.mxu0 %v20438_v42  ;;  %v20507_v28 = vld [vmem:[%s21667_s14 + $0xf4c] ss:$16 sps:$4 sm:$0xff]   ;;  %v20502_v42 = vld [vmem:[%s21667_s14 + $0xf40] ss:$16 sps:$4 sm:$0xff]  }
0x1b02   : > { %14834 = vmatprep.subr.bf16.mxu1 %v20441_v1  ;;  %v20505_v1 = vld [vmem:[%s21667_s14 + $0xf48] ss:$16 sps:$4 sm:$0xff]  }
0x1b04   : > { %14411 = vmatpush1.bf16.msra.mxu0 %v20436_v13  ;;  %v20510_v13 = vld [vmem:[%s21667_s14 + $0xf64] ss:$16 sps:$4 sm:$0xff]  }
0x1b05   : > { %14835 = vmatpush1.bf16.msra.mxu1 %v20439_v4  ;;  %14433 = vmatprep.subr.bf16.mxu0 %v20444_v47  ;;  %v20513_v4 = vld [vmem:[%s21667_s14 + $0xf6c] ss:$16 sps:$4 sm:$0xff]   ;;  %v20508_v47 = vld [vmem:[%s21667_s14 + $0xf60] ss:$16 sps:$4 sm:$0xff]  }
0x1b06   : > { %14857 = vmatprep.subr.bf16.mxu1 %v20447_v63  ;;  %v20511_v63 = vld [vmem:[%s21667_s14 + $0xf68] ss:$16 sps:$4 sm:$0xff]  }
0x1b07   : > { %14413 = vmatmul.mubr.bf16.vlgmr.msra.gmra.mrb[128].mxu0 %v24244_v31 }
0x1b08   : > { %14837 = vmatmul.mubr.bf16.vlgmr.msra.gmra.mrb[128].mxu1 %v24244_v31  ;;  %14422 = vmatprep.mubr.bf16.mxu0 %v24274_v45  ;;  %v20457_v31 = vld [vmem:[%s21667_s14 + $0xe48] ss:$16 sps:$4 sm:$0xff]  }
0x1b09   : > { %14434 = vmatpush1.bf16.msra.mxu0 %v20442_v61  ;;  %14846 = vmatprep.mubr.bf16.mxu1 %v24274_v45  ;;  %v20465_v45 = vld [vmem:[%s21667_s14 + $0xe6c] ss:$16 sps:$4 sm:$0xff]   ;;  %v20516_v61 = vld [vmem:[%s21667_s14 + $0xf84] ss:$16 sps:$4 sm:$0xff]  }
0x1b0a   : > { %14858 = vmatpush1.bf16.msra.mxu1 %v20445_v46  ;;  %14435 = vmatprep.subr.bf16.mxu0 %v20450_v38  ;;  %v20519_v46 = vld [vmem:[%s21667_s14 + $0xf8c] ss:$16 sps:$4 sm:$0xff]   ;;  %v20514_v38 = vld [vmem:[%s21667_s14 + $0xf80] ss:$16 sps:$4 sm:$0xff]  }
0x1b0b   : > { %14859 = vmatprep.subr.bf16.mxu1 %v20453_v56  ;;  %v20517_v56 = vld [vmem:[%s21667_s14 + $0xf88] ss:$16 sps:$4 sm:$0xff]  }
0x1b0d   : > { %14436 = vmatpush1.bf16.msra.mxu0 %v20448_v8  ;;  %v20522_v8 = vld [vmem:[%s21667_s14 + $0xfa4] ss:$16 sps:$4 sm:$0xff]  }
0x1b0e   : > { %14860 = vmatpush1.bf16.msra.mxu1 %v20451_v25  ;;  %14437 = vmatprep.subr.bf16.mxu0 %v20456_v32  ;;  %v20525_v25 = vld [vmem:[%s21667_s14 + $0xfac] ss:$16 sps:$4 sm:$0xff]   ;;  %v20520_v32 = vld [vmem:[%s21667_s14 + $0xfa0] ss:$16 sps:$4 sm:$0xff]  }
0x1b0f   : > { %14423 = vmatmul.mubr.bf16.gmra.mrb[132].mxu0 %v24268_v43  ;;  %14861 = vmatprep.subr.bf16.mxu1 %v20459_v15  ;;  %v20523_v15 = vld [vmem:[%s21667_s14 + $0xfa8] ss:$16 sps:$4 sm:$0xff]  }
0x1b10   : > { %14847 = vmatmul.mubr.bf16.gmra.mrb[132].mxu1 %v24268_v43  ;;  %14465 = vmatprep.mubr.bf16.mxu0 %v24253_v34  ;;  %v20466_v43 = vld [vmem:[%s21667_s14 + $0xe80] ss:$16 sps:$4 sm:$0xff]  }
0x1b11   : > { %14438 = vmatpush1.bf16.msra.mxu0 %v20454_v14  ;;  %14889 = vmatprep.mubr.bf16.mxu1 %v24253_v34  ;;  %v20477_v34 = vld [vmem:[%s21667_s14 + $0xeac] ss:$16 sps:$4 sm:$0xff]   ;;  %v20528_v14 = vld [vmem:[%s21667_s14 + $0xfc4] ss:$16 sps:$4 sm:$0xff]  }
0x1b12   : > { %14862 = vmatpush1.bf16.msra.mxu1 %v20457_v31  ;;  %14439 = vmatprep.subr.bf16.mxu0 %v20462_v11  ;;  %v20531_v31 = vld [vmem:[%s21667_s14 + $0xfcc] ss:$16 sps:$4 sm:$0xff]   ;;  %v20526_v11 = vld [vmem:[%s21667_s14 + $0xfc0] ss:$16 sps:$4 sm:$0xff]  }
0x1b13   : > { %14863 = vmatprep.subr.bf16.mxu1 %v20465_v45  ;;  %v20529_v45 = vld [vmem:[%s21667_s14 + $0xfc8] ss:$16 sps:$4 sm:$0xff]  }
0x1b15   : > { %14440 = vmatpush1.bf16.msra.mxu0 %v20460_v33  ;;  %v20534_v33 = vld [vmem:[%s21667_s14 + $0xfe4] ss:$16 sps:$4 sm:$0xff]  }
0x1b16   : > { %14864 = vmatpush1.bf16.msra.mxu1 %v20463_v20  ;;  %14441 = vmatprep.subr.bf16.mxu0 %v20468_v16  ;;  %v20537_v20 = vld [vmem:[%s21667_s14 + $0xfec] ss:$16 sps:$4 sm:$0xff]   ;;  %v20532_v16 = vld [vmem:[%s21667_s14 + $0xfe0] ss:$16 sps:$4 sm:$0xff]  }
0x1b17   : > { %14865 = vmatprep.subr.bf16.mxu1 %v20471_v51  ;;  %v20535_v51 = vld [vmem:[%s21667_s14 + $0xfe8] ss:$16 sps:$4 sm:$0xff]  }
0x1b19   : > { %14442 = vmatpush1.bf16.msra.mxu0 %v20466_v43  ;;  %v16545_v43 = vld [vmem:[%s21673_s8 + $0x3] ss:$8 sm:$0xf] }
0x1b1a   : > { %14866 = vmatpush1.bf16.msra.mxu1 %v20469_v19  ;;  %14443 = vmatprep.subr.bf16.mxu0 %v20474_v57  ;;  %v11485_v19 = vrot.slane %v16545_v43, %v22880_v53  ;;  %v11489_v57 = vrot.slane %v16545_v43, %v22884_v52 }
0x1b1b   : > { %14867 = vmatprep.subr.bf16.mxu1 %v20477_v34 }
0x1b1d   : > { %14444 = vmatpush1.bf16.msra.mxu0 %v20472_v7  ;;  %v11493_v7 = vrot.slane %v16545_v43, %v22887_v5 }
0x1b1e   : > { %14868 = vmatpush1.bf16.msra.mxu1 %v20475_v39  ;;  %14445 = vmatprep.subr.bf16.mxu0 %v20480_v3 }
0x1b1f   : > { %14869 = vmatprep.subr.bf16.mxu1 %v20483_v30 }
0x1b21   : > { %14446 = vmatpush1.bf16.msra.mxu0 %v20478_v49  ;;  %v11497_v49 = vrot.slane %v16545_v43, %v22892_v23 }
0x1b22   : > { %14870 = vmatpush1.bf16.msra.mxu1 %v20481_v60  ;;  %14447 = vmatprep.subr.bf16.mxu0 %v20486_v21 }
0x1b23   : > { %14871 = vmatprep.subr.bf16.mxu1 %v20489_v54 }
0x1b25   : > { %14448 = vmatpush1.bf16.msra.mxu0 %v20484_v12 }
0x1b26   : > { %14872 = vmatpush1.bf16.msra.mxu1 %v20487_v40  ;;  %14449 = vmatprep.subr.bf16.mxu0 %v20492_v36 }
0x1b27   : > { %14873 = vmatprep.subr.bf16.mxu1 %v20495_v58 }
0x1b29   : > { %14450 = vmatpush1.bf16.msra.mxu0 %v20490_v55 }
0x1b2a   : > { %14874 = vmatpush1.bf16.msra.mxu1 %v20493_v27  ;;  %14451 = vmatprep.subr.bf16.mxu0 %v20498_v62 }
0x1b2b   : > { %14875 = vmatprep.subr.bf16.mxu1 %v20501_v59 }
0x1b2d   : > { %14452 = vmatpush1.bf16.msra.mxu0 %v20496_v10 }
0x1b2e   : > { %14876 = vmatpush1.bf16.msra.mxu1 %v20499_v6  ;;  %14453 = vmatprep.subr.bf16.mxu0 %v20504_v35 }
0x1b2f   : > { %14877 = vmatprep.subr.bf16.mxu1 %v20507_v28 }
0x1b31   : > { %14454 = vmatpush1.bf16.msra.mxu0 %v20502_v42 }
0x1b32   : > { %14878 = vmatpush1.bf16.msra.mxu1 %v20505_v1  ;;  %14455 = vmatprep.subr.bf16.mxu0 %v20510_v13 }
0x1b33   : > { %14879 = vmatprep.subr.bf16.mxu1 %v20513_v4 }
0x1b35   : > { %14456 = vmatpush1.bf16.msra.mxu0 %v20508_v47 }
0x1b36   : > { %14880 = vmatpush1.bf16.msra.mxu1 %v20511_v63  ;;  %14457 = vmatprep.subr.bf16.mxu0 %v20516_v61 }
0x1b37   : > { %14881 = vmatprep.subr.bf16.mxu1 %v20519_v46 }
0x1b39   : > { %14458 = vmatpush1.bf16.msra.mxu0 %v20514_v38 }
0x1b3a   : > { %14882 = vmatpush1.bf16.msra.mxu1 %v20517_v56  ;;  %14459 = vmatprep.subr.bf16.mxu0 %v20522_v8 }
0x1b3b   : > { %14883 = vmatprep.subr.bf16.mxu1 %v20525_v25 }
0x1b3d   : > { %14460 = vmatpush1.bf16.msra.mxu0 %v20520_v32 }
0x1b3e   : > { %14884 = vmatpush1.bf16.msra.mxu1 %v20523_v15  ;;  %14461 = vmatprep.subr.bf16.mxu0 %v20528_v14 }
0x1b3f   : > { %14885 = vmatprep.subr.bf16.mxu1 %v20531_v31 }
0x1b41   : > { %14462 = vmatpush1.bf16.msra.mxu0 %v20526_v11 }
0x1b42   : > { %14886 = vmatpush1.bf16.msra.mxu1 %v20529_v45  ;;  %14463 = vmatprep.subr.bf16.mxu0 %v20534_v33 }
0x1b43   : > { %14887 = vmatprep.subr.bf16.mxu1 %v20537_v20 }
0x1b45   : > { %14464 = vmatpush1.bf16.msra.mxu0 %v20532_v16 }
0x1b46   : > { %14888 = vmatpush1.bf16.msra.mxu1 %v20535_v51 }
0x1b48   : > { %14466 = vmatmul.mubr.bf16.vlgmr.msra.gmra.mrb[128].mxu0 %v24248_v26 }
0x1b49   : > { %14890 = vmatmul.mubr.bf16.vlgmr.msra.gmra.mrb[128].mxu1 %v24248_v26  ;;  %14475 = vmatprep.mubr.bf16.mxu0 %v24277_v50 }
0x1b4a   : > { %14899 = vmatprep.mubr.bf16.mxu1 %v24277_v50 }
0x1b50   : > { %14476 = vmatmul.mubr.bf16.gmra.mrb[132].mxu0 %v24272_v24 }
0x1b51   : > { %14900 = vmatmul.mubr.bf16.gmra.mrb[132].mxu1 %v24272_v24 }
0x1c1b   : > { %v14467_v34 = vpop.f32.mrb[128].mxu0 }
0x1c1c   : > { %v18593_v39 = vadd.f32 %v14467_v34, %v11485_v19  ;;  %v14891_v3 = vpop.f32.mrb[128].mxu1  ;;  %v14469_v30 = vpop.f32.mrb[129].mxu0 }
0x1c1d   : > { %v18594_v26 = vadd.f32 %v14469_v30, %v11489_v57  ;;  %v14893_v60 = vpop.f32.mrb[129].mxu1  ;;  %v14471_v50 = vpop.f32.mrb[130].mxu0  ;;  %v18601_v24 = vadd.f32 %v14891_v3, %v11493_v7 }
0x1c1e   : > { %v18595_v21 = vadd.f32 %v14471_v50, %v11485_v19  ;;  %v14895_v54 = vpop.f32.mrb[130].mxu1  ;;  %v14473_v12 = vpop.f32.mrb[131].mxu0  ;;  %v18602_v55 = vadd.f32 %v14893_v60, %v11497_v49 }
0x1c1f   : > { %v14910_v40 = vadd.f32 %v18594_v26, %v18593_v39  ;;  %v18596_v36 = vadd.f32 %v14473_v12, %v11489_v57  ;;  %v14897_v58 = vpop.f32.mrb[131].mxu1  ;;  %v18603_v62 = vadd.f32 %v14895_v54, %v11493_v7 }
0x1c20   : > { %v18604_v6 = vadd.f32 %v14897_v58, %v11497_v49 }
0x1c21   : > { %v14911_v27 = vadd.f32 %v18601_v24, %v14910_v40  ;;  %v14915_v59 = vadd.f32 %v18596_v36, %v18595_v21 }
0x1c23   : > { %v14912_v10 = vadd.f32 %v18602_v55, %v14911_v27  ;;  %v14916_v35 = vadd.f32 %v18603_v62, %v14915_v59  ;;  %v14477_v28 = vpop.f32.mrb[132].mxu0 }
0x1c24   : > { %v18597_v42 = vadd.f32 %v14477_v28, %v11485_v19  ;;  %v14901_v1 = vpop.f32.mrb[132].mxu1  ;;  %v14479_v13 = vpop.f32.mrb[133].mxu0 }
0x1c25   : > { %v14917_v4 = vadd.f32 %v18604_v6, %v14916_v35  ;;  %v18598_v47 = vadd.f32 %v14479_v13, %v11489_v57  ;;  %v14903_v63 = vpop.f32.mrb[133].mxu1  ;;  %v14481_v61 = vpop.f32.mrb[134].mxu0  ;;  %14913 = vadd.xlane.f32.xlu0 %v14912_v10  ;;  %v18605_v8 = vadd.f32 %v14901_v1, %v11493_v7 }
0x1c26   : > { %v18599_v46 = vadd.f32 %v14481_v61, %v11485_v19  ;;  %v14905_v38 = vpop.f32.mrb[134].mxu1  ;;  %v14483_v56 = vpop.f32.mrb[135].mxu0  ;;  %v18606_v14 = vadd.f32 %v14903_v63, %v11497_v49 }
0x1c27   : > { %v14920_v25 = vadd.f32 %v18598_v47, %v18597_v42  ;;  %v18600_v32 = vadd.f32 %v14483_v56, %v11489_v57  ;;  %v14907_v15 = vpop.f32.mrb[135].mxu1  ;;  %14918 = vadd.xlane.f32.xlu1 %v14917_v4  ;;  %v18607_v11 = vadd.f32 %v14905_v38, %v11493_v7 }
0x1c28   : > { %v18608_v20 = vadd.f32 %v14907_v15, %v11497_v49 }
0x1c29   : > { %v14921_v31 = vadd.f32 %v18605_v8, %v14920_v25  ;;  %v14925_v45 = vadd.f32 %v18600_v32, %v18599_v46 }
0x1c2b   : > { %v14922_v33 = vadd.f32 %v18606_v14, %v14921_v31  ;;  %v14926_v16 = vadd.f32 %v18607_v11, %v14925_v45 }
0x1c2d   : > { %v14927_v51 = vadd.f32 %v18608_v20, %v14926_v16  ;;  %14923 = vadd.xlane.f32.xlu0 %v14922_v33 }
0x1c2f   : > { %14928 = vadd.xlane.f32.xlu1 %v14927_v51 }
0x1cb2   : > { %v14914_v43 = vpop.xlane.xlu0 %14913 }
0x1cb3   : > { %v14930_v34 = vmul.f32 0.001953125, %v14914_v43 }
0x1cb4   : > { %v14919_v19 = vpop.xlane.xlu1 %14918 }
0x1cb5   : > { %v24604_v3 = vsub.f32 %v18593_v39, %v14930_v34  ;;  %v24606_v30 = vsub.f32 %v18594_v26, %v14930_v34  ;;  %v14931_v57 = vmul.f32 0.001953125, %v14919_v19  ;;  %v24608_v60 = vsub.f32 %v18601_v24, %v14930_v34 }
0x1cb6   : > { %v24618_v12 = vsub.f32 %v18602_v55, %v14930_v34 }
0x1cb7   : > { %v24610_v50 = vsub.f32 %v18595_v21, %v14931_v57  ;;  %v24612_v7 = vsub.f32 %v18596_v36, %v14931_v57  ;;  %v14950_v49 = vmul.f32 %v24604_v3, %v24604_v3  ;;  %v24616_v54 = vsub.f32 %v18603_v62, %v14931_v57 }
0x1cb8   : > { %v14951_v39 = vmul.f32 %v24606_v30, %v24606_v30  ;;  %v14952_v40 = vmul.f32 %v24608_v60, %v24608_v60  ;;  %v24628_v58 = vsub.f32 %v18604_v6, %v14931_v57  ;;  %v14953_v59 = vmul.f32 %v24618_v12, %v24618_v12 }
0x1cb9   : > { %v14954_v26 = vmul.f32 %v24610_v50, %v24610_v50  ;;  %v14955_v24 = vmul.f32 %v24612_v7, %v24612_v7  ;;  %v14956_v35 = vmul.f32 %v24616_v54, %v24616_v54 }
0x1cba   : > { %v14924_v21 = vpop.xlane.xlu0 %14923  ;;  %v14966_v36 = vadd.f32 %v14951_v39, %v14950_v49  ;;  %v14957_v6 = vmul.f32 %v24628_v58, %v24628_v58 }
0x1cbb   : > { %v14932_v27 = vmul.f32 0.001953125, %v14924_v21  ;;  %v14971_v62 = vadd.f32 %v14955_v24, %v14954_v26 }
0x1cbc   : > { %v14929_v55 = vpop.xlane.xlu1 %14928  ;;  %v14967_v10 = vadd.f32 %v14966_v36, %v14952_v40 }
0x1cbd   : > { %v24634_v28 = vsub.f32 %v18597_v42, %v14932_v27  ;;  %v24636_v1 = vsub.f32 %v18598_v47, %v14932_v27  ;;  %v14933_v13 = vmul.f32 0.001953125, %v14929_v55  ;;  %v24638_v4 = vsub.f32 %v18605_v8, %v14932_v27 }
0x1cbe   : > { %v14968_v63 = vadd.f32 %v14967_v10, %v14953_v59  ;;  %v14972_v61 = vadd.f32 %v14971_v62, %v14956_v35  ;;  %v24650_v15 = vsub.f32 %v18606_v14, %v14932_v27  ;;  %v16546_v62 = vld [vmem:[%s21673_s8 + $0x4] ss:$8 sm:$0xf]  ;;  %v16547_v10 = vld [vmem:[%s21673_s8 + $0x5] ss:$8 sm:$0xf] }
0x1cbf   : > { %v24642_v38 = vsub.f32 %v18599_v46, %v14933_v13  ;;  %v24644_v56 = vsub.f32 %v18600_v32, %v14933_v13  ;;  %v24646_v25 = vsub.f32 %v18607_v11, %v14933_v13  ;;  %v14958_v42 = vmul.f32 %v24634_v28, %v24634_v28 }
0x1cc0   : > { %14969 = vadd.xlane.f32.xlu0 %v14968_v63  ;;  %v14973_v47 = vadd.f32 %v14972_v61, %v14957_v6  ;;  %v14959_v8 = vmul.f32 %v24636_v1, %v24636_v1  ;;  %v24654_v31 = vsub.f32 %v18608_v20, %v14933_v13  ;;  %v14960_v11 = vmul.f32 %v24638_v4, %v24638_v4 }
0x1cc1   : > { %v14962_v46 = vmul.f32 %v24642_v38, %v24642_v38  ;;  %v14963_v32 = vmul.f32 %v24644_v56, %v24644_v56  ;;  %v14964_v14 = vmul.f32 %v24646_v25, %v24646_v25  ;;  %v14961_v16 = vmul.f32 %v24650_v15, %v24650_v15 }
0x1cc2   : > { %14974 = vadd.xlane.f32.xlu1 %v14973_v47  ;;  %v14976_v45 = vadd.f32 %v14959_v8, %v14958_v42  ;;  %v14965_v51 = vmul.f32 %v24654_v31, %v24654_v31  ;;  %v24671_v13 = vrot.slane %v16546_v62, %v22880_v53  ;;  %v24674_v63 = vrot.slane %v16546_v62, %v22884_v52 }
0x1cc3   : > { %v14981_v33 = vadd.f32 %v14963_v32, %v14962_v46  ;;  %v24677_v6 = vrot.slane %v16546_v62, %v22887_v5  ;;  %v24680_v61 = vrot.slane %v16546_v62, %v22892_v23  ;;  %v24683_v47 = vrot.slane %v16547_v10, %v22880_v53 }
0x1cc4   : > { %v14977_v20 = vadd.f32 %v14976_v45, %v14960_v11  ;;  %v24686_v8 = vrot.slane %v16547_v10, %v22884_v52  ;;  %v24689_v46 = vrot.slane %v16547_v10, %v22887_v5  ;;  %v24692_v32 = vrot.slane %v16547_v10, %v22892_v23 }
0x1cc5   : > { %v14982_v43 = vadd.f32 %v14981_v33, %v14964_v14 }
0x1cc6   : > { %v14978_v34 = vadd.f32 %v14977_v20, %v14961_v16 }
0x1cc7   : > { %v14983_v19 = vadd.f32 %v14982_v43, %v14965_v51 }
0x1cc8   : > { %14979 = vadd.xlane.f32.xlu0 %v14978_v34 }
0x1cc9   : > { %14984 = vadd.xlane.f32.xlu1 %v14983_v19 }
0x1d4d   : > { %v14970_v57 = vpop.xlane.xlu0 %14969 }
0x1d4e   : > { %v14986_v49 = vmul.f32 0.001953125, %v14970_v57 }
0x1d4f   : > { %v14975_v39 = vpop.xlane.xlu1 %14974 }
0x1d50   : > { %v14990_v26 = vadd.f32 1e-05, %v14986_v49  ;;  %v14987_v24 = vmul.f32 0.001953125, %v14975_v39 }
0x1d52   : > { %20674 = vrsqrt.f32 %v14990_v26  ;;  %v14991_v21 = vadd.f32 1e-05, %v14987_v24 }
0x1d54   : > { %20676 = vrsqrt.f32 %v14991_v21 }
0x1d55   : > { %v14980_v40 = vpop.xlane.xlu0 %14979 }
0x1d56   : > { %v14988_v36 = vmul.f32 0.001953125, %v14980_v40  ;;  %v14985_v27 = vpop.xlane.xlu1 %14984 }
0x1d57   : > { %v14989_v55 = vmul.f32 0.001953125, %v14985_v27 }
0x1d58   : > { %v14992_v59 = vadd.f32 1e-05, %v14988_v36 }
0x1d59   : > { %v14993_v35 = vadd.f32 1e-05, %v14989_v55 }
0x1d5a   : > { %20678 = vrsqrt.f32 %v14992_v59 }
0x1d5b   : > { %20680 = vrsqrt.f32 %v14993_v35 }
0x1d5c   : > { %v20675_v42 = vpop.eup %20674 }
0x1d5d   : > { %v14998_v11 = vmul.f32 %v20675_v42, %v24604_v3  ;;  %v14999_v45 = vmul.f32 %v20675_v42, %v24606_v30  ;;  %v15000_v14 = vmul.f32 %v20675_v42, %v24608_v60  ;;  %v15001_v33 = vmul.f32 %v20675_v42, %v24618_v12 }
0x1d5e   : > { %v20677_v16 = vpop.eup %20676 }
0x1d5f   : > { %v15035_v20 = vmul.f32 %v24671_v13, %v14998_v11  ;;  %v15036_v51 = vmul.f32 %v24674_v63, %v14999_v45  ;;  %v15037_v43 = vmul.f32 %v24677_v6, %v15000_v14  ;;  %v15038_v34 = vmul.f32 %v24680_v61, %v15001_v33 }
0x1d60   : > { %v15002_v19 = vmul.f32 %v20677_v16, %v24610_v50  ;;  %v15003_v57 = vmul.f32 %v20677_v16, %v24612_v7  ;;  %v15004_v3 = vmul.f32 %v20677_v16, %v24616_v54  ;;  %v15005_v30 = vmul.f32 %v20677_v16, %v24628_v58 }
0x1d61   : > { %v15072_v60 = vadd.f32 %v24683_v47, %v15035_v20  ;;  %v15073_v12 = vadd.f32 %v24686_v8, %v15036_v51  ;;  %v15074_v49 = vadd.f32 %v24689_v46, %v15037_v43  ;;  %v15075_v39 = vadd.f32 %v24692_v32, %v15038_v34 }
0x1d62   : > { %v15039_v26 = vmul.f32 %v24671_v13, %v15002_v19  ;;  %v15040_v24 = vmul.f32 %v24674_v63, %v15003_v57  ;;  %v15041_v50 = vmul.f32 %v24677_v6, %v15004_v3  ;;  %v15042_v7 = vmul.f32 %v24680_v61, %v15005_v30  ;;  %v25099_v19 = vld [vmem:[#allocation34_spill] sm:$0xff] }
0x1d63   : > { %v24715_v54 = vadd.f32 %v15072_v60, %v23171_v41  ;;  %v24718_v58 = vadd.f32 %v15073_v12, %v23167_v17  ;;  %v24721_v21 = vadd.f32 %v15074_v49, %v23331_v22  ;;  %v24724_v40 = vadd.f32 %v15075_v39, %v23314_v37 }
0x1d64   : > { %v20679_v36 = vpop.eup %20678  ;;  %v15076_v27 = vadd.f32 %v24683_v47, %v15039_v26  ;;  %v15077_v62 = vadd.f32 %v24686_v8, %v15040_v24  ;;  %v15078_v55 = vadd.f32 %v24689_v46, %v15041_v50  ;;  %v15079_v59 = vadd.f32 %v24692_v32, %v15042_v7 }
0x1d65   : > { %v20681_v41 = vpop.eup %20680  ;;  %15104 = vst [vmem:[#allocation2] sm:$0xff] %v24715_v54  ;;  %15105 = vst [vmem:[#allocation2 + $0x8] sm:$0xff] %v24718_v58  ;;  %v15006_v17 = vmul.f32 %v20679_v36, %v24634_v28  ;;  %v15007_v37 = vmul.f32 %v20679_v36, %v24636_v1  ;;  %v15008_v22 = vmul.f32 %v20679_v36, %v24638_v4 }
0x1d66   : > { %15106 = vst [vmem:[#allocation2 + $0x10] sm:$0xff] %v24721_v21  ;;  %15107 = vst [vmem:[#allocation2 + $0x18] sm:$0xff] %v24724_v40  ;;  %v15009_v10 = vmul.f32 %v20679_v36, %v24650_v15  ;;  %v24739_v35 = vadd.f32 %v15076_v27, %v23173_v48  ;;  %v24742_v42 = vadd.f32 %v15077_v62, %v23169_v9 }
0x1d67   : > { %v24745_v11 = vadd.f32 %v15078_v55, %v23327_v2  ;;  %v24748_v45 = vadd.f32 %v15079_v59, %v23293_v44  ;;  %v15043_v28 = vmul.f32 %v24671_v13, %v15006_v17  ;;  %v15044_v1 = vmul.f32 %v24674_v63, %v15007_v37  ;;  %v20698_v55 = vld [vmem:[#allocation15 + $0x4] ss:$16 sps:$4 sm:$0xff] (!%p18120_p12)   ;;  %v20700_v59 = vld [vmem:[#allocation15 + $0xc] ss:$16 sps:$4 sm:$0xff] (!%p18120_p12)   ;;  %v20703_v17 = vld [vmem:[#allocation15 + $0x8] ss:$16 sps:$4 sm:$0xff] (!%p18120_p12)  }
0x1d68   : > { %v15045_v4 = vmul.f32 %v24677_v6, %v15008_v22  ;;  %v15046_v15 = vmul.f32 %v24680_v61, %v15009_v10  ;;  %15108 = vst [vmem:[#allocation2 + $0x20] sm:$0xff] %v24739_v35  ;;  %15109 = vst [vmem:[#allocation2 + $0x28] sm:$0xff] %v24742_v42  ;;  %v15010_v9 = vmul.f32 %v20681_v41, %v24642_v38  ;;  %v20704_v37 = vld [vmem:[#allocation15 + $0x24] ss:$16 sps:$4 sm:$0xff] (!%p18120_p12)   ;;  %v20706_v22 = vld [vmem:[#allocation15 + $0x2c] ss:$16 sps:$4 sm:$0xff] (!%p18120_p12)   ;;  %16102 = vmatprep.subr.bf16.mxu0 (!%p18120_p12), %v20698_v55 }
0x1d69   : > { %15110 = vst [vmem:[#allocation2 + $0x30] sm:$0xff] %v24745_v11  ;;  %15111 = vst [vmem:[#allocation2 + $0x38] sm:$0xff] %v24748_v45  ;;  %v15011_v48 = vmul.f32 %v20681_v41, %v24644_v56  ;;  %v15012_v44 = vmul.f32 %v20681_v41, %v24646_v25  ;;  %v15013_v2 = vmul.f32 %v20681_v41, %v24654_v31  ;;  %v20702_v41 = vld [vmem:[#allocation15] ss:$16 sps:$4 sm:$0xff] (!%p18120_p12)   ;;  %16208 = vmatprep.subr.bf16.mxu1 (!%p18120_p12), %v20700_v59 }
0x1d6a   : > { %v15080_v14 = vadd.f32 %v24683_v47, %v15043_v28  ;;  %v15081_v33 = vadd.f32 %v24686_v8, %v15044_v1  ;;  %v15082_v16 = vadd.f32 %v24689_v46, %v15045_v4  ;;  %v15083_v20 = vadd.f32 %v24692_v32, %v15046_v15  ;;  %16103 = vmatpush1.bf16.msra.mxu0 (!%p18120_p12), %v20702_v41  ;;  %v20708_v10 = vld [vmem:[#allocation15 + $0x20] ss:$16 sps:$4 sm:$0xff] (!%p18120_p12)   ;;  %v20709_v28 = vld [vmem:[#allocation15 + $0x28] ss:$16 sps:$4 sm:$0xff] (!%p18120_p12)   ;;  %v20710_v1 = vld [vmem:[#allocation15 + $0x44] ss:$16 sps:$4 sm:$0xff] (!%p18120_p12)  }
0x1d6b   : > { %v15047_v51 = vmul.f32 %v24671_v13, %v15010_v9  ;;  %v15048_v43 = vmul.f32 %v24674_v63, %v15011_v48  ;;  %v15049_v38 = vmul.f32 %v24677_v6, %v15012_v44  ;;  %v15050_v56 = vmul.f32 %v24680_v61, %v15013_v2  ;;  %16209 = vmatpush1.bf16.msra.mxu1 (!%p18120_p12), %v20703_v17  ;;  %v20712_v4 = vld [vmem:[#allocation15 + $0x4c] ss:$16 sps:$4 sm:$0xff] (!%p18120_p12)   ;;  %v20714_v15 = vld [vmem:[#allocation15 + $0x40] ss:$16 sps:$4 sm:$0xff] (!%p18120_p12)   ;;  %v20715_v9 = vld [vmem:[#allocation15 + $0x48] ss:$16 sps:$4 sm:$0xff] (!%p18120_p12)  }
0x1d6c   : > { %v24771_v25 = vadd.f32 %v15080_v14, %v23301_v18  ;;  %v24774_v31 = vadd.f32 %v15081_v33, %v23297_v0  ;;  %v24777_v34 = vadd.f32 %v15082_v16, %v23364_v29  ;;  %v24780_v57 = vadd.f32 %v15083_v20, %v25099_v19  ;;  %v25100_v0 = vld [vmem:[#allocation32_spill] sm:$0xff]  ;;  %v25101_v29 = vld [vmem:[#allocation31_spill] sm:$0xff]  ;;  %15123 = sbr.rel (%p18120_p12) target bundleno = 8154 (0x1fda), region = 104  ;;  %16104 = vmatprep.subr.bf16.mxu0 (!%p18120_p12), %v20704_v37 }
0x1d6d   : > { %v15084_v13 = vadd.f32 %v24683_v47, %v15047_v51  ;;  %v15085_v63 = vadd.f32 %v24686_v8, %v15048_v43  ;;  %v15086_v6 = vadd.f32 %v24689_v46, %v15049_v38  ;;  %v15087_v61 = vadd.f32 %v24692_v32, %v15050_v56  ;;  %v25102_v47 = vld [vmem:[#allocation35_spill] sm:$0xff]  ;;  %v25103_v46 = vld [vmem:[#allocation33_spill] sm:$0xff]  ;;  %16210 = vmatprep.subr.bf16.mxu1 (!%p18120_p12), %v20706_v22  ;;  %v20718_v44 = vld [vmem:[#allocation15 + $0x6c] ss:$16 sps:$4 sm:$0xff] (!%p18120_p12)  }
0x1d6e   : > { %15112 = vst [vmem:[#allocation2 + $0x40] sm:$0xff] %v24771_v25  ;;  %15113 = vst [vmem:[#allocation2 + $0x48] sm:$0xff] %v24774_v31  ;;  %v15126_v32 = vadd.f32 (!%p18120_p12), %v24718_v58, %v24715_v54  ;;  %v15136_v60 = vadd.f32 (!%p18120_p12), %v24774_v31, %v24771_v25  ;;  %v15131_v12 = vadd.f32 (!%p18120_p12), %v24742_v42, %v24739_v35  ;;  %16105 = vmatpush1.bf16.msra.mxu0 (!%p18120_p12), %v20708_v10  ;;  %v20716_v48 = vld [vmem:[#allocation15 + $0x64] ss:$16 sps:$4 sm:$0xff] (!%p18120_p12)   ;;  %v20720_v2 = vld [vmem:[#allocation15 + $0x60] ss:$16 sps:$4 sm:$0xff] (!%p18120_p12)  }
0x1d6f   : > { %15114 = vst [vmem:[#allocation2 + $0x50] sm:$0xff] %v24777_v34  ;;  %15115 = vst [vmem:[#allocation2 + $0x58] sm:$0xff] %v24780_v57  ;;  %v24791_v18 = vadd.f32 %v15084_v13, %v25100_v0  ;;  %v24794_v3 = vadd.f32 %v15085_v63, %v25101_v29  ;;  %v24797_v8 = vadd.f32 %v15086_v6, %v25102_v47  ;;  %16211 = vmatpush1.bf16.msra.mxu1 (!%p18120_p12), %v20709_v28  ;;  %v20721_v14 = vld [vmem:[#allocation15 + $0x68] ss:$16 sps:$4 sm:$0xff] (!%p18120_p12)   ;;  %v20722_v33 = vld [vmem:[#allocation15 + $0x84] ss:$16 sps:$4 sm:$0xff] (!%p18120_p12)  }
0x1d70   : > { %v24800_v30 = vadd.f32 %v15087_v61, %v25103_v46  ;;  %v15127_v39 = vadd.f32 (!%p18120_p12), %v15126_v32, %v24721_v21  ;;  %v15137_v26 = vadd.f32 (!%p18120_p12), %v15136_v60, %v24777_v34  ;;  %v15132_v24 = vadd.f32 (!%p18120_p12), %v15131_v12, %v24745_v11  ;;  %16106 = vmatprep.subr.bf16.mxu0 (!%p18120_p12), %v20710_v1  ;;  %v20724_v16 = vld [vmem:[#allocation15 + $0x8c] ss:$16 sps:$4 sm:$0xff] (!%p18120_p12)   ;;  %v20726_v20 = vld [vmem:[#allocation15 + $0x80] ss:$16 sps:$4 sm:$0xff] (!%p18120_p12)   ;;  %v20727_v51 = vld [vmem:[#allocation15 + $0x88] ss:$16 sps:$4 sm:$0xff] (!%p18120_p12)  }
0x1d71   : > { %15116 = vst [vmem:[#allocation2 + $0x60] sm:$0xff] %v24791_v18  ;;  %15117 = vst [vmem:[#allocation2 + $0x68] sm:$0xff] %v24794_v3  ;;  %v15141_v49 = vadd.f32 (!%p18120_p12), %v24794_v3, %v24791_v18  ;;  %16212 = vmatprep.subr.bf16.mxu1 (!%p18120_p12), %v20712_v4  ;;  %v20728_v43 = vld [vmem:[#allocation15 + $0xa4] ss:$16 sps:$4 sm:$0xff] (!%p18120_p12)   ;;  %v20730_v38 = vld [vmem:[#allocation15 + $0xac] ss:$16 sps:$4 sm:$0xff] (!%p18120_p12)  }
0x1d72   : > { %15118 = vst [vmem:[#allocation2 + $0x70] sm:$0xff] %v24797_v8  ;;  %15119 = vst [vmem:[#allocation2 + $0x78] sm:$0xff] %v24800_v30  ;;  %v15128_v7 = vadd.f32 (!%p18120_p12), %v15127_v39, %v24724_v40  ;;  %v15138_v36 = vadd.f32 (!%p18120_p12), %v15137_v26, %v24780_v57  ;;  %v15133_v27 = vadd.f32 (!%p18120_p12), %v15132_v24, %v24748_v45  ;;  %16107 = vmatpush1.bf16.msra.mxu0 (!%p18120_p12), %v20714_v15  ;;  %v20732_v56 = vld [vmem:[#allocation15 + $0xa0] ss:$16 sps:$4 sm:$0xff] (!%p18120_p12)   ;;  %v20733_v19 = vld [vmem:[#allocation15 + $0xa8] ss:$16 sps:$4 sm:$0xff] (!%p18120_p12)  }
0x1d73   : > { %v15142_v50 = vadd.f32 %v15141_v49, %v24797_v8  ;;  %16213 = vmatpush1.bf16.msra.mxu1 %v20715_v9  ;;  %16108 = vmatprep.subr.bf16.mxu0 %v20716_v48  ;;  %v20734_v13 = vld [vmem:[#allocation15 + $0xc4] ss:$16 sps:$4 sm:$0xff]   ;;  %v20736_v63 = vld [vmem:[#allocation15 + $0xcc] ss:$16 sps:$4 sm:$0xff]   ;;  %v20738_v6 = vld [vmem:[#allocation15 + $0xc0] ss:$16 sps:$4 sm:$0xff]  }
0x1d74   : > { %15129 = vadd.xlane.f32.xlu0 %v15128_v7  ;;  %15139 = vadd.xlane.f32.xlu1 %v15138_v36  ;;  %v20739_v61 = vld [vmem:[#allocation15 + $0xc8] ss:$16 sps:$4 sm:$0xff]   ;;  %v20740_v0 = vld [vmem:[#allocation15 + $0xe4] ss:$16 sps:$4 sm:$0xff]   ;;  %v20742_v29 = vld [vmem:[#allocation15 + $0xec] ss:$16 sps:$4 sm:$0xff]  }
0x1d75   : > { %v15143_v62 = vadd.f32 %v15142_v50, %v24800_v30  ;;  %16214 = vmatprep.subr.bf16.mxu1 %v20718_v44  ;;  %v20744_v47 = vld [vmem:[#allocation15 + $0xe0] ss:$16 sps:$4 sm:$0xff]   ;;  %v20745_v46 = vld [vmem:[#allocation15 + $0xe8] ss:$16 sps:$4 sm:$0xff]   ;;  %v20746_v32 = vld [vmem:[#allocation15 + $0x104] ss:$16 sps:$4 sm:$0xff]  }
0x1d76   : > { %16109 = vmatpush1.bf16.msra.mxu0 %v20720_v2  ;;  %v20748_v60 = vld [vmem:[#allocation15 + $0x10c] ss:$16 sps:$4 sm:$0xff]   ;;  %v20750_v12 = vld [vmem:[#allocation15 + $0x100] ss:$16 sps:$4 sm:$0xff]   ;;  %v20751_v49 = vld [vmem:[#allocation15 + $0x108] ss:$16 sps:$4 sm:$0xff]  }
0x1d77   : > { %16215 = vmatpush1.bf16.msra.mxu1 %v20721_v14  ;;  %16110 = vmatprep.subr.bf16.mxu0 %v20722_v33  ;;  %v20752_v39 = vld [vmem:[#allocation15 + $0x124] ss:$16 sps:$4 sm:$0xff]   ;;  %v20754_v26 = vld [vmem:[#allocation15 + $0x12c] ss:$16 sps:$4 sm:$0xff]  }
0x1d78   : > { %15134 = vadd.xlane.f32.xlu0 %v15133_v27  ;;  %15144 = vadd.xlane.f32.xlu1 %v15143_v62 }
0x1d79   : > { %16216 = vmatprep.subr.bf16.mxu1 %v20724_v16 }
0x1d7a   : > { %16111 = vmatpush1.bf16.msra.mxu0 %v20726_v20 }
0x1d7b   : > { %16217 = vmatpush1.bf16.msra.mxu1 %v20727_v51  ;;  %16112 = vmatprep.subr.bf16.mxu0 %v20728_v43 }
0x1d7c   : > { %16218 = vmatprep.subr.bf16.mxu1 %v20730_v38 }
0x1d7e   : > { %16113 = vmatpush1.bf16.msra.mxu0 %v20732_v56 }
0x1d7f   : > { %16219 = vmatpush1.bf16.msra.mxu1 %v20733_v19  ;;  %16114 = vmatprep.subr.bf16.mxu0 %v20734_v13 }
0x1d80   : > { %16220 = vmatprep.subr.bf16.mxu1 %v20736_v63 }
0x1d82   : > { %16115 = vmatpush1.bf16.msra.mxu0 %v20738_v6 }
0x1d83   : > { %16221 = vmatpush1.bf16.msra.mxu1 %v20739_v61  ;;  %16116 = vmatprep.subr.bf16.mxu0 %v20740_v0 }
0x1d84   : > { %16222 = vmatprep.subr.bf16.mxu1 %v20742_v29 }
0x1d86   : > { %16117 = vmatpush1.bf16.msra.mxu0 %v20744_v47  ;;  %v20756_v47 = vld [vmem:[#allocation15 + $0x120] ss:$16 sps:$4 sm:$0xff]  }
0x1d87   : > { %16223 = vmatpush1.bf16.msra.mxu1 %v20745_v46  ;;  %16118 = vmatprep.subr.bf16.mxu0 %v20746_v32  ;;  %v20757_v46 = vld [vmem:[#allocation15 + $0x128] ss:$16 sps:$4 sm:$0xff]   ;;  %v20758_v32 = vld [vmem:[#allocation15 + $0x144] ss:$16 sps:$4 sm:$0xff]  }
0x1d88   : > { %16224 = vmatprep.subr.bf16.mxu1 %v20748_v60  ;;  %v20760_v60 = vld [vmem:[#allocation15 + $0x14c] ss:$16 sps:$4 sm:$0xff]  }
0x1d8a   : > { %16119 = vmatpush1.bf16.msra.mxu0 %v20750_v12  ;;  %v20762_v12 = vld [vmem:[#allocation15 + $0x140] ss:$16 sps:$4 sm:$0xff]  }
0x1d8b   : > { %16225 = vmatpush1.bf16.msra.mxu1 %v20751_v49  ;;  %16120 = vmatprep.subr.bf16.mxu0 %v20752_v39  ;;  %v20763_v49 = vld [vmem:[#allocation15 + $0x148] ss:$16 sps:$4 sm:$0xff]   ;;  %v20764_v39 = vld [vmem:[#allocation15 + $0x164] ss:$16 sps:$4 sm:$0xff]  }
0x1d8c   : > { %16226 = vmatprep.subr.bf16.mxu1 %v20754_v26  ;;  %v20766_v26 = vld [vmem:[#allocation15 + $0x16c] ss:$16 sps:$4 sm:$0xff]  }
0x1d8e   : > { %16121 = vmatpush1.bf16.msra.mxu0 %v20756_v47 }
0x1d8f   : > { %16227 = vmatpush1.bf16.msra.mxu1 %v20757_v46  ;;  %16122 = vmatprep.subr.bf16.mxu0 %v20758_v32 }
0x1d90   : > { %16228 = vmatprep.subr.bf16.mxu1 %v20760_v60 }
0x1d92   : > { %16123 = vmatpush1.bf16.msra.mxu0 %v20762_v12 }
0x1d93   : > { %16229 = vmatpush1.bf16.msra.mxu1 %v20763_v49  ;;  %16124 = vmatprep.subr.bf16.mxu0 %v20764_v39 }
0x1d94   : > { %16230 = vmatprep.subr.bf16.mxu1 %v20766_v26 }
0x1e01   : > { %v15130_v24 = vpop.xlane.xlu0 %15129  ;;  %v15140_v50 = vpop.xlane.xlu1 %15139 }
0x1e02   : > { %v15146_v7 = vmul.f32 0.001953125, %v15130_v24  ;;  %v15148_v36 = vmul.f32 0.001953125, %v15140_v50  ;;  %v20768_v24 = vld [vmem:[#allocation15 + $0x160] ss:$16 sps:$4 sm:$0xff]   ;;  %v20769_v50 = vld [vmem:[#allocation15 + $0x168] ss:$16 sps:$4 sm:$0xff]  }
0x1e03   : > { %16125 = vmatpush1.bf16.msra.mxu0 %v20768_v24  ;;  %16231 = vmatpush1.bf16.msra.mxu1 %v20769_v50 }
0x1e04   : > { %v24824_v27 = vsub.f32 %v24715_v54, %v15146_v7  ;;  %v24827_v62 = vsub.f32 %v24718_v58, %v15146_v7  ;;  %v24830_v55 = vsub.f32 %v24771_v25, %v15148_v36  ;;  %v24833_v59 = vsub.f32 %v24774_v31, %v15148_v36 }
0x1e05   : > { %v15135_v41 = vpop.xlane.xlu0 %15134  ;;  %v15145_v17 = vpop.xlane.xlu1 %15144  ;;  %v24836_v37 = vsub.f32 %v24721_v21, %v15146_v7  ;;  %v24839_v22 = vsub.f32 %v24724_v40, %v15146_v7  ;;  %v24842_v54 = vsub.f32 %v24777_v34, %v15148_v36  ;;  %v24845_v58 = vsub.f32 %v24780_v57, %v15148_v36  ;;  %v20770_v7 = vld [vmem:[#allocation15 + $0x184] ss:$16 sps:$4 sm:$0xff]   ;;  %v20772_v36 = vld [vmem:[#allocation15 + $0x18c] ss:$16 sps:$4 sm:$0xff]  }
0x1e06   : > { %v15147_v10 = vmul.f32 0.001953125, %v15135_v41  ;;  %v15149_v25 = vmul.f32 0.001953125, %v15145_v17  ;;  %v15166_v31 = vmul.f32 %v24824_v27, %v24824_v27  ;;  %v15167_v28 = vmul.f32 %v24827_v62, %v24827_v62  ;;  %v20774_v41 = vld [vmem:[#allocation15 + $0x180] ss:$16 sps:$4 sm:$0xff]   ;;  %v20775_v17 = vld [vmem:[#allocation15 + $0x188] ss:$16 sps:$4 sm:$0xff]   ;;  %16126 = vmatprep.subr.bf16.mxu0 %v20770_v7  ;;  %16232 = vmatprep.subr.bf16.mxu1 %v20772_v36 }
0x1e07   : > { %v15168_v21 = vmul.f32 %v24836_v37, %v24836_v37  ;;  %v15169_v40 = vmul.f32 %v24839_v22, %v24839_v22  ;;  %v15174_v34 = vmul.f32 %v24830_v55, %v24830_v55  ;;  %v15175_v57 = vmul.f32 %v24833_v59, %v24833_v59  ;;  %16127 = vmatpush1.bf16.msra.mxu0 %v20774_v41 }
0x1e08   : > { %v24860_v1 = vsub.f32 %v24739_v35, %v15147_v10  ;;  %v24863_v4 = vsub.f32 %v24742_v42, %v15147_v10  ;;  %v24866_v15 = vsub.f32 %v24791_v18, %v15149_v25  ;;  %v24869_v9 = vsub.f32 %v24794_v3, %v15149_v25  ;;  %16233 = vmatpush1.bf16.msra.mxu1 %v20775_v17 }
0x1e09   : > { %v15182_v48 = vadd.f32 %v15167_v28, %v15166_v31  ;;  %v15176_v44 = vmul.f32 %v24842_v54, %v24842_v54  ;;  %v15177_v2 = vmul.f32 %v24845_v58, %v24845_v58  ;;  %v15192_v14 = vadd.f32 %v15175_v57, %v15174_v34  ;;  %v20780_v31 = vld [vmem:[#allocation15 + $0x1a0] ss:$16 sps:$4 sm:$0xff]   ;;  %v20781_v28 = vld [vmem:[#allocation15 + $0x1a8] ss:$16 sps:$4 sm:$0xff]  }
0x1e0a   : > { %v24876_v35 = vsub.f32 %v24745_v11, %v15147_v10  ;;  %v24879_v42 = vsub.f32 %v24748_v45, %v15147_v10  ;;  %v15170_v18 = vmul.f32 %v24860_v1, %v24860_v1  ;;  %v15171_v3 = vmul.f32 %v24863_v4, %v24863_v4  ;;  %v20776_v10 = vld [vmem:[#allocation15 + $0x1a4] ss:$16 sps:$4 sm:$0xff]   ;;  %v20786_v34 = vld [vmem:[#allocation15 + $0x1c0] ss:$16 sps:$4 sm:$0xff]   ;;  %v20787_v57 = vld [vmem:[#allocation15 + $0x1c8] ss:$16 sps:$4 sm:$0xff]  }
0x1e0b   : > { %v15183_v33 = vadd.f32 %v15182_v48, %v15168_v21  ;;  %v15193_v16 = vadd.f32 %v15192_v14, %v15176_v44  ;;  %v24886_v20 = vsub.f32 %v24797_v8, %v15149_v25  ;;  %v24889_v51 = vsub.f32 %v24800_v30, %v15149_v25  ;;  %v20778_v25 = vld [vmem:[#allocation15 + $0x1ac] ss:$16 sps:$4 sm:$0xff]   ;;  %16128 = vmatprep.subr.bf16.mxu0 %v20776_v10  ;;  %v20782_v21 = vld [vmem:[#allocation15 + $0x1c4] ss:$16 sps:$4 sm:$0xff]   ;;  %v20793_v14 = vld [vmem:[#allocation15 + $0x1e8] ss:$16 sps:$4 sm:$0xff]  }
0x1e0c   : > { %v15172_v11 = vmul.f32 %v24876_v35, %v24876_v35  ;;  %v15187_v43 = vadd.f32 %v15171_v3, %v15170_v18  ;;  %v15178_v45 = vmul.f32 %v24866_v15, %v24866_v15  ;;  %v15179_v56 = vmul.f32 %v24869_v9, %v24869_v9  ;;  %16234 = vmatprep.subr.bf16.mxu1 %v20778_v25  ;;  %v20788_v48 = vld [vmem:[#allocation15 + $0x1e4] ss:$16 sps:$4 sm:$0xff]   ;;  %v20790_v44 = vld [vmem:[#allocation15 + $0x1ec] ss:$16 sps:$4 sm:$0xff]  }
0x1e0d   : > { %v15184_v38 = vadd.f32 %v15183_v33, %v15169_v40  ;;  %v15180_v19 = vmul.f32 %v24886_v20, %v24886_v20  ;;  %v15173_v8 = vmul.f32 %v24879_v42, %v24879_v42  ;;  %v15194_v30 = vadd.f32 %v15193_v16, %v15177_v2  ;;  %v20784_v40 = vld [vmem:[#allocation15 + $0x1cc] ss:$16 sps:$4 sm:$0xff]   ;;  %16129 = vmatpush1.bf16.msra.mxu0 %v20780_v31  ;;  %v20792_v2 = vld [vmem:[#allocation15 + $0x1e0] ss:$16 sps:$4 sm:$0xff]   ;;  %v20796_v18 = vld [vmem:[#allocation15 + $0x204] ss:$16 sps:$4 sm:$0xff]  }
0x1e0e   : > { %v15188_v13 = vadd.f32 %v15187_v43, %v15172_v11  ;;  %v15181_v63 = vmul.f32 %v24889_v51, %v24889_v51  ;;  %v15197_v6 = vadd.f32 %v15179_v56, %v15178_v45  ;;  %16235 = vmatpush1.bf16.msra.mxu1 %v20781_v28  ;;  %16130 = vmatprep.subr.bf16.mxu0 %v20782_v21  ;;  %v20799_v3 = vld [vmem:[#allocation15 + $0x20c] ss:$16 sps:$4 sm:$0xff]  }
0x1e0f   : > { %15185 = vadd.xlane.f32.xlu0 %v15184_v38  ;;  %16236 = vmatprep.subr.bf16.mxu1 %v20784_v40 }
0x1e10   : > { %v15189_v61 = vadd.f32 %v15188_v13, %v15173_v8  ;;  %v15198_v0 = vadd.f32 %v15197_v6, %v15180_v19  ;;  %v15124_v6 = vld [vmem:[#allocation12] sm:$0xf] }
0x1e11   : > { %16131 = vmatpush1.bf16.msra.mxu0 %v20786_v34  ;;  %v15234_v47 = vrot.slane %v15124_v6, %v22880_v53  ;;  %v15246_v31 = vrot.slane %v15124_v6, %v22892_v23 }
0x1e12   : > { %15190 = vadd.xlane.f32.xlu1 %v15189_v61  ;;  %v15199_v29 = vadd.f32 %v15198_v0, %v15181_v63  ;;  %16237 = vmatpush1.bf16.msra.mxu1 %v20787_v57  ;;  %v15125_v61 = vld [vmem:[#allocation14] sm:$0xf]  ;;  %v15238_v0 = vrot.slane %v15124_v6, %v22884_v52 }
0x1e13   : > { %15195 = vadd.xlane.f32.xlu0 %v15194_v30  ;;  %16132 = vmatprep.subr.bf16.mxu0 %v20788_v48  ;;  %v15275_v49 = vrot.slane %v15125_v61, %v22884_v52  ;;  %v24913_v39 = vrot.slane %v15125_v61, %v22880_v53  ;;  %v24916_v50 = vrot.slane %v15125_v61, %v22887_v5 }
0x1e14   : > { %16238 = vmatprep.subr.bf16.mxu1 %v20790_v44 }
0x1e15   : > { %16133 = vmatpush1.bf16.msra.mxu0 %v20792_v2 }
0x1e16   : > { %15200 = vadd.xlane.f32.xlu1 %v15199_v29  ;;  %16239 = vmatpush1.bf16.msra.mxu1 %v20793_v14  ;;  %v24905_v29 = vrot.slane %v15124_v6, %v22887_v5 }
0x1e17   : > { %16155 = vmatprep.subr.bf16.mxu0 %v20796_v18  ;;  %16261 = vmatprep.subr.bf16.mxu1 %v20799_v3  ;;  %v15283_v18 = vrot.slane %v15125_v61, %v22892_v23 }
0x1e9c   : > { %v15186_v33 = vpop.xlane.xlu0 %15185 }
0x1e9d   : > { %v15202_v16 = vmul.f32 0.001953125, %v15186_v33 }
0x1e9f   : > { %v15206_v11 = vadd.f32 1e-05, %v15202_v16  ;;  %v15191_v43 = vpop.xlane.xlu1 %15190  ;;  %v20794_v16 = vld [vmem:[#allocation15 + $0x200] ss:$16 sps:$4 sm:$0xff]  }
0x1ea0   : > { %v15203_v45 = vmul.f32 0.001953125, %v15191_v43  ;;  %v15196_v38 = vpop.xlane.xlu0 %15195 }
0x1ea1   : > { %20890 = vrsqrt.f32 %v15206_v11  ;;  %v15204_v56 = vmul.f32 0.001953125, %v15196_v38  ;;  %v20802_v38 = vld [vmem:[#allocation15 + $0x224] ss:$16 sps:$4 sm:$0xff]  }
0x1ea2   : > { %v15207_v19 = vadd.f32 1e-05, %v15203_v45 }
0x1ea3   : > { %v15208_v8 = vadd.f32 1e-05, %v15204_v56  ;;  %v15201_v13 = vpop.xlane.xlu1 %15200  ;;  %v20805_v56 = vld [vmem:[#allocation15 + $0x22c] ss:$16 sps:$4 sm:$0xff]  }
0x1ea4   : > { %20892 = vrsqrt.f32 %v15207_v19  ;;  %v15205_v30 = vmul.f32 0.001953125, %v15201_v13 }
0x1ea5   : > { %20894 = vrsqrt.f32 %v15208_v8 }
0x1ea6   : > { %v15209_v63 = vadd.f32 1e-05, %v15205_v30 }
0x1ea8   : > { %20896 = vrsqrt.f32 %v15209_v63 }
0x1eab   : > { %v20891_v46 = vpop.eup %20890 }
0x1eac   : > { %v15215_v32 = vmul.f32 %v20891_v46, %v24827_v62  ;;  %v15214_v60 = vmul.f32 %v20891_v46, %v24824_v27  ;;  %v15216_v12 = vmul.f32 %v20891_v46, %v24836_v37  ;;  %v15217_v10 = vmul.f32 %v20891_v46, %v24839_v22  ;;  %v20800_v46 = vld [vmem:[#allocation15 + $0x220] ss:$16 sps:$4 sm:$0xff]  }
0x1eae   : > { %v20893_v26 = vpop.eup %20892  ;;  %v15252_v24 = vmul.f32 %v15238_v0, %v15215_v32  ;;  %v15251_v7 = vmul.f32 %v15234_v47, %v15214_v60  ;;  %v15253_v36 = vmul.f32 %v24905_v29, %v15216_v12  ;;  %v15254_v2 = vmul.f32 %v15246_v31, %v15217_v10  ;;  %v20803_v32 = vld [vmem:[#allocation15 + $0x228] ss:$16 sps:$4 sm:$0xff]   ;;  %v20808_v60 = vld [vmem:[#allocation15 + $0x244] ss:$16 sps:$4 sm:$0xff]   ;;  %v20811_v12 = vld [vmem:[#allocation15 + $0x24c] ss:$16 sps:$4 sm:$0xff]  }
0x1eaf   : > { %v20895_v41 = vpop.eup %20894  ;;  %v15219_v62 = vmul.f32 %v20893_v26, %v24863_v4  ;;  %v15218_v27 = vmul.f32 %v20893_v26, %v24860_v1  ;;  %v15220_v37 = vmul.f32 %v20893_v26, %v24876_v35  ;;  %v15221_v25 = vmul.f32 %v20893_v26, %v24879_v42  ;;  %v20814_v10 = vld [vmem:[#allocation15 + $0x264] ss:$16 sps:$4 sm:$0xff]  }
0x1eb0   : > { %v15223_v17 = vmul.f32 %v20895_v41, %v24833_v59  ;;  %v15289_v21 = vadd.f32 %v15275_v49, %v15252_v24  ;;  %v15288_v34 = vadd.f32 %v24913_v39, %v15251_v7  ;;  %v15222_v4 = vmul.f32 %v20895_v41, %v24830_v55  ;;  %v20797_v55 = vld [vmem:[#allocation15 + $0x208] ss:$16 sps:$4 sm:$0xff]  }
0x1eb1   : > { %v15256_v28 = vmul.f32 %v15238_v0, %v15219_v62  ;;  %v15255_v40 = vmul.f32 %v15234_v47, %v15218_v27  ;;  %v15257_v1 = vmul.f32 %v24905_v29, %v15220_v37  ;;  %v15290_v35 = vadd.f32 %v24916_v50, %v15253_v36  ;;  %v20806_v62 = vld [vmem:[#allocation15 + $0x240] ss:$16 sps:$4 sm:$0xff]   ;;  %v20809_v27 = vld [vmem:[#allocation15 + $0x248] ss:$16 sps:$4 sm:$0xff]  }
0x1eb2   : > { %v20897_v57 = vpop.eup %20896  ;;  %v15260_v48 = vmul.f32 %v15238_v0, %v15223_v17  ;;  %v15258_v14 = vmul.f32 %v15246_v31, %v15221_v25  ;;  %v15259_v19 = vmul.f32 %v15234_v47, %v15222_v4  ;;  %v15224_v63 = vmul.f32 %v20895_v41, %v24842_v54  ;;  %v20817_v25 = vld [vmem:[#allocation15 + $0x26c] ss:$16 sps:$4 sm:$0xff]   ;;  %v20824_v4 = vld [vmem:[#allocation15 + $0x2a0] ss:$16 sps:$4 sm:$0xff]  }
0x1eb3   : > { %v15293_v59 = vadd.f32 %v15275_v49, %v15256_v28  ;;  %v15292_v22 = vadd.f32 %v24913_v39, %v15255_v40  ;;  %v15227_v42 = vmul.f32 %v20897_v57, %v24869_v9  ;;  %v15226_v44 = vmul.f32 %v20897_v57, %v24866_v15  ;;  %v20815_v28 = vld [vmem:[#allocation15 + $0x268] ss:$16 sps:$4 sm:$0xff]   ;;  %v20818_v40 = vld [vmem:[#allocation15 + $0x280] ss:$16 sps:$4 sm:$0xff]  }
0x1eb4   : > { %v15294_v3 = vadd.f32 %v24916_v50, %v15257_v1  ;;  %v15225_v9 = vmul.f32 %v20895_v41, %v24845_v58  ;;  %v15229_v15 = vmul.f32 %v20897_v57, %v24889_v51  ;;  %v15297_v13 = vadd.f32 %v15275_v49, %v15260_v48  ;;  %v20829_v48 = vld [vmem:[#allocation15 + $0x2ac] ss:$16 sps:$4 sm:$0xff]   ;;  %v20827_v1 = vld [vmem:[#allocation15 + $0x2a8] ss:$16 sps:$4 sm:$0xff]  }
0x1eb5   : > { %v15305_v33 = vpack.c.bf16 %v15293_v59, %v15289_v21  ;;  %v15304_v11 = vpack.c.bf16 %v15292_v22, %v15288_v34  ;;  %v15264_v43 = vmul.f32 %v15238_v0, %v15227_v42  ;;  %v15263_v45 = vmul.f32 %v15234_v47, %v15226_v44  ;;  %v20823_v21 = vld [vmem:[#allocation15 + $0x28c] ss:$16 sps:$4 sm:$0xff]   ;;  %v20821_v34 = vld [vmem:[#allocation15 + $0x288] ss:$16 sps:$4 sm:$0xff]   ;;  %v20830_v22 = vld [vmem:[#allocation15 + $0x2c0] ss:$16 sps:$4 sm:$0xff]  }
0x1eb6   : > { %v24935_v8 = vpack.c.bf16 %v15294_v3, %v15290_v35  ;;  %v15262_v6 = vmul.f32 %v15246_v31, %v15225_v9  ;;  %v15266_v61 = vmul.f32 %v15246_v31, %v15229_v15  ;;  %v15228_v0 = vmul.f32 %v20897_v57, %v24886_v20  ;;  %v20812_v31 = vld [vmem:[#allocation15 + $0x260] ss:$16 sps:$4 sm:$0xff]   ;;  %v20826_v57 = vld [vmem:[#allocation15 + $0x2a4] ss:$16 sps:$4 sm:$0xff]   ;;  %v20835_v59 = vld [vmem:[#allocation15 + $0x2cc] ss:$16 sps:$4 sm:$0xff]  }
0x1eb7   : > { %16134 = vmatprep.mubr.bf16.mxu0 %v15305_v33  ;;  %16240 = vmatprep.mubr.bf16.mxu1 %v15305_v33  ;;  %v15301_v30 = vadd.f32 %v15275_v49, %v15264_v43  ;;  %v15300_v58 = vadd.f32 %v24913_v39, %v15263_v45  ;;  %v15261_v51 = vmul.f32 %v24905_v29, %v15224_v63  ;;  %v20832_v35 = vld [vmem:[#allocation15 + $0x2c4] ss:$16 sps:$4 sm:$0xff]   ;;  %v20833_v42 = vld [vmem:[#allocation15 + $0x2c8] ss:$16 sps:$4 sm:$0xff]   ;;  %v20847_v33 = vld [vmem:[#allocation15 + $0x30c] ss:$16 sps:$4 sm:$0xff]  }
0x1eb8   : > { %16135 = vmatmul.mubr.bf16.vlgmr.msra.gmra.mrb[0].mxu0 %v15304_v11  ;;  %16241 = vmatmul.mubr.bf16.vlgmr.msra.gmra.mrb[0].mxu1 %v15304_v11  ;;  %v15299_v54 = vadd.f32 %v15283_v18, %v15262_v6  ;;  %v15303_v49 = vadd.f32 %v15283_v18, %v15266_v61  ;;  %v15265_v26 = vmul.f32 %v24905_v29, %v15228_v0  ;;  %v20838_v44 = vld [vmem:[#allocation15 + $0x2e4] ss:$16 sps:$4 sm:$0xff]   ;;  %v20853_v43 = vld [vmem:[#allocation15 + $0x32c] ss:$16 sps:$4 sm:$0xff]   ;;  %v20848_v45 = vld [vmem:[#allocation15 + $0x320] ss:$16 sps:$4 sm:$0xff]  }
0x1eb9   : > { %16156 = vmatpush1.bf16.msra.mxu0 %v20794_v16  ;;  %16262 = vmatpush1.bf16.msra.mxu1 %v20797_v55  ;;  %v15309_v47 = vpack.c.bf16 %v15301_v30, %v15297_v13  ;;  %v15298_v20 = vadd.f32 %v24916_v50, %v15261_v51  ;;  %v15296_v24 = vadd.f32 %v24913_v39, %v15259_v19  ;;  %v20844_v3 = vld [vmem:[#allocation15 + $0x304] ss:$16 sps:$4 sm:$0xff]   ;;  %v20842_v16 = vld [vmem:[#allocation15 + $0x300] ss:$16 sps:$4 sm:$0xff]   ;;  %v20845_v55 = vld [vmem:[#allocation15 + $0x308] ss:$16 sps:$4 sm:$0xff]  }
0x1eba   : > { %16157 = vmatprep.subr.bf16.mxu0 %v20802_v38  ;;  %16263 = vmatprep.subr.bf16.mxu1 %v20805_v56  ;;  %v15295_v7 = vadd.f32 %v15283_v18, %v15258_v14  ;;  %v24946_v36 = vpack.c.bf16 %v15303_v49, %v15299_v54  ;;  %v15302_v41 = vadd.f32 %v24916_v50, %v15265_v26  ;;  %v20820_v50 = vld [vmem:[#allocation15 + $0x284] ss:$16 sps:$4 sm:$0xff]   ;;  %v20836_v14 = vld [vmem:[#allocation15 + $0x2e0] ss:$16 sps:$4 sm:$0xff]   ;;  %v20851_v38 = vld [vmem:[#allocation15 + $0x328] ss:$16 sps:$4 sm:$0xff]  }
0x1ebb   : > { %16144 = vmatprep.mubr.bf16.mxu0 %v15309_v47  ;;  %16250 = vmatprep.mubr.bf16.mxu1 %v15309_v47  ;;  %v15308_v37 = vpack.c.bf16 %v15300_v58, %v15296_v24  ;;  %v15291_v17 = vadd.f32 %v15283_v18, %v15254_v2  ;;  %v20841_v2 = vld [vmem:[#allocation15 + $0x2ec] ss:$16 sps:$4 sm:$0xff]   ;;  %v20839_v18 = vld [vmem:[#allocation15 + $0x2e8] ss:$16 sps:$4 sm:$0xff]   ;;  %v20850_v11 = vld [vmem:[#allocation15 + $0x324] ss:$16 sps:$4 sm:$0xff]  }
0x1ebc   : > { %v24949_v29 = vpack.c.bf16 %v15302_v41, %v15298_v20  ;;  %v20856_v56 = vld [vmem:[#allocation15 + $0x344] ss:$16 sps:$4 sm:$0xff]   ;;  %v20859_v19 = vld [vmem:[#allocation15 + $0x34c] ss:$16 sps:$4 sm:$0xff]   ;;  %v20854_v9 = vld [vmem:[#allocation15 + $0x340] ss:$16 sps:$4 sm:$0xff]  }
0x1ebd   : > { %16158 = vmatpush1.bf16.msra.mxu0 %v20800_v46  ;;  %16264 = vmatpush1.bf16.msra.mxu1 %v20803_v32  ;;  %v15307_v39 = vpack.c.bf16 %v15295_v7, %v15291_v17  ;;  %v20857_v15 = vld [vmem:[#allocation15 + $0x348] ss:$16 sps:$4 sm:$0xff]   ;;  %v20862_v13 = vld [vmem:[#allocation15 + $0x364] ss:$16 sps:$4 sm:$0xff]   ;;  %v20865_v30 = vld [vmem:[#allocation15 + $0x36c] ss:$16 sps:$4 sm:$0xff]  }
0x1ebe   : > { %16159 = vmatprep.subr.bf16.mxu0 %v20808_v60  ;;  %16265 = vmatprep.subr.bf16.mxu1 %v20811_v12  ;;  %v20860_v63 = vld [vmem:[#allocation15 + $0x360] ss:$16 sps:$4 sm:$0xff]   ;;  %v20863_v6 = vld [vmem:[#allocation15 + $0x368] ss:$16 sps:$4 sm:$0xff]   ;;  %v20868_v61 = vld [vmem:[#allocation15 + $0x384] ss:$16 sps:$4 sm:$0xff]  }
0x1ebf   : > { %v20871_v0 = vld [vmem:[#allocation15 + $0x38c] ss:$16 sps:$4 sm:$0xff]   ;;  %v20866_v47 = vld [vmem:[#allocation15 + $0x380] ss:$16 sps:$4 sm:$0xff]   ;;  %v20869_v46 = vld [vmem:[#allocation15 + $0x388] ss:$16 sps:$4 sm:$0xff]  }
0x1ec0   : > { %16145 = vmatmul.mubr.bf16.gmra.mrb[4].mxu0 %v15308_v37  ;;  %16251 = vmatmul.mubr.bf16.gmra.mrb[4].mxu1 %v15308_v37  ;;  %v20874_v32 = vld [vmem:[#allocation15 + $0x3a4] ss:$16 sps:$4 sm:$0xff]   ;;  %v20877_v58 = vld [vmem:[#allocation15 + $0x3ac] ss:$16 sps:$4 sm:$0xff]   ;;  %v20872_v51 = vld [vmem:[#allocation15 + $0x3a0] ss:$16 sps:$4 sm:$0xff]  }
0x1ec1   : > { %16160 = vmatpush1.bf16.msra.mxu0 %v20806_v62  ;;  %16266 = vmatpush1.bf16.msra.mxu1 %v20809_v27  ;;  %v20875_v60 = vld [vmem:[#allocation15 + $0x3a8] ss:$16 sps:$4 sm:$0xff]   ;;  %v20880_v12 = vld [vmem:[#allocation15 + $0x3c4] ss:$16 sps:$4 sm:$0xff]   ;;  %v20883_v54 = vld [vmem:[#allocation15 + $0x3cc] ss:$16 sps:$4 sm:$0xff]  }
0x1ec2   : > { %16187 = vmatprep.mubr.bf16.mxu0 %v15307_v39  ;;  %16293 = vmatprep.mubr.bf16.mxu1 %v15307_v39  ;;  %v20878_v49 = vld [vmem:[#allocation15 + $0x3c0] ss:$16 sps:$4 sm:$0xff]   ;;  %v20881_v26 = vld [vmem:[#allocation15 + $0x3c8] ss:$16 sps:$4 sm:$0xff]   ;;  %v20886_v20 = vld [vmem:[#allocation15 + $0x3e4] ss:$16 sps:$4 sm:$0xff]  }
0x1ec3   : > { %16161 = vmatprep.subr.bf16.mxu0 %v20814_v10  ;;  %16267 = vmatprep.subr.bf16.mxu1 %v20817_v25  ;;  %v20889_v24 = vld [vmem:[#allocation15 + $0x3ec] ss:$16 sps:$4 sm:$0xff]   ;;  %v20884_v7 = vld [vmem:[#allocation15 + $0x3e0] ss:$16 sps:$4 sm:$0xff]   ;;  %v20887_v41 = vld [vmem:[#allocation15 + $0x3e8] ss:$16 sps:$4 sm:$0xff]  }
0x1ec4   : > { %v15440_v62 = vld [vmem:[#allocation17] sm:$0xf] }
0x1ec5   : > { %16162 = vmatpush1.bf16.msra.mxu0 %v20812_v31  ;;  %16268 = vmatpush1.bf16.msra.mxu1 %v20815_v28  ;;  %v15445_v27 = vrot.slane %v15440_v62, %v22880_v53  ;;  %v15453_v37 = vrot.slane %v15440_v62, %v22887_v5  ;;  %v15449_v17 = vrot.slane %v15440_v62, %v22884_v52 }
0x1ec6   : > { %16163 = vmatprep.subr.bf16.mxu0 %v20820_v50  ;;  %16269 = vmatprep.subr.bf16.mxu1 %v20823_v21  ;;  %v15457_v10 = vrot.slane %v15440_v62, %v22892_v23 }
0x1ec9   : > { %16164 = vmatpush1.bf16.msra.mxu0 %v20818_v40  ;;  %16270 = vmatpush1.bf16.msra.mxu1 %v20821_v34 }
0x1eca   : > { %16165 = vmatprep.subr.bf16.mxu0 %v20826_v57  ;;  %16271 = vmatprep.subr.bf16.mxu1 %v20829_v48 }
0x1ecd   : > { %16166 = vmatpush1.bf16.msra.mxu0 %v20824_v4  ;;  %16272 = vmatpush1.bf16.msra.mxu1 %v20827_v1 }
0x1ece   : > { %16167 = vmatprep.subr.bf16.mxu0 %v20832_v35  ;;  %16273 = vmatprep.subr.bf16.mxu1 %v20835_v59 }
0x1ed1   : > { %16168 = vmatpush1.bf16.msra.mxu0 %v20830_v22  ;;  %16274 = vmatpush1.bf16.msra.mxu1 %v20833_v42 }
0x1ed2   : > { %16169 = vmatprep.subr.bf16.mxu0 %v20838_v44  ;;  %16275 = vmatprep.subr.bf16.mxu1 %v20841_v2 }
0x1ed5   : > { %16170 = vmatpush1.bf16.msra.mxu0 %v20836_v14  ;;  %16276 = vmatpush1.bf16.msra.mxu1 %v20839_v18 }
0x1ed6   : > { %16171 = vmatprep.subr.bf16.mxu0 %v20844_v3  ;;  %16277 = vmatprep.subr.bf16.mxu1 %v20847_v33 }
0x1ed9   : > { %16172 = vmatpush1.bf16.msra.mxu0 %v20842_v16  ;;  %16278 = vmatpush1.bf16.msra.mxu1 %v20845_v55 }
0x1eda   : > { %16173 = vmatprep.subr.bf16.mxu0 %v20850_v11  ;;  %16279 = vmatprep.subr.bf16.mxu1 %v20853_v43 }
0x1edd   : > { %16174 = vmatpush1.bf16.msra.mxu0 %v20848_v45  ;;  %16280 = vmatpush1.bf16.msra.mxu1 %v20851_v38 }
0x1ede   : > { %16175 = vmatprep.subr.bf16.mxu0 %v20856_v56  ;;  %16281 = vmatprep.subr.bf16.mxu1 %v20859_v19 }
0x1ee1   : > { %16176 = vmatpush1.bf16.msra.mxu0 %v20854_v9  ;;  %16282 = vmatpush1.bf16.msra.mxu1 %v20857_v15 }
0x1ee2   : > { %16177 = vmatprep.subr.bf16.mxu0 %v20862_v13  ;;  %16283 = vmatprep.subr.bf16.mxu1 %v20865_v30 }
0x1ee5   : > { %16178 = vmatpush1.bf16.msra.mxu0 %v20860_v63  ;;  %16284 = vmatpush1.bf16.msra.mxu1 %v20863_v6 }
0x1ee6   : > { %16179 = vmatprep.subr.bf16.mxu0 %v20868_v61  ;;  %16285 = vmatprep.subr.bf16.mxu1 %v20871_v0 }
0x1ee9   : > { %16180 = vmatpush1.bf16.msra.mxu0 %v20866_v47  ;;  %16286 = vmatpush1.bf16.msra.mxu1 %v20869_v46 }
0x1eea   : > { %16181 = vmatprep.subr.bf16.mxu0 %v20874_v32  ;;  %16287 = vmatprep.subr.bf16.mxu1 %v20877_v58 }
0x1eed   : > { %16182 = vmatpush1.bf16.msra.mxu0 %v20872_v51  ;;  %16288 = vmatpush1.bf16.msra.mxu1 %v20875_v60 }
0x1eee   : > { %16183 = vmatprep.subr.bf16.mxu0 %v20880_v12  ;;  %16289 = vmatprep.subr.bf16.mxu1 %v20883_v54 }
0x1ef1   : > { %16184 = vmatpush1.bf16.msra.mxu0 %v20878_v49  ;;  %16290 = vmatpush1.bf16.msra.mxu1 %v20881_v26 }
0x1ef2   : > { %16185 = vmatprep.subr.bf16.mxu0 %v20886_v20  ;;  %16291 = vmatprep.subr.bf16.mxu1 %v20889_v24 }
0x1ef5   : > { %16186 = vmatpush1.bf16.msra.mxu0 %v20884_v7  ;;  %16292 = vmatpush1.bf16.msra.mxu1 %v20887_v41 }
0x1ef8   : > { %16188 = vmatmul.mubr.bf16.vlgmr.msra.gmra.mrb[0].mxu0 %v24935_v8  ;;  %16294 = vmatmul.mubr.bf16.vlgmr.msra.gmra.mrb[0].mxu1 %v24935_v8 }
0x1ef9   : > { %16197 = vmatprep.mubr.bf16.mxu0 %v24946_v36  ;;  %16303 = vmatprep.mubr.bf16.mxu1 %v24946_v36 }
0x1f00   : > { %16198 = vmatmul.mubr.bf16.gmra.mrb[4].mxu0 %v24949_v29  ;;  %16304 = vmatmul.mubr.bf16.gmra.mrb[4].mxu1 %v24949_v29 }
0x1fcb   : > { %v16189_v25 = vpop.f32.mrb[0].mxu0  ;;  %v16295_v39 = vpop.f32.mrb[0].mxu1 }
0x1fcc   : > { %v18849_v8 = vadd.f32 %v16189_v25, %v15445_v27  ;;  %v18857_v31 = vadd.f32 %v16295_v39, %v15453_v37  ;;  %v16191_v28 = vpop.f32.mrb[1].mxu0  ;;  %v16297_v50 = vpop.f32.mrb[1].mxu1 }
0x1fcd   : > { %v18850_v36 = vadd.f32 %v16191_v28, %v15449_v17  ;;  %v18858_v21 = vadd.f32 %v16297_v50, %v15457_v10  ;;  %v16193_v40 = vpop.f32.mrb[2].mxu0  ;;  %v16299_v34 = vpop.f32.mrb[2].mxu1 }
0x1fce   : > { %16314 = vst [vmem:[#allocation18] sm:$0xff] %v18849_v8  ;;  %16316 = vst [vmem:[#allocation18 + $0x10] sm:$0xff] %v18857_v31  ;;  %v18851_v29 = vadd.f32 %v16193_v40, %v15445_v27  ;;  %v18859_v53 = vadd.f32 %v16299_v34, %v15453_v37  ;;  %v16195_v57 = vpop.f32.mrb[3].mxu0  ;;  %v16301_v5 = vpop.f32.mrb[3].mxu1 }
0x1fcf   : > { %16315 = vst [vmem:[#allocation18 + $0x8] sm:$0xff] %v18850_v36  ;;  %16317 = vst [vmem:[#allocation18 + $0x18] sm:$0xff] %v18858_v21  ;;  %v18852_v52 = vadd.f32 %v16195_v57, %v15449_v17  ;;  %v18860_v23 = vadd.f32 %v16301_v5, %v15457_v10 }
0x1fd0   : > { %16318 = vst [vmem:[#allocation18 + $0x20] sm:$0xff] %v18851_v29  ;;  %16320 = vst [vmem:[#allocation18 + $0x30] sm:$0xff] %v18859_v53 }
0x1fd1   : > { %16319 = vst [vmem:[#allocation18 + $0x28] sm:$0xff] %v18852_v52  ;;  %16321 = vst [vmem:[#allocation18 + $0x38] sm:$0xff] %v18860_v23 }
0x1fd3   : > { %v16199_v48 = vpop.f32.mrb[4].mxu0  ;;  %v16305_v4 = vpop.f32.mrb[4].mxu1 }
0x1fd4   : > { %v18853_v1 = vadd.f32 %v16199_v48, %v15445_v27  ;;  %v18861_v35 = vadd.f32 %v16305_v4, %v15453_v37  ;;  %v16201_v59 = vpop.f32.mrb[5].mxu0  ;;  %v16307_v22 = vpop.f32.mrb[5].mxu1 }
0x1fd5   : > { %v18854_v42 = vadd.f32 %v16201_v59, %v15449_v17  ;;  %v18862_v44 = vadd.f32 %v16307_v22, %v15457_v10  ;;  %v16203_v2 = vpop.f32.mrb[6].mxu0  ;;  %v16309_v14 = vpop.f32.mrb[6].mxu1 }
0x1fd6   : > { %16322 = vst [vmem:[#allocation18 + $0x40] sm:$0xff] %v18853_v1  ;;  %16324 = vst [vmem:[#allocation18 + $0x50] sm:$0xff] %v18861_v35  ;;  %v18855_v18 = vadd.f32 %v16203_v2, %v15445_v27  ;;  %v18863_v3 = vadd.f32 %v16309_v14, %v15453_v37  ;;  %v16205_v33 = vpop.f32.mrb[7].mxu0  ;;  %v16311_v16 = vpop.f32.mrb[7].mxu1 }
0x1fd7   : > { %16323 = vst [vmem:[#allocation18 + $0x48] sm:$0xff] %v18854_v42  ;;  %16325 = vst [vmem:[#allocation18 + $0x58] sm:$0xff] %v18862_v44  ;;  %v18856_v55 = vadd.f32 %v16205_v33, %v15449_v17  ;;  %v18864_v11 = vadd.f32 %v16311_v16, %v15457_v10 }
0x1fd8   : > { %16326 = vst [vmem:[#allocation18 + $0x60] sm:$0xff] %v18855_v18  ;;  %16328 = vst [vmem:[#allocation18 + $0x70] sm:$0xff] %v18863_v3 }
0x1fd9   : > { %16327 = vst [vmem:[#allocation18 + $0x68] sm:$0xff] %v18856_v55  ;;  %16329 = vst [vmem:[#allocation18 + $0x78] sm:$0xff] %v18864_v11 }
0x1fda PF: > { %s25105_s28 = sld [smem:[#allocation27_spill]]  ;;  %s21260_s14 = smov [#allocation18]  }
0x1fdb   : > { %s16336_s8 = sshll.u32 %s21260_s14, 4  ;;  %s16337_s8 = int_to_ptr.vmem [resolvable:$true] %s16336_s8 }
0x1fdc   : > { %s21160_s23 = scalar_lea.vmem %s16337_s8, 2048  ;;  %p21167_p9 = scmp.lt.s32.totalorder %s16337_s8, %s16337_s8 }
0x1fdd   : > { %p21161_p7 = scmp.ne.s32.totalorder %s16337_s8, %s21160_s23  ;;  %p21168_p11 = scmp.lt.s32.totalorder %s21160_s23, %s21160_s23 }
0x1fdf   : > { %p21169_p10 = por %p21168_p11, %p21167_p9 }
0x1fe0   : > { %p18952_p3 = scmp.eq.s32.totalorder %s25105_s28, 5 }
0x1fe2   : > { %p21162_p0 = pnand %p21161_p7, %p18952_p3 }
0x1fe4   : > { %p21163_p8 = pneg %p21162_p0 }
0x1fe6   : > { %p21170_p1 = pnand %p21169_p10, %p21163_p8 }
0x1fe8   : > { %21173 = shalt.err (!%p21170_p1)
}
0x1fe9   : > { %s25106_s19 = sld [smem:[#allocation40_spill]] }
0x1fef   : > { %s21174_s13 = scalar_lea.hbm %s25106_s19, 2048 }
0x1ff0   : > { %p21175_p2 = scmp.ne.s32.totalorder %s25106_s19, %s21174_s13  ;;  %p21180_p4 = scmp.lt.u32.totalorder %s21174_s13, %s25106_s19 }
0x1ff2   : > { %p21176_p13 = pnand %p21175_p2, %p18952_p3 }
0x1ff4   : > { %p21177_p6 = pneg %p21176_p13 }
0x1ff6   : > { %p21182_p5 = pnand %p21180_p4, %p21177_p6 }
0x1ff8   : > { %21185 = shalt.err (!%p21182_p5)
}
0x1ff9   : > { %s21261_s29 = smov 512   ;;  %s21262_s10 = smov 32  }
0x1ffa   : > { %18911 = dma.vmem_to_hbm [thread:$0]  (%p18952_p3), %s16337_s8, 2048, %s25106_s19, [#allocation5], %s21261_s29, %s21261_s29, %s21262_s10  }
0x1ffb   : > { %21223 = dma.done.wait (%p18952_p3), [#allocation5], 2048  }
0x1ffc   : > { %21225 = vsyncadd (%p18952_p3), [#allocation5], 4294965248 }
0x1ffd PF: > { %s25107_s16 = sld [smem:[#allocation29_spill]]  ;;  %s25108_s13 = sld [smem:[#allocation25_spill]] }
0x1ffe   : > { %s25109_s14 = sld [smem:[#allocation26_spill]]  ;;  %s25110_s15 = sld [smem:[#allocation30_spill]] }
0x2003   : > { %p29_p12 = scmp.ge.s32.totalorder %s25107_s16, 8  }
0x2005   :  { %31 = sbr.rel (!%p29_p12) target bundleno = 16 (0x10), region = 176 }
0x200c   :  { %16352 = vsyncpa [#allocation4], 1 }
0x200d   :  { %16354 = vsyncpa [#allocation4 + $0x1], 1 }
0x200e   :  { %16355 = vsyncpa [#allocation7], 1 }
0x200f   :  { %16357 = vsyncpa [#allocation7 + $0x1], 1 }
0x2010   :  { %16358 = vsyncpa [#allocation10], 1 }
0x2011   :  { %16360 = vsyncpa [#allocation10 + $0x1], 1 }
0x2012   :  { %16361 = vsyncpa [#allocation13], 1 }
0x2013   :  { %16362 = vsyncpa [#allocation16], 1 }
0x2014   :  { %16363 = vsyncpa [#allocation5], 1 }
0x2015   :  { %16365 = vsyncpa [#allocation5 + $0x1], 1 }

</bundles_post_ra>
